<compile_context>
chip_gen: v7x
topology: tpu7x:2x2x1
jax: 0.10.0
libtpu: 0.0.40
codegen_flags: <defaults>
</compile_context>

<pallas_src>
import jax
import jax.numpy as jnp
from jax import lax
from jax.experimental import pallas as pl
from jax.experimental.pallas import tpu as pltpu

HW = 7 * 7          # N*H*W = 49 (N=1)
C_IN = 2304
C_OUT = 384
EPS = 1e-5

# TODO(synk): BatchNorm2d running_mean/running_var/num_batches_tracked updates are a
# training-mode side effect that does not affect the returned tensor; not implemented.


def _fused_kernel(s_ref, x_ref, w_ref, gamma_ref, beta_ref, o_ref):
    # s_ref:      (C_IN, 1)        f32   pre-sigmoid per-input-channel gate
    # x_ref:      (C_IN, HW)       f32   activations (resident across grid steps)
    # w_ref:      (TILE_CO, C_IN)  bf16  1x1 conv weight tile (streamed, untouched)
    # gamma/beta: (TILE_CO, 1)     f32   BN affine params
    # o_ref:      (TILE_CO, HW)    f32
    gate = jax.nn.sigmoid(s_ref[...])                            # (C_IN, 1), EUP

    # Gate activations, single cast to bf16 -> both MXU operands are native bf16.
    xg = (x_ref[...] * gate).astype(jnp.bfloat16)                # (C_IN, HW)

    # 1x1 conv == matmul on the MXU, f32 accumulation.
    y = jnp.dot(w_ref[...], xg, preferred_element_type=jnp.float32)  # (TILE_CO, HW)

    # BatchNorm2d training mode: per-output-channel batch stats over N*H*W=49,
    # biased variance, eps=1e-5.  One-pass sum / sum-of-squares formulation.
    inv_n = jnp.float32(1.0 / HW)
    mean = jnp.sum(y, axis=1, keepdims=True) * inv_n                    # (TILE_CO, 1)
    var = jnp.sum(y * y, axis=1, keepdims=True) * inv_n - mean * mean
    inv_std = lax.rsqrt(jnp.maximum(var, 0.0) + EPS)

    # Folded affine: one mul + one add per element.
    scale = gamma_ref[...] * inv_std
    bias = beta_ref[...] - mean * scale
    o_ref[...] = y * scale + bias


def prepare_conv_weight(w_oihw):
    """One-time weight prep (amortized across calls): (C_OUT, C_IN, 1, 1) -> (C_OUT, C_IN) bf16."""
    return w_oihw.reshape(C_OUT, C_IN).astype(jnp.bfloat16)


def _default_tile_co():
    """grid=(2,) on 2-TensorCore chips (balanced tile per core); grid=(1,) on single-TC parts."""
    try:
        kind = jax.devices()[0].device_kind.lower()
    except Exception:
        return 192
    if ("v7" in kind) or ("v4" in kind) or ("v5p" in kind):
        return 192   # two TensorCores per chip -> one 192-row tile per core
    return 384       # single TC (v5e/v6e) -> one grid step, no per-step overhead


def fused_sigmoid_mul_conv_bn(x_nchw, s_nchw, w_co_ci, gamma, beta, tile_co=None):
    """x_nchw: (1, C_IN, 7, 7) f32; s_nchw: (1, C_IN, 1, 1) f32;
    w_co_ci: (C_OUT, C_IN) bf16 (from prepare_conv_weight); gamma/beta: (C_OUT,) f32."""
    n, c, h, w = x_nchw.shape
    assert n == 1 and c == C_IN and h * w == HW
    tile_co = _default_tile_co() if tile_co is None else tile_co
    assert C_OUT % tile_co == 0

    # Free reshapes of contiguous buffers (no transposes, no extra HBM traffic).
    x = x_nchw.reshape(C_IN, HW)
    s = s_nchw.reshape(C_IN, 1)
    g = gamma.reshape(C_OUT, 1)
    b = beta.reshape(C_OUT, 1)

    out = pl.pallas_call(
        _fused_kernel,
        out_shape=jax.ShapeDtypeStruct((C_OUT, HW), jnp.float32),
        grid_spec=pltpu.PrefetchScalarGridSpec(
            num_scalar_prefetch=0,
            grid=(C_OUT // tile_co,),
            in_specs=[
                pl.BlockSpec((C_IN, 1), lambda i: (0, 0)),           # s  (resident)
                pl.BlockSpec((C_IN, HW), lambda i: (0, 0)),          # x  (resident)
                pl.BlockSpec((tile_co, C_IN), lambda i: (i, 0)),     # W tile (streamed)
                pl.BlockSpec((tile_co, 1), lambda i: (i, 0)),        # gamma tile
                pl.BlockSpec((tile_co, 1), lambda i: (i, 0)),        # beta tile
            ],
            out_specs=pl.BlockSpec((tile_co, HW), lambda i: (i, 0)),
        ),
        compiler_params=pltpu.CompilerParams(
            dimension_semantics=("parallel",),   # independent C_OUT tiles -> megacore sharding
        ),
    )(s, x, w_co_ci, g, b)

    # (C_OUT, HW) is already NCHW memory order for N=1 -> free reshape.
    return out.reshape(1, C_OUT, h, w)


if __name__ == "__main__":
    key = jax.random.PRNGKey(0)
    k1, k2, k3 = jax.random.split(key, 3)

    # Shapes implied by the module's forward.
    x389 = jax.random.normal(k1, (1, C_IN, 7, 7), dtype=jnp.float32)
    x393 = jax.random.normal(k2, (1, C_IN, 1, 1), dtype=jnp.float32)

    conv_w = jax.random.normal(k3, (C_OUT, C_IN, 1, 1), dtype=jnp.float32) * 0.02
    bn_gamma = jnp.ones((C_OUT,), dtype=jnp.float32)   # PyTorch default affine init
    bn_beta = jnp.zeros((C_OUT,), dtype=jnp.float32)

    w_prep = prepare_conv_weight(conv_w)                # one-time bf16 weight

    out = fused_sigmoid_mul_conv_bn(x389, x393, w_prep, bn_gamma, bn_beta)
    out = jax.block_until_ready(out)

    # Pure-JAX f32 reference of the module's math.
    xs_ref = jax.nn.sigmoid(x393) * x389
    y_ref = jnp.einsum("nchw,oc->nohw", xs_ref, conv_w.reshape(C_OUT, C_IN),
                       precision=jax.lax.Precision.HIGHEST)
    mean_ref = y_ref.mean(axis=(0, 2, 3), keepdims=True)
    var_ref = ((y_ref - mean_ref) ** 2).mean(axis=(0, 2, 3), keepdims=True)
    ref = (y_ref - mean_ref) * jax.lax.rsqrt(var_ref + EPS)
    ref = ref * bn_gamma.reshape(1, C_OUT, 1, 1) + bn_beta.reshape(1, C_OUT, 1, 1)

    assert out.shape == (1, C_OUT, 7, 7)
    # Tolerance covers bf16 weight + bf16 gated-activation quantization (f32 MXU accumulation).
    assert jnp.allclose(out, ref, atol=4e-2, rtol=4e-2)

    print("KERNEL_OK")
</pallas_src>

<mosaic_0001>
module attributes {stable_mosaic.version = 11 : i64} {
  func.func @_fused_kernel(%arg0: i32, %arg1: memref<2304x1xf32, #tpu.memory_space<vmem>>, %arg2: memref<2304x49xf32, #tpu.memory_space<vmem>>, %arg3: memref<384x2304xbf16, #tpu.memory_space<vmem>>, %arg4: memref<384x1xf32, #tpu.memory_space<vmem>>, %arg5: memref<384x1xf32, #tpu.memory_space<vmem>>, %arg6: memref<384x49xf32, #tpu.memory_space<vmem>>) attributes {dimension_semantics = [#tpu.dimension_semantics<parallel>], iteration_bounds = array<i64: 1>, scalar_prefetch = 0 : i64, scratch_operands = 0 : i64, tpu.core_type = #tpu.core_type<tc>, window_params = [{pipeline_mode = #tpu.pipeline_mode<synchronous>, transform_indices = @transform_0, window_bounds = array<i64: 2304, 1>}, {pipeline_mode = #tpu.pipeline_mode<synchronous>, transform_indices = @transform_1, window_bounds = array<i64: 2304, 49>}, {transform_indices = @transform_2, window_bounds = array<i64: 384, 2304>}, {transform_indices = @transform_3, window_bounds = array<i64: 384, 1>}, {transform_indices = @transform_4, window_bounds = array<i64: 384, 1>}, {transform_indices = @transform_5, window_bounds = array<i64: 384, 49>}]} {
    %c0 = arith.constant 0 : index
    %c0_0 = arith.constant 0 : index
    %0 = vector.load %arg1[%c0, %c0_0] : memref<2304x1xf32, #tpu.memory_space<vmem>>, vector<2304x1xf32>
    %1 = arith.negf %0 : vector<2304x1xf32>
    %2 = math.exp %1 : vector<2304x1xf32>
    %cst = arith.constant 1.000000e+00 : f32
    %3 = vector.broadcast %cst : f32 to vector<2304x1xf32>
    %4 = arith.addf %3, %2 : vector<2304x1xf32>
    %5 = arith.divf %3, %4 : vector<2304x1xf32>
    %c0_1 = arith.constant 0 : index
    %c0_2 = arith.constant 0 : index
    %6 = vector.load %arg2[%c0_1, %c0_2] : memref<2304x49xf32, #tpu.memory_space<vmem>>, vector<2304x49xf32>
    %7 = vector.broadcast %5 : vector<2304x1xf32> to vector<2304x49xf32>
    %8 = arith.mulf %6, %7 : vector<2304x49xf32>
    %9 = arith.truncf %8 : vector<2304x49xf32> to vector<2304x49xbf16>
    %c0_3 = arith.constant 0 : index
    %c0_4 = arith.constant 0 : index
    %10 = vector.load %arg3[%c0_3, %c0_4] : memref<384x2304xbf16, #tpu.memory_space<vmem>>, vector<384x2304xbf16>
    %cst_5 = arith.constant dense<0.000000e+00> : vector<384x49xf32>
    %11 = tpu.matmul %10, %9, %cst_5 {dimension_numbers = #tpu.dot_dimension_numbers<[1], [0], [0], [1], [0, 0, 1, 1], [], []>} : vector<384x2304xbf16>, vector<2304x49xbf16>, vector<384x49xf32> -> vector<384x49xf32>
    %cst_6 = arith.constant dense<0.000000e+00> : vector<384xf32>
    %12 = vector.multi_reduction <add>, %11, %cst_6 [1] : vector<384x49xf32> to vector<384xf32>
    %13 = vector.shape_cast %12 : vector<384xf32> to vector<384x1xf32>
    %cst_7 = arith.constant 0.0204081628 : f32
    %14 = vector.broadcast %cst_7 : f32 to vector<384x1xf32>
    %15 = arith.mulf %13, %14 : vector<384x1xf32>
    %16 = arith.mulf %11, %11 : vector<384x49xf32>
    %cst_8 = arith.constant dense<0.000000e+00> : vector<384xf32>
    %17 = vector.multi_reduction <add>, %16, %cst_8 [1] : vector<384x49xf32> to vector<384xf32>
    %18 = vector.shape_cast %17 : vector<384xf32> to vector<384x1xf32>
    %cst_9 = arith.constant 0.0204081628 : f32
    %19 = vector.broadcast %cst_9 : f32 to vector<384x1xf32>
    %20 = arith.mulf %18, %19 : vector<384x1xf32>
    %21 = arith.mulf %15, %15 : vector<384x1xf32>
    %22 = arith.subf %20, %21 : vector<384x1xf32>
    %cst_10 = arith.constant 0.000000e+00 : f32
    %23 = vector.broadcast %cst_10 : f32 to vector<384x1xf32>
    %24 = arith.maximumf %22, %23 : vector<384x1xf32>
    %cst_11 = arith.constant 9.99999974E-6 : f32
    %25 = vector.broadcast %cst_11 : f32 to vector<384x1xf32>
    %26 = arith.addf %24, %25 : vector<384x1xf32>
    %27 = math.rsqrt %26 : vector<384x1xf32>
    %c0_12 = arith.constant 0 : index
    %c0_13 = arith.constant 0 : index
    %28 = vector.load %arg4[%c0_12, %c0_13] : memref<384x1xf32, #tpu.memory_space<vmem>>, vector<384x1xf32>
    %29 = arith.mulf %28, %27 : vector<384x1xf32>
    %c0_14 = arith.constant 0 : index
    %c0_15 = arith.constant 0 : index
    %30 = vector.load %arg5[%c0_14, %c0_15] : memref<384x1xf32, #tpu.memory_space<vmem>>, vector<384x1xf32>
    %31 = arith.mulf %15, %29 : vector<384x1xf32>
    %32 = arith.subf %30, %31 : vector<384x1xf32>
    %33 = vector.broadcast %29 : vector<384x1xf32> to vector<384x49xf32>
    %34 = arith.mulf %11, %33 : vector<384x49xf32>
    %35 = vector.broadcast %32 : vector<384x1xf32> to vector<384x49xf32>
    %36 = arith.addf %34, %35 : vector<384x49xf32>
    %c0_16 = arith.constant 0 : index
    %c0_17 = arith.constant 0 : index
    %37 = vector.load %arg6[%c0_16, %c0_17] : memref<384x49xf32, #tpu.memory_space<vmem>>, vector<384x49xf32>
    tpu.vector_store %arg6[%c0_16, %c0_17], %36 {strides = array<i32>} : memref<384x49xf32, #tpu.memory_space<vmem>>, vector<384x49xf32>,
    return
  }
  func.func @transform_0(%arg0: i32) -> (i32, i32) {
    %c0_i32 = arith.constant 0 : i32
    %c0_i32_0 = arith.constant 0 : i32
    %c0_i32_1 = arith.constant 0 : i32
    return %c0_i32, %c0_i32_0 : i32, i32
  }
  func.func @transform_1(%arg0: i32) -> (i32, i32) {
    %c0_i32 = arith.constant 0 : i32
    %c0_i32_0 = arith.constant 0 : i32
    %c0_i32_1 = arith.constant 0 : i32
    return %c0_i32, %c0_i32_0 : i32, i32
  }
  func.func @transform_2(%arg0: i32) -> (i32, i32) {
    %c0_i32 = arith.constant 0 : i32
    %c0_i32_0 = arith.constant 0 : i32
    return %arg0, %c0_i32 : i32, i32
  }
  func.func @transform_3(%arg0: i32) -> (i32, i32) {
    %c0_i32 = arith.constant 0 : i32
    %c0_i32_0 = arith.constant 0 : i32
    return %arg0, %c0_i32 : i32, i32
  }
  func.func @transform_4(%arg0: i32) -> (i32, i32) {
    %c0_i32 = arith.constant 0 : i32
    %c0_i32_0 = arith.constant 0 : i32
    return %arg0, %c0_i32 : i32, i32
  }
  func.func @transform_5(%arg0: i32) -> (i32, i32) {
    %c0_i32 = arith.constant 0 : i32
    %c0_i32_0 = arith.constant 0 : i32
    return %arg0, %c0_i32 : i32, i32
  }
}

</mosaic_0001>

<bundles_post_ra>
// kernel: tpu_custom_call.1
= control target key start
LH: loop header
LB: loop body
LE: loop exit
PB: predicated region body
PF: predicated region fallthrough
CT: control target
= control target key end

     0   :  { %v19103_v0 = vmov 0   ;;  %vm8814_vm0 = vcmask 400384   ;;  %s19097_s0 = inlined_call_operand.vmem [shape: f32[2304,1], index: 0, kind: input, shape index: {}]   ;;  %s19098_s2 = inlined_call_operand.vmem [shape: bf16[384,2304], index: 2, kind: input, shape index: {}]   ;;  %s19099_s1 = inlined_call_operand.vmem [shape: f32[2304,49], index: 1, kind: input, shape index: {}]   ;;  %s19100_s3 = inlined_call_operand.vmem [shape: f32[384,1], index: 3, kind: input, shape index: {}]   ;;  %s19101_s4 = inlined_call_operand.vmem [shape: f32[384,1], index: 4, kind: input, shape index: {}]   ;;  %s19102_s5 = inlined_call_operand.vmem [shape: f32[384,49], index: 5, kind: output, shape index: {}]  }
   0x1   :  { %11829 = vset.pattern.permute.xlu1 %v19103_v0  ;;  %11828 = vset.pattern.permute.xlu0 %v19103_v0  ;;  %v23_v1 = vld [vmem:[%s19097_s0 + $0x10] sm:$0xff]  ;;  %v21_v2 = vld [vmem:[%s19097_s0] sm:$0xff]  ;;  %v24_v3 = vld [vmem:[%s19097_s0 + $0x18] sm:$0xff] }
   0x2   :  { %v10357_v4 = vmul.f32 -1.442695, %v23_v1  ;;  %v10355_v5 = vmul.f32 -1.442695, %v21_v2  ;;  %v10358_v6 = vmul.f32 -1.442695, %v24_v3  ;;  %6789 = vmatprep.subr.bf16.mxu1 %v19103_v0  ;;  %7689 = vmatprep.subr.bf16.mxu0 %v19103_v0 }
   0x3   :  { %v22_v7 = vld [vmem:[%s19097_s0 + $0x8] sm:$0xff]  ;;  %v25_v9 = vld [vmem:[%s19097_s0 + $0x20] sm:$0xff]  ;;  %v28_v13 = vld [vmem:[%s19097_s0 + $0x38] sm:$0xff] }
   0x4   :  { %v26_v8 = vld [vmem:[%s19097_s0 + $0x28] sm:$0xff]  ;;  %12478 = vpow2.f32 %v10357_v4  ;;  %v10356_v10 = vmul.f32 -1.442695, %v22_v7  ;;  %v10359_v12 = vmul.f32 -1.442695, %v25_v9  ;;  %v27_v14 = vld [vmem:[%s19097_s0 + $0x30] sm:$0xff] }
   0x5   :  { %v10360_v11 = vmul.f32 -1.442695, %v26_v8  ;;  %12480 = vpow2.f32 %v10355_v5  ;;  %v30_v15 = vld [vmem:[%s19097_s0 + $0x48] sm:$0xff]  ;;  %v10362_v16 = vmul.f32 -1.442695, %v28_v13  ;;  %v29_v18 = vld [vmem:[%s19097_s0 + $0x40] sm:$0xff] }
   0x6   :  { %12482 = vpow2.f32 %v10358_v6  ;;  %v10361_v17 = vmul.f32 -1.442695, %v27_v14  ;;  %v32_v19 = vld [vmem:[%s19097_s0 + $0x58] sm:$0xff]  ;;  %v10364_v20 = vmul.f32 -1.442695, %v30_v15  ;;  %v31_v21 = vld [vmem:[%s19097_s0 + $0x50] sm:$0xff] }
   0x7   :  { %12484 = vpow2.f32 %v10356_v10  ;;  %v10363_v22 = vmul.f32 -1.442695, %v29_v18  ;;  %v34_v23 = vld [vmem:[%s19097_s0 + $0x68] sm:$0xff]  ;;  %v10366_v24 = vmul.f32 -1.442695, %v32_v19  ;;  %v33_v46 = vld [vmem:[%s19097_s0 + $0x60] sm:$0xff] }
   0x8   :  { %12486 = vpow2.f32 %v10360_v11  ;;  %v10365_v25 = vmul.f32 -1.442695, %v31_v21  ;;  %v10368_v26 = vmul.f32 -1.442695, %v34_v23  ;;  %v36_v49 = vld [vmem:[%s19097_s0 + $0x78] sm:$0xff]  ;;  %v35_v52 = vld [vmem:[%s19097_s0 + $0x70] sm:$0xff] }
   0x9   :  { %12488 = vpow2.f32 %v10359_v12  ;;  %v10367_v55 = vmul.f32 -1.442695, %v33_v46  ;;  %v38_v56 = vld [vmem:[%s19097_s0 + $0x88] sm:$0xff]  ;;  %v10370_v59 = vmul.f32 -1.442695, %v36_v49  ;;  %v37_v60 = vld [vmem:[%s19097_s0 + $0x80] sm:$0xff] }
   0xa   :  { %12490 = vpow2.f32 %v10362_v16  ;;  %v10369_v62 = vmul.f32 -1.442695, %v35_v52  ;;  %v40_v63 = vld [vmem:[%s19097_s0 + $0x98] sm:$0xff]  ;;  %v10372_v2 = vmul.f32 -1.442695, %v38_v56  ;;  %v39_v3 = vld [vmem:[%s19097_s0 + $0x90] sm:$0xff] }
   0xb   :  { %12492 = vpow2.f32 %v10361_v17  ;;  %v10371_v5 = vmul.f32 -1.442695, %v37_v60  ;;  %v42_v6 = vld [vmem:[%s19097_s0 + $0xa8] sm:$0xff]  ;;  %v10374_v8 = vmul.f32 -1.442695, %v40_v63  ;;  %v41_v9 = vld [vmem:[%s19097_s0 + $0xa0] sm:$0xff] }
   0xc   :  { %12494 = vpow2.f32 %v10364_v20  ;;  %v10373_v11 = vmul.f32 -1.442695, %v39_v3  ;;  %v44_v12 = vld [vmem:[%s19097_s0 + $0xb8] sm:$0xff]  ;;  %v10376_v14 = vmul.f32 -1.442695, %v42_v6  ;;  %v43_v15 = vld [vmem:[%s19097_s0 + $0xb0] sm:$0xff] }
   0xd   :  { %12496 = vpow2.f32 %v10363_v22  ;;  %v10375_v17 = vmul.f32 -1.442695, %v41_v9  ;;  %v46_v18 = vld [vmem:[%s19097_s0 + $0xc8] sm:$0xff]  ;;  %v10378_v20 = vmul.f32 -1.442695, %v44_v12  ;;  %v45_v21 = vld [vmem:[%s19097_s0 + $0xc0] sm:$0xff] }
   0xe   :  { %v12479_v27 = vpop.eup %12478  ;;  %12498 = vpow2.f32 %v10366_v24  ;;  %v10377_v23 = vmul.f32 -1.442695, %v43_v15 }
   0xf   :  { %v12481_v28 = vpop.eup %12480  ;;  %v1175_v29 = vadd.f32 1.0, %v12479_v27  ;;  %12500 = vpow2.f32 %v10365_v25  ;;  %v10380_v25 = vmul.f32 -1.442695, %v46_v18  ;;  %v10379_v27 = vmul.f32 -1.442695, %v45_v21 }
  0x10   :  { %v12483_v30 = vpop.eup %12482  ;;  %v1173_v31 = vadd.f32 1.0, %v12481_v28  ;;  %12502 = vpow2.f32 %v10368_v26 }
  0x11   :  { %v12485_v32 = vpop.eup %12484  ;;  %12504 = vrcp.f32 %v1175_v29  ;;  %v1176_v33 = vadd.f32 1.0, %v12483_v30 }
  0x12   :  { %v12487_v34 = vpop.eup %12486  ;;  %12506 = vrcp.f32 %v1173_v31  ;;  %v1174_v35 = vadd.f32 1.0, %v12485_v32 }
  0x13   :  { %v12489_v36 = vpop.eup %12488  ;;  %12508 = vrcp.f32 %v1176_v33  ;;  %v1178_v37 = vadd.f32 1.0, %v12487_v34 }
  0x14   :  { %v12491_v38 = vpop.eup %12490  ;;  %12510 = vrcp.f32 %v1174_v35  ;;  %v1177_v39 = vadd.f32 1.0, %v12489_v36 }
  0x15   :  { %v12493_v40 = vpop.eup %12492  ;;  %12512 = vrcp.f32 %v1178_v37  ;;  %v1180_v41 = vadd.f32 1.0, %v12491_v38 }
  0x16   :  { %v12495_v42 = vpop.eup %12494  ;;  %12514 = vrcp.f32 %v1177_v39  ;;  %v1179_v43 = vadd.f32 1.0, %v12493_v40 }
  0x17   :  { %v12497_v44 = vpop.eup %12496  ;;  %12516 = vrcp.f32 %v1180_v41  ;;  %v1182_v45 = vadd.f32 1.0, %v12495_v42 }
  0x18   :  { %v12499_v47 = vpop.eup %12498  ;;  %12518 = vrcp.f32 %v1179_v43  ;;  %v1181_v48 = vadd.f32 1.0, %v12497_v44 }
  0x19   :  { %v12501_v50 = vpop.eup %12500  ;;  %12520 = vrcp.f32 %v1182_v45  ;;  %v1184_v51 = vadd.f32 1.0, %v12499_v47 }
  0x1a   :  { %v12503_v53 = vpop.eup %12502  ;;  %12522 = vrcp.f32 %v1181_v48  ;;  %v1183_v54 = vadd.f32 1.0, %v12501_v50  ;;  %v48_v48 = vld [vmem:[%s19097_s0 + $0xd8] sm:$0xff] }
  0x1b   :  { %v12505_v57 = vpop.eup %12504  ;;  %12524 = vrcp.f32 %v1184_v51  ;;  %v1186_v58 = vadd.f32 1.0, %v12503_v53  ;;  %v47_v51 = vld [vmem:[%s19097_s0 + $0xd0] sm:$0xff] }
  0x1c   :  { %v12507_v61 = vpop.eup %12506  ;;  %2337 = vperm.xlu1 %11829, %v12505_v57   ;;  %12526 = vrcp.f32 %v1183_v54  ;;  %v50_v54 = vld [vmem:[%s19097_s0 + $0xe8] sm:$0xff]  ;;  %v10382_v57 = vmul.f32 -1.442695, %v48_v48 }
  0x1d   :  { %v12509_v1 = vpop.eup %12508  ;;  %2327 = vperm.xlu0 %11828, %v12507_v61   ;;  %12528 = vrcp.f32 %v1186_v58  ;;  %v49_v58 = vld [vmem:[%s19097_s0 + $0xe0] sm:$0xff]  ;;  %v10381_v61 = vmul.f32 -1.442695, %v47_v51 }
  0x1e   :  { %v12511_v4 = vpop.eup %12510  ;;  %12530 = vpow2.f32 %v10367_v55 }
  0x1f   :  { %v12513_v7 = vpop.eup %12512  ;;  %12532 = vpow2.f32 %v10370_v59 }
  0x20   :  { %v12515_v10 = vpop.eup %12514  ;;  %2342 = vperm.xlu1 %11829, %v12509_v1   ;;  %12534 = vpow2.f32 %v10369_v62  ;;  %v52_v62 = vld [vmem:[%s19097_s0 + $0xf8] sm:$0xff]  ;;  %v10384_v1 = vmul.f32 -1.442695, %v50_v54 }
  0x21   :  { %v12517_v13 = vpop.eup %12516  ;;  %2332 = vperm.xlu0 %11828, %v12511_v4   ;;  %12536 = vpow2.f32 %v10372_v2  ;;  %v51_v2 = vld [vmem:[%s19097_s0 + $0xf0] sm:$0xff]  ;;  %v10383_v4 = vmul.f32 -1.442695, %v49_v58 }
  0x22   :  { %v12519_v16 = vpop.eup %12518  ;;  %12538 = vpow2.f32 %v10371_v5  ;;  %v54_v5 = vld [vmem:[%s19097_s0 + $0x108] sm:$0xff] }
  0x23   :  { %v12521_v19 = vpop.eup %12520  ;;  %12540 = vpow2.f32 %v10374_v8  ;;  %v53_v8 = vld [vmem:[%s19097_s0 + $0x100] sm:$0xff] }
  0x24   :  { %v12523_v22 = vpop.eup %12522  ;;  %2352 = vperm.xlu1 %11829, %v12513_v7   ;;  %12542 = vpow2.f32 %v10373_v11  ;;  %v10386_v7 = vmul.f32 -1.442695, %v52_v62  ;;  %v56_v11 = vld [vmem:[%s19097_s0 + $0x118] sm:$0xff] }
  0x25   :  { %v12525_v24 = vpop.eup %12524  ;;  %2347 = vperm.xlu0 %11828, %v12515_v10   ;;  %12544 = vpow2.f32 %v10376_v14  ;;  %v10385_v10 = vmul.f32 -1.442695, %v51_v2  ;;  %v55_v14 = vld [vmem:[%s19097_s0 + $0x110] sm:$0xff] }
  0x26   :  { %v12527_v26 = vpop.eup %12526  ;;  %12546 = vpow2.f32 %v10375_v17  ;;  %v58_v17 = vld [vmem:[%s19097_s0 + $0x128] sm:$0xff] }
  0x27   :  { %v12529_v28 = vpop.eup %12528  ;;  %12548 = vpow2.f32 %v10378_v20  ;;  %v57_v20 = vld [vmem:[%s19097_s0 + $0x120] sm:$0xff] }
  0x28   :  { %v12531_v29 = vpop.eup %12530  ;;  %2362 = vperm.xlu1 %11829, %v12517_v13   ;;  %12550 = vpow2.f32 %v10377_v23  ;;  %v10388_v13 = vmul.f32 -1.442695, %v54_v5  ;;  %v60_v23 = vld [vmem:[%s19097_s0 + $0x138] sm:$0xff] }
  0x29   :  { %v12533_v30 = vpop.eup %12532  ;;  %2357 = vperm.xlu0 %11828, %v12519_v16   ;;  %v1185_v31 = vadd.f32 1.0, %v12531_v29  ;;  %12552 = vpow2.f32 %v10380_v25  ;;  %v10387_v16 = vmul.f32 -1.442695, %v53_v8  ;;  %v10392_v25 = vmul.f32 -1.442695, %v58_v17 }
  0x2a   :  { %v12535_v32 = vpop.eup %12534  ;;  %v1188_v33 = vadd.f32 1.0, %v12533_v30  ;;  %12554 = vpow2.f32 %v10379_v27  ;;  %v10391_v27 = vmul.f32 -1.442695, %v57_v20  ;;  %v10394_v29 = vmul.f32 -1.442695, %v60_v23 }
  0x2b   :  { %v12537_v34 = vpop.eup %12536  ;;  %12556 = vrcp.f32 %v1185_v31  ;;  %v1187_v35 = vadd.f32 1.0, %v12535_v32 }
  0x2c   :  { %v12539_v36 = vpop.eup %12538  ;;  %2372 = vperm.xlu1 %11829, %v12521_v19   ;;  %12558 = vrcp.f32 %v1188_v33  ;;  %v1190_v37 = vadd.f32 1.0, %v12537_v34  ;;  %v10390_v19 = vmul.f32 -1.442695, %v56_v11 }
  0x2d   :  { %v12541_v38 = vpop.eup %12540  ;;  %2367 = vperm.xlu0 %11828, %v12523_v22   ;;  %12560 = vrcp.f32 %v1187_v35  ;;  %v1189_v39 = vadd.f32 1.0, %v12539_v36  ;;  %v10389_v22 = vmul.f32 -1.442695, %v55_v14 }
  0x2e   :  { %v12543_v40 = vpop.eup %12542  ;;  %12562 = vrcp.f32 %v1190_v37  ;;  %v1192_v41 = vadd.f32 1.0, %v12541_v38 }
  0x2f   :  { %v12545_v42 = vpop.eup %12544  ;;  %12564 = vrcp.f32 %v1189_v39  ;;  %v1191_v43 = vadd.f32 1.0, %v12543_v40 }
  0x30   :  { %v12547_v44 = vpop.eup %12546  ;;  %2382 = vperm.xlu1 %11829, %v12525_v24   ;;  %12566 = vrcp.f32 %v1192_v41  ;;  %v1194_v45 = vadd.f32 1.0, %v12545_v42 }
  0x31   :  { %v12549_v46 = vpop.eup %12548  ;;  %2377 = vperm.xlu0 %11828, %v12527_v26   ;;  %12568 = vrcp.f32 %v1191_v43  ;;  %v1193_v47 = vadd.f32 1.0, %v12547_v44 }
  0x32   :  { %v12551_v49 = vpop.eup %12550  ;;  %12570 = vrcp.f32 %v1194_v45  ;;  %v1196_v50 = vadd.f32 1.0, %v12549_v46 }
  0x33   :  { %v12553_v52 = vpop.eup %12552  ;;  %12572 = vrcp.f32 %v1193_v47  ;;  %v1195_v53 = vadd.f32 1.0, %v12551_v49 }
  0x34   :  { %v12555_v55 = vpop.eup %12554  ;;  %2392 = vperm.xlu1 %11829, %v12529_v28   ;;  %12574 = vrcp.f32 %v1196_v50  ;;  %v1198_v56 = vadd.f32 1.0, %v12553_v52  ;;  %v59_v50 = vld [vmem:[%s19097_s0 + $0x130] sm:$0xff] }
  0x35   :  { %v12557_v59 = vpop.eup %12556  ;;  %12576 = vrcp.f32 %v1195_v53  ;;  %v1197_v60 = vadd.f32 1.0, %v12555_v55  ;;  %v62_v53 = vld [vmem:[%s19097_s0 + $0x148] sm:$0xff] }
  0x36   :  { %v12559_v63 = vpop.eup %12558  ;;  %2387 = vperm.xlu0 %11828, %v12557_v59   ;;  %12578 = vrcp.f32 %v1198_v56  ;;  %v61_v56 = vld [vmem:[%s19097_s0 + $0x140] sm:$0xff]  ;;  %v10393_v59 = vmul.f32 -1.442695, %v59_v50 }
  0x37   :  { %v12561_v3 = vpop.eup %12560  ;;  %12580 = vrcp.f32 %v1197_v60  ;;  %v64_v60 = vld [vmem:[%s19097_s0 + $0x158] sm:$0xff] }
  0x38   :  { %v12563_v6 = vpop.eup %12562  ;;  %2402 = vperm.xlu1 %11829, %v12559_v63   ;;  %12582 = vpow2.f32 %v10382_v57  ;;  %v10396_v63 = vmul.f32 -1.442695, %v62_v53 }
  0x39   :  { %v12565_v9 = vpop.eup %12564  ;;  %12584 = vpow2.f32 %v10381_v61 }
  0x3a   :  { %v12567_v12 = vpop.eup %12566  ;;  %2397 = vperm.xlu0 %11828, %v12561_v3   ;;  %12586 = vpow2.f32 %v10384_v1  ;;  %v63_v1 = vld [vmem:[%s19097_s0 + $0x150] sm:$0xff]  ;;  %v10395_v3 = vmul.f32 -1.442695, %v61_v56  ;;  %v73_v56 = vld [vmem:[%s19097_s0 + $0x1a0] sm:$0xff] }
  0x3b   :  { %v12569_v15 = vpop.eup %12568  ;;  %12588 = vpow2.f32 %v10383_v4  ;;  %v66_v4 = vld [vmem:[%s19097_s0 + $0x168] sm:$0xff] }
  0x3c   :  { %v12571_v18 = vpop.eup %12570  ;;  %2412 = vperm.xlu1 %11829, %v12563_v6   ;;  %12590 = vpow2.f32 %v10386_v7  ;;  %v10398_v6 = vmul.f32 -1.442695, %v64_v60  ;;  %v65_v7 = vld [vmem:[%s19097_s0 + $0x160] sm:$0xff] }
  0x3d   :  { %v12573_v21 = vpop.eup %12572  ;;  %12592 = vpow2.f32 %v10385_v10  ;;  %v68_v10 = vld [vmem:[%s19097_s0 + $0x178] sm:$0xff] }
  0x3e   :  { %v12575_v24 = vpop.eup %12574  ;;  %2407 = vperm.xlu0 %11828, %v12565_v9   ;;  %12594 = vpow2.f32 %v10388_v13  ;;  %v10397_v9 = vmul.f32 -1.442695, %v63_v1  ;;  %v67_v13 = vld [vmem:[%s19097_s0 + $0x170] sm:$0xff]  ;;  %v78_v1 = vld [vmem:[%s19097_s0 + $0x1c8] sm:$0xff] }
  0x3f   :  { %v12577_v26 = vpop.eup %12576  ;;  %12596 = vpow2.f32 %v10387_v16  ;;  %v70_v16 = vld [vmem:[%s19097_s0 + $0x188] sm:$0xff] }
  0x40   :  { %v12579_v28 = vpop.eup %12578  ;;  %2422 = vperm.xlu1 %11829, %v12567_v12   ;;  %12598 = vpow2.f32 %v10390_v19  ;;  %v10400_v12 = vmul.f32 -1.442695, %v66_v4  ;;  %v69_v19 = vld [vmem:[%s19097_s0 + $0x180] sm:$0xff]  ;;  %v10407_v4 = vmul.f32 -1.442695, %v73_v56 }
  0x41   :  { %v12581_v30 = vpop.eup %12580  ;;  %12600 = vpow2.f32 %v10389_v22  ;;  %v72_v22 = vld [vmem:[%s19097_s0 + $0x198] sm:$0xff] }
  0x42   :  { %v12583_v31 = vpop.eup %12582  ;;  %2417 = vperm.xlu0 %11828, %v12569_v15   ;;  %12602 = vpow2.f32 %v10392_v25  ;;  %v10399_v15 = vmul.f32 -1.442695, %v65_v7  ;;  %v71_v25 = vld [vmem:[%s19097_s0 + $0x190] sm:$0xff]  ;;  %v77_v7 = vld [vmem:[%s19097_s0 + $0x1c0] sm:$0xff] }
  0x43   :  { %v12585_v32 = vpop.eup %12584  ;;  %v1200_v33 = vadd.f32 1.0, %v12583_v31  ;;  %12604 = vpow2.f32 %v10391_v27  ;;  %v10403_v27 = vmul.f32 -1.442695, %v69_v19  ;;  %v10405_v31 = vmul.f32 -1.442695, %v71_v25  ;;  %v83_v25 = vld [vmem:[%s19097_s0 + $0x1f0] sm:$0xff] }
  0x44   :  { %v12587_v34 = vpop.eup %12586  ;;  %2432 = vperm.xlu1 %11829, %v12571_v18   ;;  %v1199_v35 = vadd.f32 1.0, %v12585_v32  ;;  %12606 = vpow2.f32 %v10394_v29  ;;  %v10402_v18 = vmul.f32 -1.442695, %v68_v10  ;;  %v10406_v29 = vmul.f32 -1.442695, %v72_v22  ;;  %v80_v10 = vld [vmem:[%s19097_s0 + $0x1d8] sm:$0xff] }
  0x45   :  { %v12589_v36 = vpop.eup %12588  ;;  %12608 = vrcp.f32 %v1200_v33  ;;  %v1202_v37 = vadd.f32 1.0, %v12587_v34  ;;  %v10414_v19 = vmul.f32 -1.442695, %v80_v10  ;;  %v84_v22 = vld [vmem:[%s19097_s0 + $0x1f8] sm:$0xff]  ;;  %v91_v10 = vld [vmem:[%s19097_s0 + $0x230] sm:$0xff] }
  0x46   :  { %v12591_v38 = vpop.eup %12590  ;;  %2427 = vperm.xlu0 %11828, %v12573_v21   ;;  %12610 = vrcp.f32 %v1199_v35  ;;  %v1201_v39 = vadd.f32 1.0, %v12589_v36  ;;  %v10401_v21 = vmul.f32 -1.442695, %v67_v13  ;;  %v79_v13 = vld [vmem:[%s19097_s0 + $0x1d0] sm:$0xff] }
  0x47   :  { %v12593_v40 = vpop.eup %12592  ;;  %12612 = vrcp.f32 %v1202_v37  ;;  %v1204_v41 = vadd.f32 1.0, %v12591_v38 }
  0x48   :  { %v12595_v42 = vpop.eup %12594  ;;  %2442 = vperm.xlu1 %11829, %v12575_v24   ;;  %12614 = vrcp.f32 %v1201_v39  ;;  %v1203_v43 = vadd.f32 1.0, %v12593_v40  ;;  %v10404_v24 = vmul.f32 -1.442695, %v70_v16 }
  0x49   :  { %v12597_v44 = vpop.eup %12596  ;;  %12616 = vrcp.f32 %v1204_v41  ;;  %v1206_v45 = vadd.f32 1.0, %v12595_v42 }
  0x4a   :  { %v12599_v46 = vpop.eup %12598  ;;  %2437 = vperm.xlu0 %11828, %v12577_v26   ;;  %12618 = vrcp.f32 %v1203_v43  ;;  %v1205_v47 = vadd.f32 1.0, %v12597_v44 }
  0x4b   :  { %v12601_v48 = vpop.eup %12600  ;;  %12620 = vrcp.f32 %v1206_v45  ;;  %v1208_v49 = vadd.f32 1.0, %v12599_v46  ;;  %v11832_v46 = vld [vmem:[%s19098_s2 + $0x4] ss:$72 sps:$4 sm:$0xff]  }
  0x4c   :  { %v12603_v51 = vpop.eup %12602  ;;  %2452 = vperm.xlu1 %11829, %v12579_v28   ;;  %12622 = vrcp.f32 %v1205_v47  ;;  %v1207_v52 = vadd.f32 1.0, %v12601_v48  ;;  %6821 = vmatprep.mubr.bf16.mxu1 %v11832_v46 }
  0x4d   :  { %v12605_v54 = vpop.eup %12604  ;;  %12624 = vrcp.f32 %v1208_v49  ;;  %v1210_v55 = vadd.f32 1.0, %v12603_v51  ;;  %v74_v51 = vld [vmem:[%s19097_s0 + $0x1a8] sm:$0xff] }
  0x4e   :  { %v12607_v57 = vpop.eup %12606  ;;  %2447 = vperm.xlu0 %11828, %v12581_v30   ;;  %12626 = vrcp.f32 %v1207_v52  ;;  %v1209_v58 = vadd.f32 1.0, %v12605_v54 }
  0x4f   :  { %v12609_v61 = vpop.eup %12608  ;;  %12628 = vrcp.f32 %v1210_v55  ;;  %v1212_v62 = vadd.f32 1.0, %v12607_v57 }
  0x50   :  { %v12611_v2 = vpop.eup %12610  ;;  %2462 = vperm.xlu1 %11829, %v12609_v61   ;;  %12630 = vrcp.f32 %v1209_v58 }
  0x51   :  { %v12613_v5 = vpop.eup %12612  ;;  %12632 = vrcp.f32 %v1212_v62  ;;  %v10408_v62 = vmul.f32 -1.442695, %v74_v51 }
  0x52   :  { %v12615_v8 = vpop.eup %12614  ;;  %2457 = vperm.xlu0 %11828, %v12611_v2   ;;  %12634 = vpow2.f32 %v10393_v59  ;;  %v76_v59 = vld [vmem:[%s19097_s0 + $0x1b8] sm:$0xff] }
  0x53   :  { %v12617_v11 = vpop.eup %12616  ;;  %12636 = vpow2.f32 %v10396_v63  ;;  %v75_v63 = vld [vmem:[%s19097_s0 + $0x1b0] sm:$0xff] }
  0x54   :  { %v12619_v14 = vpop.eup %12618  ;;  %2472 = vperm.xlu1 %11829, %v12613_v5   ;;  %12638 = vpow2.f32 %v10395_v3 }
  0x55   :  { %v12621_v17 = vpop.eup %12620  ;;  %12640 = vpow2.f32 %v10398_v6  ;;  %v10410_v6 = vmul.f32 -1.442695, %v76_v59  ;;  %v87_v59 = vld [vmem:[%s19097_s0 + $0x210] sm:$0xff] }
  0x56   :  { %v12623_v20 = vpop.eup %12622  ;;  %2467 = vperm.xlu0 %11828, %v12615_v8   ;;  %12642 = vpow2.f32 %v10397_v9  ;;  %v10409_v9 = vmul.f32 -1.442695, %v75_v63 }
  0x57   :  { %v12625_v23 = vpop.eup %12624  ;;  %12644 = vpow2.f32 %v10400_v12  ;;  %v10412_v12 = vmul.f32 -1.442695, %v78_v1 }
  0x58   :  { %v12627_v26 = vpop.eup %12626  ;;  %2482 = vperm.xlu1 %11829, %v12617_v11   ;;  %12646 = vpow2.f32 %v10399_v15  ;;  %v81_v15 = vld [vmem:[%s19097_s0 + $0x1e0] sm:$0xff] }
  0x59   :  { %v12629_v28 = vpop.eup %12628  ;;  %12648 = vpow2.f32 %v10402_v18 }
  0x5a   :  { %v12631_v30 = vpop.eup %12630  ;;  %2477 = vperm.xlu0 %11828, %v12619_v14   ;;  %12650 = vpow2.f32 %v10401_v21  ;;  %v82_v14 = vld [vmem:[%s19097_s0 + $0x1e8] sm:$0xff]  ;;  %v10413_v21 = vmul.f32 -1.442695, %v79_v13 }
  0x5b   :  { %v12633_v32 = vpop.eup %12632  ;;  %12652 = vpow2.f32 %v10404_v24  ;;  %v10416_v24 = vmul.f32 -1.442695, %v82_v14 }
  0x5c   :  { %v12635_v33 = vpop.eup %12634  ;;  %2492 = vperm.xlu1 %11829, %v12621_v17   ;;  %12654 = vpow2.f32 %v10403_v27  ;;  %v10411_v17 = vmul.f32 -1.442695, %v77_v7 }
  0x5d   :  { %v12637_v34 = vpop.eup %12636  ;;  %v1211_v35 = vadd.f32 1.0, %v12635_v33  ;;  %12656 = vpow2.f32 %v10406_v29 }
  0x5e   :  { %v12639_v36 = vpop.eup %12638  ;;  %2487 = vperm.xlu0 %11828, %v12623_v20   ;;  %v1214_v37 = vadd.f32 1.0, %v12637_v34  ;;  %12658 = vpow2.f32 %v10405_v31 }
  0x5f   :  { %v12641_v38 = vpop.eup %12640  ;;  %12660 = vrcp.f32 %v1211_v35  ;;  %v1213_v39 = vadd.f32 1.0, %v12639_v36 }
  0x60   :  { %v12643_v40 = vpop.eup %12642  ;;  %2502 = vperm.xlu1 %11829, %v12625_v23   ;;  %12662 = vrcp.f32 %v1214_v37  ;;  %v1216_v41 = vadd.f32 1.0, %v12641_v38 }
  0x61   :  { %v12645_v42 = vpop.eup %12644  ;;  %12664 = vrcp.f32 %v1213_v39  ;;  %v1215_v43 = vadd.f32 1.0, %v12643_v40 }
  0x62   :  { %v12647_v44 = vpop.eup %12646  ;;  %2497 = vperm.xlu0 %11828, %v12627_v26   ;;  %12666 = vrcp.f32 %v1216_v41  ;;  %v1218_v45 = vadd.f32 1.0, %v12645_v42  ;;  %v86_v26 = vld [vmem:[%s19097_s0 + $0x208] sm:$0xff] }
  0x63   :  { %v12649_v47 = vpop.eup %12648  ;;  %12668 = vrcp.f32 %v1215_v43  ;;  %v1217_v48 = vadd.f32 1.0, %v12647_v44  ;;  %v10420_v34 = vmul.f32 -1.442695, %v86_v26 }
  0x64   :  { %v12651_v49 = vpop.eup %12650  ;;  %2512 = vperm.xlu1 %11829, %v12629_v28   ;;  %12670 = vrcp.f32 %v1218_v45  ;;  %v1220_v50 = vadd.f32 1.0, %v12649_v47  ;;  %v10415_v28 = vmul.f32 -1.442695, %v81_v15 }
  0x65   :  { %v12653_v52 = vpop.eup %12652  ;;  %12672 = vrcp.f32 %v1217_v48  ;;  %v1219_v53 = vadd.f32 1.0, %v12651_v49 }
  0x66   :  { %v12655_v54 = vpop.eup %12654  ;;  %2507 = vperm.xlu0 %11828, %v12631_v30   ;;  %12674 = vrcp.f32 %v1220_v50  ;;  %v1222_v55 = vadd.f32 1.0, %v12653_v52  ;;  %v10418_v30 = vmul.f32 -1.442695, %v84_v22  ;;  %v95_v22 = vld [vmem:[%s19097_s0 + $0x250] sm:$0xff] }
  0x67   :  { %v12657_v57 = vpop.eup %12656  ;;  %12676 = vrcp.f32 %v1219_v53  ;;  %v1221_v58 = vadd.f32 1.0, %v12655_v54 }
  0x68   :  { %v12659_v60 = vpop.eup %12658  ;;  %2522 = vperm.xlu1 %11829, %v12633_v32   ;;  %12678 = vrcp.f32 %v1222_v55  ;;  %v1224_v61 = vadd.f32 1.0, %v12657_v57  ;;  %v10417_v32 = vmul.f32 -1.442695, %v83_v25  ;;  %v85_v55 = vld [vmem:[%s19097_s0 + $0x200] sm:$0xff] }
  0x69   :  { %v12661_v2 = vpop.eup %12660  ;;  %12680 = vrcp.f32 %v1221_v58  ;;  %v1223_v3 = vadd.f32 1.0, %v12659_v60  ;;  %v88_v58 = vld [vmem:[%s19097_s0 + $0x218] sm:$0xff]  ;;  %v10419_v1 = vmul.f32 -1.442695, %v85_v55 }
  0x6a   :  { %v12663_v5 = vpop.eup %12662  ;;  %2517 = vperm.xlu0 %11828, %v12661_v2   ;;  %12682 = vrcp.f32 %v1224_v61  ;;  %v90_v2 = vld [vmem:[%s19097_s0 + $0x228] sm:$0xff]  ;;  %v100_v55 = vld [vmem:[%s19097_s0 + $0x278] sm:$0xff] }
  0x6b   :  { %v12665_v8 = vpop.eup %12664  ;;  %12684 = vrcp.f32 %v1223_v3  ;;  %v10424_v13 = vmul.f32 -1.442695, %v90_v2  ;;  %v101_v2 = vld [vmem:[%s19097_s0 + $0x280] sm:$0xff] }
  0x6c   :  { %v12667_v11 = vpop.eup %12666  ;;  %2532 = vperm.xlu1 %11829, %v12663_v5   ;;  %12686 = vpow2.f32 %v10408_v62  ;;  %v10422_v5 = vmul.f32 -1.442695, %v88_v58 }
  0x6d   :  { %v12669_v16 = vpop.eup %12668  ;;  %12688 = vpow2.f32 %v10407_v4 }
  0x6e   :  { %v12671_v18 = vpop.eup %12670  ;;  %2527 = vperm.xlu0 %11828, %v12665_v8   ;;  %12690 = vpow2.f32 %v10410_v6  ;;  %v89_v6 = vld [vmem:[%s19097_s0 + $0x220] sm:$0xff]  ;;  %v10421_v8 = vmul.f32 -1.442695, %v87_v59 }
  0x6f   :  { %v12673_v20 = vpop.eup %12672  ;;  %12692 = vpow2.f32 %v10409_v9  ;;  %v92_v9 = vld [vmem:[%s19097_s0 + $0x238] sm:$0xff]  ;;  %v10423_v15 = vmul.f32 -1.442695, %v89_v6  ;;  %v2038_v6 = vld [vmem:[%s19099_s1 + $0x8] sm:$0xff] }
  0x70   :  { %v12675_v23 = vpop.eup %12674  ;;  %2542 = vperm.xlu1 %11829, %v12667_v11   ;;  %12694 = vpow2.f32 %v10412_v12  ;;  %v94_v11 = vld [vmem:[%s19097_s0 + $0x248] sm:$0xff] }
  0x71   :  { %v12677_v27 = vpop.eup %12676  ;;  %12696 = vpow2.f32 %v10411_v17  ;;  %v10426_v17 = vmul.f32 -1.442695, %v92_v9  ;;  %v104_v9 = vld [vmem:[%s19097_s0 + $0x298] sm:$0xff] }
  0x72   :  { %v12679_v29 = vpop.eup %12678  ;;  %2537 = vperm.xlu0 %11828, %v12669_v16   ;;  %12698 = vpow2.f32 %v10414_v19 }
  0x73   :  { %v12681_v31 = vpop.eup %12680  ;;  %12700 = vpow2.f32 %v10413_v21  ;;  %v96_v21 = vld [vmem:[%s19097_s0 + $0x258] sm:$0xff] }
  0x74   :  { %v12683_v33 = vpop.eup %12682  ;;  %2552 = vperm.xlu1 %11829, %v12671_v18   ;;  %12702 = vpow2.f32 %v10416_v24  ;;  %v93_v18 = vld [vmem:[%s19097_s0 + $0x240] sm:$0xff]  ;;  %v10428_v24 = vmul.f32 -1.442695, %v94_v11 }
  0x75   :  { %v12685_v35 = vpop.eup %12684  ;;  %12704 = vpow2.f32 %v10415_v28  ;;  %v10427_v26 = vmul.f32 -1.442695, %v93_v18 }
  0x76   :  { %v12687_v36 = vpop.eup %12686  ;;  %2547 = vperm.xlu0 %11828, %v12673_v20   ;;  %12706 = vpow2.f32 %v10418_v30  ;;  %v10425_v20 = vmul.f32 -1.442695, %v91_v10  ;;  %v97_v30 = vld [vmem:[%s19097_s0 + $0x260] sm:$0xff]  ;;  %v103_v10 = vld [vmem:[%s19097_s0 + $0x290] sm:$0xff] }
  0x77   :  { %v12689_v37 = vpop.eup %12688  ;;  %v1226_v38 = vadd.f32 1.0, %v12687_v36  ;;  %12708 = vpow2.f32 %v10417_v32  ;;  %v10429_v32 = vmul.f32 -1.442695, %v95_v22  ;;  %v10431_v36 = vmul.f32 -1.442695, %v97_v30  ;;  %v2039_v22 = vld [vmem:[%s19099_s1 + $0x10] sm:$0xff] }
  0x78   :  { %v12691_v39 = vpop.eup %12690  ;;  %2562 = vperm.xlu1 %11829, %v12675_v23   ;;  %v1225_v40 = vadd.f32 1.0, %v12689_v37  ;;  %12710 = vpow2.f32 %v10420_v34 }
  0x79   :  { %v12693_v41 = vpop.eup %12692  ;;  %12712 = vrcp.f32 %v1226_v38  ;;  %v1228_v42 = vadd.f32 1.0, %v12691_v39 }
  0x7a   :  { %v12695_v43 = vpop.eup %12694  ;;  %2557 = vperm.xlu0 %11828, %v12677_v27   ;;  %12714 = vrcp.f32 %v1225_v40  ;;  %v1227_v44 = vadd.f32 1.0, %v12693_v41  ;;  %v98_v27 = vld [vmem:[%s19097_s0 + $0x268] sm:$0xff] }
  0x7b   :  { %v12697_v45 = vpop.eup %12696  ;;  %12716 = vrcp.f32 %v1228_v42  ;;  %v1230_v46 = vadd.f32 1.0, %v12695_v43  ;;  %v10432_v34 = vmul.f32 -1.442695, %v98_v27  ;;  %v107_v27 = vld [vmem:[%s19097_s0 + $0x2b0] sm:$0xff] }
  0x7c   :  { %v12699_v47 = vpop.eup %12698  ;;  %2572 = vperm.xlu1 %11829, %v12679_v29   ;;  %12718 = vrcp.f32 %v1227_v44  ;;  %v1229_v48 = vadd.f32 1.0, %v12697_v45  ;;  %v10430_v29 = vmul.f32 -1.442695, %v96_v21 }
  0x7d   :  { %v12701_v49 = vpop.eup %12700  ;;  %12720 = vrcp.f32 %v1230_v46  ;;  %v1232_v50 = vadd.f32 1.0, %v12699_v47 }
  0x7e   :  { %v12703_v51 = vpop.eup %12702  ;;  %2567 = vperm.xlu0 %11828, %v12681_v31   ;;  %12722 = vrcp.f32 %v1229_v48  ;;  %v1231_v52 = vadd.f32 1.0, %v12701_v49 }
  0x7f   :  { %v12705_v53 = vpop.eup %12704  ;;  %12724 = vrcp.f32 %v1232_v50  ;;  %v1234_v54 = vadd.f32 1.0, %v12703_v51 }
  0x80   :  { %v12707_v56 = vpop.eup %12706  ;;  %2582 = vperm.xlu1 %11829, %v12683_v33   ;;  %12726 = vrcp.f32 %v1231_v52  ;;  %v1233_v57 = vadd.f32 1.0, %v12705_v53 }
  0x81   :  { %v12709_v60 = vpop.eup %12708  ;;  %12728 = vrcp.f32 %v1234_v54  ;;  %v1236_v61 = vadd.f32 1.0, %v12707_v56 }
  0x82   :  { %v12711_v62 = vpop.eup %12710  ;;  %2577 = vperm.xlu0 %11828, %v12685_v35   ;;  %12730 = vrcp.f32 %v1233_v57  ;;  %v1235_v63 = vadd.f32 1.0, %v12709_v60  ;;  %v99_v60 = vld [vmem:[%s19097_s0 + $0x270] sm:$0xff] }
  0x83   :  { %v12713_v3 = vpop.eup %12712  ;;  %12732 = vrcp.f32 %v1236_v61  ;;  %v1238_v4 = vadd.f32 1.0, %v12711_v62 }
  0x84   :  { %v12715_v7 = vpop.eup %12714  ;;  %2592 = vperm.xlu1 %11829, %v12713_v3   ;;  %12734 = vrcp.f32 %v1235_v63 }
  0x85   :  { %v12717_v12 = vpop.eup %12716  ;;  %12736 = vrcp.f32 %v1238_v4  ;;  %v2037_v4 = vld [vmem:[%s19099_s1] sm:$0xff] }
  0x86   :  { %v12719_v14 = vpop.eup %12718  ;;  %2587 = vperm.xlu0 %11828, %v12715_v7   ;;  %12738 = vpow2.f32 %v10419_v1  ;;  %v102_v1 = vld [vmem:[%s19097_s0 + $0x288] sm:$0xff] }
  0x87   :  { %v12721_v16 = vpop.eup %12720  ;;  %12740 = vpow2.f32 %v10422_v5 }
  0x88   :  { %v12723_v19 = vpop.eup %12722  ;;  %2602 = vperm.xlu1 %11829, %v12717_v12   ;;  %12742 = vpow2.f32 %v10421_v8  ;;  %v10434_v8 = vmul.f32 -1.442695, %v100_v55 }
  0x89   :  { %v12725_v23 = vpop.eup %12724  ;;  %12744 = vpow2.f32 %v10424_v13  ;;  %v10433_v13 = vmul.f32 -1.442695, %v99_v60 }
  0x8a   :  { %v12727_v25 = vpop.eup %12726  ;;  %2597 = vperm.xlu0 %11828, %v12719_v14   ;;  %12746 = vpow2.f32 %v10423_v15  ;;  %v10436_v15 = vmul.f32 -1.442695, %v102_v1 }
  0x8b   :  { %v12729_v28 = vpop.eup %12728  ;;  %12748 = vpow2.f32 %v10426_v17  ;;  %v2040_v17 = vld [vmem:[%s19099_s1 + $0x18] sm:$0xff] }
  0x8c   :  { %v12731_v31 = vpop.eup %12730  ;;  %2612 = vperm.xlu1 %11829, %v12721_v16   ;;  %12750 = vpow2.f32 %v10425_v20  ;;  %v106_v20 = vld [vmem:[%s19097_s0 + $0x2a8] sm:$0xff] }
  0x8d   :  { %v12733_v33 = vpop.eup %12732  ;;  %12752 = vpow2.f32 %v10428_v24  ;;  %v10438_v24 = vmul.f32 -1.442695, %v104_v9  ;;  %v2046_v9 = vld [vmem:[%s19099_s1 + $0x48] sm:$0xff] }
  0x8e   :  { %v12735_v35 = vpop.eup %12734  ;;  %2607 = vperm.xlu0 %11828, %v12723_v19   ;;  %12754 = vpow2.f32 %v10427_v26  ;;  %v10435_v19 = vmul.f32 -1.442695, %v101_v2  ;;  %v108_v26 = vld [vmem:[%s19097_s0 + $0x2b8] sm:$0xff] }
  0x8f   :  { %v12737_v37 = vpop.eup %12736  ;;  %12756 = vpow2.f32 %v10430_v29 }
  0x90   :  { %v12739_v38 = vpop.eup %12738  ;;  %2622 = vperm.xlu1 %11829, %v12725_v23   ;;  %12758 = vpow2.f32 %v10429_v32 }
  0x91   :  { %v12741_v39 = vpop.eup %12740  ;;  %v1237_v40 = vadd.f32 1.0, %v12739_v38  ;;  %12760 = vpow2.f32 %v10432_v34  ;;  %v110_v34 = vld [vmem:[%s19097_s0 + $0x2c8] sm:$0xff] }
  0x92   :  { %v12743_v41 = vpop.eup %12742  ;;  %2617 = vperm.xlu0 %11828, %v12727_v25   ;;  %v1240_v42 = vadd.f32 1.0, %v12741_v39  ;;  %12762 = vpow2.f32 %v10431_v36  ;;  %v105_v25 = vld [vmem:[%s19097_s0 + $0x2a0] sm:$0xff] }
  0x93   :  { %v12745_v43 = vpop.eup %12744  ;;  %12764 = vrcp.f32 %v1237_v40  ;;  %v1239_v44 = vadd.f32 1.0, %v12743_v41  ;;  %v10439_v40 = vmul.f32 -1.442695, %v105_v25  ;;  %v109_v41 = vld [vmem:[%s19097_s0 + $0x2c0] sm:$0xff] }
  0x94   :  { %v12747_v45 = vpop.eup %12746  ;;  %2632 = vperm.xlu1 %11829, %v12729_v28   ;;  %12766 = vrcp.f32 %v1240_v42  ;;  %v1242_v46 = vadd.f32 1.0, %v12745_v43  ;;  %v2041_v43 = vld [vmem:[%s19099_s1 + $0x20] sm:$0xff] }
  0x95   :  { %v12749_v47 = vpop.eup %12748  ;;  %12768 = vrcp.f32 %v1239_v44  ;;  %v1241_v48 = vadd.f32 1.0, %v12747_v45  ;;  %v10442_v45 = vmul.f32 -1.442695, %v108_v26 }
  0x96   :  { %v12751_v49 = vpop.eup %12750  ;;  %2627 = vperm.xlu0 %11828, %v12731_v31   ;;  %12770 = vrcp.f32 %v1242_v46  ;;  %v1244_v50 = vadd.f32 1.0, %v12749_v47  ;;  %v10437_v31 = vmul.f32 -1.442695, %v103_v10  ;;  %v10441_v46 = vmul.f32 -1.442695, %v107_v27  ;;  %v112_v47 = vld [vmem:[%s19097_s0 + $0x2d8] sm:$0xff] }
  0x97   :  { %v12753_v51 = vpop.eup %12752  ;;  %12772 = vrcp.f32 %v1241_v48  ;;  %v1243_v52 = vadd.f32 1.0, %v12751_v49  ;;  %v2045_v10 = vld [vmem:[%s19099_s1 + $0x40] sm:$0xff] }
  0x98   :  { %v12755_v53 = vpop.eup %12754  ;;  %2642 = vperm.xlu1 %11829, %v12733_v33   ;;  %12774 = vrcp.f32 %v1244_v50  ;;  %v1246_v54 = vadd.f32 1.0, %v12753_v51  ;;  %v10440_v33 = vmul.f32 -1.442695, %v106_v20  ;;  %v10444_v50 = vmul.f32 -1.442695, %v110_v34  ;;  %v2050_v34 = vld [vmem:[%s19099_s1 + $0x68] sm:$0xff] }
  0x99   :  { %v12757_v56 = vpop.eup %12756  ;;  %12776 = vrcp.f32 %v1243_v52  ;;  %v1245_v57 = vadd.f32 1.0, %v12755_v53  ;;  %v10443_v52 = vmul.f32 -1.442695, %v109_v41 }
  0x9a   :  { %v12759_v58 = vpop.eup %12758  ;;  %2637 = vperm.xlu0 %11828, %v12735_v35   ;;  %12778 = vrcp.f32 %v1246_v54  ;;  %v1248_v59 = vadd.f32 1.0, %v12757_v56 }
  0x9b   :  { %v12761_v61 = vpop.eup %12760  ;;  %v14004_v62 = vpop.permute.xlu1 %2337  ;;  %12780 = vrcp.f32 %v1245_v57  ;;  %v1247_v63 = vadd.f32 1.0, %v12759_v58  ;;  %v2044_v57 = vld [vmem:[%s19099_s1 + $0x38] sm:$0xff] }
  0x9c   :  { %v12763_v3 = vpop.eup %12762  ;;  %v2328_v5 = vpop.permute.xlu0 %2327  ;;  %2652 = vperm.xlu1 %11829, %v12737_v37   ;;  %12782 = vrcp.f32 %v1248_v59  ;;  %v1250_v7 = vadd.f32 1.0, %v12761_v61  ;;  %v2042_v37 = vld [vmem:[%s19099_s1 + $0x28] sm:$0xff]  ;;  %v3767_v49 = vmul.f32 %v14004_v62, %v2039_v22  ;;  %v2043_v59 = vld [vmem:[%s19099_s1 + $0x30] sm:$0xff]  ;;  %v10446_v62 = vmul.f32 -1.442695, %v112_v47 }
  0x9d   :  { %v12765_v11 = vpop.eup %12764  ;;  %12784 = vrcp.f32 %v1247_v63  ;;  %v1249_v12 = vadd.f32 1.0, %v12763_v3  ;;  %v3765_v29 = vmul.f32 %v2328_v5, %v2037_v4  ;;  %v115_v47 = vld [vmem:[%s19097_s0 + $0x2f0] sm:$0xff] }
  0x9e   :  { %v12767_v14 = vpop.eup %12766  ;;  %2647 = vperm.xlu0 %11828, %v12765_v11   ;;  %12786 = vrcp.f32 %v1250_v7 }
  0x9f   :  { %v12769_v16 = vpop.eup %12768  ;;  %v2343_v18 = vpop.permute.xlu1 %2342  ;;  %12788 = vrcp.f32 %v1249_v12 }
  0xa0   :  { %v12771_v21 = vpop.eup %12770  ;;  %v2333_v23 = vpop.permute.xlu0 %2332  ;;  %2662 = vperm.xlu1 %11829, %v12767_v14   ;;  %12790 = vpow2.f32 %v10434_v8  ;;  %v3768_v36 = vmul.f32 %v2343_v18, %v2040_v17 }
  0xa1   :  { %v12773_v28 = vpop.eup %12772  ;;  %v3766_v30 = vmul.f32 %v2333_v23, %v2038_v6  ;;  %12792 = vpow2.f32 %v10433_v13  ;;  %v2047_v23 = vld [vmem:[%s19099_s1 + $0x50] sm:$0xff] }
  0xa2   :  { %v12775_v32 = vpop.eup %12774  ;;  %2657 = vperm.xlu0 %11828, %v12769_v16   ;;  %12794 = vpow2.f32 %v10436_v15  ;;  %v4054_v54 = vpack.c.bf16 %v3768_v36, %v3767_v49  ;;  %v114_v36 = vld [vmem:[%s19097_s0 + $0x2e8] sm:$0xff] }
  0xa3   :  { %v12777_v35 = vpop.eup %12776  ;;  %v2353_v38 = vpop.permute.xlu1 %2352  ;;  %v4053_v39 = vpack.c.bf16 %v3766_v30, %v3765_v29  ;;  %12796 = vpow2.f32 %v10435_v19 }
  0xa4   :  { %v12779_v42 = vpop.eup %12778  ;;  %v2348_v44 = vpop.permute.xlu0 %2347  ;;  %2672 = vperm.xlu1 %11829, %v12771_v21   ;;  %12798 = vpow2.f32 %v10438_v24  ;;  %v3770_v55 = vmul.f32 %v2353_v38, %v2042_v37  ;;  %v2048_v21 = vld [vmem:[%s19099_s1 + $0x58] sm:$0xff] }
  0xa5   :  { %v12781_v48 = vpop.eup %12780  ;;  %6790 = vmatpush1.bf16.msra.mxu1 %v4053_v39  ;;  %12800 = vpow2.f32 %v10437_v31  ;;  %v3769_v56 = vmul.f32 %v2348_v44, %v2041_v43  ;;  %v116_v43 = vld [vmem:[%s19097_s0 + $0x2f8] sm:$0xff] }
  0xa6   :  { %v12783_v51 = vpop.eup %12782  ;;  %2667 = vperm.xlu0 %11828, %v12773_v28   ;;  %6791 = vmatprep.subr.bf16.mxu1 %v19103_v0  ;;  %12802 = vpow2.f32 %v10440_v33  ;;  %v111_v28 = vld [vmem:[%s19097_s0 + $0x2d0] sm:$0xff] }
  0xa7   :  { %v14059_v53 = vpop.eup %12784  ;;  %v2363_v58 = vpop.permute.xlu1 %2362  ;;  %12804 = vpow2.f32 %v10439_v40  ;;  %v4055_v5 = vpack.c.bf16 %v3770_v55, %v3769_v56  ;;  %v2049_v40 = vld [vmem:[%s19099_s1 + $0x60] sm:$0xff]  ;;  %v2052_v55 = vld [vmem:[%s19099_s1 + $0x78] sm:$0xff] }
  0xa8   :  { %v14067_v60 = vpop.eup %12786  ;;  %v2358_v61 = vpop.permute.xlu0 %2357  ;;  %2682 = vperm.xlu1 %11829, %v12775_v32   ;;  %12806 = vpow2.f32 %v10442_v45  ;;  %v3772_v2 = vmul.f32 %v2363_v58, %v2044_v57 }
  0xa9   :  { %v14069_v63 = vpop.eup %12788  ;;  %6792 = vmatpush1.bf16.msra.mxu1 %v4054_v54  ;;  %12808 = vpow2.f32 %v10441_v46  ;;  %v3771_v3 = vmul.f32 %v2358_v61, %v2043_v59  ;;  %v10445_v46 = vmul.f32 -1.442695, %v111_v28 }
  0xaa   :  { %v12791_v1 = vpop.eup %12790  ;;  %2677 = vperm.xlu0 %11828, %v12777_v35   ;;  %6793 = vmatprep.subr.bf16.mxu1 %v19103_v0  ;;  %12810 = vpow2.f32 %v10444_v50 }
  0xab   :  { %v12793_v4 = vpop.eup %12792  ;;  %v2373_v6 = vpop.permute.xlu1 %2372  ;;  %v1252_v7 = vadd.f32 1.0, %v12791_v1  ;;  %12812 = vpow2.f32 %v10443_v52  ;;  %v4056_v16 = vpack.c.bf16 %v3772_v2, %v3771_v3  ;;  %v10448_v52 = vmul.f32 -1.442695, %v114_v36  ;;  %v153_v36 = vld [vmem:[%s19097_s0 + $0x420] sm:$0xff] }
  0xac   :  { %v12795_v8 = vpop.eup %12794  ;;  %v2368_v11 = vpop.permute.xlu0 %2367  ;;  %2692 = vperm.xlu1 %11829, %v12779_v42   ;;  %v1251_v12 = vadd.f32 1.0, %v12793_v4  ;;  %12814 = vpow2.f32 %v10446_v62  ;;  %v3774_v19 = vmul.f32 %v2373_v6, %v2046_v9  ;;  %v113_v42 = vld [vmem:[%s19097_s0 + $0x2e0] sm:$0xff]  ;;  %v2051_v62 = vld [vmem:[%s19099_s1 + $0x70] sm:$0xff]  ;;  %v10450_v3 = vmul.f32 -1.442695, %v116_v43 }
  0xad   :  { %v12797_v13 = vpop.eup %12796  ;;  %6794 = vmatpush1.bf16.msra.mxu1 %v4055_v5  ;;  %12816 = vrcp.f32 %v1252_v7  ;;  %v1254_v14 = vadd.f32 1.0, %v12795_v8  ;;  %v3773_v20 = vmul.f32 %v2368_v11, %v2045_v10  ;;  %v10447_v57 = vmul.f32 -1.442695, %v113_v42  ;;  %v150_v5 = vld [vmem:[%s19097_s0 + $0x408] sm:$0xff]  ;;  %v149_v11 = vld [vmem:[%s19097_s0 + $0x400] sm:$0xff] }
  0xae   :  { %v12799_v15 = vpop.eup %12798  ;;  %2687 = vperm.xlu0 %11828, %v12781_v48   ;;  %6795 = vmatprep.subr.bf16.mxu1 %v19103_v0  ;;  %12818 = vrcp.f32 %v1251_v12  ;;  %v1253_v17 = vadd.f32 1.0, %v12797_v13  ;;  %v118_v48 = vld [vmem:[%s19097_s0 + $0x308] sm:$0xff]  ;;  %v10449_v4 = vmul.f32 -1.442695, %v115_v47 }
  0xaf   :  { %v12801_v18 = vpop.eup %12800  ;;  %v2383_v22 = vpop.permute.xlu1 %2382  ;;  %12820 = vrcp.f32 %v1254_v14  ;;  %v1256_v24 = vadd.f32 1.0, %v12799_v15  ;;  %v4057_v38 = vpack.c.bf16 %v3774_v19, %v3773_v20  ;;  %v10452_v8 = vmul.f32 -1.442695, %v118_v48  ;;  %v152_v19 = vld [vmem:[%s19097_s0 + $0x418] sm:$0xff] }
  0xb0   :  { %v12803_v25 = vpop.eup %12802  ;;  %v2378_v26 = vpop.permute.xlu0 %2377  ;;  %2702 = vperm.xlu1 %11829, %v12783_v51   ;;  %12822 = vrcp.f32 %v1253_v17  ;;  %v1255_v27 = vadd.f32 1.0, %v12801_v18  ;;  %v3776_v32 = vmul.f32 %v2383_v22, %v2048_v21  ;;  %v2053_v18 = vld [vmem:[%s19099_s1 + $0x80] sm:$0xff]  ;;  %v10484_v21 = vmul.f32 -1.442695, %v150_v5  ;;  %v151_v22 = vld [vmem:[%s19097_s0 + $0x410] sm:$0xff] }
  0xb1   :  { %v12805_v29 = vpop.eup %12804  ;;  %6796 = vmatpush1.bf16.msra.mxu1 %v4056_v16  ;;  %12824 = vrcp.f32 %v1256_v24  ;;  %v1258_v30 = vadd.f32 1.0, %v12803_v25  ;;  %v3775_v33 = vmul.f32 %v2378_v26, %v2047_v23  ;;  %v2054_v16 = vld [vmem:[%s19099_s1 + $0x88] sm:$0xff]  ;;  %v2056_v26 = vld [vmem:[%s19099_s1 + $0x98] sm:$0xff] }
  0xb2   :  { %v12807_v31 = vpop.eup %12806  ;;  %2697 = vperm.xlu0 %11828, %v14059_v53   ;;  %6797 = vmatprep.subr.bf16.mxu1 %v19103_v0  ;;  %12826 = vrcp.f32 %v1255_v27  ;;  %v1257_v35 = vadd.f32 1.0, %v12805_v29  ;;  %v154_v23 = vld [vmem:[%s19097_s0 + $0x428] sm:$0xff]  ;;  %v10483_v27 = vmul.f32 -1.442695, %v149_v11  ;;  %v10486_v29 = vmul.f32 -1.442695, %v152_v19 }
  0xb3   :  { %v12809_v37 = vpop.eup %12808  ;;  %v2393_v39 = vpop.permute.xlu1 %2392  ;;  %12828 = vrcp.f32 %v1258_v30  ;;  %v1260_v41 = vadd.f32 1.0, %v12807_v31  ;;  %v4058_v54 = vpack.c.bf16 %v3776_v32, %v3775_v33 }
  0xb4   :  { %v12811_v44 = vpop.eup %12810  ;;  %2712 = vperm.xlu1 %11829, %v14067_v60   ;;  %12830 = vrcp.f32 %v1257_v35  ;;  %v1259_v45 = vadd.f32 1.0, %v12809_v37  ;;  %v3778_v59 = vmul.f32 %v2393_v39, %v2050_v34  ;;  %v2055_v35 = vld [vmem:[%s19099_s1 + $0x90] sm:$0xff] }
  0xb5   :  { %v12813_v49 = vpop.eup %12812  ;;  %v2388_v50 = vpop.permute.xlu0 %2387  ;;  %6798 = vmatpush1.bf16.msra.mxu1 %v4057_v38  ;;  %12832 = vrcp.f32 %v1260_v41  ;;  %v1262_v51 = vadd.f32 1.0, %v12811_v44  ;;  %v10485_v38 = vmul.f32 -1.442695, %v151_v22  ;;  %v10488_v41 = vmul.f32 -1.442695, %v154_v23 }
  0xb6   :  { %v12815_v53 = vpop.eup %12814  ;;  %2707 = vperm.xlu0 %11828, %v14069_v63   ;;  %6799 = vmatprep.subr.bf16.mxu1 %v19103_v0  ;;  %12834 = vrcp.f32 %v1259_v45  ;;  %v1261_v56 = vadd.f32 1.0, %v12813_v49  ;;  %v3777_v60 = vmul.f32 %v2388_v50, %v2049_v40  ;;  %v117_v63 = vld [vmem:[%s19097_s0 + $0x300] sm:$0xff]  ;;  %v10487_v45 = vmul.f32 -1.442695, %v153_v36  ;;  %v2058_v50 = vld [vmem:[%s19099_s1 + $0xa8] sm:$0xff] }
  0xb7   :  { %v12817_v58 = vpop.eup %12816  ;;  %v2403_v61 = vpop.permute.xlu1 %2402  ;;  %12836 = vrcp.f32 %v1262_v51  ;;  %v1264_v1 = vadd.f32 1.0, %v12815_v53  ;;  %v10451_v10 = vmul.f32 -1.442695, %v117_v63  ;;  %v2057_v51 = vld [vmem:[%s19099_s1 + $0xa0] sm:$0xff] }
  0xb8   :  { %v12819_v2 = vpop.eup %12818  ;;  %2722 = vperm.xlu1 %11829, %v12817_v58   ;;  %12838 = vrcp.f32 %v1261_v56  ;;  %v4059_v13 = vpack.c.bf16 %v3778_v59, %v3777_v60  ;;  %v3780_v14 = vmul.f32 %v2403_v61, %v2052_v55  ;;  %v2060_v61 = vld [vmem:[%s19099_s1 + $0xb8] sm:$0xff] }
  0xb9   :  { %v12821_v6 = vpop.eup %12820  ;;  %v2398_v7 = vpop.permute.xlu0 %2397  ;;  %6800 = vmatpush1.bf16.msra.mxu1 %v4058_v54  ;;  %12840 = vrcp.f32 %v1264_v1  ;;  %v2059_v1 = vld [vmem:[%s19099_s1 + $0xb0] sm:$0xff] }
  0xba   :  { %v12823_v9 = vpop.eup %12822  ;;  %2717 = vperm.xlu0 %11828, %v12819_v2   ;;  %6801 = vmatprep.subr.bf16.mxu1 %v19103_v0  ;;  %12842 = vpow2.f32 %v10445_v46  ;;  %v3779_v15 = vmul.f32 %v2398_v7, %v2051_v62 }
  0xbb   :  { %v12825_v12 = vpop.eup %12824  ;;  %v2413_v17 = vpop.permute.xlu1 %2412  ;;  %12844 = vpow2.f32 %v10448_v52 }
  0xbc   :  { %v12827_v20 = vpop.eup %12826  ;;  %2732 = vperm.xlu1 %11829, %v12821_v6   ;;  %12846 = vpow2.f32 %v10447_v57  ;;  %v4060_v31 = vpack.c.bf16 %v3780_v14, %v3779_v15  ;;  %v3782_v32 = vmul.f32 %v2413_v17, %v2054_v16  ;;  %v156_v16 = vld [vmem:[%s19097_s0 + $0x438] sm:$0xff] }
  0xbd   :  { %v12829_v24 = vpop.eup %12828  ;;  %v2408_v25 = vpop.permute.xlu0 %2407  ;;  %6802 = vmatpush1.bf16.msra.mxu1 %v4059_v13  ;;  %12848 = vpow2.f32 %v10450_v3  ;;  %v2062_v13 = vld [vmem:[%s19099_s1 + $0xc8] sm:$0xff] }
  0xbe   :  { %v12831_v28 = vpop.eup %12830  ;;  %2727 = vperm.xlu0 %11828, %v12823_v9   ;;  %6803 = vmatprep.subr.bf16.mxu1 %v19103_v0  ;;  %12850 = vpow2.f32 %v10449_v4  ;;  %v3781_v33 = vmul.f32 %v2408_v25, %v2053_v18  ;;  %v2061_v18 = vld [vmem:[%s19099_s1 + $0xc0] sm:$0xff] }
  0xbf   :  { %v12833_v30 = vpop.eup %12832  ;;  %v2423_v34 = vpop.permute.xlu1 %2422  ;;  %12852 = vpow2.f32 %v10452_v8  ;;  %v157_v25 = vld [vmem:[%s19097_s0 + $0x440] sm:$0xff] }
  0xc0   :  { %v12835_v37 = vpop.eup %12834  ;;  %2742 = vperm.xlu1 %11829, %v12825_v12   ;;  %12854 = vpow2.f32 %v10451_v10  ;;  %v3784_v43 = vmul.f32 %v2423_v34, %v2056_v26  ;;  %v4061_v47 = vpack.c.bf16 %v3782_v32, %v3781_v33 }
  0xc1   :  { %v14155_v39 = vpop.eup %12836  ;;  %v2418_v40 = vpop.permute.xlu0 %2417  ;;  %6804 = vmatpush1.bf16.msra.mxu1 %v4060_v31  ;;  %12856 = vpow2.f32 %v10484_v21 }
  0xc2   :  { %v14157_v42 = vpop.eup %12838  ;;  %v3783_v44 = vmul.f32 %v2418_v40, %v2055_v35  ;;  %2737 = vperm.xlu0 %11828, %v12827_v20   ;;  %6805 = vmatprep.subr.bf16.mxu1 %v19103_v0  ;;  %12858 = vpow2.f32 %v10483_v27  ;;  %v155_v20 = vld [vmem:[%s19097_s0 + $0x430] sm:$0xff] }
  0xc3   :  { %v14160_v46 = vpop.eup %12840  ;;  %v2433_v48 = vpop.permute.xlu1 %2432  ;;  %12860 = vpow2.f32 %v10486_v29  ;;  %v2063_v35 = vld [vmem:[%s19099_s1 + $0xd0] sm:$0xff]  ;;  %v10489_v40 = vmul.f32 -1.442695, %v155_v20 }
  0xc4   :  { %v12843_v49 = vpop.eup %12842  ;;  %2752 = vperm.xlu1 %11829, %v12829_v24   ;;  %12862 = vpow2.f32 %v10485_v38  ;;  %v4062_v56 = vpack.c.bf16 %v3784_v43, %v3783_v44  ;;  %v3786_v59 = vmul.f32 %v2433_v48, %v2058_v50  ;;  %v158_v24 = vld [vmem:[%s19097_s0 + $0x448] sm:$0xff] }
  0xc5   :  { %v12845_v52 = vpop.eup %12844  ;;  %v2428_v53 = vpop.permute.xlu0 %2427  ;;  %6806 = vmatpush1.bf16.msra.mxu1 %v4061_v47  ;;  %v1263_v54 = vadd.f32 1.0, %v12843_v49  ;;  %12864 = vpow2.f32 %v10488_v41  ;;  %v10492_v41 = vmul.f32 -1.442695, %v158_v24  ;;  %v159_v47 = vld [vmem:[%s19097_s0 + $0x450] sm:$0xff]  ;;  %v162_v49 = vld [vmem:[%s19097_s0 + $0x468] sm:$0xff] }
  0xc6   :  { %v12847_v55 = vpop.eup %12846  ;;  %2747 = vperm.xlu0 %11828, %v12831_v28   ;;  %6807 = vmatprep.subr.bf16.mxu1 %v19103_v0  ;;  %v1266_v57 = vadd.f32 1.0, %v12845_v52  ;;  %12866 = vpow2.f32 %v10487_v45  ;;  %v3785_v60 = vmul.f32 %v2428_v53, %v2057_v51  ;;  %v2064_v28 = vld [vmem:[%s19099_s1 + $0xd8] sm:$0xff]  ;;  %v10491_v45 = vmul.f32 -1.442695, %v157_v25 }
  0xc7   :  { %v12849_v58 = vpop.eup %12848  ;;  %v2443_v62 = vpop.permute.xlu1 %2442  ;;  %12868 = vrcp.f32 %v1263_v54  ;;  %v1265_v63 = vadd.f32 1.0, %v12847_v55  ;;  %v2066_v54 = vld [vmem:[%s19099_s1 + $0xe8] sm:$0xff] }
  0xc8   :  { %v12851_v2 = vpop.eup %12850  ;;  %2762 = vperm.xlu1 %11829, %v12833_v30   ;;  %12870 = vrcp.f32 %v1266_v57  ;;  %v1268_v3 = vadd.f32 1.0, %v12849_v58  ;;  %v3788_v8 = vmul.f32 %v2443_v62, %v2060_v61  ;;  %v4063_v12 = vpack.c.bf16 %v3786_v59, %v3785_v60  ;;  %v161_v57 = vld [vmem:[%s19097_s0 + $0x460] sm:$0xff]  ;;  %v164_v60 = vld [vmem:[%s19097_s0 + $0x478] sm:$0xff]  ;;  %v163_v61 = vld [vmem:[%s19097_s0 + $0x470] sm:$0xff] }
  0xc9   :  { %v12853_v4 = vpop.eup %12852  ;;  %v2438_v5 = vpop.permute.xlu0 %2437  ;;  %6808 = vmatpush1.bf16.msra.mxu1 %v4062_v56  ;;  %12872 = vrcp.f32 %v1265_v63  ;;  %v1267_v6 = vadd.f32 1.0, %v12851_v2  ;;  %v10490_v30 = vmul.f32 -1.442695, %v156_v16  ;;  %v2065_v56 = vld [vmem:[%s19099_s1 + $0xe0] sm:$0xff]  ;;  %v10493_v59 = vmul.f32 -1.442695, %v159_v47 }
  0xca   :  { %v12855_v7 = vpop.eup %12854  ;;  %v3787_v9 = vmul.f32 %v2438_v5, %v2059_v1  ;;  %2757 = vperm.xlu0 %11828, %v12835_v37   ;;  %6809 = vmatprep.subr.bf16.mxu1 %v19103_v0  ;;  %12874 = vrcp.f32 %v1268_v3  ;;  %v1270_v10 = vadd.f32 1.0, %v12853_v4  ;;  %v160_v37 = vld [vmem:[%s19097_s0 + $0x458] sm:$0xff]  ;;  %v10496_v63 = vmul.f32 -1.442695, %v162_v49 }
  0xcb   :  { %v12857_v11 = vpop.eup %12856  ;;  %v2453_v14 = vpop.permute.xlu1 %2452  ;;  %12876 = vrcp.f32 %v1267_v6  ;;  %v1269_v15 = vadd.f32 1.0, %v12855_v7  ;;  %v2068_v3 = vld [vmem:[%s19099_s1 + $0xf8] sm:$0xff]  ;;  %v10495_v4 = vmul.f32 -1.442695, %v161_v57  ;;  %v2073_v57 = vld [vmem:[%s19099_s1 + $0x120] sm:$0xff] }
  0xcc   :  { %v12859_v17 = vpop.eup %12858  ;;  %2772 = vperm.xlu1 %11829, %v14155_v39   ;;  %12878 = vrcp.f32 %v1270_v10  ;;  %v1302_v19 = vadd.f32 1.0, %v12857_v11  ;;  %v4064_v27 = vpack.c.bf16 %v3788_v8, %v3787_v9  ;;  %v3790_v32 = vmul.f32 %v2453_v14, %v2062_v13  ;;  %v166_v10 = vld [vmem:[%s19097_s0 + $0x488] sm:$0xff]  ;;  %v165_v11 = vld [vmem:[%s19097_s0 + $0x480] sm:$0xff]  ;;  %v2067_v13 = vld [vmem:[%s19099_s1 + $0xf0] sm:$0xff] }
  0xcd   :  { %v12861_v21 = vpop.eup %12860  ;;  %v2448_v22 = vpop.permute.xlu0 %2447  ;;  %6810 = vmatpush1.bf16.msra.mxu1 %v4063_v12  ;;  %12880 = vrcp.f32 %v1269_v15  ;;  %v1301_v23 = vadd.f32 1.0, %v12859_v17  ;;  %v10498_v14 = vmul.f32 -1.442695, %v164_v60  ;;  %v168_v15 = vld [vmem:[%s19097_s0 + $0x498] sm:$0xff]  ;;  %v10500_v20 = vmul.f32 -1.442695, %v166_v10 }
  0xce   :  { %v12863_v26 = vpop.eup %12862  ;;  %2767 = vperm.xlu0 %11828, %v14157_v42   ;;  %6811 = vmatprep.subr.bf16.mxu1 %v19103_v0  ;;  %12882 = vrcp.f32 %v1302_v19  ;;  %v1304_v29 = vadd.f32 1.0, %v12861_v21  ;;  %v3789_v33 = vmul.f32 %v2448_v22, %v2061_v18  ;;  %v10497_v18 = vmul.f32 -1.442695, %v163_v61  ;;  %v167_v61 = vld [vmem:[%s19097_s0 + $0x490] sm:$0xff] }
  0xcf   :  { %v12865_v31 = vpop.eup %12864  ;;  %v2463_v34 = vpop.permute.xlu1 %2462  ;;  %12884 = vrcp.f32 %v1301_v23  ;;  %v1303_v36 = vadd.f32 1.0, %v12863_v26  ;;  %v10499_v21 = vmul.f32 -1.442695, %v165_v11  ;;  %v2070_v26 = vld [vmem:[%s19099_s1 + $0x108] sm:$0xff] }
  0xd0   :  { %v12867_v38 = vpop.eup %12866  ;;  %2782 = vperm.xlu1 %11829, %v14160_v46   ;;  %12886 = vrcp.f32 %v1304_v29  ;;  %v1306_v39 = vadd.f32 1.0, %v12865_v31  ;;  %v10494_v46 = vmul.f32 -1.442695, %v160_v37  ;;  %v4065_v51 = vpack.c.bf16 %v3790_v32, %v3789_v33 }
  0xd1   :  { %v12869_v42 = vpop.eup %12868  ;;  %v2458_v43 = vpop.permute.xlu0 %2457  ;;  %6812 = vmatpush1.bf16.msra.mxu1 %v4064_v27  ;;  %12888 = vrcp.f32 %v1303_v36  ;;  %v1305_v44 = vadd.f32 1.0, %v12867_v38  ;;  %v3792_v52 = vmul.f32 %v2463_v34, %v2064_v28  ;;  %v2069_v28 = vld [vmem:[%s19099_s1 + $0x100] sm:$0xff]  ;;  %v2072_v38 = vld [vmem:[%s19099_s1 + $0x118] sm:$0xff] }
  0xd2   :  { %v12871_v48 = vpop.eup %12870  ;;  %2777 = vperm.xlu0 %11828, %v12869_v42   ;;  %6813 = vmatprep.subr.bf16.mxu1 %v19103_v0  ;;  %12890 = vrcp.f32 %v1306_v39  ;;  %v3791_v53 = vmul.f32 %v2458_v43, %v2063_v35  ;;  %v2071_v42 = vld [vmem:[%s19099_s1 + $0x110] sm:$0xff]  ;;  %v11830_v43 = vld [vmem:[%s19098_s2] ss:$72 sps:$4 sm:$0xff]  }
  0xd3   :  { %v12873_v50 = vpop.eup %12872  ;;  %v2473_v55 = vpop.permute.xlu1 %2472  ;;  %12892 = vrcp.f32 %v1305_v44 }
  0xd4   :  { %v12875_v58 = vpop.eup %12874  ;;  %2792 = vperm.xlu1 %11829, %v12871_v48   ;;  %12894 = vpow2.f32 %v10490_v30  ;;  %v4066_v6 = vpack.c.bf16 %v3792_v52, %v3791_v53  ;;  %v3794_v7 = vmul.f32 %v2473_v55, %v2066_v54  ;;  %v10502_v30 = vmul.f32 -1.442695, %v168_v15  ;;  %v11833_v48 = vld [vmem:[%s19098_s2 + $0x94] ss:$72 sps:$4 sm:$0xff]   ;;  %v2074_v55 = vld [vmem:[%s19099_s1 + $0x128] sm:$0xff] }
  0xd5   :  { %v12877_v62 = vpop.eup %12876  ;;  %v2468_v1 = vpop.permute.xlu0 %2467  ;;  %6814 = vmatpush1.bf16.msra.mxu1 %v4065_v51  ;;  %12896 = vpow2.f32 %v10489_v40  ;;  %v10501_v15 = vmul.f32 -1.442695, %v167_v61 }
  0xd6   :  { %v12879_v2 = vpop.eup %12878  ;;  %2787 = vperm.xlu0 %11828, %v12873_v50   ;;  %6815 = vmatprep.subr.bf16.mxu1 %v19103_v0  ;;  %12898 = vpow2.f32 %v10492_v41  ;;  %v3793_v8 = vmul.f32 %v2468_v1, %v2065_v56 }
  0xd7   :  { %v12881_v5 = vpop.eup %12880  ;;  %v2483_v9 = vpop.permute.xlu1 %2482  ;;  %12900 = vpow2.f32 %v10491_v45 }
  0xd8   :  { %v12883_v12 = vpop.eup %12882  ;;  %2802 = vperm.xlu1 %11829, %v12875_v58   ;;  %12902 = vpow2.f32 %v10494_v46  ;;  %v4067_v23 = vpack.c.bf16 %v3794_v7, %v3793_v8  ;;  %v3796_v24 = vmul.f32 %v2483_v9, %v2068_v3  ;;  %v169_v3 = vld [vmem:[%s19097_s0 + $0x4a0] sm:$0xff]  ;;  %v2076_v7 = vld [vmem:[%s19099_s1 + $0x138] sm:$0xff] }
  0xd9   :  { %v12885_v16 = vpop.eup %12884  ;;  %v2478_v17 = vpop.permute.xlu0 %2477  ;;  %6816 = vmatpush1.bf16.msra.mxu1 %v4066_v6  ;;  %12904 = vpow2.f32 %v10493_v59  ;;  %v11835_v8 = vld [vmem:[%s19098_s2 + $0x90] ss:$72 sps:$4 sm:$0xff]  }
  0xda   :  { %v12887_v19 = vpop.eup %12886  ;;  %2797 = vperm.xlu0 %11828, %v12877_v62   ;;  %6817 = vmatprep.subr.bf16.mxu1 %v19103_v0  ;;  %12906 = vpow2.f32 %v10496_v63  ;;  %v3795_v25 = vmul.f32 %v2478_v17, %v2067_v13  ;;  %v2075_v13 = vld [vmem:[%s19099_s1 + $0x130] sm:$0xff] }
  0xdb   :  { %v14246_v22 = vpop.eup %12888  ;;  %v2493_v27 = vpop.permute.xlu1 %2492  ;;  %12908 = vpow2.f32 %v10495_v4 }
  0xdc   :  { %v14254_v29 = vpop.eup %12890  ;;  %2812 = vperm.xlu1 %11829, %v12879_v2   ;;  %12910 = vpow2.f32 %v10498_v14  ;;  %v3798_v34 = vmul.f32 %v2493_v27, %v2070_v26  ;;  %v4068_v37 = vpack.c.bf16 %v3796_v24, %v3795_v25  ;;  %v170_v2 = vld [vmem:[%s19097_s0 + $0x4a8] sm:$0xff]  ;;  %v171_v25 = vld [vmem:[%s19097_s0 + $0x4b0] sm:$0xff] }
  0xdd   :  { %v14256_v31 = vpop.eup %12892  ;;  %v2488_v32 = vpop.permute.xlu0 %2487  ;;  %6818 = vmatpush1.bf16.msra.mxu1 %v4067_v23  ;;  %12912 = vpow2.f32 %v10497_v18  ;;  %v11836_v23 = vld [vmem:[%s19098_s2 + $0x124] ss:$72 sps:$4 sm:$0xff]  }
  0xde   :  { %v12895_v33 = vpop.eup %12894  ;;  %v3797_v35 = vmul.f32 %v2488_v32, %v2069_v28  ;;  %2807 = vperm.xlu0 %11828, %v12881_v5   ;;  %6819 = vmatprep.subr.bf16.mxu1 %v19103_v0  ;;  %12914 = vpow2.f32 %v10500_v20  ;;  %v10503_v20 = vmul.f32 -1.442695, %v169_v3  ;;  %v180_v3 = vld [vmem:[%s19097_s0 + $0x4f8] sm:$0xff] }
  0xdf   :  { %v12897_v36 = vpop.eup %12896  ;;  %v2503_v39 = vpop.permute.xlu1 %2502  ;;  %v1308_v40 = vadd.f32 1.0, %v12895_v33  ;;  %12916 = vpow2.f32 %v10499_v21 }
  0xe0   :  { %v12899_v41 = vpop.eup %12898  ;;  %2972 = vperm.xlu1 %11829, %v12883_v12   ;;  %v1307_v44 = vadd.f32 1.0, %v12897_v36  ;;  %12918 = vpow2.f32 %v10502_v30  ;;  %v4069_v50 = vpack.c.bf16 %v3798_v34, %v3797_v35  ;;  %v3800_v53 = vmul.f32 %v2503_v39, %v2072_v38  ;;  %v174_v30 = vld [vmem:[%s19097_s0 + $0x4c8] sm:$0xff]  ;;  %v173_v38 = vld [vmem:[%s19097_s0 + $0x4c0] sm:$0xff] }
  0xe1   :  { %v12901_v45 = vpop.eup %12900  ;;  %v2498_v47 = vpop.permute.xlu0 %2497  ;;  %6820 = vmatpush1.bf16.msra.mxu1 %v4068_v37  ;;  %12920 = vrcp.f32 %v1308_v40  ;;  %v1310_v46 = vadd.f32 1.0, %v12899_v41  ;;  %v2078_v35 = vld [vmem:[%s19099_s1 + $0x148] sm:$0xff]  ;;  %v10505_v40 = vmul.f32 -1.442695, %v171_v25  ;;  %v176_v41 = vld [vmem:[%s19097_s0 + $0x4d8] sm:$0xff]  ;;  %v2083_v25 = vld [vmem:[%s19099_s1 + $0x170] sm:$0xff] }
  0xe2   :  { %v12903_v49 = vpop.eup %12902  ;;  %2967 = vperm.xlu0 %11828, %v12885_v16   ;;  %7014 = vmatprep.subr.bf16.mxu1 %v19103_v0  ;;  %12922 = vrcp.f32 %v1307_v44  ;;  %v1309_v51 = vadd.f32 1.0, %v12901_v45  ;;  %v3799_v54 = vmul.f32 %v2498_v47, %v2071_v42  ;;  %v172_v16 = vld [vmem:[%s19097_s0 + $0x4b8] sm:$0xff]  ;;  %v175_v42 = vld [vmem:[%s19097_s0 + $0x4d0] sm:$0xff]  ;;  %v10508_v45 = vmul.f32 -1.442695, %v174_v30 }
  0xe3   :  { %v12905_v52 = vpop.eup %12904  ;;  %v2513_v56 = vpop.permute.xlu1 %2512  ;;  %12924 = vrcp.f32 %v1310_v46  ;;  %v1312_v58 = vadd.f32 1.0, %v12903_v49  ;;  %v2079_v46 = vld [vmem:[%s19099_s1 + $0x150] sm:$0xff]  ;;  %v10507_v49 = vmul.f32 -1.442695, %v173_v38  ;;  %v2086_v38 = vld [vmem:[%s19099_s1 + $0x188] sm:$0xff] }
  0xe4   :  { %v12907_v59 = vpop.eup %12906  ;;  %6822 = vmatmul.mubr.bf16.vlgmr.msra.gmra.mrb[0].mxu1 %v11830_v43  ;;  %2982 = vperm.xlu1 %11829, %v12887_v19   ;;  %12926 = vrcp.f32 %v1309_v51  ;;  %v1311_v60 = vadd.f32 1.0, %v12905_v52  ;;  %v3802_v5 = vmul.f32 %v2513_v56, %v2074_v55  ;;  %v4070_v11 = vpack.c.bf16 %v3800_v53, %v3799_v54  ;;  %v11838_v55 = vld [vmem:[%s19098_s2 + $0x120] ss:$72 sps:$4 sm:$0xff]  }
  0xe5   :  { %v12909_v62 = vpop.eup %12908  ;;  %v2508_v1 = vpop.permute.xlu0 %2507  ;;  %7015 = vmatpush1.bf16.msra.mxu1 %v4069_v50  ;;  %6829 = vmatprep.mubr.bf16.mxu1 %v11833_v48  ;;  %12928 = vrcp.f32 %v1312_v58  ;;  %v1314_v63 = vadd.f32 1.0, %v12907_v59  ;;  %v10504_v19 = vmul.f32 -1.442695, %v170_v2  ;;  %v2080_v48 = vld [vmem:[%s19099_s1 + $0x158] sm:$0xff]  ;;  %v178_v56 = vld [vmem:[%s19097_s0 + $0x4e8] sm:$0xff] }
  0xe6   :  { %v12911_v4 = vpop.eup %12910  ;;  %v3801_v6 = vmul.f32 %v2508_v1, %v2073_v57  ;;  %2977 = vperm.xlu0 %11828, %v14246_v22   ;;  %7016 = vmatprep.subr.bf16.mxu1 %v19103_v0  ;;  %12930 = vrcp.f32 %v1311_v60  ;;  %v1313_v9 = vadd.f32 1.0, %v12909_v62  ;;  %v11839_v58 = vld [vmem:[%s19098_s2 + $0x1b4] ss:$72 sps:$4 sm:$0xff]   ;;  %v10510_v59 = vmul.f32 -1.442695, %v176_v41  ;;  %v177_v60 = vld [vmem:[%s19097_s0 + $0x4e0] sm:$0xff] }
  0xe7   :  { %v12913_v10 = vpop.eup %12912  ;;  %v2523_v12 = vpop.permute.xlu1 %2522  ;;  %12932 = vrcp.f32 %v1314_v63  ;;  %v1316_v14 = vadd.f32 1.0, %v12911_v4  ;;  %v10509_v1 = vmul.f32 -1.442695, %v175_v42  ;;  %v10512_v2 = vmul.f32 -1.442695, %v178_v56 }
  0xe8   :  { %v12915_v17 = vpop.eup %12914  ;;  %2992 = vperm.xlu1 %11829, %v14254_v29   ;;  %12934 = vrcp.f32 %v1313_v9  ;;  %v1315_v18 = vadd.f32 1.0, %v12913_v10  ;;  %v4071_v27 = vpack.c.bf16 %v3802_v5, %v3801_v6  ;;  %v10506_v29 = vmul.f32 -1.442695, %v172_v16  ;;  %v2081_v10 = vld [vmem:[%s19099_s1 + $0x160] sm:$0xff] }
  0xe9   :  { %v12917_v21 = vpop.eup %12916  ;;  %v2518_v22 = vpop.permute.xlu0 %2517  ;;  %7017 = vmatpush1.bf16.msra.mxu1 %v4070_v11  ;;  %12936 = vrcp.f32 %v1316_v14  ;;  %v1318_v24 = vadd.f32 1.0, %v12915_v17  ;;  %v3804_v33 = vmul.f32 %v2523_v12, %v2076_v7  ;;  %v179_v11 = vld [vmem:[%s19097_s0 + $0x4f0] sm:$0xff]  ;;  %v10514_v16 = vmul.f32 -1.442695, %v180_v3  ;;  %v184_v3 = vld [vmem:[%s19097_s0 + $0x518] sm:$0xff] }
  0xea   :  { %v12919_v26 = vpop.eup %12918  ;;  %2987 = vperm.xlu0 %11828, %v14256_v31   ;;  %7018 = vmatprep.subr.bf16.mxu1 %v19103_v0  ;;  %12938 = vrcp.f32 %v1315_v18  ;;  %v1317_v28 = vadd.f32 1.0, %v12917_v21  ;;  %v3803_v34 = vmul.f32 %v2518_v22, %v2075_v13  ;;  %v2077_v31 = vld [vmem:[%s19099_s1 + $0x140] sm:$0xff]  ;;  %v10511_v13 = vmul.f32 -1.442695, %v177_v60 }
  0xeb   :  { %v12921_v32 = vpop.eup %12920  ;;  %v2533_v36 = vpop.permute.xlu1 %2532  ;;  %12940 = vrcp.f32 %v1318_v24  ;;  %v1320_v37 = vadd.f32 1.0, %v12919_v26 }
  0xec   :  { %v12923_v39 = vpop.eup %12922  ;;  %6830 = vmatmul.mubr.bf16.gmra.mrb[4].mxu1 %v11835_v8  ;;  %3002 = vperm.xlu1 %11829, %v12921_v32   ;;  %12942 = vrcp.f32 %v1317_v28  ;;  %v4072_v51 = vpack.c.bf16 %v3804_v33, %v3803_v34  ;;  %v3806_v52 = vmul.f32 %v2533_v36, %v2078_v35  ;;  %v2082_v8 = vld [vmem:[%s19099_s1 + $0x168] sm:$0xff] }
  0xed   :  { %v12925_v43 = vpop.eup %12924  ;;  %v2528_v44 = vpop.permute.xlu0 %2527  ;;  %7019 = vmatpush1.bf16.msra.mxu1 %v4071_v27  ;;  %6837 = vmatprep.mubr.bf16.mxu1 %v11836_v23  ;;  %12944 = vrcp.f32 %v1320_v37  ;;  %v2084_v23 = vld [vmem:[%s19099_s1 + $0x178] sm:$0xff]  ;;  %v11842_v28 = vld [vmem:[%s19098_s2 + $0x244] ss:$72 sps:$4 sm:$0xff]  }
  0xee   :  { %v12927_v47 = vpop.eup %12926  ;;  %2997 = vperm.xlu0 %11828, %v12923_v39   ;;  %7020 = vmatprep.subr.bf16.mxu1 %v19103_v0  ;;  %12946 = vpow2.f32 %v10501_v15  ;;  %v3805_v53 = vmul.f32 %v2528_v44, %v2077_v31  ;;  %v11841_v27 = vld [vmem:[%s19098_s2 + $0x1b0] ss:$72 sps:$4 sm:$0xff]  }
  0xef   :  { %v12929_v50 = vpop.eup %12928  ;;  %v2543_v54 = vpop.permute.xlu1 %2542  ;;  %12948 = vpow2.f32 %v10504_v19 }
  0xf0   :  { %v12931_v57 = vpop.eup %12930  ;;  %3012 = vperm.xlu1 %11829, %v12925_v43   ;;  %12950 = vpow2.f32 %v10503_v20  ;;  %v4073_v5 = vpack.c.bf16 %v3806_v52, %v3805_v53  ;;  %v3808_v6 = vmul.f32 %v2543_v54, %v2080_v48  ;;  %v10513_v20 = vmul.f32 -1.442695, %v179_v11 }
  0xf1   :  { %v12933_v61 = vpop.eup %12932  ;;  %v2538_v62 = vpop.permute.xlu0 %2537  ;;  %7021 = vmatpush1.bf16.msra.mxu1 %v4072_v51  ;;  %12952 = vpow2.f32 %v10506_v29 }
  0xf2   :  { %v12935_v63 = vpop.eup %12934  ;;  %3007 = vperm.xlu0 %11828, %v12927_v47   ;;  %7022 = vmatprep.subr.bf16.mxu1 %v19103_v0  ;;  %12954 = vpow2.f32 %v10505_v40  ;;  %v3807_v7 = vmul.f32 %v2538_v62, %v2079_v46  ;;  %v2085_v40 = vld [vmem:[%s19099_s1 + $0x180] sm:$0xff] }
  0xf3   :  { %v12937_v4 = vpop.eup %12936  ;;  %v2553_v9 = vpop.permute.xlu1 %2552  ;;  %12956 = vpow2.f32 %v10508_v45 }
  0xf4   :  { %v12939_v12 = vpop.eup %12938  ;;  %6838 = vmatmul.mubr.bf16.gmra.mrb[8].mxu1 %v11838_v55  ;;  %3022 = vperm.xlu1 %11829, %v12929_v50   ;;  %12958 = vpow2.f32 %v10507_v49  ;;  %v3810_v18 = vmul.f32 %v2553_v9, %v2082_v8  ;;  %v4074_v22 = vpack.c.bf16 %v3808_v6, %v3807_v7  ;;  %v2088_v50 = vld [vmem:[%s19099_s1 + $0x198] sm:$0xff]  ;;  %v2087_v55 = vld [vmem:[%s19099_s1 + $0x190] sm:$0xff] }
  0xf5   :  { %v14360_v14 = vpop.eup %12940  ;;  %v2548_v15 = vpop.permute.xlu0 %2547  ;;  %7023 = vmatpush1.bf16.msra.mxu1 %v4073_v5  ;;  %6845 = vmatprep.mubr.bf16.mxu1 %v11839_v58  ;;  %12960 = vpow2.f32 %v10510_v59  ;;  %v11844_v59 = vld [vmem:[%s19098_s2 + $0x240] ss:$72 sps:$4 sm:$0xff]   ;;  %v183_v8 = vld [vmem:[%s19097_s0 + $0x510] sm:$0xff] }
  0xf6   :  { %v14362_v17 = vpop.eup %12942  ;;  %v3809_v19 = vmul.f32 %v2548_v15, %v2081_v10  ;;  %3017 = vperm.xlu0 %11828, %v12931_v57   ;;  %7024 = vmatprep.subr.bf16.mxu1 %v19103_v0  ;;  %12962 = vpow2.f32 %v10509_v1  ;;  %v182_v57 = vld [vmem:[%s19097_s0 + $0x508] sm:$0xff] }
  0xf7   :  { %v14365_v21 = vpop.eup %12944  ;;  %v2563_v24 = vpop.permute.xlu1 %2562  ;;  %12964 = vpow2.f32 %v10512_v2  ;;  %v10516_v7 = vmul.f32 -1.442695, %v182_v57 }
  0xf8   :  { %v12947_v26 = vpop.eup %12946  ;;  %3032 = vperm.xlu1 %11829, %v12933_v61   ;;  %12966 = vpow2.f32 %v10511_v13  ;;  %v4075_v34 = vpack.c.bf16 %v3810_v18, %v3809_v19  ;;  %v3812_v31 = vmul.f32 %v2563_v24, %v2084_v23  ;;  %v181_v61 = vld [vmem:[%s19097_s0 + $0x500] sm:$0xff] }
  0xf9   :  { %v12949_v29 = vpop.eup %12948  ;;  %v2558_v30 = vpop.permute.xlu0 %2557  ;;  %7025 = vmatpush1.bf16.msra.mxu1 %v4074_v22  ;;  %v1319_v32 = vadd.f32 1.0, %v12947_v26  ;;  %12968 = vpow2.f32 %v10514_v16  ;;  %v186_v16 = vld [vmem:[%s19097_s0 + $0x528] sm:$0xff]  ;;  %v10515_v19 = vmul.f32 -1.442695, %v181_v61  ;;  %v185_v26 = vld [vmem:[%s19097_s0 + $0x520] sm:$0xff] }
  0xfa   :  { %v12951_v33 = vpop.eup %12950  ;;  %3027 = vperm.xlu0 %11828, %v12935_v63   ;;  %7026 = vmatprep.subr.bf16.mxu1 %v19103_v0  ;;  %v1322_v35 = vadd.f32 1.0, %v12949_v29  ;;  %12970 = vpow2.f32 %v10513_v20  ;;  %v3811_v37 = vmul.f32 %v2558_v30, %v2083_v25  ;;  %v11845_v63 = vld [vmem:[%s19098_s2 + $0x2d4] ss:$72 sps:$4 sm:$0xff]   ;;  %v10518_v20 = vmul.f32 -1.442695, %v184_v3 }
  0xfb   :  { %v12953_v36 = vpop.eup %12952  ;;  %v2573_v39 = vpop.permute.xlu1 %2572  ;;  %12972 = vrcp.f32 %v1319_v32  ;;  %v1321_v41 = vadd.f32 1.0, %v12951_v33  ;;  %v10517_v25 = vmul.f32 -1.442695, %v183_v8  ;;  %v2091_v29 = vld [vmem:[%s19099_s1 + $0x1b0] sm:$0xff]  ;;  %v10520_v30 = vmul.f32 -1.442695, %v186_v16 }
  0xfc   :  { %v12955_v42 = vpop.eup %12954  ;;  %6846 = vmatmul.mubr.bf16.gmra.mrb[12].mxu1 %v11841_v27  ;;  %3042 = vperm.xlu1 %11829, %v12937_v4   ;;  %12974 = vrcp.f32 %v1322_v35  ;;  %v1324_v43 = vadd.f32 1.0, %v12953_v36  ;;  %v3814_v46 = vmul.f32 %v2573_v39, %v2086_v38  ;;  %v4076_v53 = vpack.c.bf16 %v3812_v31, %v3811_v37  ;;  %v188_v27 = vld [vmem:[%s19097_s0 + $0x538] sm:$0xff]  ;;  %v187_v37 = vld [vmem:[%s19097_s0 + $0x530] sm:$0xff]  ;;  %v11848_v39 = vld [vmem:[%s19098_s2 + $0x364] ss:$72 sps:$4 sm:$0xff]  }
  0xfd   :  { %v12957_v44 = vpop.eup %12956  ;;  %v2568_v45 = vpop.permute.xlu0 %2567  ;;  %7027 = vmatpush1.bf16.msra.mxu1 %v4075_v34  ;;  %6853 = vmatprep.mubr.bf16.mxu1 %v11842_v28  ;;  %12976 = vrcp.f32 %v1321_v41  ;;  %v1323_v47 = vadd.f32 1.0, %v12955_v42  ;;  %v2092_v28 = vld [vmem:[%s19099_s1 + $0x1b8] sm:$0xff]  ;;  %v190_v41 = vld [vmem:[%s19097_s0 + $0x548] sm:$0xff] }
  0xfe   :  { %v12959_v48 = vpop.eup %12958  ;;  %v3813_v49 = vmul.f32 %v2568_v45, %v2085_v40  ;;  %3037 = vperm.xlu0 %11828, %v12939_v12   ;;  %7028 = vmatprep.subr.bf16.mxu1 %v19103_v0  ;;  %12978 = vrcp.f32 %v1324_v43  ;;  %v1326_v51 = vadd.f32 1.0, %v12957_v44  ;;  %v2090_v12 = vld [vmem:[%s19099_s1 + $0x1a8] sm:$0xff]  ;;  %v11847_v31 = vld [vmem:[%s19098_s2 + $0x2d0] ss:$72 sps:$4 sm:$0xff]   ;;  %v10519_v40 = vmul.f32 -1.442695, %v185_v26 }
  0xff   :  { %v12961_v52 = vpop.eup %12960  ;;  %v2583_v54 = vpop.permute.xlu1 %2582  ;;  %12980 = vrcp.f32 %v1323_v47  ;;  %v1325_v56 = vadd.f32 1.0, %v12959_v48  ;;  %v10522_v44 = vmul.f32 -1.442695, %v188_v27  ;;  %v10521_v47 = vmul.f32 -1.442695, %v187_v37  ;;  %v189_v48 = vld [vmem:[%s19097_s0 + $0x540] sm:$0xff] }
 0x100   :  { %v12963_v58 = vpop.eup %12962  ;;  %3052 = vperm.xlu1 %11829, %v14360_v14   ;;  %12982 = vrcp.f32 %v1326_v51  ;;  %v1328_v60 = vadd.f32 1.0, %v12961_v52  ;;  %v4077_v5 = vpack.c.bf16 %v3814_v46, %v3813_v49  ;;  %v3816_v10 = vmul.f32 %v2583_v54, %v2088_v50  ;;  %v2089_v14 = vld [vmem:[%s19099_s1 + $0x1a0] sm:$0xff]  ;;  %v2094_v52 = vld [vmem:[%s19099_s1 + $0x1c8] sm:$0xff] }
 0x101   :  { %v12965_v62 = vpop.eup %12964  ;;  %v2578_v1 = vpop.permute.xlu0 %2577  ;;  %7029 = vmatpush1.bf16.msra.mxu1 %v4076_v53  ;;  %12984 = vrcp.f32 %v1325_v56  ;;  %v1327_v2 = vadd.f32 1.0, %v12963_v58  ;;  %v2093_v54 = vld [vmem:[%s19099_s1 + $0x1c0] sm:$0xff]  ;;  %v10524_v57 = vmul.f32 -1.442695, %v190_v41  ;;  %v191_v58 = vld [vmem:[%s19097_s0 + $0x550] sm:$0xff] }
 0x102   :  { %v12967_v4 = vpop.eup %12966  ;;  %3047 = vperm.xlu0 %11828, %v14362_v17   ;;  %7030 = vmatprep.subr.bf16.mxu1 %v19103_v0  ;;  %12986 = vrcp.f32 %v1328_v60  ;;  %v1330_v6 = vadd.f32 1.0, %v12965_v62  ;;  %v3815_v11 = vmul.f32 %v2578_v1, %v2087_v55  ;;  %v192_v55 = vld [vmem:[%s19097_s0 + $0x558] sm:$0xff]  ;;  %v10523_v62 = vmul.f32 -1.442695, %v189_v48  ;;  %v11850_v8 = vld [vmem:[%s19098_s2 + $0x360] ss:$72 sps:$4 sm:$0xff]  }
 0x103   :  { %v12969_v9 = vpop.eup %12968  ;;  %v2593_v13 = vpop.permute.xlu1 %2592  ;;  %12988 = vrcp.f32 %v1327_v2  ;;  %v1329_v15 = vadd.f32 1.0, %v12967_v4  ;;  %v10526_v3 = vmul.f32 -1.442695, %v192_v55  ;;  %v11853_v41 = vld [vmem:[%s19098_s2 + $0x3f0] ss:$72 sps:$4 sm:$0xff]  }
 0x104   :  { %v12971_v17 = vpop.eup %12970  ;;  %6854 = vmatmul.mubr.bf16.gmra.mrb[16].mxu1 %v11844_v59  ;;  %3062 = vperm.xlu1 %11829, %v14365_v21   ;;  %12990 = vrcp.f32 %v1330_v6  ;;  %v1332_v18 = vadd.f32 1.0, %v12969_v9  ;;  %v4078_v33 = vpack.c.bf16 %v3816_v10, %v3815_v11  ;;  %v3818_v34 = vmul.f32 %v2593_v13, %v2090_v12  ;;  %v194_v59 = vld [vmem:[%s19097_s0 + $0x568] sm:$0xff]  ;;  %v2096_v6 = vld [vmem:[%s19099_s1 + $0x1d8] sm:$0xff]  ;;  %v2095_v11 = vld [vmem:[%s19099_s1 + $0x1d0] sm:$0xff] }
 0x105   :  { %v12973_v22 = vpop.eup %12972  ;;  %v2588_v23 = vpop.permute.xlu0 %2587  ;;  %7031 = vmatpush1.bf16.msra.mxu1 %v4077_v5  ;;  %6861 = vmatprep.mubr.bf16.mxu1 %v11845_v63  ;;  %12992 = vrcp.f32 %v1329_v15  ;;  %v1331_v24 = vadd.f32 1.0, %v12971_v17  ;;  %v10525_v9 = vmul.f32 -1.442695, %v191_v58  ;;  %v11851_v12 = vld [vmem:[%s19098_s2 + $0x3f4] ss:$72 sps:$4 sm:$0xff]  }
 0x106   :  { %v12975_v21 = vpop.eup %12974  ;;  %3057 = vperm.xlu0 %11828, %v12973_v22   ;;  %7032 = vmatprep.subr.bf16.mxu1 %v19103_v0  ;;  %12994 = vrcp.f32 %v1332_v18  ;;  %v3817_v35 = vmul.f32 %v2588_v23, %v2089_v14  ;;  %v10528_v13 = vmul.f32 -1.442695, %v194_v59  ;;  %v2098_v22 = vld [vmem:[%s19099_s1 + $0x1e8] sm:$0xff] }
 0x107   :  { %v12977_v32 = vpop.eup %12976  ;;  %v2603_v36 = vpop.permute.xlu1 %2602  ;;  %12996 = vrcp.f32 %v1331_v24  ;;  %v2097_v24 = vld [vmem:[%s19099_s1 + $0x1e0] sm:$0xff] }
 0x108   :  { %v12979_v38 = vpop.eup %12978  ;;  %3072 = vperm.xlu1 %11829, %v12975_v21   ;;  %12998 = vpow2.f32 %v10516_v7  ;;  %v4079_v49 = vpack.c.bf16 %v3818_v34, %v3817_v35  ;;  %v3820_v50 = vmul.f32 %v2603_v36, %v2092_v28 }
 0x109   :  { %v12981_v42 = vpop.eup %12980  ;;  %v2598_v43 = vpop.permute.xlu0 %2597  ;;  %7033 = vmatpush1.bf16.msra.mxu1 %v4078_v33  ;;  %13000 = vpow2.f32 %v10515_v19 }
 0x10a   :  { %v12983_v45 = vpop.eup %12982  ;;  %3067 = vperm.xlu0 %11828, %v12977_v32   ;;  %7034 = vmatprep.subr.bf16.mxu1 %v19103_v0  ;;  %13002 = vpow2.f32 %v10518_v20  ;;  %v3819_v51 = vmul.f32 %v2598_v43, %v2091_v29 }
 0x10b   :  { %v12985_v46 = vpop.eup %12984  ;;  %v2613_v53 = vpop.permute.xlu1 %2612  ;;  %13004 = vpow2.f32 %v10517_v25 }
 0x10c   :  { %v12987_v56 = vpop.eup %12986  ;;  %6862 = vmatmul.mubr.bf16.gmra.mrb[20].mxu1 %v11847_v31  ;;  %3082 = vperm.xlu1 %11829, %v12979_v38   ;;  %13006 = vpow2.f32 %v10520_v30  ;;  %v3822_v63 = vmul.f32 %v2613_v53, %v2094_v52  ;;  %v4080_v5 = vpack.c.bf16 %v3820_v50, %v3819_v51  ;;  %v2100_v31 = vld [vmem:[%s19099_s1 + $0x1f8] sm:$0xff]  ;;  %v193_v50 = vld [vmem:[%s19097_s0 + $0x560] sm:$0xff] }
 0x10d   :  { %v12989_v60 = vpop.eup %12988  ;;  %v2608_v61 = vpop.permute.xlu0 %2607  ;;  %7035 = vmatpush1.bf16.msra.mxu1 %v4079_v49  ;;  %6869 = vmatprep.mubr.bf16.mxu1 %v11848_v39  ;;  %13008 = vpow2.f32 %v10519_v40  ;;  %v2099_v40 = vld [vmem:[%s19099_s1 + $0x1f0] sm:$0xff] }
 0x10e   :  { %v12991_v1 = vpop.eup %12990  ;;  %v3821_v2 = vmul.f32 %v2608_v61, %v2093_v54  ;;  %3077 = vperm.xlu0 %11828, %v12981_v42   ;;  %7036 = vmatprep.subr.bf16.mxu1 %v19103_v0  ;;  %13010 = vpow2.f32 %v10522_v44 }
 0x10f   :  { %v14469_v4 = vpop.eup %12992  ;;  %v2623_v7 = vpop.permute.xlu1 %2622  ;;  %13012 = vpow2.f32 %v10521_v47 }
 0x110   :  { %v14477_v10 = vpop.eup %12994  ;;  %3092 = vperm.xlu1 %11829, %v12983_v45   ;;  %13014 = vpow2.f32 %v10524_v57  ;;  %v4081_v17 = vpack.c.bf16 %v3822_v63, %v3821_v2  ;;  %v3824_v19 = vmul.f32 %v2623_v7, %v2096_v6  ;;  %v11854_v45 = vld [vmem:[%s19098_s2 + $0x484] ss:$72 sps:$4 sm:$0xff]  }
 0x111   :  { %v14485_v14 = vpop.eup %12996  ;;  %v2618_v15 = vpop.permute.xlu0 %2617  ;;  %7037 = vmatpush1.bf16.msra.mxu1 %v4080_v5  ;;  %13016 = vpow2.f32 %v10523_v62  ;;  %v10527_v62 = vmul.f32 -1.442695, %v193_v50  ;;  %v198_v63 = vld [vmem:[%s19097_s0 + $0x588] sm:$0xff] }
 0x112   :  { %v12999_v16 = vpop.eup %12998  ;;  %3087 = vperm.xlu0 %11828, %v12985_v46   ;;  %7038 = vmatprep.subr.bf16.mxu1 %v19103_v0  ;;  %13018 = vpow2.f32 %v10526_v3  ;;  %v3823_v20 = vmul.f32 %v2618_v15, %v2095_v11  ;;  %v11856_v3 = vld [vmem:[%s19098_s2 + $0x480] ss:$72 sps:$4 sm:$0xff]   ;;  %v199_v15 = vld [vmem:[%s19097_s0 + $0x590] sm:$0xff] }
 0x113   :  { %v13001_v18 = vpop.eup %13000  ;;  %v2633_v23 = vpop.permute.xlu1 %2632  ;;  %v1334_v25 = vadd.f32 1.0, %v12999_v16  ;;  %13020 = vpow2.f32 %v10525_v9  ;;  %v11857_v9 = vld [vmem:[%s19098_s2 + $0x514] ss:$72 sps:$4 sm:$0xff]   ;;  %v197_v11 = vld [vmem:[%s19097_s0 + $0x580] sm:$0xff] }
 0x114   :  { %v13003_v26 = vpop.eup %13002  ;;  %6870 = vmatmul.mubr.bf16.gmra.mrb[24].mxu1 %v11850_v8  ;;  %3102 = vperm.xlu1 %11829, %v12987_v56   ;;  %v1333_v27 = vadd.f32 1.0, %v13001_v18  ;;  %13022 = vpow2.f32 %v10528_v13  ;;  %v3826_v32 = vmul.f32 %v2633_v23, %v2098_v22  ;;  %v4082_v36 = vpack.c.bf16 %v3824_v19, %v3823_v20  ;;  %v196_v56 = vld [vmem:[%s19097_s0 + $0x578] sm:$0xff]  ;;  %v202_v22 = vld [vmem:[%s19097_s0 + $0x5a8] sm:$0xff] }
 0x115   :  { %v13005_v21 = vpop.eup %13004  ;;  %v2628_v28 = vpop.permute.xlu0 %2627  ;;  %7039 = vmatpush1.bf16.msra.mxu1 %v4081_v17  ;;  %6877 = vmatprep.mubr.bf16.mxu1 %v11851_v12  ;;  %13024 = vrcp.f32 %v1334_v25  ;;  %v1336_v29 = vadd.f32 1.0, %v13003_v26  ;;  %v10530_v5 = vmul.f32 -1.442695, %v196_v56  ;;  %v10532_v18 = vmul.f32 -1.442695, %v198_v63 }
 0x116   :  { %v13007_v30 = vpop.eup %13006  ;;  %v3825_v33 = vmul.f32 %v2628_v28, %v2097_v24  ;;  %3097 = vperm.xlu0 %11828, %v12989_v60   ;;  %7040 = vmatprep.subr.bf16.mxu1 %v19103_v0  ;;  %13026 = vrcp.f32 %v1333_v27  ;;  %v1335_v34 = vadd.f32 1.0, %v13005_v21  ;;  %v10531_v20 = vmul.f32 -1.442695, %v197_v11  ;;  %v11907_v23 = vld [vmem:[%s19098_s2 + $0x24] ss:$72 sps:$4 sm:$0xff]  }
 0x117   :  { %v13009_v35 = vpop.eup %13008  ;;  %v2643_v37 = vpop.permute.xlu1 %2642  ;;  %13028 = vrcp.f32 %v1336_v29  ;;  %v1338_v38 = vadd.f32 1.0, %v13007_v30  ;;  %v201_v27 = vld [vmem:[%s19097_s0 + $0x5a0] sm:$0xff]  ;;  %v10533_v28 = vmul.f32 -1.442695, %v199_v15  ;;  %v204_v29 = vld [vmem:[%s19097_s0 + $0x5b8] sm:$0xff]  ;;  %v203_v30 = vld [vmem:[%s19097_s0 + $0x5b0] sm:$0xff]  ;;  %7721 = vmatprep.mubr.bf16.mxu0 %v11907_v23 }
 0x118   :  { %v13011_v39 = vpop.eup %13010  ;;  %3112 = vperm.xlu1 %11829, %v12991_v1   ;;  %13030 = vrcp.f32 %v1335_v34  ;;  %v1337_v42 = vadd.f32 1.0, %v13009_v35  ;;  %v4083_v46 = vpack.c.bf16 %v3826_v32, %v3825_v33  ;;  %v3828_v52 = vmul.f32 %v2643_v37, %v2100_v31  ;;  %v195_v1 = vld [vmem:[%s19097_s0 + $0x570] sm:$0xff]  ;;  %v206_v35 = vld [vmem:[%s19097_s0 + $0x5c8] sm:$0xff] }
 0x119   :  { %v13013_v43 = vpop.eup %13012  ;;  %v2638_v44 = vpop.permute.xlu0 %2637  ;;  %7041 = vmatpush1.bf16.msra.mxu1 %v4082_v36  ;;  %13032 = vrcp.f32 %v1338_v38  ;;  %v1340_v47 = vadd.f32 1.0, %v13011_v39  ;;  %v10529_v13 = vmul.f32 -1.442695, %v195_v1  ;;  %v10536_v34 = vmul.f32 -1.442695, %v202_v22 }
 0x11a   :  { %v13015_v48 = vpop.eup %13014  ;;  %3107 = vperm.xlu0 %11828, %v14469_v4   ;;  %7042 = vmatprep.subr.bf16.mxu1 %v19103_v0  ;;  %13034 = vrcp.f32 %v1337_v42  ;;  %v1339_v49 = vadd.f32 1.0, %v13013_v43  ;;  %v3827_v53 = vmul.f32 %v2638_v44, %v2099_v40  ;;  %v10535_v31 = vmul.f32 -1.442695, %v201_v27  ;;  %v205_v40 = vld [vmem:[%s19097_s0 + $0x5c0] sm:$0xff]  ;;  %v11859_v42 = vld [vmem:[%s19098_s2 + $0x510] ss:$72 sps:$4 sm:$0xff]  }
 0x11b   :  { %v13017_v51 = vpop.eup %13016  ;;  %v14512_v54 = vpop.permute.xlu1 %2652  ;;  %13036 = vrcp.f32 %v1340_v47  ;;  %v1342_v55 = vadd.f32 1.0, %v13015_v48  ;;  %v10538_v39 = vmul.f32 -1.442695, %v204_v29  ;;  %v10537_v43 = vmul.f32 -1.442695, %v203_v30 }
 0x11c   :  { %v13019_v57 = vpop.eup %13018  ;;  %6878 = vmatmul.mubr.bf16.gmra.mrb[28].mxu1 %v11853_v41  ;;  %3122 = vperm.xlu1 %11829, %v14477_v10   ;;  %13038 = vrcp.f32 %v1339_v49  ;;  %v1341_v58 = vadd.f32 1.0, %v13017_v51  ;;  %v4084_v7 = vpack.c.bf16 %v3828_v52, %v3827_v53  ;;  %v11860_v47 = vld [vmem:[%s19098_s2 + $0x5a4] ss:$72 sps:$4 sm:$0xff]   ;;  %v10540_v48 = vmul.f32 -1.442695, %v206_v35 }
 0x11d   :  { %v13021_v59 = vpop.eup %13020  ;;  %v14518_v60 = vpop.permute.xlu0 %2647  ;;  %7043 = vmatpush1.bf16.msra.mxu1 %v4083_v46  ;;  %6885 = vmatprep.mubr.bf16.mxu1 %v11854_v45  ;;  %13040 = vrcp.f32 %v1342_v55  ;;  %v1344_v61 = vadd.f32 1.0, %v13019_v57  ;;  %v10539_v49 = vmul.f32 -1.442695, %v205_v40  ;;  %v11862_v63 = vld [vmem:[%s19098_s2 + $0x5a0] ss:$72 sps:$4 sm:$0xff]   ;;  %v212_v40 = vld [vmem:[%s19097_s0 + $0x5f8] sm:$0xff] }
 0x11e   :  { %v13023_v2 = vpop.eup %13022  ;;  %3117 = vperm.xlu0 %11828, %v14485_v14   ;;  %7044 = vmatprep.subr.bf16.mxu1 %v19103_v0  ;;  %13042 = vrcp.f32 %v1341_v58  ;;  %v1343_v4 = vadd.f32 1.0, %v13021_v59  ;;  %v200_v14 = vld [vmem:[%s19097_s0 + $0x598] sm:$0xff] }
 0x11f   :  { %v13025_v6 = vpop.eup %13024  ;;  %v14531_v8 = vpop.permute.xlu1 %2662  ;;  %13044 = vrcp.f32 %v1344_v61  ;;  %v1346_v10 = vadd.f32 1.0, %v13023_v2  ;;  %v10534_v26 = vmul.f32 -1.442695, %v200_v14  ;;  %v11865_v27 = vld [vmem:[%s19098_s2 + $0x630] ss:$72 sps:$4 sm:$0xff]  }
 0x120   :  { %v13027_v12 = vpop.eup %13026  ;;  %3132 = vperm.xlu1 %11829, %v13025_v6   ;;  %13046 = vrcp.f32 %v1343_v4 }
 0x121   :  { %v13029_v16 = vpop.eup %13028  ;;  %v14545_v17 = vpop.permute.xlu0 %2657  ;;  %7045 = vmatpush1.bf16.msra.mxu1 %v4084_v7  ;;  %13048 = vrcp.f32 %v1346_v10 }
 0x122   :  { %v13031_v19 = vpop.eup %13030  ;;  %3127 = vperm.xlu0 %11828, %v13027_v12   ;;  %13050 = vpow2.f32 %v10527_v62  ;;  %7239 = vmatprep.subr.bf16.mxu1 %v19103_v0 }
 0x123   :  { %v13033_v24 = vpop.eup %13032  ;;  %v14554_v25 = vpop.permute.xlu1 %2672  ;;  %13052 = vpow2.f32 %v10530_v5  ;;  %v11863_v5 = vld [vmem:[%s19098_s2 + $0x634] ss:$72 sps:$4 sm:$0xff]  }
 0x124   :  { %v13035_v21 = vpop.eup %13034  ;;  %6886 = vmatmul.mubr.bf16.gmra.mrb[32].mxu1 %v11856_v3  ;;  %3142 = vperm.xlu1 %11829, %v13029_v16   ;;  %13054 = vpow2.f32 %v10529_v13 }
 0x125   :  { %v13037_v32 = vpop.eup %13036  ;;  %v14565_v33 = vpop.permute.xlu0 %2667  ;;  %6893 = vmatprep.mubr.bf16.mxu1 %v11857_v9  ;;  %13056 = vpow2.f32 %v10532_v18 }
 0x126   :  { %v13039_v36 = vpop.eup %13038  ;;  %3137 = vperm.xlu0 %11828, %v13031_v19   ;;  %13058 = vpow2.f32 %v10531_v20  ;;  %v208_v19 = vld [vmem:[%s19097_s0 + $0x5d8] sm:$0xff]  ;;  %v207_v20 = vld [vmem:[%s19097_s0 + $0x5d0] sm:$0xff] }
 0x127   :  { %v13041_v37 = vpop.eup %13040  ;;  %v14570_v38 = vpop.permute.xlu1 %2682  ;;  %13060 = vpow2.f32 %v10534_v26 }
 0x128   :  { %v13043_v41 = vpop.eup %13042  ;;  %3152 = vperm.xlu1 %11829, %v13033_v24   ;;  %13062 = vpow2.f32 %v10533_v28  ;;  %v210_v28 = vld [vmem:[%s19097_s0 + $0x5e8] sm:$0xff] }
 0x129   :  { %v13045_v44 = vpop.eup %13044  ;;  %v14578_v45 = vpop.permute.xlu0 %2677  ;;  %13064 = vpow2.f32 %v10536_v34  ;;  %v209_v34 = vld [vmem:[%s19097_s0 + $0x5e0] sm:$0xff] }
 0x12a   :  { %v13047_v46 = vpop.eup %13046  ;;  %3147 = vperm.xlu0 %11828, %v13035_v21   ;;  %13066 = vpow2.f32 %v10535_v31  ;;  %v11866_v31 = vld [vmem:[%s19098_s2 + $0x6c4] ss:$72 sps:$4 sm:$0xff]  }
 0x12b   :  { %v13049_v50 = vpop.eup %13048  ;;  %v14583_v51 = vpop.permute.xlu1 %2692  ;;  %13068 = vpow2.f32 %v10538_v39  ;;  %v10541_v39 = vmul.f32 -1.442695, %v207_v20 }
 0x12c   :  { %v13051_v52 = vpop.eup %13050  ;;  %6894 = vmatmul.mubr.bf16.gmra.mrb[36].mxu1 %v11859_v42  ;;  %3162 = vperm.xlu1 %11829, %v13037_v32   ;;  %13070 = vpow2.f32 %v10537_v43  ;;  %v10542_v32 = vmul.f32 -1.442695, %v208_v19  ;;  %v10544_v42 = vmul.f32 -1.442695, %v210_v28  ;;  %v211_v43 = vld [vmem:[%s19097_s0 + $0x5f0] sm:$0xff] }
 0x12d   :  { %v13053_v53 = vpop.eup %13052  ;;  %v14585_v55 = vpop.permute.xlu0 %2687  ;;  %6901 = vmatprep.mubr.bf16.mxu1 %v11860_v47  ;;  %v1345_v56 = vadd.f32 1.0, %v13051_v52  ;;  %13072 = vpow2.f32 %v10540_v48  ;;  %v10543_v48 = vmul.f32 -1.442695, %v209_v34  ;;  %v119_v52 = vld [vmem:[%s19097_s0 + $0x310] sm:$0xff] }
 0x12e   :  { %v13055_v57 = vpop.eup %13054  ;;  %3157 = vperm.xlu0 %11828, %v13039_v36   ;;  %v1348_v58 = vadd.f32 1.0, %v13053_v53  ;;  %13074 = vpow2.f32 %v10539_v49  ;;  %v122_v53 = vld [vmem:[%s19097_s0 + $0x328] sm:$0xff] }
 0x12f   :  { %v13057_v59 = vpop.eup %13056  ;;  %v14587_v61 = vpop.permute.xlu1 %2702  ;;  %13076 = vrcp.f32 %v1345_v56  ;;  %v1347_v62 = vadd.f32 1.0, %v13055_v57 }
 0x130   :  { %v13059_v1 = vpop.eup %13058  ;;  %3172 = vperm.xlu1 %11829, %v13041_v37   ;;  %13078 = vrcp.f32 %v1348_v58  ;;  %v1350_v2 = vadd.f32 1.0, %v13057_v59  ;;  %v10545_v58 = vmul.f32 -1.442695, %v211_v43  ;;  %v121_v59 = vld [vmem:[%s19097_s0 + $0x320] sm:$0xff] }
 0x131   :  { %v13061_v3 = vpop.eup %13060  ;;  %v14592_v4 = vpop.permute.xlu0 %2697  ;;  %13080 = vrcp.f32 %v1347_v62  ;;  %v1349_v6 = vadd.f32 1.0, %v13059_v1  ;;  %v11868_v1 = vld [vmem:[%s19098_s2 + $0x6c0] ss:$72 sps:$4 sm:$0xff]  }
 0x132   :  { %v13063_v7 = vpop.eup %13062  ;;  %3167 = vperm.xlu0 %11828, %v13043_v41   ;;  %13082 = vrcp.f32 %v1350_v2  ;;  %v1352_v9 = vadd.f32 1.0, %v13061_v3 }
 0x133   :  { %v13065_v10 = vpop.eup %13064  ;;  %v14597_v11 = vpop.permute.xlu1 %2712  ;;  %13084 = vrcp.f32 %v1349_v6  ;;  %v1351_v12 = vadd.f32 1.0, %v13063_v7  ;;  %v10453_v6 = vmul.f32 -1.442695, %v119_v52  ;;  %v124_v7 = vld [vmem:[%s19097_s0 + $0x338] sm:$0xff] }
 0x134   :  { %v13067_v13 = vpop.eup %13066  ;;  %6902 = vmatmul.mubr.bf16.gmra.mrb[40].mxu1 %v11862_v63  ;;  %3182 = vperm.xlu1 %11829, %v13045_v44   ;;  %13086 = vrcp.f32 %v1352_v9  ;;  %v1354_v14 = vadd.f32 1.0, %v13065_v10  ;;  %v10456_v10 = vmul.f32 -1.442695, %v122_v53  ;;  %v10458_v20 = vmul.f32 -1.442695, %v124_v7  ;;  %v125_v7 = vld [vmem:[%s19097_s0 + $0x340] sm:$0xff] }
 0x135   :  { %v13069_v15 = vpop.eup %13068  ;;  %v14599_v16 = vpop.permute.xlu0 %2707  ;;  %6909 = vmatprep.mubr.bf16.mxu1 %v11863_v5  ;;  %13088 = vrcp.f32 %v1351_v12  ;;  %v1353_v18 = vadd.f32 1.0, %v13067_v13  ;;  %v11869_v5 = vld [vmem:[%s19098_s2 + $0x754] ss:$72 sps:$4 sm:$0xff]  }
 0x136   :  { %v13071_v22 = vpop.eup %13070  ;;  %3177 = vperm.xlu0 %11828, %v13047_v46   ;;  %13090 = vrcp.f32 %v1354_v14  ;;  %v1356_v23 = vadd.f32 1.0, %v13069_v15  ;;  %v120_v46 = vld [vmem:[%s19097_s0 + $0x318] sm:$0xff]  ;;  %v123_v12 = vld [vmem:[%s19097_s0 + $0x330] sm:$0xff]  ;;  %v10455_v15 = vmul.f32 -1.442695, %v121_v59 }
 0x137   :  { %v13073_v24 = vpop.eup %13072  ;;  %v14607_v26 = vpop.permute.xlu1 %2722  ;;  %13092 = vrcp.f32 %v1353_v18  ;;  %v1355_v21 = vadd.f32 1.0, %v13071_v22  ;;  %v10454_v63 = vmul.f32 -1.442695, %v120_v46  ;;  %v126_v18 = vld [vmem:[%s19097_s0 + $0x348] sm:$0xff] }
 0x138   :  { %v13075_v29 = vpop.eup %13074  ;;  %3192 = vperm.xlu1 %11829, %v13049_v50   ;;  %13094 = vrcp.f32 %v1356_v23  ;;  %v1358_v30 = vadd.f32 1.0, %v13073_v24  ;;  %v10546_v50 = vmul.f32 -1.442695, %v212_v40  ;;  %v10457_v24 = vmul.f32 -1.442695, %v123_v12  ;;  %v214_v12 = vld [vmem:[%s19097_s0 + $0x608] sm:$0xff] }
 0x139   :  { %v13077_v35 = vpop.eup %13076  ;;  %v14618_v36 = vpop.permute.xlu0 %2717  ;;  %13096 = vrcp.f32 %v1355_v21  ;;  %v1357_v37 = vadd.f32 1.0, %v13075_v29  ;;  %v10460_v21 = vmul.f32 -1.442695, %v126_v18  ;;  %v11875_v18 = vld [vmem:[%s19098_s2 + $0x874] ss:$72 sps:$4 sm:$0xff]  }
 0x13a   :  { %v13079_v41 = vpop.eup %13078  ;;  %3187 = vperm.xlu0 %11828, %v13077_v35   ;;  %13098 = vrcp.f32 %v1358_v30 }
 0x13b   :  { %v13081_v44 = vpop.eup %13080  ;;  %v14629_v47 = vpop.permute.xlu1 %2732  ;;  %13100 = vrcp.f32 %v1357_v37  ;;  %v11871_v37 = vld [vmem:[%s19098_s2 + $0x750] ss:$72 sps:$4 sm:$0xff]  }
 0x13c   :  { %v13083_v49 = vpop.eup %13082  ;;  %6910 = vmatmul.mubr.bf16.gmra.mrb[44].mxu1 %v11865_v27  ;;  %3202 = vperm.xlu1 %11829, %v13079_v41   ;;  %13102 = vpow2.f32 %v10542_v32 }
 0x13d   :  { %v13085_v56 = vpop.eup %13084  ;;  %v14640_v57 = vpop.permute.xlu0 %2727  ;;  %6917 = vmatprep.mubr.bf16.mxu1 %v11866_v31  ;;  %13104 = vpow2.f32 %v10541_v39 }
 0x13e   :  { %v13087_v62 = vpop.eup %13086  ;;  %3197 = vperm.xlu0 %11828, %v13081_v44   ;;  %13106 = vpow2.f32 %v10544_v42  ;;  %v11872_v42 = vld [vmem:[%s19098_s2 + $0x7e4] ss:$72 sps:$4 sm:$0xff]  }
 0x13f   :  { %v13089_v2 = vpop.eup %13088  ;;  %v14648_v3 = vpop.permute.xlu1 %2742  ;;  %13108 = vpow2.f32 %v10543_v48 }
 0x140   :  { %v13091_v9 = vpop.eup %13090  ;;  %3212 = vperm.xlu1 %11829, %v13083_v49   ;;  %13110 = vpow2.f32 %v10546_v50 }
 0x141   :  { %v13093_v13 = vpop.eup %13092  ;;  %v14659_v14 = vpop.permute.xlu0 %2737  ;;  %13112 = vpow2.f32 %v10545_v58 }
 0x142   :  { %v13095_v19 = vpop.eup %13094  ;;  %3207 = vperm.xlu0 %11828, %v13085_v56   ;;  %13114 = vpow2.f32 %v10454_v63 }
 0x143   :  { %v13097_v22 = vpop.eup %13096  ;;  %v14664_v23 = vpop.permute.xlu1 %2752  ;;  %13116 = vpow2.f32 %v10453_v6 }
 0x144   :  { %v13099_v27 = vpop.eup %13098  ;;  %6918 = vmatmul.mubr.bf16.gmra.mrb[48].mxu1 %v11868_v1  ;;  %3222 = vperm.xlu1 %11829, %v13087_v62   ;;  %13118 = vpow2.f32 %v10456_v10 }
 0x145   :  { %v13101_v28 = vpop.eup %13100  ;;  %v14666_v29 = vpop.permute.xlu0 %2747  ;;  %6925 = vmatprep.mubr.bf16.mxu1 %v11869_v5  ;;  %13120 = vpow2.f32 %v10455_v15  ;;  %v11874_v5 = vld [vmem:[%s19098_s2 + $0x7e0] ss:$72 sps:$4 sm:$0xff]  }
 0x146   :  { %v13103_v30 = vpop.eup %13102  ;;  %3217 = vperm.xlu0 %11828, %v13089_v2   ;;  %13122 = vpow2.f32 %v10458_v20  ;;  %v213_v20 = vld [vmem:[%s19097_s0 + $0x600] sm:$0xff] }
 0x147   :  { %v13105_v32 = vpop.eup %13104  ;;  %v14668_v34 = vpop.permute.xlu1 %2762  ;;  %v1360_v35 = vadd.f32 1.0, %v13103_v30  ;;  %13124 = vpow2.f32 %v10457_v24 }
 0x148   :  { %v13107_v31 = vpop.eup %13106  ;;  %3232 = vperm.xlu1 %11829, %v13091_v9   ;;  %v1359_v39 = vadd.f32 1.0, %v13105_v32  ;;  %13126 = vpow2.f32 %v10460_v21  ;;  %v216_v21 = vld [vmem:[%s19097_s0 + $0x618] sm:$0xff] }
 0x149   :  { %v13109_v40 = vpop.eup %13108  ;;  %v14673_v41 = vpop.permute.xlu0 %2757  ;;  %13128 = vrcp.f32 %v1360_v35  ;;  %v1362_v43 = vadd.f32 1.0, %v13107_v31  ;;  %v10548_v31 = vmul.f32 -1.442695, %v214_v12 }
 0x14a   :  { %v13111_v44 = vpop.eup %13110  ;;  %3227 = vperm.xlu0 %11828, %v13093_v13   ;;  %13130 = vrcp.f32 %v1359_v39  ;;  %v1361_v48 = vadd.f32 1.0, %v13109_v40  ;;  %v218_v40 = vld [vmem:[%s19097_s0 + $0x628] sm:$0xff] }
 0x14b   :  { %v13113_v46 = vpop.eup %13112  ;;  %v14678_v49 = vpop.permute.xlu1 %2772  ;;  %13132 = vrcp.f32 %v1362_v43  ;;  %v1364_v50 = vadd.f32 1.0, %v13111_v44 }
 0x14c   :  { %v13115_v52 = vpop.eup %13114  ;;  %6926 = vmatmul.mubr.bf16.gmra.mrb[52].mxu1 %v11871_v37  ;;  %3242 = vperm.xlu1 %11829, %v13095_v19   ;;  %13134 = vrcp.f32 %v1361_v48  ;;  %v1363_v53 = vadd.f32 1.0, %v13113_v46  ;;  %v215_v37 = vld [vmem:[%s19097_s0 + $0x610] sm:$0xff]  ;;  %v10550_v48 = vmul.f32 -1.442695, %v216_v21  ;;  %v220_v46 = vld [vmem:[%s19097_s0 + $0x638] sm:$0xff] }
 0x14d   :  { %v13117_v56 = vpop.eup %13116  ;;  %v14680_v58 = vpop.permute.xlu0 %2767  ;;  %6933 = vmatprep.mubr.bf16.mxu1 %v11872_v42  ;;  %13136 = vrcp.f32 %v1364_v50  ;;  %v1272_v59 = vadd.f32 1.0, %v13115_v52  ;;  %v217_v42 = vld [vmem:[%s19097_s0 + $0x620] sm:$0xff]  ;;  %v11877_v52 = vld [vmem:[%s19098_s2 + $0x870] ss:$72 sps:$4 sm:$0xff]   ;;  %v10554_v12 = vmul.f32 -1.442695, %v220_v46 }
 0x14e   :  { %v13119_v62 = vpop.eup %13118  ;;  %3237 = vperm.xlu0 %11828, %v13097_v22   ;;  %13138 = vrcp.f32 %v1363_v53  ;;  %v1271_v1 = vadd.f32 1.0, %v13117_v56  ;;  %v10549_v53 = vmul.f32 -1.442695, %v215_v37  ;;  %v223_v21 = vld [vmem:[%s19097_s0 + $0x650] sm:$0xff]  ;;  %v2165_v46 = vld [vmem:[%s19099_s1 + $0x400] sm:$0xff] }
 0x14f   :  { %v13121_v63 = vpop.eup %13120  ;;  %v14682_v2 = vpop.permute.xlu1 %2782  ;;  %13140 = vrcp.f32 %v1272_v59  ;;  %v1274_v6 = vadd.f32 1.0, %v13119_v62  ;;  %v11878_v62 = vld [vmem:[%s19098_s2 + $0x904] ss:$72 sps:$4 sm:$0xff]  }
 0x150   :  { %v13123_v9 = vpop.eup %13122  ;;  %3252 = vperm.xlu1 %11829, %v13099_v27   ;;  %13142 = vrcp.f32 %v1271_v1  ;;  %v1273_v10 = vadd.f32 1.0, %v13121_v63  ;;  %v10459_v27 = vmul.f32 -1.442695, %v125_v7  ;;  %v10552_v1 = vmul.f32 -1.442695, %v218_v40  ;;  %v219_v63 = vld [vmem:[%s19097_s0 + $0x630] sm:$0xff] }
 0x151   :  { %v13125_v13 = vpop.eup %13124  ;;  %v14693_v15 = vpop.permute.xlu0 %2777  ;;  %13144 = vrcp.f32 %v1274_v6  ;;  %v1276_v19 = vadd.f32 1.0, %v13123_v9  ;;  %v10551_v6 = vmul.f32 -1.442695, %v217_v42  ;;  %v222_v7 = vld [vmem:[%s19097_s0 + $0x648] sm:$0xff]  ;;  %v10557_v42 = vmul.f32 -1.442695, %v223_v21 }
 0x152   :  { %v13127_v22 = vpop.eup %13126  ;;  %3247 = vperm.xlu0 %11828, %v13101_v28   ;;  %13146 = vrcp.f32 %v1273_v10  ;;  %v1275_v24 = vadd.f32 1.0, %v13125_v13  ;;  %v10547_v28 = vmul.f32 -1.442695, %v213_v20  ;;  %v221_v13 = vld [vmem:[%s19097_s0 + $0x640] sm:$0xff]  ;;  %v224_v20 = vld [vmem:[%s19097_s0 + $0x658] sm:$0xff] }
 0x153   :  { %v13129_v30 = vpop.eup %13128  ;;  %v14704_v32 = vpop.permute.xlu1 %2792  ;;  %13148 = vrcp.f32 %v1276_v19  ;;  %v1278_v35 = vadd.f32 1.0, %v13127_v22  ;;  %v10553_v19 = vmul.f32 -1.442695, %v219_v63  ;;  %v11881_v63 = vld [vmem:[%s19098_s2 + $0x994] ss:$72 sps:$4 sm:$0xff]  }
 0x154   :  { %v13131_v39 = vpop.eup %13130  ;;  %6934 = vmatmul.mubr.bf16.gmra.mrb[56].mxu1 %v11874_v5  ;;  %3262 = vperm.xlu1 %11829, %v13129_v30   ;;  %13150 = vrcp.f32 %v1275_v24 }
 0x155   :  { %v13133_v43 = vpop.eup %13132  ;;  %v14715_v44 = vpop.permute.xlu0 %2787  ;;  %6941 = vmatprep.mubr.bf16.mxu1 %v11875_v18  ;;  %13152 = vrcp.f32 %v1278_v35  ;;  %v10555_v35 = vmul.f32 -1.442695, %v221_v13 }
 0x156   :  { %v13135_v50 = vpop.eup %13134  ;;  %3257 = vperm.xlu0 %11828, %v13131_v39   ;;  %13154 = vpow2.f32 %v10459_v27  ;;  %v10556_v27 = vmul.f32 -1.442695, %v222_v7  ;;  %v2166_v39 = vld [vmem:[%s19099_s1 + $0x408] sm:$0xff] }
 0x157   :  { %v13137_v56 = vpop.eup %13136  ;;  %v14723_v59 = vpop.permute.xlu1 %2802  ;;  %13156 = vpow2.f32 %v10548_v31 }
 0x158   :  { %v13139_v5 = vpop.eup %13138  ;;  %3272 = vperm.xlu1 %11829, %v13133_v43   ;;  %13158 = vpow2.f32 %v10547_v28  ;;  %v10558_v28 = vmul.f32 -1.442695, %v224_v20 }
 0x159   :  { %v13141_v9 = vpop.eup %13140  ;;  %v14734_v10 = vpop.permute.xlu0 %2797  ;;  %13160 = vpow2.f32 %v10550_v48 }
 0x15a   :  { %v13143_v18 = vpop.eup %13142  ;;  %3267 = vperm.xlu0 %11828, %v13135_v50   ;;  %13162 = vpow2.f32 %v10549_v53  ;;  %v2168_v50 = vld [vmem:[%s19099_s1 + $0x418] sm:$0xff] }
 0x15b   :  { %v13145_v22 = vpop.eup %13144  ;;  %v14742_v24 = vpop.permute.xlu1 %2812  ;;  %13164 = vpow2.f32 %v10552_v1 }
 0x15c   :  { %v13147_v30 = vpop.eup %13146  ;;  %6942 = vmatmul.mubr.bf16.gmra.mrb[60].mxu1 %v11877_v52  ;;  %3282 = vperm.xlu1 %11829, %v13137_v56   ;;  %13166 = vpow2.f32 %v10551_v6  ;;  %v11880_v56 = vld [vmem:[%s19098_s2 + $0x900] ss:$72 sps:$4 sm:$0xff]  }
 0x15d   :  { %v14747_v31 = vpop.eup %13148  ;;  %v14749_v37 = vpop.permute.xlu0 %2807  ;;  %6949 = vmatprep.mubr.bf16.mxu1 %v11878_v62  ;;  %13168 = vpow2.f32 %v10554_v12 }
 0x15e   :  { %v14754_v40 = vpop.eup %13150  ;;  %3277 = vperm.xlu0 %11828, %v13139_v5   ;;  %13170 = vpow2.f32 %v10553_v19  ;;  %v2167_v19 = vld [vmem:[%s19099_s1 + $0x410] sm:$0xff] }
 0x15f   :  { %v14756_v43 = vpop.eup %13152  ;;  %v2973_v48 = vpop.permute.xlu1 %2972  ;;  %13172 = vpow2.f32 %v10556_v27 }
 0x160   :  { %v13155_v52 = vpop.eup %13154  ;;  %v3894_v53 = vmul.f32 %v2973_v48, %v2166_v39  ;;  %2822 = vperm.xlu1 %11829, %v13141_v9   ;;  %13174 = vpow2.f32 %v10555_v35 }
 0x161   :  { %v13157_v62 = vpop.eup %13156  ;;  %v2968_v1 = vpop.permute.xlu0 %2967  ;;  %v1277_v5 = vadd.f32 1.0, %v13155_v52  ;;  %13176 = vpow2.f32 %v10558_v28 }
 0x162   :  { %v13159_v6 = vpop.eup %13158  ;;  %v3893_v7 = vmul.f32 %v2968_v1, %v2165_v46  ;;  %2817 = vperm.xlu0 %11828, %v13143_v18   ;;  %v1366_v12 = vadd.f32 1.0, %v13157_v62  ;;  %13178 = vpow2.f32 %v10557_v42  ;;  %v2170_v42 = vld [vmem:[%s19099_s1 + $0x428] sm:$0xff] }
 0x163   :  { %v13161_v13 = vpop.eup %13160  ;;  %v2983_v9 = vpop.permute.xlu1 %2982  ;;  %13180 = vrcp.f32 %v1277_v5  ;;  %v1365_v20 = vadd.f32 1.0, %v13159_v6 }
 0x164   :  { %v13163_v27 = vpop.eup %13162  ;;  %v3896_v21 = vmul.f32 %v2983_v9, %v2168_v50  ;;  %6950 = vmatmul.mubr.bf16.gmra.mrb[64].mxu1 %v11880_v56  ;;  %2832 = vperm.xlu1 %11829, %v13145_v22   ;;  %v14773_v35 = vpack.c.bf16 %v3894_v53, %v3893_v7  ;;  %13182 = vrcp.f32 %v1366_v12  ;;  %v1368_v39 = vadd.f32 1.0, %v13161_v13  ;;  %v2169_v56 = vld [vmem:[%s19099_s1 + $0x420] sm:$0xff]  ;;  %v226_v7 = vld [vmem:[%s19097_s0 + $0x668] sm:$0xff]  ;;  %v2172_v9 = vld [vmem:[%s19099_s1 + $0x438] sm:$0xff] }
 0x165   :  { %v13165_v28 = vpop.eup %13164  ;;  %v2978_v18 = vpop.permute.xlu0 %2977  ;;  %6957 = vmatprep.mubr.bf16.mxu1 %v11881_v63  ;;  %13184 = vrcp.f32 %v1365_v20  ;;  %v1367_v48 = vadd.f32 1.0, %v13163_v27 }
 0x166   :  { %v13167_v46 = vpop.eup %13166  ;;  %v3895_v52 = vmul.f32 %v2978_v18, %v2167_v19  ;;  %2827 = vperm.xlu0 %11828, %v13147_v30   ;;  %7690 = vmatpush1.bf16.msra.mxu0 %v14773_v35  ;;  %13186 = vrcp.f32 %v1368_v39  ;;  %v1370_v22 = vadd.f32 1.0, %v13165_v28  ;;  %v11883_v30 = vld [vmem:[%s19098_s2 + $0x990] ss:$72 sps:$4 sm:$0xff]   ;;  %v225_v39 = vld [vmem:[%s19097_s0 + $0x660] sm:$0xff] }
 0x167   :  { %v13169_v50 = vpop.eup %13168  ;;  %v2993_v53 = vpop.permute.xlu1 %2992  ;;  %7691 = vmatprep.subr.bf16.mxu0 %v19103_v0  ;;  %13188 = vrcp.f32 %v1367_v48  ;;  %v1369_v62 = vadd.f32 1.0, %v13167_v46  ;;  %v10560_v46 = vmul.f32 -1.442695, %v226_v7  ;;  %v230_v7 = vld [vmem:[%s19097_s0 + $0x688] sm:$0xff] }
 0x168   :  { %v13171_v1 = vpop.eup %13170  ;;  %v14783_v63 = vpack.c.bf16 %v3896_v21, %v3895_v52  ;;  %v3898_v5 = vmul.f32 %v2993_v53, %v2170_v42  ;;  %2842 = vperm.xlu1 %11829, %v14747_v31   ;;  %13190 = vrcp.f32 %v1370_v22  ;;  %v1372_v6 = vadd.f32 1.0, %v13169_v50  ;;  %v11884_v31 = vld [vmem:[%s19098_s2 + $0xa24] ss:$72 sps:$4 sm:$0xff]   ;;  %v2171_v42 = vld [vmem:[%s19099_s1 + $0x430] sm:$0xff] }
 0x169   :  { %v13173_v12 = vpop.eup %13172  ;;  %v2988_v13 = vpop.permute.xlu0 %2987  ;;  %13192 = vrcp.f32 %v1369_v62  ;;  %v1371_v19 = vadd.f32 1.0, %v13171_v1  ;;  %v2174_v53 = vld [vmem:[%s19099_s1 + $0x448] sm:$0xff]  ;;  %v227_v62 = vld [vmem:[%s19097_s0 + $0x670] sm:$0xff] }
 0x16a   :  { %v13175_v20 = vpop.eup %13174  ;;  %v3897_v27 = vmul.f32 %v2988_v13, %v2169_v56  ;;  %2837 = vperm.xlu0 %11828, %v14754_v40   ;;  %7692 = vmatpush1.bf16.msra.mxu0 %v14783_v63  ;;  %13194 = vrcp.f32 %v1372_v6  ;;  %v1374_v21 = vadd.f32 1.0, %v13173_v12  ;;  %v228_v40 = vld [vmem:[%s19097_s0 + $0x678] sm:$0xff]  ;;  %v229_v12 = vld [vmem:[%s19097_s0 + $0x680] sm:$0xff] }
 0x16b   :  { %v13177_v28 = vpop.eup %13176  ;;  %v3003_v18 = vpop.permute.xlu1 %3002  ;;  %7693 = vmatprep.subr.bf16.mxu0 %v19103_v0  ;;  %13196 = vrcp.f32 %v1371_v19  ;;  %v1373_v48 = vadd.f32 1.0, %v13175_v20  ;;  %v232_v13 = vld [vmem:[%s19097_s0 + $0x698] sm:$0xff]  ;;  %v10562_v20 = vmul.f32 -1.442695, %v228_v40  ;;  %v10564_v40 = vmul.f32 -1.442695, %v230_v7 }
 0x16c   :  { %v13179_v52 = vpop.eup %13178  ;;  %v14810_v22 = vpack.c.bf16 %v3898_v5, %v3897_v27  ;;  %v3900_v50 = vmul.f32 %v3003_v18, %v2172_v9  ;;  %6958 = vmatmul.mubr.bf16.gmra.mrb[68].mxu1 %v11883_v30  ;;  %2852 = vperm.xlu1 %11829, %v14756_v43   ;;  %13198 = vrcp.f32 %v1374_v21  ;;  %v1376_v56 = vadd.f32 1.0, %v13177_v28  ;;  %v2173_v5 = vld [vmem:[%s19099_s1 + $0x440] sm:$0xff] }
 0x16d   :  { %v13181_v1 = vpop.eup %13180  ;;  %v2998_v6 = vpop.permute.xlu0 %2997  ;;  %6965 = vmatprep.mubr.bf16.mxu1 %v11884_v31  ;;  %13200 = vrcp.f32 %v1373_v48  ;;  %v1375_v30 = vadd.f32 1.0, %v13179_v52  ;;  %v10559_v43 = vmul.f32 -1.442695, %v225_v39  ;;  %v11886_v31 = vld [vmem:[%s19098_s2 + $0xa20] ss:$72 sps:$4 sm:$0xff]  }
 0x16e   :  { %19163 = vst [vmem:[#allocation2_spill] sm:$0xff] %v14810_v22  ;;  %v13183_v9 = vpop.eup %13182  ;;  %v3899_v19 = vmul.f32 %v2998_v6, %v2171_v42  ;;  %2847 = vperm.xlu0 %11828, %v13181_v1   ;;  %7694 = vmatpush1.bf16.msra.mxu0 %v14810_v22  ;;  %13202 = vrcp.f32 %v1376_v56  ;;  %v10561_v39 = vmul.f32 -1.442695, %v227_v62  ;;  %v2176_v42 = vld [vmem:[%s19099_s1 + $0x458] sm:$0xff]  ;;  %v231_v56 = vld [vmem:[%s19097_s0 + $0x690] sm:$0xff]  ;;  %v233_v7 = vld [vmem:[%s19097_s0 + $0x6a0] sm:$0xff] }
 0x16f   :  { %v13185_v27 = vpop.eup %13184  ;;  %v3013_v21 = vpop.permute.xlu1 %3012  ;;  %7695 = vmatprep.subr.bf16.mxu0 %v19103_v0  ;;  %13204 = vrcp.f32 %v1375_v30  ;;  %v11887_v52 = vld [vmem:[%s19098_s2 + $0xab4] ss:$72 sps:$4 sm:$0xff]  }
 0x170   :  { %v13187_v28 = vpop.eup %13186  ;;  %v14836_v18 = vpack.c.bf16 %v3900_v50, %v3899_v19  ;;  %v3902_v48 = vmul.f32 %v3013_v21, %v2174_v53  ;;  %3292 = vperm.xlu1 %11829, %v13183_v9   ;;  %13206 = vpow2.f32 %v10560_v46  ;;  %v10563_v50 = vmul.f32 -1.442695, %v229_v12  ;;  %v234_v53 = vld [vmem:[%s19097_s0 + $0x6a8] sm:$0xff] }
 0x171   :  { %v13189_v62 = vpop.eup %13188  ;;  %v3008_v1 = vpop.permute.xlu0 %3007  ;;  %13208 = vpow2.f32 %v10559_v43  ;;  %v10566_v46 = vmul.f32 -1.442695, %v232_v13  ;;  %v2175_v43 = vld [vmem:[%s19099_s1 + $0x450] sm:$0xff]  ;;  %v10565_v12 = vmul.f32 -1.442695, %v231_v56  ;;  %v2178_v21 = vld [vmem:[%s19099_s1 + $0x468] sm:$0xff] }
 0x172   :  { %19164 = vst [vmem:[#allocation3_spill] sm:$0xff] %v14836_v18  ;;  %v13191_v6 = vpop.eup %13190  ;;  %v3901_v30 = vmul.f32 %v3008_v1, %v2173_v5  ;;  %3287 = vperm.xlu0 %11828, %v13185_v27   ;;  %7696 = vmatpush1.bf16.msra.mxu0 %v14836_v18  ;;  %13210 = vpow2.f32 %v10562_v20  ;;  %v236_v5 = vld [vmem:[%s19097_s0 + $0x6b8] sm:$0xff]  ;;  %v10568_v1 = vmul.f32 -1.442695, %v234_v53  ;;  %v19166_v18 = vmov 0  }
 0x173   :  { %v13193_v9 = vpop.eup %13192  ;;  %v3023_v19 = vpop.permute.xlu1 %3022  ;;  %7697 = vmatprep.subr.bf16.mxu0 %v19103_v0  ;;  %13212 = vpow2.f32 %v10561_v39  ;;  %v235_v39 = vld [vmem:[%s19097_s0 + $0x6b0] sm:$0xff]  ;;  %v10570_v53 = vmul.f32 -1.442695, %v236_v5  ;;  %v11890_v5 = vld [vmem:[%s19098_s2 + $0xb44] ss:$72 sps:$4 sm:$0xff]  }
 0x174   :  { %v13195_v20 = vpop.eup %13194  ;;  %v14861_v13 = vpack.c.bf16 %v3902_v48, %v3901_v30  ;;  %v3904_v27 = vmul.f32 %v3023_v19, %v2176_v42  ;;  %6966 = vmatmul.mubr.bf16.gmra.mrb[72].mxu1 %v11886_v31  ;;  %3302 = vperm.xlu1 %11829, %v13187_v28   ;;  %13214 = vpow2.f32 %v10564_v40  ;;  %v2177_v48 = vld [vmem:[%s19099_s1 + $0x460] sm:$0xff]  ;;  %v10567_v31 = vmul.f32 -1.442695, %v233_v7  ;;  %v238_v28 = vld [vmem:[%s19097_s0 + $0x6c8] sm:$0xff] }
 0x175   :  { %v13197_v56 = vpop.eup %13196  ;;  %v3018_v0 = vpop.permute.xlu0 %3017  ;;  %6973 = vmatprep.mubr.bf16.mxu1 %v11887_v52  ;;  %13216 = vpow2.f32 %v10563_v50  ;;  %v10569_v52 = vmul.f32 -1.442695, %v235_v39 }
 0x176   :  { %19165 = vst [vmem:[#allocation4_spill] sm:$0xff] %v14861_v13  ;;  %v13199_v42 = vpop.eup %13198  ;;  %v3903_v40 = vmul.f32 %v3018_v0, %v2175_v43  ;;  %3297 = vperm.xlu0 %11828, %v13189_v62   ;;  %7698 = vmatpush1.bf16.msra.mxu0 %v14861_v13  ;;  %13218 = vpow2.f32 %v10566_v46  ;;  %v2180_v0 = vld [vmem:[%s19099_s1 + $0x478] sm:$0xff]  ;;  %v10572_v46 = vmul.f32 -1.442695, %v238_v28 }
 0x177   :  { %v14876_v30 = vpop.eup %13200  ;;  %v3033_v19 = vpop.permute.xlu1 %3032  ;;  %7699 = vmatprep.subr.bf16.mxu0 %v19166_v18  ;;  %13220 = vpow2.f32 %v10565_v12  ;;  %v11889_v62 = vld [vmem:[%s19098_s2 + $0xab0] ss:$72 sps:$4 sm:$0xff]  }
 0x178   :  { %v14879_v50 = vpop.eup %13202  ;;  %v14881_v7 = vpack.c.bf16 %v3904_v27, %v3903_v40  ;;  %v3906_v22 = vmul.f32 %v3033_v19, %v2178_v21  ;;  %3312 = vperm.xlu1 %11829, %v13191_v6   ;;  %13222 = vpow2.f32 %v10568_v1  ;;  %v2179_v1 = vld [vmem:[%s19099_s1 + $0x470] sm:$0xff] }
 0x179   :  { %v14889_v43 = vpop.eup %13204  ;;  %v3028_v12 = vpop.permute.xlu0 %3027  ;;  %13224 = vpow2.f32 %v10567_v31 }
 0x17a   :  { %19167 = vst [vmem:[#allocation5_spill] sm:$0xff] %v14881_v7  ;;  %v13207_v27 = vpop.eup %13206  ;;  %v3905_v6 = vmul.f32 %v3028_v12, %v2177_v48  ;;  %3307 = vperm.xlu0 %11828, %v13193_v9   ;;  %7700 = vmatpush1.bf16.msra.mxu0 %v14881_v7  ;;  %13226 = vpow2.f32 %v10570_v53  ;;  %v2182_v12 = vld [vmem:[%s19099_s1 + $0x488] sm:$0xff]  ;;  %v2181_v7 = vld [vmem:[%s19099_s1 + $0x480] sm:$0xff] }
 0x17b   :  { %v13209_v21 = vpop.eup %13208  ;;  %v3043_v39 = vpop.permute.xlu1 %3042  ;;  %7701 = vmatprep.subr.bf16.mxu0 %v19166_v18  ;;  %v1378_v28 = vadd.f32 1.0, %v13207_v27  ;;  %13228 = vpow2.f32 %v10569_v52 }
 0x17c   :  { %v13211_v40 = vpop.eup %13210  ;;  %v14899_v19 = vpack.c.bf16 %v3906_v22, %v3905_v6  ;;  %v3908_v31 = vmul.f32 %v3043_v39, %v2180_v0  ;;  %6974 = vmatmul.mubr.bf16.gmra.mrb[76].mxu1 %v11889_v62  ;;  %3322 = vperm.xlu1 %11829, %v13195_v20   ;;  %v1377_v9 = vadd.f32 1.0, %v13209_v21  ;;  %13230 = vpow2.f32 %v10572_v46 }
 0x17d   :  { %v13213_v48 = vpop.eup %13212  ;;  %v3038_v53 = vpop.permute.xlu0 %3037  ;;  %6981 = vmatprep.mubr.bf16.mxu1 %v11890_v5  ;;  %13232 = vrcp.f32 %v1378_v28  ;;  %v1380_v52 = vadd.f32 1.0, %v13211_v40  ;;  %v2184_v5 = vld [vmem:[%s19099_s1 + $0x498] sm:$0xff] }
 0x17e   :  { %19168 = vst [vmem:[#allocation6_spill] sm:$0xff] %v14899_v19  ;;  %v13215_v22 = vpop.eup %13214  ;;  %v3907_v27 = vmul.f32 %v3038_v53, %v2179_v1  ;;  %3317 = vperm.xlu0 %11828, %v13197_v56   ;;  %7702 = vmatpush1.bf16.msra.mxu0 %v14899_v19  ;;  %13234 = vrcp.f32 %v1377_v9  ;;  %v1379_v20 = vadd.f32 1.0, %v13213_v48  ;;  %v11892_v56 = vld [vmem:[%s19098_s2 + $0xb40] ss:$72 sps:$4 sm:$0xff]   ;;  %v11893_v9 = vld [vmem:[%s19098_s2 + $0xbd4] ss:$72 sps:$4 sm:$0xff]  }
 0x17f   :  { %v13217_v0 = vpop.eup %13216  ;;  %v3053_v62 = vpop.permute.xlu1 %3052  ;;  %7703 = vmatprep.subr.bf16.mxu0 %v19166_v18  ;;  %13236 = vrcp.f32 %v1380_v52  ;;  %v1382_v46 = vadd.f32 1.0, %v13215_v22  ;;  %v2183_v22 = vld [vmem:[%s19099_s1 + $0x490] sm:$0xff] }
 0x180   :  { %v13219_v6 = vpop.eup %13218  ;;  %v14909_v21 = vpack.c.bf16 %v3908_v31, %v3907_v27  ;;  %v3910_v39 = vmul.f32 %v3053_v62, %v2182_v12  ;;  %3332 = vperm.xlu1 %11829, %v13199_v42   ;;  %13238 = vrcp.f32 %v1379_v20  ;;  %v1381_v1 = vadd.f32 1.0, %v13217_v0  ;;  %v2186_v62 = vld [vmem:[%s19099_s1 + $0x4a8] sm:$0xff] }
 0x181   :  { %v13221_v28 = vpop.eup %13220  ;;  %v3048_v40 = vpop.permute.xlu0 %3047  ;;  %13240 = vrcp.f32 %v1382_v46  ;;  %v1384_v31 = vadd.f32 1.0, %v13219_v6  ;;  %v240_v6 = vld [vmem:[%s19097_s0 + $0x6d8] sm:$0xff] }
 0x182   :  { %19169 = vst [vmem:[#allocation7_spill] sm:$0xff] %v14909_v21  ;;  %v13223_v48 = vpop.eup %13222  ;;  %v3909_v42 = vmul.f32 %v3048_v40, %v2181_v7  ;;  %3327 = vperm.xlu0 %11828, %v14876_v30   ;;  %7704 = vmatpush1.bf16.msra.mxu0 %v14909_v21  ;;  %13242 = vrcp.f32 %v1381_v1  ;;  %v1383_v53 = vadd.f32 1.0, %v13221_v28  ;;  %v237_v7 = vld [vmem:[%s19097_s0 + $0x6c0] sm:$0xff] }
 0x183   :  { %v13225_v12 = vpop.eup %13224  ;;  %v3063_v52 = vpop.permute.xlu1 %3062  ;;  %7705 = vmatprep.subr.bf16.mxu0 %v19166_v18  ;;  %13244 = vrcp.f32 %v1384_v31  ;;  %v1386_v27 = vadd.f32 1.0, %v13223_v48 }
 0x184   :  { %v13227_v20 = vpop.eup %13226  ;;  %v14929_v30 = vpack.c.bf16 %v3910_v39, %v3909_v42  ;;  %v3912_v0 = vmul.f32 %v3063_v52, %v2184_v5  ;;  %6982 = vmatmul.mubr.bf16.gmra.mrb[80].mxu1 %v11892_v56  ;;  %3342 = vperm.xlu1 %11829, %v14879_v50   ;;  %13246 = vrcp.f32 %v1383_v53  ;;  %v1385_v46 = vadd.f32 1.0, %v13225_v12  ;;  %v2185_v39 = vld [vmem:[%s19099_s1 + $0x4a0] sm:$0xff]  ;;  %v239_v50 = vld [vmem:[%s19097_s0 + $0x6d0] sm:$0xff]  ;;  %v242_v56 = vld [vmem:[%s19097_s0 + $0x6e8] sm:$0xff] }
 0x185   :  { %v13229_v1 = vpop.eup %13228  ;;  %v3058_v28 = vpop.permute.xlu0 %3057  ;;  %6989 = vmatprep.mubr.bf16.mxu1 %v11893_v9  ;;  %13248 = vrcp.f32 %v1386_v27  ;;  %v1388_v5 = vadd.f32 1.0, %v13227_v20  ;;  %v11895_v9 = vld [vmem:[%s19098_s2 + $0xbd0] ss:$72 sps:$4 sm:$0xff]   ;;  %v10571_v42 = vmul.f32 -1.442695, %v237_v7  ;;  %v241_v53 = vld [vmem:[%s19097_s0 + $0x6e0] sm:$0xff] }
 0x186   :  { %19170 = vst [vmem:[#allocation8_spill] sm:$0xff] %v14929_v30  ;;  %v13231_v40 = vpop.eup %13230  ;;  %v3911_v31 = vmul.f32 %v3058_v28, %v2183_v22  ;;  %3337 = vperm.xlu0 %11828, %v14889_v43   ;;  %7706 = vmatpush1.bf16.msra.mxu0 %v14929_v30  ;;  %13250 = vrcp.f32 %v1385_v46  ;;  %v1387_v48 = vadd.f32 1.0, %v13229_v1  ;;  %v10574_v43 = vmul.f32 -1.442695, %v240_v6  ;;  %v2188_v7 = vld [vmem:[%s19099_s1 + $0x4b8] sm:$0xff] }
 0x187   :  { %v13233_v12 = vpop.eup %13232  ;;  %v3073_v52 = vpop.permute.xlu1 %3072  ;;  %7707 = vmatprep.subr.bf16.mxu0 %v19166_v18  ;;  %13252 = vrcp.f32 %v1388_v5  ;;  %v1390_v22 = vadd.f32 1.0, %v13231_v40  ;;  %v11896_v46 = vld [vmem:[%s19098_s2 + $0xc64] ss:$72 sps:$4 sm:$0xff]   ;;  %v10573_v1 = vmul.f32 -1.442695, %v239_v50  ;;  %v244_v5 = vld [vmem:[%s19097_s0 + $0x6f8] sm:$0xff] }
 0x188   :  { %v13235_v27 = vpop.eup %13234  ;;  %v14956_v20 = vpack.c.bf16 %v3912_v0, %v3911_v31  ;;  %v3914_v28 = vmul.f32 %v3073_v52, %v2186_v62  ;;  %3352 = vperm.xlu1 %11829, %v13233_v12   ;;  %13254 = vrcp.f32 %v1387_v48  ;;  %v10576_v0 = vmul.f32 -1.442695, %v242_v56  ;;  %v243_v62 = vld [vmem:[%s19097_s0 + $0x6f0] sm:$0xff]  ;;  %v128_v50 = vld [vmem:[%s19097_s0 + $0x358] sm:$0xff] }
 0x189   :  { %v13237_v6 = vpop.eup %13236  ;;  %v3068_v40 = vpop.permute.xlu0 %3067  ;;  %13256 = vrcp.f32 %v1390_v22  ;;  %v10575_v48 = vmul.f32 -1.442695, %v241_v53  ;;  %v2187_v56 = vld [vmem:[%s19099_s1 + $0x4b0] sm:$0xff]  ;;  %v10578_v22 = vmul.f32 -1.442695, %v244_v5 }
 0x18a   :  { %19171 = vst [vmem:[#allocation9_spill] sm:$0xff] %v14956_v20  ;;  %v13239_v31 = vpop.eup %13238  ;;  %v3913_v12 = vmul.f32 %v3068_v40, %v2185_v39  ;;  %3347 = vperm.xlu0 %11828, %v13235_v27   ;;  %7708 = vmatpush1.bf16.msra.mxu0 %v14956_v20  ;;  %13258 = vpow2.f32 %v10571_v42  ;;  %v127_v39 = vld [vmem:[%s19097_s0 + $0x350] sm:$0xff]  ;;  %v10577_v40 = vmul.f32 -1.442695, %v243_v62  ;;  %v130_v20 = vld [vmem:[%s19097_s0 + $0x368] sm:$0xff] }
 0x18b   :  { %v13241_v52 = vpop.eup %13240  ;;  %v3083_v30 = vpop.permute.xlu1 %3082  ;;  %7709 = vmatprep.subr.bf16.mxu0 %v19166_v18  ;;  %13260 = vpow2.f32 %v10574_v43  ;;  %v2190_v43 = vld [vmem:[%s19099_s1 + $0x4c8] sm:$0xff]  ;;  %v10462_v5 = vmul.f32 -1.442695, %v128_v50 }
 0x18c   :  { %v13243_v42 = vpop.eup %13242  ;;  %v14981_v53 = vpack.c.bf16 %v3914_v28, %v3913_v12  ;;  %v3916_v27 = vmul.f32 %v3083_v30, %v2188_v7  ;;  %6990 = vmatmul.mubr.bf16.gmra.mrb[84].mxu1 %v11895_v9  ;;  %3362 = vperm.xlu1 %11829, %v13237_v6   ;;  %13262 = vpow2.f32 %v10573_v1  ;;  %v129_v30 = vld [vmem:[%s19097_s0 + $0x360] sm:$0xff]  ;;  %v10461_v7 = vmul.f32 -1.442695, %v127_v39  ;;  %v132_v1 = vld [vmem:[%s19097_s0 + $0x378] sm:$0xff] }
 0x18d   :  { %v13245_v21 = vpop.eup %13244  ;;  %v3078_v19 = vpop.permute.xlu0 %3077  ;;  %6997 = vmatprep.mubr.bf16.mxu1 %v11896_v46  ;;  %13264 = vpow2.f32 %v10576_v0  ;;  %v2189_v46 = vld [vmem:[%s19099_s1 + $0x4c0] sm:$0xff]  ;;  %v10464_v0 = vmul.f32 -1.442695, %v130_v20  ;;  %v2192_v20 = vld [vmem:[%s19099_s1 + $0x4d8] sm:$0xff] }
 0x18e   :  { %19172 = vst [vmem:[#allocation10_spill] sm:$0xff] %v14981_v53  ;;  %v13247_v9 = vpop.eup %13246  ;;  %v3915_v28 = vmul.f32 %v3078_v19, %v2187_v56  ;;  %3357 = vperm.xlu0 %11828, %v13239_v31   ;;  %7710 = vmatpush1.bf16.msra.mxu0 %v14981_v53  ;;  %13266 = vpow2.f32 %v10575_v48  ;;  %v131_v19 = vld [vmem:[%s19097_s0 + $0x370] sm:$0xff]  ;;  %v11898_v50 = vld [vmem:[%s19098_s2 + $0xc60] ss:$72 sps:$4 sm:$0xff]   ;;  %v10463_v56 = vmul.f32 -1.442695, %v129_v30 }
 0x18f   :  { %v13249_v6 = vpop.eup %13248  ;;  %v3093_v62 = vpop.permute.xlu1 %3092  ;;  %7711 = vmatprep.subr.bf16.mxu0 %v19166_v18  ;;  %13268 = vpow2.f32 %v10578_v22  ;;  %v2191_v53 = vld [vmem:[%s19099_s1 + $0x4d0] sm:$0xff] }
 0x190   :  { %v15003_v31 = vpop.eup %13250  ;;  %v15005_v12 = vpack.c.bf16 %v3916_v27, %v3915_v28  ;;  %v3918_v48 = vmul.f32 %v3093_v62, %v2190_v43  ;;  %3372 = vperm.xlu1 %11829, %v13241_v52   ;;  %13270 = vpow2.f32 %v10577_v40  ;;  %v11899_v27 = vld [vmem:[%s19098_s2 + $0xcf4] ss:$72 sps:$4 sm:$0xff]   ;;  %v10466_v43 = vmul.f32 -1.442695, %v132_v1 }
 0x191   :  { %v15010_v39 = vpop.eup %13252  ;;  %v3088_v22 = vpop.permute.xlu0 %3087  ;;  %13272 = vpow2.f32 %v10462_v5  ;;  %v10465_v40 = vmul.f32 -1.442695, %v131_v19 }
 0x192   :  { %19173 = vst [vmem:[#allocation11_spill] sm:$0xff] %v15005_v12  ;;  %v15018_v52 = vpop.eup %13254  ;;  %v3917_v28 = vmul.f32 %v3088_v22, %v2189_v46  ;;  %3367 = vperm.xlu0 %11828, %v13243_v42   ;;  %7712 = vmatpush1.bf16.msra.mxu0 %v15005_v12  ;;  %13274 = vpow2.f32 %v10461_v7  ;;  %v2194_v46 = vld [vmem:[%s19099_s1 + $0x4e8] sm:$0xff] }
 0x193   :  { %v15021_v30 = vpop.eup %13256  ;;  %v3103_v62 = vpop.permute.xlu1 %3102  ;;  %7713 = vmatprep.subr.bf16.mxu0 %v19166_v18  ;;  %13276 = vpow2.f32 %v10464_v0 }
 0x194   :  { %v13259_v5 = vpop.eup %13258  ;;  %v15027_v1 = vpack.c.bf16 %v3918_v48, %v3917_v28  ;;  %v3920_v13 = vmul.f32 %v3103_v62, %v2192_v20  ;;  %6998 = vmatmul.mubr.bf16.gmra.mrb[88].mxu1 %v11898_v50  ;;  %3382 = vperm.xlu1 %11829, %v13245_v21   ;;  %13278 = vpow2.f32 %v10463_v56  ;;  %v2193_v21 = vld [vmem:[%s19099_s1 + $0x4e0] sm:$0xff]  ;;  %v2196_v62 = vld [vmem:[%s19099_s1 + $0x4f8] sm:$0xff] }
 0x195   :  { %v13261_v42 = vpop.eup %13260  ;;  %v3098_v7 = vpop.permute.xlu0 %3097  ;;  %7005 = vmatprep.mubr.bf16.mxu1 %v11899_v27  ;;  %v1389_v19 = vadd.f32 1.0, %v13259_v5  ;;  %13280 = vpow2.f32 %v10466_v43  ;;  %v11904_v5 = vld [vmem:[%s19098_s2 + $0xc] ss:$72 sps:$4 sm:$0xff]  }
 0x196   :  { %v13263_v22 = vpop.eup %13262  ;;  %v3919_v12 = vmul.f32 %v3098_v7, %v2191_v53  ;;  %3377 = vperm.xlu0 %11828, %v13247_v9   ;;  %7714 = vmatpush1.bf16.msra.mxu0 %v15027_v1  ;;  %v1392_v0 = vadd.f32 1.0, %v13261_v42  ;;  %13282 = vpow2.f32 %v10465_v40  ;;  %v11901_v53 = vld [vmem:[%s19098_s2 + $0xcf0] ss:$72 sps:$4 sm:$0xff]  }
 0x197   :  { %v13265_v48 = vpop.eup %13264  ;;  %v3113_v50 = vpop.permute.xlu1 %3112  ;;  %7715 = vmatprep.subr.bf16.mxu0 %v19166_v18  ;;  %13284 = vrcp.f32 %v1389_v19  ;;  %v1391_v56 = vadd.f32 1.0, %v13263_v22  ;;  %v2101_v19 = vld [vmem:[%s19099_s1 + $0x200] sm:$0xff] }
 0x198   :  { %v13267_v20 = vpop.eup %13266  ;;  %v15037_v27 = vpack.c.bf16 %v3920_v13, %v3919_v12  ;;  %v3922_v43 = vmul.f32 %v3113_v50, %v2194_v46  ;;  %3392 = vperm.xlu1 %11829, %v13249_v6   ;;  %13286 = vrcp.f32 %v1392_v0  ;;  %v1394_v9 = vadd.f32 1.0, %v13265_v48  ;;  %v2102_v6 = vld [vmem:[%s19099_s1 + $0x208] sm:$0xff]  ;;  %v2195_v0 = vld [vmem:[%s19099_s1 + $0x4f0] sm:$0xff] }
 0x199   :  { %v13269_v28 = vpop.eup %13268  ;;  %v3108_v40 = vpop.permute.xlu0 %3107  ;;  %13288 = vrcp.f32 %v1391_v56  ;;  %v1393_v13 = vadd.f32 1.0, %v13267_v20  ;;  %v134_v20 = vld [vmem:[%s19097_s0 + $0x388] sm:$0xff] }
 0x19a   :  { %19174 = vst [vmem:[#allocation12_spill] sm:$0xff] %v15037_v27  ;;  %v13271_v12 = vpop.eup %13270  ;;  %v3921_v42 = vmul.f32 %v3108_v40, %v2193_v21  ;;  %3387 = vperm.xlu0 %11828, %v15003_v31   ;;  %7716 = vmatpush1.bf16.msra.mxu0 %v15037_v27  ;;  %13290 = vrcp.f32 %v1394_v9  ;;  %v1396_v7 = vadd.f32 1.0, %v13269_v28  ;;  %v15067_v28 = vmul.f32 %v14512_v54, %v2102_v6 }
 0x19b   :  { %v13273_v46 = vpop.eup %13272  ;;  %v3123_v22 = vpop.permute.xlu1 %3122  ;;  %7717 = vmatprep.subr.bf16.mxu0 %v19166_v18  ;;  %13292 = vrcp.f32 %v1393_v13  ;;  %v1395_v48 = vadd.f32 1.0, %v13271_v12  ;;  %v2104_v13 = vld [vmem:[%s19099_s1 + $0x218] sm:$0xff] }
 0x19c   :  { %v13275_v50 = vpop.eup %13274  ;;  %v15060_v31 = vpack.c.bf16 %v3922_v43, %v3921_v42  ;;  %v3924_v21 = vmul.f32 %v3123_v22, %v2196_v62  ;;  %7006 = vmatmul.mubr.bf16.gmra.mrb[92].mxu1 %v11901_v53  ;;  %3402 = vperm.xlu1 %11829, %v15010_v39   ;;  %13294 = vrcp.f32 %v1396_v7  ;;  %v1280_v56 = vadd.f32 1.0, %v13273_v46  ;;  %v2198_v43 = vld [vmem:[%s19099_s1 + $0x508] sm:$0xff] }
 0x19d   :  { %v13277_v9 = vpop.eup %13276  ;;  %v3118_v40 = vpop.permute.xlu0 %3117  ;;  %7046 = vmatprep.mubr.bf16.mxu1 %v11904_v5  ;;  %13296 = vrcp.f32 %v1395_v48  ;;  %v1279_v53 = vadd.f32 1.0, %v13275_v50  ;;  %v15073_v39 = vmul.f32 %v14518_v60, %v2101_v19  ;;  %v133_v5 = vld [vmem:[%s19097_s0 + $0x380] sm:$0xff]  ;;  %v2103_v60 = vld [vmem:[%s19099_s1 + $0x210] sm:$0xff]  ;;  %v10468_v46 = vmul.f32 -1.442695, %v134_v20  ;;  %v136_v19 = vld [vmem:[%s19097_s0 + $0x398] sm:$0xff] }
 0x19e   :  { %19175 = vst [vmem:[#allocation13_spill] sm:$0xff] %v15060_v31  ;;  %v13279_v62 = vpop.eup %13278  ;;  %v3923_v12 = vmul.f32 %v3118_v40, %v2195_v0  ;;  %3397 = vperm.xlu0 %11828, %v15018_v52   ;;  %7718 = vmatpush1.bf16.msra.mxu0 %v15060_v31  ;;  %13298 = vrcp.f32 %v1280_v56  ;;  %v1282_v54 = vadd.f32 1.0, %v13277_v9  ;;  %v2197_v52 = vld [vmem:[%s19099_s1 + $0x500] sm:$0xff]  ;;  %v11902_v50 = vld [vmem:[%s19098_s2 + $0x8] ss:$72 sps:$4 sm:$0xff]   ;;  %v3832_v31 = vmul.f32 %v14531_v8, %v2104_v13 }
 0x19f   :  { %v13281_v6 = vpop.eup %13280  ;;  %v3133_v42 = vpop.permute.xlu1 %3132  ;;  %7719 = vmatprep.subr.bf16.mxu0 %v19166_v18  ;;  %13300 = vrcp.f32 %v1279_v53  ;;  %v1281_v7 = vadd.f32 1.0, %v13279_v62  ;;  %v11905_v56 = vld [vmem:[%s19098_s2 + $0x20] ss:$72 sps:$4 sm:$0xff]   ;;  %v135_v9 = vld [vmem:[%s19097_s0 + $0x390] sm:$0xff]  ;;  %v10467_v53 = vmul.f32 -1.442695, %v133_v5  ;;  %v3831_v27 = vmul.f32 %v14545_v17, %v2103_v60 }
 0x1a0   :  { %v13283_v22 = vpop.eup %13282  ;;  %v15093_v0 = vpack.c.bf16 %v3924_v21, %v3923_v12  ;;  %v3926_v48 = vmul.f32 %v3133_v42, %v2198_v43  ;;  %3412 = vperm.xlu1 %11829, %v15021_v30   ;;  %13302 = vrcp.f32 %v1282_v54  ;;  %v1284_v20 = vadd.f32 1.0, %v13281_v6  ;;  %v2200_v30 = vld [vmem:[%s19099_s1 + $0x518] sm:$0xff]  ;;  %v138_v62 = vld [vmem:[%s19097_s0 + $0x3a8] sm:$0xff]  ;;  %v137_v5 = vld [vmem:[%s19097_s0 + $0x3a0] sm:$0xff] }
 0x1a1   :  { %v13285_v40 = vpop.eup %13284  ;;  %v3128_v21 = vpop.permute.xlu0 %3127  ;;  %13304 = vrcp.f32 %v1281_v7  ;;  %v1283_v43 = vadd.f32 1.0, %v13283_v22  ;;  %v4085_v54 = vpack.c.bf16 %v15067_v28, %v15073_v39  ;;  %v2106_v6 = vld [vmem:[%s19099_s1 + $0x228] sm:$0xff]  ;;  %v10470_v7 = vmul.f32 -1.442695, %v136_v19  ;;  %v2105_v28 = vld [vmem:[%s19099_s1 + $0x220] sm:$0xff] }
 0x1a2   :  { %19176 = vst [vmem:[#allocation14_spill] sm:$0xff] %v15093_v0  ;;  %v13287_v12 = vpop.eup %13286  ;;  %v3925_v42 = vmul.f32 %v3128_v21, %v2197_v52  ;;  %3407 = vperm.xlu0 %11828, %v13285_v40   ;;  %7720 = vmatpush1.bf16.msra.mxu0 %v15093_v0  ;;  %13306 = vrcp.f32 %v1284_v20  ;;  %v2199_v52 = vld [vmem:[%s19099_s1 + $0x510] sm:$0xff]  ;;  %v10469_v19 = vmul.f32 -1.442695, %v135_v9  ;;  %v140_v20 = vld [vmem:[%s19097_s0 + $0x3b8] sm:$0xff]  ;;  %v2109_v0 = vld [vmem:[%s19099_s1 + $0x240] sm:$0xff] }
 0x1a3   :  { %v13289_v22 = vpop.eup %13288  ;;  %v3143_v39 = vpop.permute.xlu1 %3142  ;;  %7914 = vmatprep.subr.bf16.mxu0 %v19166_v18  ;;  %13308 = vrcp.f32 %v1283_v43  ;;  %v11908_v60 = vld [vmem:[%s19098_s2 + $0x9c] ss:$72 sps:$4 sm:$0xff]   ;;  %v10472_v40 = vmul.f32 -1.442695, %v138_v62  ;;  %v139_v21 = vld [vmem:[%s19097_s0 + $0x3b0] sm:$0xff]  ;;  %v15139_v43 = vmul.f32 %v14554_v25, %v2106_v6  ;;  %v142_v62 = vld [vmem:[%s19097_s0 + $0x3c8] sm:$0xff]  ;;  %v15151_v25 = vmul.f32 %v14565_v33, %v2105_v28 }
 0x1a4   :  { %v13291_v8 = vpop.eup %13290  ;;  %v4133_v13 = vpack.c.bf16 %v3926_v48, %v3925_v42  ;;  %v3928_v17 = vmul.f32 %v3143_v39, %v2200_v30  ;;  %7047 = vmatmul.mubr.bf16.vlgmr.msra.gmra.mrb[0].mxu1 %v11902_v50  ;;  %3422 = vperm.xlu1 %11829, %v13287_v12   ;;  %13310 = vpow2.f32 %v10468_v46  ;;  %v2202_v50 = vld [vmem:[%s19099_s1 + $0x528] sm:$0xff]  ;;  %v11910_v46 = vld [vmem:[%s19098_s2 + $0xb4] ss:$72 sps:$4 sm:$0xff]   ;;  %v10471_v30 = vmul.f32 -1.442695, %v137_v5  ;;  %v141_v6 = vld [vmem:[%s19097_s0 + $0x3c0] sm:$0xff] }
 0x1a5   :  { %v13293_v9 = vpop.eup %13292  ;;  %7240 = vmatpush1.bf16.msra.mxu1 %v4085_v54  ;;  %7722 = vmatmul.mubr.bf16.vlgmr.msra.gmra.mrb[0].mxu0 %v11905_v56  ;;  %v3138_v48 = vpop.permute.xlu0 %3137  ;;  %13312 = vpow2.f32 %v10467_v53  ;;  %v10474_v54 = vmul.f32 -1.442695, %v140_v20  ;;  %v4086_v53 = vpack.c.bf16 %v3832_v31, %v3831_v27  ;;  %v2108_v5 = vld [vmem:[%s19099_s1 + $0x238] sm:$0xff]  ;;  %v246_v28 = vld [vmem:[%s19097_s0 + $0x708] sm:$0xff]  ;;  %v2107_v31 = vld [vmem:[%s19099_s1 + $0x230] sm:$0xff] }
 0x1a6   :  { %v13295_v12 = vpop.eup %13294  ;;  %v3927_v56 = vmul.f32 %v3138_v48, %v2199_v52  ;;  %3417 = vperm.xlu0 %11828, %v13289_v22   ;;  %7915 = vmatpush1.bf16.msra.mxu0 %v4133_v13  ;;  %13314 = vpow2.f32 %v10470_v7  ;;  %v2201_v7 = vld [vmem:[%s19099_s1 + $0x520] sm:$0xff]  ;;  %v10473_v22 = vmul.f32 -1.442695, %v139_v21 }
 0x1a7   :  { %v15156_v42 = vpop.eup %13296  ;;  %7241 = vmatprep.subr.bf16.mxu1 %v19166_v18  ;;  %v3153_v33 = vpop.permute.xlu1 %3152  ;;  %7916 = vmatprep.subr.bf16.mxu0 %v19166_v18  ;;  %13316 = vpow2.f32 %v10469_v19  ;;  %v11912_v20 = vld [vmem:[%s19098_s2 + $0x98] ss:$72 sps:$4 sm:$0xff]   ;;  %v10476_v19 = vmul.f32 -1.442695, %v142_v62  ;;  %v4087_v62 = vpack.c.bf16 %v15139_v43, %v15151_v25  ;;  %v2203_v43 = vld [vmem:[%s19099_s1 + $0x530] sm:$0xff] }
 0x1a8   :  { %v15169_v27 = vpop.eup %13298  ;;  %v4134_v39 = vpack.c.bf16 %v3928_v17, %v3927_v56  ;;  %v3930_v52 = vmul.f32 %v3153_v33, %v2202_v50  ;;  %3432 = vperm.xlu1 %11829, %v13291_v8   ;;  %7054 = vmatprep.mubr.bf16.mxu1 %v11908_v60  ;;  %13318 = vpow2.f32 %v10472_v40  ;;  %v245_v13 = vld [vmem:[%s19097_s0 + $0x700] sm:$0xff]  ;;  %v2204_v8 = vld [vmem:[%s19099_s1 + $0x538] sm:$0xff]  ;;  %v10475_v60 = vmul.f32 -1.442695, %v141_v6  ;;  %v2110_v6 = vld [vmem:[%s19099_s1 + $0x248] sm:$0xff] }
 0x1a9   :  { %v15180_v21 = vpop.eup %13300  ;;  %7242 = vmatpush1.bf16.msra.mxu1 %v4086_v53  ;;  %v3148_v48 = vpop.permute.xlu0 %3147  ;;  %7729 = vmatprep.mubr.bf16.mxu0 %v11910_v46  ;;  %v11913_v17 = vld [vmem:[%s19098_s2 + $0xb0] ss:$72 sps:$4 sm:$0xff]   ;;  %13320 = vpow2.f32 %v10471_v30  ;;  %v10580_v56 = vmul.f32 -1.442695, %v246_v28  ;;  %v3836_v33 = vmul.f32 %v14570_v38, %v2108_v5  ;;  %v3835_v30 = vmul.f32 %v14578_v45, %v2107_v31  ;;  %v11914_v5 = vld [vmem:[%s19098_s2 + $0x12c] ss:$72 sps:$4 sm:$0xff]  }
 0x1aa   :  { %v248_v40 = vld [vmem:[%s19097_s0 + $0x718] sm:$0xff]  ;;  %v15191_v50 = vpop.eup %13302  ;;  %v3929_v46 = vmul.f32 %v3148_v48, %v2201_v7  ;;  %3427 = vperm.xlu0 %11828, %v13293_v9   ;;  %7917 = vmatpush1.bf16.msra.mxu0 %v4134_v39  ;;  %13322 = vpow2.f32 %v10474_v54  ;;  %v10579_v38 = vmul.f32 -1.442695, %v245_v13  ;;  %v11916_v39 = vld [vmem:[%s19098_s2 + $0x144] ss:$72 sps:$4 sm:$0xff]  }
 0x1ab   :  { %v15195_v53 = vpop.eup %13304  ;;  %7243 = vmatprep.subr.bf16.mxu1 %v19166_v18  ;;  %v3163_v9 = vpop.permute.xlu1 %3162  ;;  %7918 = vmatprep.subr.bf16.mxu0 %v19166_v18  ;;  %13324 = vpow2.f32 %v10473_v22  ;;  %v10582_v7 = vmul.f32 -1.442695, %v248_v40  ;;  %v2206_v22 = vld [vmem:[%s19099_s1 + $0x548] sm:$0xff]  ;;  %v4088_v48 = vpack.c.bf16 %v3836_v33, %v3835_v30  ;;  %v2208_v30 = vld [vmem:[%s19099_s1 + $0x558] sm:$0xff] }
 0x1ac   :  { %v15210_v45 = vpop.eup %13306  ;;  %v4135_v25 = vpack.c.bf16 %v3930_v52, %v3929_v46  ;;  %v3932_v54 = vmul.f32 %v3163_v9, %v2204_v8  ;;  %7055 = vmatmul.mubr.bf16.gmra.mrb[4].mxu1 %v11912_v20  ;;  %3442 = vperm.xlu1 %11829, %v13295_v12   ;;  %13326 = vpow2.f32 %v10476_v19  ;;  %v3838_v52 = vmul.f32 %v14583_v51, %v2110_v6  ;;  %v11919_v6 = vld [vmem:[%s19098_s2 + $0x140] ss:$72 sps:$4 sm:$0xff]  }
 0x1ad   :  { %v15215_v28 = vpop.eup %13308  ;;  %7244 = vmatpush1.bf16.msra.mxu1 %v4087_v62  ;;  %7730 = vmatmul.mubr.bf16.gmra.mrb[4].mxu0 %v11913_v17  ;;  %v3158_v31 = vpop.permute.xlu0 %3157  ;;  %13328 = vpow2.f32 %v10475_v60  ;;  %v3837_v20 = vmul.f32 %v14585_v55, %v2109_v0  ;;  %v2205_v17 = vld [vmem:[%s19099_s1 + $0x540] sm:$0xff]  ;;  %v2112_v55 = vld [vmem:[%s19099_s1 + $0x258] sm:$0xff]  ;;  %v2111_v0 = vld [vmem:[%s19099_s1 + $0x250] sm:$0xff] }
 0x1ae   :  { %v13311_v12 = vpop.eup %13310  ;;  %v3931_v19 = vmul.f32 %v3158_v31, %v2203_v43  ;;  %3437 = vperm.xlu0 %11828, %v15156_v42   ;;  %7919 = vmatpush1.bf16.msra.mxu0 %v4135_v25  ;;  %13330 = vpow2.f32 %v10580_v56  ;;  %v11918_v62 = vld [vmem:[%s19098_s2 + $0x128] ss:$72 sps:$4 sm:$0xff]   ;;  %v2113_v25 = vld [vmem:[%s19099_s1 + $0x260] sm:$0xff]  ;;  %v3840_v31 = vmul.f32 %v14587_v61, %v2112_v55 }
 0x1af   :  { %v13313_v13 = vpop.eup %13312  ;;  %7245 = vmatprep.subr.bf16.mxu1 %v19166_v18  ;;  %v3173_v8 = vpop.permute.xlu1 %3172  ;;  %7920 = vmatprep.subr.bf16.mxu0 %v19166_v18  ;;  %v1286_v60 = vadd.f32 1.0, %v13311_v12  ;;  %13332 = vpow2.f32 %v10579_v38  ;;  %v4089_v43 = vpack.c.bf16 %v3838_v52, %v3837_v20  ;;  %v2114_v38 = vld [vmem:[%s19099_s1 + $0x268] sm:$0xff]  ;;  %v2207_v12 = vld [vmem:[%s19099_s1 + $0x550] sm:$0xff]  ;;  %v11920_v61 = vld [vmem:[%s19098_s2 + $0x1bc] ss:$72 sps:$4 sm:$0xff]  }
 0x1b0   :  { %v13315_v51 = vpop.eup %13314  ;;  %v4136_v42 = vpack.c.bf16 %v3932_v54, %v3931_v19  ;;  %v3934_v40 = vmul.f32 %v3173_v8, %v2206_v22  ;;  %2862 = vperm.xlu1 %11829, %v15169_v27   ;;  %7062 = vmatprep.mubr.bf16.mxu1 %v11914_v5  ;;  %v1285_v46 = vadd.f32 1.0, %v13313_v13  ;;  %13334 = vpow2.f32 %v10582_v7 }
 0x1b1   :  { %v13317_v56 = vpop.eup %13316  ;;  %7246 = vmatpush1.bf16.msra.mxu1 %v4088_v48  ;;  %v3168_v33 = vpop.permute.xlu0 %3167  ;;  %7737 = vmatprep.mubr.bf16.mxu0 %v11916_v39  ;;  %13336 = vrcp.f32 %v1286_v60  ;;  %v1288_v27 = vadd.f32 1.0, %v13315_v51  ;;  %v3839_v22 = vmul.f32 %v14592_v4, %v2111_v0  ;;  %v15266_v48 = vmul.f32 %v14597_v11, %v2114_v38  ;;  %v11922_v60 = vld [vmem:[%s19098_s2 + $0x1d4] ss:$72 sps:$4 sm:$0xff]   ;;  %v250_v38 = vld [vmem:[%s19097_s0 + $0x728] sm:$0xff] }
 0x1b2   :  { %v13319_v9 = vpop.eup %13318  ;;  %v3933_v54 = vmul.f32 %v3168_v33, %v2205_v17  ;;  %2857 = vperm.xlu0 %11828, %v15180_v21   ;;  %7921 = vmatpush1.bf16.msra.mxu0 %v4136_v42  ;;  %13338 = vrcp.f32 %v1285_v46  ;;  %v1287_v5 = vadd.f32 1.0, %v13317_v56  ;;  %v15269_v8 = vmul.f32 %v14599_v16, %v2113_v25  ;;  %v2116_v11 = vld [vmem:[%s19099_s1 + $0x278] sm:$0xff]  ;;  %v2209_v46 = vld [vmem:[%s19099_s1 + $0x560] sm:$0xff] }
 0x1b3   :  { %v13321_v7 = vpop.eup %13320  ;;  %7247 = vmatprep.subr.bf16.mxu1 %v19166_v18  ;;  %v3183_v39 = vpop.permute.xlu1 %3182  ;;  %7922 = vmatprep.subr.bf16.mxu0 %v19166_v18  ;;  %13340 = vrcp.f32 %v1288_v27  ;;  %v1290_v52 = vadd.f32 1.0, %v13319_v9  ;;  %v11924_v9 = vld [vmem:[%s19098_s2 + $0x1b8] ss:$72 sps:$4 sm:$0xff]  }
 0x1b4   :  { %v13323_v21 = vpop.eup %13322  ;;  %v4137_v20 = vpack.c.bf16 %v3934_v40, %v3933_v54  ;;  %v3936_v19 = vmul.f32 %v3183_v39, %v2208_v30  ;;  %7063 = vmatmul.mubr.bf16.gmra.mrb[8].mxu1 %v11918_v62  ;;  %2872 = vperm.xlu1 %11829, %v15191_v50   ;;  %13342 = vrcp.f32 %v1287_v5  ;;  %v1289_v4 = vadd.f32 1.0, %v13321_v7  ;;  %v2210_v50 = vld [vmem:[%s19099_s1 + $0x568] sm:$0xff]  ;;  %v2115_v30 = vld [vmem:[%s19099_s1 + $0x270] sm:$0xff]  ;;  %v2212_v7 = vld [vmem:[%s19099_s1 + $0x578] sm:$0xff] }
 0x1b5   :  { %v13325_v13 = vpop.eup %13324  ;;  %7248 = vmatpush1.bf16.msra.mxu1 %v4089_v43  ;;  %7738 = vmatmul.mubr.bf16.gmra.mrb[8].mxu0 %v11919_v6  ;;  %v3178_v17 = vpop.permute.xlu0 %3177  ;;  %13344 = vrcp.f32 %v1290_v52  ;;  %v1292_v51 = vadd.f32 1.0, %v13323_v21  ;;  %v4090_v40 = vpack.c.bf16 %v3840_v31, %v3839_v22  ;;  %v4091_v54 = vpack.c.bf16 %v15266_v48, %v15269_v8  ;;  %v11925_v31 = vld [vmem:[%s19098_s2 + $0x1d0] ss:$72 sps:$4 sm:$0xff]   ;;  %v249_v39 = vld [vmem:[%s19097_s0 + $0x720] sm:$0xff] }
 0x1b6   :  { %v13327_v55 = vpop.eup %13326  ;;  %v3935_v16 = vmul.f32 %v3178_v17, %v2207_v12  ;;  %2867 = vperm.xlu0 %11828, %v15195_v53   ;;  %7923 = vmatpush1.bf16.msra.mxu0 %v4137_v20  ;;  %13346 = vrcp.f32 %v1289_v4  ;;  %v1291_v0 = vadd.f32 1.0, %v13325_v13  ;;  %v247_v53 = vld [vmem:[%s19097_s0 + $0x710] sm:$0xff]  ;;  %v15302_v5 = vmul.f32 %v14607_v26, %v2116_v11  ;;  %v2118_v26 = vld [vmem:[%s19099_s1 + $0x288] sm:$0xff]  ;;  %v2117_v13 = vld [vmem:[%s19099_s1 + $0x280] sm:$0xff] }
 0x1b7   :  { %v13329_v42 = vpop.eup %13328  ;;  %7249 = vmatprep.subr.bf16.mxu1 %v19166_v18  ;;  %v3193_v62 = vpop.permute.xlu1 %3192  ;;  %7924 = vmatprep.subr.bf16.mxu0 %v19166_v18  ;;  %13348 = vrcp.f32 %v1292_v51  ;;  %v1294_v56 = vadd.f32 1.0, %v13327_v55  ;;  %v10581_v20 = vmul.f32 -1.442695, %v247_v53  ;;  %v3843_v4 = vmul.f32 %v14618_v36, %v2115_v30  ;;  %v251_v36 = vld [vmem:[%s19097_s0 + $0x730] sm:$0xff]  ;;  %v253_v53 = vld [vmem:[%s19097_s0 + $0x740] sm:$0xff] }
 0x1b8   :  { %v13331_v33 = vpop.eup %13330  ;;  %v4138_v6 = vpack.c.bf16 %v3936_v19, %v3935_v16  ;;  %v3938_v27 = vmul.f32 %v3193_v62, %v2210_v50  ;;  %2882 = vperm.xlu1 %11829, %v15210_v45   ;;  %7070 = vmatprep.mubr.bf16.mxu1 %v11920_v61  ;;  %13350 = vrcp.f32 %v1291_v0  ;;  %v1293_v43 = vadd.f32 1.0, %v13329_v42  ;;  %v252_v19 = vld [vmem:[%s19097_s0 + $0x738] sm:$0xff]  ;;  %v11926_v55 = vld [vmem:[%s19098_s2 + $0x24c] ss:$72 sps:$4 sm:$0xff]  }
 0x1b9   :  { %v13333_v25 = vpop.eup %13332  ;;  %7250 = vmatpush1.bf16.msra.mxu1 %v4090_v40  ;;  %v3188_v45 = vpop.permute.xlu0 %3187  ;;  %7745 = vmatprep.mubr.bf16.mxu0 %v11922_v60  ;;  %13352 = vrcp.f32 %v1294_v56  ;;  %v1398_v22 = vadd.f32 1.0, %v13331_v33  ;;  %v10584_v17 = vmul.f32 -1.442695, %v250_v38  ;;  %v10583_v11 = vmul.f32 -1.442695, %v249_v39  ;;  %v254_v16 = vld [vmem:[%s19097_s0 + $0x748] sm:$0xff] }
 0x1ba   :  { %v13335_v12 = vpop.eup %13334  ;;  %v3937_v52 = vmul.f32 %v3188_v45, %v2209_v46  ;;  %2877 = vperm.xlu0 %11828, %v15215_v28   ;;  %7925 = vmatpush1.bf16.msra.mxu0 %v4138_v6  ;;  %13354 = vrcp.f32 %v1293_v43  ;;  %v1397_v21 = vadd.f32 1.0, %v13333_v25  ;;  %v2211_v28 = vld [vmem:[%s19099_s1 + $0x570] sm:$0xff]  ;;  %v15339_v42 = vmul.f32 %v14629_v47, %v2118_v26  ;;  %v2214_v62 = vld [vmem:[%s19099_s1 + $0x588] sm:$0xff]  ;;  %v2120_v38 = vld [vmem:[%s19099_s1 + $0x298] sm:$0xff] }
 0x1bb   :  { %v13337_v61 = vpop.eup %13336  ;;  %7251 = vmatprep.subr.bf16.mxu1 %v19166_v18  ;;  %v3203_v48 = vpop.permute.xlu1 %3202  ;;  %7926 = vmatprep.subr.bf16.mxu0 %v19166_v18  ;;  %13356 = vrcp.f32 %v1398_v22  ;;  %v1400_v8 = vadd.f32 1.0, %v13335_v12  ;;  %v11928_v46 = vld [vmem:[%s19098_s2 + $0x264] ss:$72 sps:$4 sm:$0xff]   ;;  %v10586_v56 = vmul.f32 -1.442695, %v252_v19  ;;  %v15351_v47 = vmul.f32 %v14640_v57, %v2117_v13  ;;  %v255_v45 = vld [vmem:[%s19097_s0 + $0x750] sm:$0xff] }
 0x1bc   :  { %v13339_v50 = vpop.eup %13338  ;;  %v4139_v60 = vpack.c.bf16 %v3938_v27, %v3937_v52  ;;  %v3940_v51 = vmul.f32 %v3203_v48, %v2212_v7  ;;  %7071 = vmatmul.mubr.bf16.gmra.mrb[12].mxu1 %v11924_v9  ;;  %2892 = vperm.xlu1 %11829, %v13337_v61   ;;  %13358 = vrcp.f32 %v1397_v21  ;;  %v10585_v6 = vmul.f32 -1.442695, %v251_v36  ;;  %v256_v27 = vld [vmem:[%s19097_s0 + $0x758] sm:$0xff]  ;;  %v2213_v25 = vld [vmem:[%s19099_s1 + $0x580] sm:$0xff]  ;;  %v2119_v7 = vld [vmem:[%s19099_s1 + $0x290] sm:$0xff] }
 0x1bd   :  { %v13341_v0 = vpop.eup %13340  ;;  %7252 = vmatpush1.bf16.msra.mxu1 %v4091_v54  ;;  %7746 = vmatmul.mubr.bf16.gmra.mrb[12].mxu0 %v11925_v31  ;;  %v3198_v40 = vpop.permute.xlu0 %3197  ;;  %13360 = vrcp.f32 %v1400_v8  ;;  %v4092_v43 = vpack.c.bf16 %v15302_v5, %v3843_v4  ;;  %v10588_v54 = vmul.f32 -1.442695, %v254_v16  ;;  %v11930_v39 = vld [vmem:[%s19098_s2 + $0x248] ss:$72 sps:$4 sm:$0xff]   ;;  %v10587_v12 = vmul.f32 -1.442695, %v253_v53 }
 0x1be   :  { %v13343_v33 = vpop.eup %13342  ;;  %v3939_v30 = vmul.f32 %v3198_v40, %v2211_v28  ;;  %2887 = vperm.xlu0 %11828, %v13339_v50   ;;  %7927 = vmatpush1.bf16.msra.mxu0 %v4139_v60  ;;  %13362 = vpow2.f32 %v10581_v20  ;;  %v258_v26 = vld [vmem:[%s19097_s0 + $0x768] sm:$0xff]  ;;  %v2216_v20 = vld [vmem:[%s19099_s1 + $0x598] sm:$0xff]  ;;  %v10590_v61 = vmul.f32 -1.442695, %v256_v27  ;;  %v257_v4 = vld [vmem:[%s19097_s0 + $0x760] sm:$0xff]  ;;  %v4093_v48 = vpack.c.bf16 %v15339_v42, %v15351_v47 }
 0x1bf   :  { %v13345_v9 = vpop.eup %13344  ;;  %7253 = vmatprep.subr.bf16.mxu1 %v19166_v18  ;;  %v3213_v57 = vpop.permute.xlu1 %3212  ;;  %7928 = vmatprep.subr.bf16.mxu0 %v19166_v18  ;;  %13364 = vpow2.f32 %v10584_v17  ;;  %v11931_v19 = vld [vmem:[%s19098_s2 + $0x260] ss:$72 sps:$4 sm:$0xff]   ;;  %v10589_v17 = vmul.f32 -1.442695, %v255_v45  ;;  %v260_v36 = vld [vmem:[%s19097_s0 + $0x778] sm:$0xff]  ;;  %v3848_v60 = vmul.f32 %v14648_v3, %v2120_v38  ;;  %v2215_v16 = vld [vmem:[%s19099_s1 + $0x590] sm:$0xff] }
 0x1c0   :  { %v13347_v5 = vpop.eup %13346  ;;  %v4140_v31 = vpack.c.bf16 %v3940_v51, %v3939_v30  ;;  %v3942_v22 = vmul.f32 %v3213_v57, %v2214_v62  ;;  %2902 = vperm.xlu1 %11829, %v13341_v0   ;;  %7078 = vmatprep.mubr.bf16.mxu1 %v11926_v55  ;;  %13366 = vpow2.f32 %v10583_v11  ;;  %v2122_v28 = vld [vmem:[%s19099_s1 + $0x2a8] sm:$0xff]  ;;  %v3847_v51 = vmul.f32 %v14659_v14, %v2119_v7  ;;  %v2121_v55 = vld [vmem:[%s19099_s1 + $0x2a0] sm:$0xff]  ;;  %v259_v3 = vld [vmem:[%s19097_s0 + $0x770] sm:$0xff] }
 0x1c1   :  { %v15377_v52 = vpop.eup %13348  ;;  %7254 = vmatpush1.bf16.msra.mxu1 %v4092_v43  ;;  %v3208_v21 = vpop.permute.xlu0 %3207  ;;  %7753 = vmatprep.mubr.bf16.mxu0 %v11928_v46  ;;  %13368 = vpow2.f32 %v10586_v56  ;;  %v10592_v0 = vmul.f32 -1.442695, %v258_v26  ;;  %v11932_v62 = vld [vmem:[%s19098_s2 + $0x2dc] ss:$72 sps:$4 sm:$0xff]   ;;  %v10591_v46 = vmul.f32 -1.442695, %v257_v4  ;;  %v15421_v53 = vmul.f32 %v14664_v23, %v2122_v28 }
 0x1c2   :  { %v15388_v13 = vpop.eup %13350  ;;  %v3941_v8 = vmul.f32 %v3208_v21, %v2213_v25  ;;  %2897 = vperm.xlu0 %11828, %v13343_v33   ;;  %7929 = vmatpush1.bf16.msra.mxu0 %v4140_v31  ;;  %13370 = vpow2.f32 %v10585_v6  ;;  %v2218_v47 = vld [vmem:[%s19099_s1 + $0x5a8] sm:$0xff]  ;;  %v11934_v30 = vld [vmem:[%s19098_s2 + $0x2f4] ss:$72 sps:$4 sm:$0xff]   ;;  %v10594_v6 = vmul.f32 -1.442695, %v260_v36  ;;  %v4094_v57 = vpack.c.bf16 %v3848_v60, %v3847_v51  ;;  %v2125_v4 = vld [vmem:[%s19099_s1 + $0x2c0] sm:$0xff] }
 0x1c3   :  { %v15398_v50 = vpop.eup %13352  ;;  %7255 = vmatprep.subr.bf16.mxu1 %v19166_v18  ;;  %v3223_v11 = vpop.permute.xlu1 %3222  ;;  %7930 = vmatprep.subr.bf16.mxu0 %v19166_v18  ;;  %13372 = vpow2.f32 %v10588_v54  ;;  %v10593_v23 = vmul.f32 -1.442695, %v259_v3  ;;  %v2217_v54 = vld [vmem:[%s19099_s1 + $0x5a0] sm:$0xff]  ;;  %v2220_v26 = vld [vmem:[%s19099_s1 + $0x5b8] sm:$0xff]  ;;  %v2219_v51 = vld [vmem:[%s19099_s1 + $0x5b0] sm:$0xff] }
 0x1c4   :  { %v15413_v14 = vpop.eup %13354  ;;  %v4141_v42 = vpack.c.bf16 %v3942_v22, %v3941_v8  ;;  %v3944_v40 = vmul.f32 %v3223_v11, %v2216_v20  ;;  %7079 = vmatmul.mubr.bf16.gmra.mrb[16].mxu1 %v11930_v39  ;;  %2912 = vperm.xlu1 %11829, %v13345_v9   ;;  %13374 = vpow2.f32 %v10587_v12  ;;  %v3849_v9 = vmul.f32 %v14666_v29, %v2121_v55  ;;  %v2124_v29 = vld [vmem:[%s19099_s1 + $0x2b8] sm:$0xff] }
 0x1c5   :  { %v15418_v56 = vpop.eup %13356  ;;  %7256 = vmatpush1.bf16.msra.mxu1 %v4093_v48  ;;  %7754 = vmatmul.mubr.bf16.gmra.mrb[16].mxu0 %v11931_v19  ;;  %v3218_v33 = vpop.permute.xlu0 %3217  ;;  %13376 = vpow2.f32 %v10590_v61  ;;  %v11936_v22 = vld [vmem:[%s19098_s2 + $0x2d8] ss:$72 sps:$4 sm:$0xff]   ;;  %v2126_v61 = vld [vmem:[%s19099_s1 + $0x2c8] sm:$0xff] }
 0x1c6   :  { %v15429_v27 = vpop.eup %13358  ;;  %v3943_v43 = vmul.f32 %v3218_v33, %v2215_v16  ;;  %2907 = vperm.xlu0 %11828, %v13347_v5   ;;  %7931 = vmatpush1.bf16.msra.mxu0 %v4141_v42  ;;  %13378 = vpow2.f32 %v10589_v17  ;;  %v2123_v5 = vld [vmem:[%s19099_s1 + $0x2b0] sm:$0xff]  ;;  %v4095_v19 = vpack.c.bf16 %v15421_v53, %v3849_v9  ;;  %v3852_v17 = vmul.f32 %v14668_v34, %v2124_v29  ;;  %v2221_v9 = vld [vmem:[%s19099_s1 + $0x5c0] sm:$0xff]  ;;  %v262_v29 = vld [vmem:[%s19097_s0 + $0x788] sm:$0xff] }
 0x1c7   :  { %v15432_v38 = vpop.eup %13360  ;;  %7257 = vmatprep.subr.bf16.mxu1 %v19166_v18  ;;  %v3233_v25 = vpop.permute.xlu1 %3232  ;;  %7932 = vmatprep.subr.bf16.mxu0 %v19166_v18  ;;  %13380 = vpow2.f32 %v10592_v0  ;;  %v11937_v21 = vld [vmem:[%s19098_s2 + $0x2f0] ss:$72 sps:$4 sm:$0xff]   ;;  %v3851_v36 = vmul.f32 %v14673_v41, %v2123_v5  ;;  %v11938_v34 = vld [vmem:[%s19098_s2 + $0x36c] ss:$72 sps:$4 sm:$0xff]   ;;  %v15475_v3 = vmul.f32 %v14678_v49, %v2126_v61  ;;  %v15478_v42 = vmul.f32 %v14680_v58, %v2125_v4 }
 0x1c8   :  { %v13363_v45 = vpop.eup %13362  ;;  %v4142_v7 = vpack.c.bf16 %v3944_v40, %v3943_v43  ;;  %v3946_v31 = vmul.f32 %v3233_v25, %v2218_v47  ;;  %2922 = vperm.xlu1 %11829, %v15377_v52   ;;  %7086 = vmatprep.mubr.bf16.mxu1 %v11932_v62  ;;  %13382 = vpow2.f32 %v10591_v46  ;;  %v11940_v62 = vld [vmem:[%s19098_s2 + $0x384] ss:$72 sps:$4 sm:$0xff]  }
 0x1c9   :  { %v13365_v39 = vpop.eup %13364  ;;  %7258 = vmatpush1.bf16.msra.mxu1 %v4094_v57  ;;  %v3228_v12 = vpop.permute.xlu0 %3227  ;;  %7761 = vmatprep.mubr.bf16.mxu0 %v11934_v30  ;;  %v1399_v20 = vadd.f32 1.0, %v13363_v45  ;;  %13384 = vpow2.f32 %v10594_v6  ;;  %v4096_v47 = vpack.c.bf16 %v3852_v17, %v3851_v36  ;;  %v2128_v30 = vld [vmem:[%s19099_s1 + $0x2d8] sm:$0xff] }
 0x1ca   :  { %v13367_v52 = vpop.eup %13366  ;;  %v3945_v48 = vmul.f32 %v3228_v12, %v2217_v54  ;;  %2917 = vperm.xlu0 %11828, %v15388_v13   ;;  %7933 = vmatpush1.bf16.msra.mxu0 %v4142_v7  ;;  %v1402_v28 = vadd.f32 1.0, %v13365_v39  ;;  %13386 = vpow2.f32 %v10593_v23  ;;  %v2127_v23 = vld [vmem:[%s19099_s1 + $0x2d0] sm:$0xff]  ;;  %v4097_v7 = vpack.c.bf16 %v15475_v3, %v15478_v42  ;;  %v266_v42 = vld [vmem:[%s19097_s0 + $0x7a8] sm:$0xff] }
 0x1cb   :  { %v13369_v8 = vpop.eup %13368  ;;  %7259 = vmatprep.subr.bf16.mxu1 %v19166_v18  ;;  %v3243_v60 = vpop.permute.xlu1 %3242  ;;  %7934 = vmatprep.subr.bf16.mxu0 %v19166_v18  ;;  %13388 = vrcp.f32 %v1399_v20  ;;  %v1401_v55 = vadd.f32 1.0, %v13367_v52  ;;  %v11942_v54 = vld [vmem:[%s19098_s2 + $0x368] ss:$72 sps:$4 sm:$0xff]   ;;  %v3855_v4 = vmul.f32 %v14693_v15, %v2127_v23  ;;  %v264_v15 = vld [vmem:[%s19097_s0 + $0x798] sm:$0xff] }
 0x1cc   :  { %v13371_v13 = vpop.eup %13370  ;;  %v4143_v11 = vpack.c.bf16 %v3946_v31, %v3945_v48  ;;  %v3948_v16 = vmul.f32 %v3243_v60, %v2220_v26  ;;  %7087 = vmatmul.mubr.bf16.gmra.mrb[20].mxu1 %v11936_v22  ;;  %2932 = vperm.xlu1 %11829, %v15398_v50   ;;  %13390 = vrcp.f32 %v1402_v28  ;;  %v1404_v41 = vadd.f32 1.0, %v13369_v8  ;;  %v2222_v50 = vld [vmem:[%s19099_s1 + $0x5c8] sm:$0xff]  ;;  %v11948_v23 = vld [vmem:[%s19098_s2 + $0x3f8] ss:$72 sps:$4 sm:$0xff]  }
 0x1cd   :  { %v13373_v0 = vpop.eup %13372  ;;  %7260 = vmatpush1.bf16.msra.mxu1 %v4095_v19  ;;  %7762 = vmatmul.mubr.bf16.gmra.mrb[20].mxu0 %v11937_v21  ;;  %v3238_v40 = vpop.permute.xlu0 %3237  ;;  %13392 = vrcp.f32 %v1401_v55  ;;  %v1403_v46 = vadd.f32 1.0, %v13371_v13  ;;  %v11943_v22 = vld [vmem:[%s19098_s2 + $0x380] ss:$72 sps:$4 sm:$0xff]   ;;  %v15514_v26 = vmul.f32 %v14682_v2, %v2128_v30  ;;  %v10596_v8 = vmul.f32 -1.442695, %v262_v29  ;;  %v268_v30 = vld [vmem:[%s19097_s0 + $0x7b8] sm:$0xff] }
 0x1ce   :  { %v13375_v53 = vpop.eup %13374  ;;  %v3947_v33 = vmul.f32 %v3238_v40, %v2219_v51  ;;  %2927 = vperm.xlu0 %11828, %v15413_v14   ;;  %7935 = vmatpush1.bf16.msra.mxu0 %v4143_v11  ;;  %13394 = vrcp.f32 %v1404_v41  ;;  %v1406_v49 = vadd.f32 1.0, %v13373_v0  ;;  %v2130_v21 = vld [vmem:[%s19099_s1 + $0x2e8] sm:$0xff]  ;;  %v261_v19 = vld [vmem:[%s19097_s0 + $0x780] sm:$0xff]  ;;  %v263_v11 = vld [vmem:[%s19097_s0 + $0x790] sm:$0xff] }
 0x1cf   :  { %v13377_v58 = vpop.eup %13376  ;;  %7261 = vmatprep.subr.bf16.mxu1 %v19166_v18  ;;  %v3253_v6 = vpop.permute.xlu1 %3252  ;;  %7936 = vmatprep.subr.bf16.mxu0 %v19166_v18  ;;  %13396 = vrcp.f32 %v1403_v46  ;;  %v1405_v14 = vadd.f32 1.0, %v13375_v53  ;;  %v2129_v2 = vld [vmem:[%s19099_s1 + $0x2e0] sm:$0xff]  ;;  %v2226_v51 = vld [vmem:[%s19099_s1 + $0x5e8] sm:$0xff]  ;;  %v11946_v41 = vld [vmem:[%s19098_s2 + $0x414] ss:$72 sps:$4 sm:$0xff]  }
 0x1d0   :  { %v13379_v43 = vpop.eup %13378  ;;  %v4144_v57 = vpack.c.bf16 %v3948_v16, %v3947_v33  ;;  %v3950_v25 = vmul.f32 %v3253_v6, %v2222_v50  ;;  %3452 = vperm.xlu1 %11829, %v15418_v56   ;;  %7094 = vmatprep.mubr.bf16.mxu1 %v11938_v34  ;;  %13398 = vrcp.f32 %v1406_v49  ;;  %v1408_v45 = vadd.f32 1.0, %v13377_v58  ;;  %v2224_v56 = vld [vmem:[%s19099_s1 + $0x5d8] sm:$0xff]  ;;  %v265_v46 = vld [vmem:[%s19097_s0 + $0x7a0] sm:$0xff] }
 0x1d1   :  { %v13381_v5 = vpop.eup %13380  ;;  %7262 = vmatpush1.bf16.msra.mxu1 %v4096_v47  ;;  %v3248_v31 = vpop.permute.xlu0 %3247  ;;  %7769 = vmatprep.mubr.bf16.mxu0 %v11940_v62  ;;  %13400 = vrcp.f32 %v1405_v14  ;;  %v1407_v39 = vadd.f32 1.0, %v13379_v43  ;;  %v11944_v55 = vld [vmem:[%s19098_s2 + $0x3fc] ss:$72 sps:$4 sm:$0xff]   ;;  %v15546_v34 = vmul.f32 %v14704_v32, %v2130_v21  ;;  %v10595_v3 = vmul.f32 -1.442695, %v261_v19 }
 0x1d2   :  { %v13383_v12 = vpop.eup %13382  ;;  %v3949_v20 = vmul.f32 %v3248_v31, %v2221_v9  ;;  %3447 = vperm.xlu0 %11828, %v15429_v27   ;;  %7937 = vmatpush1.bf16.msra.mxu0 %v4144_v57  ;;  %13402 = vrcp.f32 %v1408_v45  ;;  %v1410_v52 = vadd.f32 1.0, %v13381_v5  ;;  %v2223_v27 = vld [vmem:[%s19099_s1 + $0x5d0] sm:$0xff]  ;;  %v15555_v50 = vmul.f32 %v14715_v44, %v2129_v2  ;;  %v2132_v49 = vld [vmem:[%s19099_s1 + $0x2f8] sm:$0xff]  ;;  %v2225_v58 = vld [vmem:[%s19099_s1 + $0x5e0] sm:$0xff] }
 0x1d3   :  { %v13385_v61 = vpop.eup %13384  ;;  %7263 = vmatprep.subr.bf16.mxu1 %v19166_v18  ;;  %v3263_v48 = vpop.permute.xlu1 %3262  ;;  %7938 = vmatprep.subr.bf16.mxu0 %v19166_v18  ;;  %13404 = vrcp.f32 %v1407_v39  ;;  %v1409_v28 = vadd.f32 1.0, %v13383_v12  ;;  %v10598_v62 = vmul.f32 -1.442695, %v264_v15  ;;  %v4098_v33 = vpack.c.bf16 %v15514_v26, %v3855_v4  ;;  %v2131_v9 = vld [vmem:[%s19099_s1 + $0x2f0] sm:$0xff]  ;;  %v2228_v29 = vld [vmem:[%s19099_s1 + $0x5f8] sm:$0xff]  ;;  %v270_v31 = vld [vmem:[%s19097_s0 + $0x7c8] sm:$0xff] }
 0x1d4   :  { %v13387_v17 = vpop.eup %13386  ;;  %v4145_v36 = vpack.c.bf16 %v3950_v25, %v3949_v20  ;;  %v3952_v60 = vmul.f32 %v3263_v48, %v2224_v56  ;;  %7095 = vmatmul.mubr.bf16.gmra.mrb[24].mxu1 %v11942_v54  ;;  %3462 = vperm.xlu1 %11829, %v15432_v38   ;;  %13406 = vrcp.f32 %v1410_v52  ;;  %v1412_v13 = vadd.f32 1.0, %v13385_v61  ;;  %v267_v25 = vld [vmem:[%s19097_s0 + $0x7b0] sm:$0xff]  ;;  %v269_v26 = vld [vmem:[%s19097_s0 + $0x7c0] sm:$0xff]  ;;  %v272_v2 = vld [vmem:[%s19097_s0 + $0x7d8] sm:$0xff] }
 0x1d5   :  { %v13389_v16 = vpop.eup %13388  ;;  %7264 = vmatpush1.bf16.msra.mxu1 %v4097_v7  ;;  %7770 = vmatmul.mubr.bf16.gmra.mrb[24].mxu0 %v11943_v22  ;;  %v3258_v38 = vpop.permute.xlu0 %3257  ;;  %13408 = vrcp.f32 %v1409_v28  ;;  %v1411_v0 = vadd.f32 1.0, %v13387_v17  ;;  %v10597_v47 = vmul.f32 -1.442695, %v263_v11  ;;  %v10600_v57 = vmul.f32 -1.442695, %v266_v42  ;;  %v2227_v61 = vld [vmem:[%s19099_s1 + $0x5f0] sm:$0xff] }
 0x1d6   :  { %v13391_v40 = vpop.eup %13390  ;;  %v3951_v32 = vmul.f32 %v3258_v38, %v2223_v27  ;;  %3457 = vperm.xlu0 %11828, %v13389_v16   ;;  %7939 = vmatpush1.bf16.msra.mxu0 %v4145_v36  ;;  %13410 = vrcp.f32 %v1412_v13  ;;  %v11949_v5 = vld [vmem:[%s19098_s2 + $0x410] ss:$72 sps:$4 sm:$0xff]   ;;  %v10599_v7 = vmul.f32 -1.442695, %v265_v46  ;;  %v4099_v22 = vpack.c.bf16 %v15546_v34, %v15555_v50  ;;  %v11952_v36 = vld [vmem:[%s19098_s2 + $0x4a4] ss:$72 sps:$4 sm:$0xff]  }
 0x1d7   :  { %v13393_v53 = vpop.eup %13392  ;;  %7265 = vmatprep.subr.bf16.mxu1 %v19166_v18  ;;  %v3273_v44 = vpop.permute.xlu1 %3272  ;;  %7940 = vmatprep.subr.bf16.mxu0 %v19166_v18  ;;  %13412 = vrcp.f32 %v1411_v0  ;;  %v10602_v12 = vmul.f32 -1.442695, %v268_v30  ;;  %v3860_v20 = vmul.f32 %v14723_v59, %v2132_v49  ;;  %v3859_v52 = vmul.f32 %v14734_v10, %v2131_v9  ;;  %v11950_v10 = vld [vmem:[%s19098_s2 + $0x48c] ss:$72 sps:$4 sm:$0xff]   ;;  %v11954_v42 = vld [vmem:[%s19098_s2 + $0x488] ss:$72 sps:$4 sm:$0xff]  }
 0x1d8   :  { %v13395_v6 = vpop.eup %13394  ;;  %v4146_v14 = vpack.c.bf16 %v3952_v60, %v3951_v32  ;;  %v3954_v43 = vmul.f32 %v3273_v44, %v2226_v51  ;;  %3472 = vperm.xlu1 %11829, %v13391_v40   ;;  %7102 = vmatprep.mubr.bf16.mxu1 %v11944_v55  ;;  %13414 = vpow2.f32 %v10596_v8  ;;  %v10601_v4 = vmul.f32 -1.442695, %v267_v25  ;;  %v271_v8 = vld [vmem:[%s19097_s0 + $0x7d0] sm:$0xff]  ;;  %v274_v51 = vld [vmem:[%s19097_s0 + $0x7e8] sm:$0xff]  ;;  %v11956_v46 = vld [vmem:[%s19098_s2 + $0x51c] ss:$72 sps:$4 sm:$0xff]  }
 0x1d9   :  { %v13397_v54 = vpop.eup %13396  ;;  %7266 = vmatpush1.bf16.msra.mxu1 %v4098_v33  ;;  %v3268_v45 = vpop.permute.xlu0 %3267  ;;  %7777 = vmatprep.mubr.bf16.mxu0 %v11946_v41  ;;  %13416 = vpow2.f32 %v10595_v3  ;;  %v10604_v28 = vmul.f32 -1.442695, %v270_v31  ;;  %v10603_v60 = vmul.f32 -1.442695, %v269_v26  ;;  %v10606_v11 = vmul.f32 -1.442695, %v272_v2 }
 0x1da   :  { %v13399_v56 = vpop.eup %13398  ;;  %v3953_v39 = vmul.f32 %v3268_v45, %v2225_v58  ;;  %3467 = vperm.xlu0 %11828, %v13393_v53   ;;  %7941 = vmatpush1.bf16.msra.mxu0 %v4146_v14  ;;  %13418 = vpow2.f32 %v10598_v62  ;;  %v4100_v34 = vpack.c.bf16 %v3860_v20, %v3859_v52  ;;  %v10605_v41 = vmul.f32 -1.442695, %v271_v8  ;;  %v11955_v62 = vld [vmem:[%s19098_s2 + $0x4a0] ss:$72 sps:$4 sm:$0xff]   ;;  %v11958_v33 = vld [vmem:[%s19098_s2 + $0x534] ss:$72 sps:$4 sm:$0xff]  }
 0x1db   :  { %v13401_v21 = vpop.eup %13400  ;;  %7267 = vmatprep.subr.bf16.mxu1 %v19166_v18  ;;  %v3283_v19 = vpop.permute.xlu1 %3282  ;;  %7942 = vmatprep.subr.bf16.mxu0 %v19166_v18  ;;  %13420 = vpow2.f32 %v10597_v47  ;;  %v10608_v40 = vmul.f32 -1.442695, %v274_v51  ;;  %v11964_v26 = vld [vmem:[%s19098_s2 + $0x5c4] ss:$72 sps:$4 sm:$0xff]  }
 0x1dc   :  { %v13403_v48 = vpop.eup %13402  ;;  %v4147_v27 = vpack.c.bf16 %v3954_v43, %v3953_v39  ;;  %v3956_v59 = vmul.f32 %v3283_v19, %v2228_v29  ;;  %7103 = vmatmul.mubr.bf16.gmra.mrb[28].mxu1 %v11948_v23  ;;  %3482 = vperm.xlu1 %11829, %v13395_v6   ;;  %13422 = vpow2.f32 %v10600_v57  ;;  %v11960_v29 = vld [vmem:[%s19098_s2 + $0x518] ss:$72 sps:$4 sm:$0xff]  }
 0x1dd   :  { %v13405_v15 = vpop.eup %13404  ;;  %7268 = vmatpush1.bf16.msra.mxu1 %v4099_v22  ;;  %7778 = vmatmul.mubr.bf16.gmra.mrb[28].mxu0 %v11949_v5  ;;  %v3278_v17 = vpop.permute.xlu0 %3277  ;;  %13424 = vpow2.f32 %v10599_v7  ;;  %v11962_v22 = vld [vmem:[%s19098_s2 + $0x5ac] ss:$72 sps:$4 sm:$0xff]  }
 0x1de   :  { %v13407_v55 = vpop.eup %13406  ;;  %v3955_v13 = vmul.f32 %v3278_v17, %v2227_v61  ;;  %3477 = vperm.xlu0 %11828, %v13397_v54   ;;  %7943 = vmatpush1.bf16.msra.mxu0 %v4147_v27  ;;  %13426 = vpow2.f32 %v10602_v12  ;;  %v273_v61 = vld [vmem:[%s19097_s0 + $0x7e0] sm:$0xff] }
 0x1df   :  { %v15617_v16 = vpop.eup %13408  ;;  %7269 = vmatprep.subr.bf16.mxu1 %v19166_v18  ;;  %v15620_v38 = vpop.permute.xlu1 %2822  ;;  %7944 = vmatprep.subr.bf16.mxu0 %v19166_v18  ;;  %13428 = vpow2.f32 %v10601_v4  ;;  %v10607_v17 = vmul.f32 -1.442695, %v273_v61 }
 0x1e0   :  { %v15623_v0 = vpop.eup %13410  ;;  %v4148_v3 = vpack.c.bf16 %v3956_v59, %v3955_v13  ;;  %3492 = vperm.xlu1 %11829, %v13399_v56   ;;  %7110 = vmatprep.mubr.bf16.mxu1 %v11950_v10  ;;  %13430 = vpow2.f32 %v10604_v28  ;;  %v11961_v56 = vld [vmem:[%s19098_s2 + $0x530] ss:$72 sps:$4 sm:$0xff]  }
 0x1e1   :  { %v15628_v50 = vpop.eup %13412  ;;  %7270 = vmatpush1.bf16.msra.mxu1 %v4100_v34  ;;  %v15630_v32 = vpop.permute.xlu0 %2817  ;;  %7785 = vmatprep.mubr.bf16.mxu0 %v11952_v36  ;;  %13432 = vpow2.f32 %v10603_v60  ;;  %v275_v28 = vld [vmem:[%s19097_s0 + $0x7f0] sm:$0xff]  ;;  %v144_v36 = vld [vmem:[%s19097_s0 + $0x3d8] sm:$0xff] }
 0x1e2   :  { %v13415_v53 = vpop.eup %13414  ;;  %3487 = vperm.xlu0 %11828, %v13401_v21   ;;  %7945 = vmatpush1.bf16.msra.mxu0 %v4148_v3  ;;  %13434 = vpow2.f32 %v10606_v11  ;;  %v146_v3 = vld [vmem:[%s19097_s0 + $0x3e8] sm:$0xff] }
 0x1e3   :  { %v13417_v49 = vpop.eup %13416  ;;  %v15641_v44 = vpop.permute.xlu1 %2832  ;;  %v1414_v58 = vadd.f32 1.0, %v13415_v53  ;;  %8139 = vmatprep.subr.bf16.mxu0 %v19166_v18  ;;  %13436 = vpow2.f32 %v10605_v41  ;;  %7464 = vmatprep.subr.bf16.mxu1 %v19166_v18  ;;  %v11967_v41 = vld [vmem:[%s19098_s2 + $0x5c0] ss:$72 sps:$4 sm:$0xff]  }
 0x1e4   :  { %v13419_v47 = vpop.eup %13418  ;;  %7111 = vmatmul.mubr.bf16.gmra.mrb[32].mxu1 %v11954_v42  ;;  %3502 = vperm.xlu1 %11829, %v13403_v48   ;;  %v1413_v30 = vadd.f32 1.0, %v13417_v49  ;;  %13438 = vpow2.f32 %v10608_v40  ;;  %v276_v48 = vld [vmem:[%s19097_s0 + $0x7f8] sm:$0xff] }
 0x1e5   :  { %v13421_v6 = vpop.eup %13420  ;;  %7786 = vmatmul.mubr.bf16.gmra.mrb[32].mxu0 %v11955_v62  ;;  %v15645_v9 = vpop.permute.xlu0 %2827  ;;  %7118 = vmatprep.mubr.bf16.mxu1 %v11956_v46  ;;  %13440 = vrcp.f32 %v1414_v58  ;;  %v1416_v14 = vadd.f32 1.0, %v13419_v47  ;;  %v10610_v11 = vmul.f32 -1.442695, %v276_v48  ;;  %v10478_v62 = vmul.f32 -1.442695, %v144_v36  ;;  %v145_v46 = vld [vmem:[%s19097_s0 + $0x3e0] sm:$0xff] }
 0x1e6   :  { %v13423_v43 = vpop.eup %13422  ;;  %3497 = vperm.xlu0 %11828, %v13405_v15   ;;  %7793 = vmatprep.mubr.bf16.mxu0 %v11958_v33  ;;  %13442 = vrcp.f32 %v1413_v30  ;;  %v1415_v23 = vadd.f32 1.0, %v13421_v6  ;;  %v11970_v33 = vld [vmem:[%s19098_s2 + $0x654] ss:$72 sps:$4 sm:$0xff]   ;;  %v10480_v6 = vmul.f32 -1.442695, %v146_v3 }
 0x1e7   :  { %v13425_v57 = vpop.eup %13424  ;;  %v15647_v25 = vpop.permute.xlu1 %2842  ;;  %13444 = vrcp.f32 %v1416_v14  ;;  %v1418_v54 = vadd.f32 1.0, %v13423_v43  ;;  %v148_v58 = vld [vmem:[%s19097_s0 + $0x3f8] sm:$0xff]  ;;  %v147_v14 = vld [vmem:[%s19097_s0 + $0x3f0] sm:$0xff] }
 0x1e8   :  { %v13427_v45 = vpop.eup %13426  ;;  %3512 = vperm.xlu1 %11829, %v13407_v55   ;;  %13446 = vrcp.f32 %v1415_v23  ;;  %v1417_v5 = vadd.f32 1.0, %v13425_v57  ;;  %v11966_v55 = vld [vmem:[%s19098_s2 + $0x5a8] ss:$72 sps:$4 sm:$0xff]   ;;  %v10479_v23 = vmul.f32 -1.442695, %v145_v46 }
 0x1e9   :  { %v13429_v7 = vpop.eup %13428  ;;  %v15652_v31 = vpop.permute.xlu0 %2837  ;;  %13448 = vrcp.f32 %v1418_v54  ;;  %v1420_v39 = vadd.f32 1.0, %v13427_v45  ;;  %v278_v57 = vld [vmem:[%s19097_s0 + $0x808] sm:$0xff]  ;;  %v11973_v48 = vld [vmem:[%s19098_s2 + $0x650] ss:$72 sps:$4 sm:$0xff]  }
 0x1ea   :  { %v13431_v12 = vpop.eup %13430  ;;  %3507 = vperm.xlu0 %11828, %v15617_v16   ;;  %13450 = vrcp.f32 %v1417_v5  ;;  %v1419_v21 = vadd.f32 1.0, %v13429_v7  ;;  %v143_v16 = vld [vmem:[%s19097_s0 + $0x3d0] sm:$0xff]  ;;  %v277_v5 = vld [vmem:[%s19097_s0 + $0x800] sm:$0xff] }
 0x1eb   :  { %v13433_v20 = vpop.eup %13432  ;;  %v15664_v52 = vpop.permute.xlu1 %2852  ;;  %13452 = vrcp.f32 %v1420_v39  ;;  %v1422_v19 = vadd.f32 1.0, %v13431_v12  ;;  %v10477_v49 = vmul.f32 -1.442695, %v143_v16  ;;  %v10611_v61 = vmul.f32 -1.442695, %v277_v5 }
 0x1ec   :  { %v13435_v4 = vpop.eup %13434  ;;  %7119 = vmatmul.mubr.bf16.gmra.mrb[36].mxu1 %v11960_v29  ;;  %3522 = vperm.xlu1 %11829, %v15623_v0   ;;  %13454 = vrcp.f32 %v1419_v21  ;;  %v1421_v2 = vadd.f32 1.0, %v13433_v20  ;;  %v10609_v0 = vmul.f32 -1.442695, %v275_v28  ;;  %v10482_v29 = vmul.f32 -1.442695, %v148_v58  ;;  %v279_v21 = vld [vmem:[%s19097_s0 + $0x810] sm:$0xff] }
 0x1ed   :  { %v13437_v27 = vpop.eup %13436  ;;  %7794 = vmatmul.mubr.bf16.gmra.mrb[36].mxu0 %v11961_v56  ;;  %v15673_v59 = vpop.permute.xlu0 %2847  ;;  %7126 = vmatprep.mubr.bf16.mxu1 %v11962_v22  ;;  %13456 = vrcp.f32 %v1422_v19  ;;  %v1424_v10 = vadd.f32 1.0, %v13435_v4  ;;  %v10481_v56 = vmul.f32 -1.442695, %v147_v14  ;;  %v280_v22 = vld [vmem:[%s19097_s0 + $0x818] sm:$0xff]  ;;  %v11979_v58 = vld [vmem:[%s19098_s2 + $0x6c8] ss:$72 sps:$4 sm:$0xff]  }
 0x1ee   :  { %v13439_v8 = vpop.eup %13438  ;;  %3517 = vperm.xlu0 %11828, %v15628_v50   ;;  %7801 = vmatprep.mubr.bf16.mxu0 %v11964_v26  ;;  %13458 = vrcp.f32 %v1421_v2  ;;  %v1423_v15 = vadd.f32 1.0, %v13437_v27  ;;  %v11968_v50 = vld [vmem:[%s19098_s2 + $0x63c] ss:$72 sps:$4 sm:$0xff]   ;;  %v10612_v26 = vmul.f32 -1.442695, %v278_v57 }
 0x1ef   :  { %v13441_v60 = vpop.eup %13440  ;;  %v15682_v51 = vpop.permute.xlu1 %3292  ;;  %13460 = vrcp.f32 %v1424_v10  ;;  %v1426_v13 = vadd.f32 1.0, %v13439_v8  ;;  %v11972_v19 = vld [vmem:[%s19098_s2 + $0x638] ss:$72 sps:$4 sm:$0xff]   ;;  %v11974_v27 = vld [vmem:[%s19098_s2 + $0x6cc] ss:$72 sps:$4 sm:$0xff]  }
 0x1f0   :  { %v13443_v34 = vpop.eup %13442  ;;  %3532 = vperm.xlu1 %11829, %v13441_v60   ;;  %13462 = vrcp.f32 %v1423_v15  ;;  %v10614_v10 = vmul.f32 -1.442695, %v280_v22  ;;  %v11978_v8 = vld [vmem:[%s19098_s2 + $0x2c] ss:$72 sps:$4 sm:$0xff]   ;;  %v10613_v15 = vmul.f32 -1.442695, %v279_v21 }
 0x1f1   :  { %v13445_v42 = vpop.eup %13444  ;;  %v15696_v40 = vpop.permute.xlu0 %3287  ;;  %13464 = vrcp.f32 %v1426_v13  ;;  %v2230_v13 = vld [vmem:[%s19099_s1 + $0x608] sm:$0xff] }
 0x1f2   :  { %v13447_v53 = vpop.eup %13446  ;;  %3527 = vperm.xlu0 %11828, %v13443_v34   ;;  %13466 = vpow2.f32 %v10607_v17  ;;  %v3958_v46 = vmul.f32 %v15682_v51, %v2230_v13  ;;  %v11976_v51 = vld [vmem:[%s19098_s2 + $0x28] ss:$72 sps:$4 sm:$0xff]  }
 0x1f3   :  { %v13449_v47 = vpop.eup %13448  ;;  %v15710_v30 = vpop.permute.xlu1 %3302  ;;  %13468 = vpow2.f32 %v10610_v11  ;;  %v2229_v11 = vld [vmem:[%s19099_s1 + $0x600] sm:$0xff] }
 0x1f4   :  { %v13451_v43 = vpop.eup %13450  ;;  %7127 = vmatmul.mubr.bf16.gmra.mrb[40].mxu1 %v11966_v55  ;;  %3542 = vperm.xlu1 %11829, %v13445_v42   ;;  %13470 = vpow2.f32 %v10609_v0 }
 0x1f5   :  { %v13453_v54 = vpop.eup %13452  ;;  %7802 = vmatmul.mubr.bf16.gmra.mrb[40].mxu0 %v11967_v41  ;;  %v15718_v45 = vpop.permute.xlu0 %3297  ;;  %7134 = vmatprep.mubr.bf16.mxu1 %v11968_v50  ;;  %13472 = vpow2.f32 %v10478_v62 }
 0x1f6   :  { %v13455_v7 = vpop.eup %13454  ;;  %3537 = vperm.xlu0 %11828, %v13447_v53   ;;  %7809 = vmatprep.mubr.bf16.mxu0 %v11970_v33  ;;  %13474 = vpow2.f32 %v10477_v49  ;;  %v3957_v53 = vmul.f32 %v15696_v40, %v2229_v11  ;;  %v2232_v33 = vld [vmem:[%s19099_s1 + $0x618] sm:$0xff]  ;;  %v2231_v49 = vld [vmem:[%s19099_s1 + $0x610] sm:$0xff] }
 0x1f7   :  { %v13457_v39 = vpop.eup %13456  ;;  %v15726_v12 = vpop.permute.xlu1 %3312  ;;  %13476 = vpow2.f32 %v10480_v6  ;;  %v11980_v40 = vld [vmem:[%s19098_s2 + $0x75c] ss:$72 sps:$4 sm:$0xff]   ;;  %v3959_v5 = vmul.f32 %v15718_v45, %v2231_v49 }
 0x1f8   :  { %v13459_v20 = vpop.eup %13458  ;;  %3552 = vperm.xlu1 %11829, %v13449_v47   ;;  %13478 = vpow2.f32 %v10479_v23  ;;  %v284_v11 = vld [vmem:[%s19097_s0 + $0x838] sm:$0xff] }
 0x1f9   :  { %v15734_v4 = vpop.eup %13460  ;;  %v15736_v2 = vpop.permute.xlu0 %3307  ;;  %13480 = vpow2.f32 %v10482_v29  ;;  %v3960_v29 = vmul.f32 %v15710_v30, %v2232_v33  ;;  %v282_v30 = vld [vmem:[%s19097_s0 + $0x828] sm:$0xff] }
 0x1fa   :  { %v15744_v28 = vpop.eup %13462  ;;  %3547 = vperm.xlu0 %11828, %v13451_v43   ;;  %13482 = vpow2.f32 %v10481_v56  ;;  %v11982_v56 = vld [vmem:[%s19098_s2 + $0xbc] ss:$72 sps:$4 sm:$0xff]  }
 0x1fb   :  { %v15749_v17 = vpop.eup %13464  ;;  %v15751_v36 = vpop.permute.xlu1 %3322  ;;  %13484 = vpow2.f32 %v10612_v26  ;;  %v4149_v26 = vpack.c.bf16 %v3958_v46, %v3957_v53  ;;  %v286_v53 = vld [vmem:[%s19097_s0 + $0x848] sm:$0xff] }
 0x1fc   :  { %v13467_v60 = vpop.eup %13466  ;;  %7135 = vmatmul.mubr.bf16.gmra.mrb[44].mxu1 %v11972_v19  ;;  %3562 = vperm.xlu1 %11829, %v13453_v54   ;;  %13486 = vpow2.f32 %v10611_v61  ;;  %v2233_v19 = vld [vmem:[%s19099_s1 + $0x620] sm:$0xff] }
 0x1fd   :  { %v13469_v55 = vpop.eup %13468  ;;  %7810 = vmatmul.mubr.bf16.gmra.mrb[44].mxu0 %v11973_v48  ;;  %v15759_v16 = vpop.permute.xlu0 %3317  ;;  %7142 = vmatprep.mubr.bf16.mxu1 %v11974_v27  ;;  %v1425_v34 = vadd.f32 1.0, %v13467_v60  ;;  %13488 = vpow2.f32 %v10614_v10  ;;  %v281_v10 = vld [vmem:[%s19097_s0 + $0x820] sm:$0xff]  ;;  %v2236_v60 = vld [vmem:[%s19099_s1 + $0x638] sm:$0xff] }
 0x1fe   :  { %v13471_v41 = vpop.eup %13470  ;;  %3557 = vperm.xlu0 %11828, %v13455_v7   ;;  %7946 = vmatprep.mubr.bf16.mxu0 %v11978_v8  ;;  %v1428_v0 = vadd.f32 1.0, %v13469_v55  ;;  %13490 = vpow2.f32 %v10613_v15  ;;  %v4150_v15 = vpack.c.bf16 %v3960_v29, %v3959_v5  ;;  %v288_v29 = vld [vmem:[%s19097_s0 + $0x858] sm:$0xff] }
 0x1ff   :  { %v13473_v3 = vpop.eup %13472  ;;  %v15761_v42 = vpop.permute.xlu1 %3332  ;;  %13492 = vrcp.f32 %v1425_v34  ;;  %v1427_v50 = vadd.f32 1.0, %v13471_v41  ;;  %v283_v34 = vld [vmem:[%s19097_s0 + $0x830] sm:$0xff] }
 0x200   :  { %v13475_v62 = vpop.eup %13474  ;;  %3572 = vperm.xlu1 %11829, %v13457_v39   ;;  %13494 = vrcp.f32 %v1428_v0  ;;  %v1296_v47 = vadd.f32 1.0, %v13473_v3  ;;  %v3961_v3 = vmul.f32 %v15736_v2, %v2233_v19 }
 0x201   :  { %v13477_v6 = vpop.eup %13476  ;;  %v15774_v14 = vpop.permute.xlu0 %3327  ;;  %13496 = vrcp.f32 %v1427_v50  ;;  %v1295_v43 = vadd.f32 1.0, %v13475_v62  ;;  %v11984_v50 = vld [vmem:[%s19098_s2 + $0x758] ss:$72 sps:$4 sm:$0xff]  }
 0x202   :  { %v13479_v23 = vpop.eup %13478  ;;  %3567 = vperm.xlu0 %11828, %v13459_v20   ;;  %13498 = vrcp.f32 %v1296_v47  ;;  %v1298_v57 = vadd.f32 1.0, %v13477_v6  ;;  %v2234_v20 = vld [vmem:[%s19099_s1 + $0x628] sm:$0xff]  ;;  %v11985_v62 = vld [vmem:[%s19098_s2 + $0xb8] ss:$72 sps:$4 sm:$0xff]   ;;  %v10618_v6 = vmul.f32 -1.442695, %v284_v11 }
 0x203   :  { %v13481_v54 = vpop.eup %13480  ;;  %v15784_v7 = vpop.permute.xlu1 %3342  ;;  %13500 = vrcp.f32 %v1295_v43  ;;  %v1297_v22 = vadd.f32 1.0, %v13479_v23  ;;  %v3962_v0 = vmul.f32 %v15726_v12, %v2234_v20  ;;  %v2235_v12 = vld [vmem:[%s19099_s1 + $0x630] sm:$0xff] }
 0x204   :  { %v13483_v39 = vpop.eup %13482  ;;  %7143 = vmatmul.mubr.bf16.gmra.mrb[48].mxu1 %v11979_v58  ;;  %3582 = vperm.xlu1 %11829, %v15734_v4   ;;  %13502 = vrcp.f32 %v1298_v57  ;;  %v1300_v21 = vadd.f32 1.0, %v13481_v54  ;;  %v10615_v58 = vmul.f32 -1.442695, %v281_v10  ;;  %v11988_v57 = vld [vmem:[%s19098_s2 + $0x14c] ss:$72 sps:$4 sm:$0xff]   ;;  %v2240_v10 = vld [vmem:[%s19099_s1 + $0x658] sm:$0xff] }
 0x205   :  { %v13485_v45 = vpop.eup %13484  ;;  %7947 = vmatmul.mubr.bf16.vlgmr.msra.gmra.mrb[0].mxu0 %v11976_v51  ;;  %v15799_v61 = vpop.permute.xlu0 %3337  ;;  %7150 = vmatprep.mubr.bf16.mxu1 %v11980_v40  ;;  %13504 = vrcp.f32 %v1297_v22  ;;  %v1299_v4 = vadd.f32 1.0, %v13483_v39  ;;  %v10617_v51 = vmul.f32 -1.442695, %v283_v34  ;;  %v285_v40 = vld [vmem:[%s19097_s0 + $0x840] sm:$0xff]  ;;  %v10620_v54 = vmul.f32 -1.442695, %v286_v53 }
 0x206   :  { %v13487_v48 = vpop.eup %13486  ;;  %8140 = vmatpush1.bf16.msra.mxu0 %v4149_v26  ;;  %3577 = vperm.xlu0 %11828, %v15744_v28   ;;  %13506 = vrcp.f32 %v1300_v21  ;;  %v1430_v27 = vadd.f32 1.0, %v13485_v45  ;;  %v10616_v28 = vmul.f32 -1.442695, %v282_v30  ;;  %v3964_v22 = vmul.f32 %v15751_v36, %v2236_v60  ;;  %v287_v26 = vld [vmem:[%s19097_s0 + $0x850] sm:$0xff]  ;;  %v290_v21 = vld [vmem:[%s19097_s0 + $0x868] sm:$0xff]  ;;  %v2237_v36 = vld [vmem:[%s19099_s1 + $0x640] sm:$0xff] }
 0x207   :  { %v13489_v8 = vpop.eup %13488  ;;  %8141 = vmatprep.subr.bf16.mxu0 %v19166_v18  ;;  %v15809_v55 = vpop.permute.xlu1 %3352  ;;  %7954 = vmatprep.mubr.bf16.mxu0 %v11982_v56  ;;  %13508 = vrcp.f32 %v1299_v4  ;;  %v1429_v13 = vadd.f32 1.0, %v13487_v48  ;;  %v4151_v56 = vpack.c.bf16 %v3962_v0, %v3961_v3  ;;  %v3963_v39 = vmul.f32 %v15759_v16, %v2235_v12  ;;  %v2238_v45 = vld [vmem:[%s19099_s1 + $0x648] sm:$0xff]  ;;  %v289_v48 = vld [vmem:[%s19097_s0 + $0x860] sm:$0xff]  ;;  %v2239_v0 = vld [vmem:[%s19099_s1 + $0x650] sm:$0xff] }
 0x208   :  { %v13491_v41 = vpop.eup %13490  ;;  %3592 = vperm.xlu1 %11829, %v15749_v17   ;;  %13510 = vrcp.f32 %v1430_v27  ;;  %v1432_v46 = vadd.f32 1.0, %v13489_v8  ;;  %v11986_v17 = vld [vmem:[%s19098_s2 + $0x7ec] ss:$72 sps:$4 sm:$0xff]   ;;  %v10619_v20 = vmul.f32 -1.442695, %v285_v40  ;;  %v3966_v34 = vmul.f32 %v15761_v42, %v2238_v45 }
 0x209   :  { %v13493_v33 = vpop.eup %13492  ;;  %v15832_v2 = vpop.permute.xlu0 %3347  ;;  %13512 = vrcp.f32 %v1429_v13  ;;  %v1431_v49 = vadd.f32 1.0, %v13491_v41  ;;  %v10622_v4 = vmul.f32 -1.442695, %v288_v29  ;;  %v10624_v60 = vmul.f32 -1.442695, %v290_v21  ;;  %v292_v13 = vld [vmem:[%s19097_s0 + $0x878] sm:$0xff] }
 0x20a   :  { %v13495_v47 = vpop.eup %13494  ;;  %8142 = vmatpush1.bf16.msra.mxu0 %v4150_v15  ;;  %3587 = vperm.xlu0 %11828, %v13493_v33   ;;  %13514 = vrcp.f32 %v1432_v46  ;;  %v10621_v15 = vmul.f32 -1.442695, %v287_v26  ;;  %v4152_v11 = vpack.c.bf16 %v3964_v22, %v3963_v39  ;;  %v3965_v41 = vmul.f32 %v15774_v14, %v2237_v36  ;;  %v11990_v3 = vld [vmem:[%s19098_s2 + $0x7e8] ss:$72 sps:$4 sm:$0xff]   ;;  %v11992_v14 = vld [vmem:[%s19098_s2 + $0x87c] ss:$72 sps:$4 sm:$0xff]  }
 0x20b   :  { %v13497_v43 = vpop.eup %13496  ;;  %8143 = vmatprep.subr.bf16.mxu0 %v19166_v18  ;;  %v15841_v23 = vpop.permute.xlu1 %3362  ;;  %13516 = vrcp.f32 %v1431_v49  ;;  %v11991_v42 = vld [vmem:[%s19098_s2 + $0x148] ss:$72 sps:$4 sm:$0xff]   ;;  %v10623_v53 = vmul.f32 -1.442695, %v289_v48  ;;  %v10626_v12 = vmul.f32 -1.442695, %v292_v13  ;;  %v3968_v40 = vmul.f32 %v15784_v7, %v2240_v10 }
 0x20c   :  { %v13499_v5 = vpop.eup %13498  ;;  %7151 = vmatmul.mubr.bf16.gmra.mrb[52].mxu1 %v11984_v50  ;;  %3602 = vperm.xlu1 %11829, %v13495_v47   ;;  %13518 = vpow2.f32 %v10616_v28  ;;  %v291_v50 = vld [vmem:[%s19097_s0 + $0x870] sm:$0xff]  ;;  %v2242_v29 = vld [vmem:[%s19099_s1 + $0x668] sm:$0xff] }
 0x20d   :  { %v13501_v30 = vpop.eup %13500  ;;  %7955 = vmatmul.mubr.bf16.gmra.mrb[4].mxu0 %v11985_v62  ;;  %v15863_v16 = vpop.permute.xlu0 %3357  ;;  %7158 = vmatprep.mubr.bf16.mxu1 %v11986_v17  ;;  %13520 = vpow2.f32 %v10615_v58  ;;  %v11994_v58 = vld [vmem:[%s19098_s2 + $0x1dc] ss:$72 sps:$4 sm:$0xff]   ;;  %v10625_v47 = vmul.f32 -1.442695, %v291_v50  ;;  %v3970_v45 = vmul.f32 %v15809_v55, %v2242_v29  ;;  %v11997_v55 = vld [vmem:[%s19098_s2 + $0x1d8] ss:$72 sps:$4 sm:$0xff]  }
 0x20e   :  { %v13503_v19 = vpop.eup %13502  ;;  %8144 = vmatpush1.bf16.msra.mxu0 %v4151_v56  ;;  %3597 = vperm.xlu0 %11828, %v13497_v43   ;;  %13522 = vpow2.f32 %v10618_v6  ;;  %v3967_v43 = vmul.f32 %v15799_v61, %v2239_v0  ;;  %v12000_v0 = vld [vmem:[%s19098_s2 + $0x26c] ss:$72 sps:$4 sm:$0xff]   ;;  %v296_v29 = vld [vmem:[%s19097_s0 + $0x898] sm:$0xff] }
 0x20f   :  { %v13505_v27 = vpop.eup %13504  ;;  %8145 = vmatprep.subr.bf16.mxu0 %v19166_v18  ;;  %v15872_v8 = vpop.permute.xlu1 %3372  ;;  %7962 = vmatprep.mubr.bf16.mxu0 %v11988_v57  ;;  %13524 = vpow2.f32 %v10617_v51  ;;  %v4153_v51 = vpack.c.bf16 %v3966_v34, %v3965_v41  ;;  %v294_v57 = vld [vmem:[%s19097_s0 + $0x888] sm:$0xff] }
 0x210   :  { %v13507_v28 = vpop.eup %13506  ;;  %2942 = vperm.xlu1 %11829, %v13499_v5   ;;  %13526 = vpow2.f32 %v10620_v54  ;;  %v2241_v5 = vld [vmem:[%s19099_s1 + $0x660] sm:$0xff]  ;;  %v10628_v26 = vmul.f32 -1.442695, %v294_v57 }
 0x211   :  { %v13509_v62 = vpop.eup %13508  ;;  %v15888_v46 = vpop.permute.xlu0 %3367  ;;  %13528 = vpow2.f32 %v10619_v20  ;;  %v3969_v36 = vmul.f32 %v15832_v2, %v2241_v5  ;;  %v2244_v20 = vld [vmem:[%s19099_s1 + $0x678] sm:$0xff]  ;;  %v11998_v2 = vld [vmem:[%s19098_s2 + $0x90c] ss:$72 sps:$4 sm:$0xff]   ;;  %v293_v57 = vld [vmem:[%s19097_s0 + $0x880] sm:$0xff] }
 0x212   :  { %v15896_v33 = vpop.eup %13510  ;;  %8146 = vmatpush1.bf16.msra.mxu0 %v4152_v11  ;;  %2937 = vperm.xlu0 %11828, %v13501_v30   ;;  %13530 = vpow2.f32 %v10622_v4  ;;  %v4154_v30 = vpack.c.bf16 %v3968_v40, %v3967_v43  ;;  %v11996_v4 = vld [vmem:[%s19098_s2 + $0x878] ss:$72 sps:$4 sm:$0xff]   ;;  %v3972_v11 = vmul.f32 %v15841_v23, %v2244_v20 }
 0x213   :  { %v15898_v17 = vpop.eup %13512  ;;  %8147 = vmatprep.subr.bf16.mxu0 %v19166_v18  ;;  %v15901_v49 = vpop.permute.xlu1 %3382  ;;  %13532 = vpow2.f32 %v10621_v15 }
 0x214   :  { %v15906_v6 = vpop.eup %13514  ;;  %7159 = vmatmul.mubr.bf16.gmra.mrb[56].mxu1 %v11990_v3  ;;  %2952 = vperm.xlu1 %11829, %v13503_v19   ;;  %13534 = vpow2.f32 %v10624_v60  ;;  %v2243_v19 = vld [vmem:[%s19099_s1 + $0x670] sm:$0xff] }
 0x215   :  { %v15913_v54 = vpop.eup %13516  ;;  %7963 = vmatmul.mubr.bf16.gmra.mrb[8].mxu0 %v11991_v42  ;;  %v15921_v7 = vpop.permute.xlu0 %3377  ;;  %7166 = vmatprep.mubr.bf16.mxu1 %v11992_v14  ;;  %13536 = vpow2.f32 %v10623_v53  ;;  %v3971_v34 = vmul.f32 %v15863_v16, %v2243_v19  ;;  %v4155_v42 = vpack.c.bf16 %v3970_v45, %v3969_v36  ;;  %v2246_v16 = vld [vmem:[%s19099_s1 + $0x688] sm:$0xff]  ;;  %v2245_v14 = vld [vmem:[%s19099_s1 + $0x680] sm:$0xff]  ;;  %v10627_v19 = vmul.f32 -1.442695, %v293_v57 }
 0x216   :  { %v13519_v61 = vpop.eup %13518  ;;  %8148 = vmatpush1.bf16.msra.mxu0 %v4153_v51  ;;  %2947 = vperm.xlu0 %11828, %v13505_v27   ;;  %13538 = vpow2.f32 %v10626_v12  ;;  %v3974_v5 = vmul.f32 %v15872_v8, %v2246_v16  ;;  %v2247_v8 = vld [vmem:[%s19099_s1 + $0x690] sm:$0xff]  ;;  %v12004_v45 = vld [vmem:[%s19098_s2 + $0x99c] ss:$72 sps:$4 sm:$0xff]   ;;  %v302_v16 = vld [vmem:[%s19097_s0 + $0x8c8] sm:$0xff] }
 0x217   :  { %v13521_v56 = vpop.eup %13520  ;;  %8149 = vmatprep.subr.bf16.mxu0 %v19166_v18  ;;  %v15924_v22 = vpop.permute.xlu1 %3392  ;;  %7970 = vmatprep.mubr.bf16.mxu0 %v11994_v58  ;;  %v1434_v39 = vadd.f32 1.0, %v13519_v61  ;;  %13540 = vpow2.f32 %v10625_v47  ;;  %v4156_v51 = vpack.c.bf16 %v3972_v11, %v3971_v34  ;;  %v3973_v61 = vmul.f32 %v15888_v46, %v2245_v14  ;;  %v300_v34 = vld [vmem:[%s19097_s0 + $0x8b8] sm:$0xff] }
 0x218   :  { %v13523_v21 = vpop.eup %13522  ;;  %2962 = vperm.xlu1 %11829, %v13507_v28   ;;  %v1433_v48 = vadd.f32 1.0, %v13521_v56  ;;  %v2248_v56 = vld [vmem:[%s19099_s1 + $0x698] sm:$0xff]  ;;  %v3975_v11 = vmul.f32 %v15921_v7, %v2247_v8 }
 0x219   :  { %v13525_v27 = vpop.eup %13524  ;;  %v15937_v10 = vpop.permute.xlu0 %3387  ;;  %13542 = vrcp.f32 %v1434_v39  ;;  %v1436_v15 = vadd.f32 1.0, %v13523_v21  ;;  %v12002_v39 = vld [vmem:[%s19098_s2 + $0x908] ss:$72 sps:$4 sm:$0xff]   ;;  %v304_v8 = vld [vmem:[%s19097_s0 + $0x8d8] sm:$0xff] }
 0x21a   :  { %v13527_v60 = vpop.eup %13526  ;;  %8150 = vmatpush1.bf16.msra.mxu0 %v4154_v30  ;;  %2957 = vperm.xlu0 %11828, %v13509_v62   ;;  %13544 = vrcp.f32 %v1433_v48  ;;  %v1435_v13 = vadd.f32 1.0, %v13525_v27  ;;  %v295_v21 = vld [vmem:[%s19097_s0 + $0x890] sm:$0xff]  ;;  %v298_v48 = vld [vmem:[%s19097_s0 + $0x8a8] sm:$0xff] }
 0x21b   :  { %v13529_v28 = vpop.eup %13528  ;;  %8151 = vmatprep.subr.bf16.mxu0 %v19166_v18  ;;  %v15948_v41 = vpop.permute.xlu1 %3402  ;;  %13546 = vrcp.f32 %v1436_v15  ;;  %v1438_v3 = vadd.f32 1.0, %v13527_v60  ;;  %v10629_v15 = vmul.f32 -1.442695, %v295_v21 }
 0x21c   :  { %v13531_v50 = vpop.eup %13530  ;;  %7167 = vmatmul.mubr.bf16.gmra.mrb[60].mxu1 %v11996_v4  ;;  %3612 = vperm.xlu1 %11829, %v15896_v33   ;;  %v1437_v62 = vadd.f32 1.0, %v13529_v28  ;;  %13548 = vpow2.f32 %v10628_v26  ;;  %v10630_v4 = vmul.f32 -1.442695, %v296_v29  ;;  %v3976_v28 = vmul.f32 %v15901_v49, %v2248_v56  ;;  %v2249_v49 = vld [vmem:[%s19099_s1 + $0x6a0] sm:$0xff] }
 0x21d   :  { %v13533_v23 = vpop.eup %13532  ;;  %7971 = vmatmul.mubr.bf16.gmra.mrb[12].mxu0 %v11997_v55  ;;  %v15960_v53 = vpop.permute.xlu0 %3397  ;;  %7174 = vmatprep.mubr.bf16.mxu1 %v11998_v2  ;;  %13550 = vrcp.f32 %v1435_v13  ;;  %v1440_v12 = vadd.f32 1.0, %v13531_v50  ;;  %v12006_v2 = vld [vmem:[%s19098_s2 + $0x2fc] ss:$72 sps:$4 sm:$0xff]   ;;  %v4157_v13 = vpack.c.bf16 %v3974_v5, %v3973_v61  ;;  %v2250_v50 = vld [vmem:[%s19099_s1 + $0x6a8] sm:$0xff]  ;;  %v3977_v29 = vmul.f32 %v15937_v10, %v2249_v49  ;;  %v2251_v5 = vld [vmem:[%s19099_s1 + $0x6b0] sm:$0xff] }
 0x21e   :  { %v13535_v58 = vpop.eup %13534  ;;  %8152 = vmatpush1.bf16.msra.mxu0 %v4155_v42  ;;  %3607 = vperm.xlu0 %11828, %v15898_v17   ;;  %13552 = vrcp.f32 %v1438_v3  ;;  %v1439_v33 = vadd.f32 1.0, %v13533_v23  ;;  %v10632_v42 = vmul.f32 -1.442695, %v298_v48  ;;  %v3978_v57 = vmul.f32 %v15924_v22, %v2250_v50  ;;  %v12008_v61 = vld [vmem:[%s19098_s2 + $0x998] ss:$72 sps:$4 sm:$0xff]   ;;  %v306_v50 = vld [vmem:[%s19097_s0 + $0x8e8] sm:$0xff] }
 0x21f   :  { %v13537_v47 = vpop.eup %13536  ;;  %8153 = vmatprep.subr.bf16.mxu0 %v19166_v18  ;;  %v15964_v40 = vpop.permute.xlu1 %3412  ;;  %7978 = vmatprep.mubr.bf16.mxu0 %v12000_v0  ;;  %13554 = vrcp.f32 %v1437_v62  ;;  %v1442_v43 = vadd.f32 1.0, %v13535_v58  ;;  %v299_v0 = vld [vmem:[%s19097_s0 + $0x8b0] sm:$0xff]  ;;  %v10634_v58 = vmul.f32 -1.442695, %v300_v34  ;;  %v12009_v22 = vld [vmem:[%s19098_s2 + $0x2f8] ss:$72 sps:$4 sm:$0xff]  }
 0x220   :  { %v13539_v17 = vpop.eup %13538  ;;  %3622 = vperm.xlu1 %11829, %v15906_v6   ;;  %13556 = vrcp.f32 %v1440_v12  ;;  %v1441_v26 = vadd.f32 1.0, %v13537_v47  ;;  %v12003_v6 = vld [vmem:[%s19098_s2 + $0x268] ss:$72 sps:$4 sm:$0xff]   ;;  %v301_v47 = vld [vmem:[%s19097_s0 + $0x8c0] sm:$0xff]  ;;  %v12010_v10 = vld [vmem:[%s19098_s2 + $0xa2c] ss:$72 sps:$4 sm:$0xff]   ;;  %v4159_v48 = vpack.c.bf16 %v3978_v57, %v3977_v29 }
 0x221   :  { %v13541_v30 = vpop.eup %13540  ;;  %v15987_v46 = vpop.permute.xlu0 %3407  ;;  %13558 = vrcp.f32 %v1439_v33  ;;  %v1444_v36 = vadd.f32 1.0, %v13539_v17  ;;  %v10633_v33 = vmul.f32 -1.442695, %v299_v0  ;;  %v2252_v17 = vld [vmem:[%s19099_s1 + $0x6b8] sm:$0xff]  ;;  %v10640_v57 = vmul.f32 -1.442695, %v306_v50 }
 0x222   :  { %8154 = vmatpush1.bf16.msra.mxu0 %v4156_v51  ;;  %3617 = vperm.xlu0 %11828, %v15913_v54   ;;  %13560 = vrcp.f32 %v1442_v43  ;;  %v1443_v20 = vadd.f32 1.0, %v13541_v30  ;;  %v297_v54 = vld [vmem:[%s19097_s0 + $0x8a0] sm:$0xff]  ;;  %v4158_v43 = vpack.c.bf16 %v3976_v28, %v3975_v11  ;;  %v10635_v30 = vmul.f32 -1.442695, %v301_v47 }
 0x223   :  { %v13543_v27 = vpop.eup %13542  ;;  %8155 = vmatprep.subr.bf16.mxu0 %v19166_v18  ;;  %v16000_v55 = vpop.permute.xlu1 %3422  ;;  %13562 = vrcp.f32 %v1441_v26  ;;  %v10631_v23 = vmul.f32 -1.442695, %v297_v54  ;;  %v10636_v26 = vmul.f32 -1.442695, %v302_v16  ;;  %v2253_v54 = vld [vmem:[%s19099_s1 + $0x6c0] sm:$0xff]  ;;  %v2255_v16 = vld [vmem:[%s19099_s1 + $0x6d0] sm:$0xff] }
 0x224   :  { %v13545_v60 = vpop.eup %13544  ;;  %7175 = vmatmul.mubr.bf16.gmra.mrb[64].mxu1 %v12002_v39  ;;  %3632 = vperm.xlu1 %11829, %v13543_v27   ;;  %13564 = vrcp.f32 %v1444_v36  ;;  %v12012_v36 = vld [vmem:[%s19098_s2 + $0x38c] ss:$72 sps:$4 sm:$0xff]   ;;  %v3980_v27 = vmul.f32 %v15948_v41, %v2252_v17  ;;  %v10638_v41 = vmul.f32 -1.442695, %v304_v8  ;;  %v3981_v0 = vmul.f32 %v15987_v46, %v2253_v54  ;;  %v305_v46 = vld [vmem:[%s19097_s0 + $0x8e0] sm:$0xff] }
 0x225   :  { %v13547_v3 = vpop.eup %13546  ;;  %7979 = vmatmul.mubr.bf16.gmra.mrb[16].mxu0 %v12003_v6  ;;  %v16022_v7 = vpop.permute.xlu0 %3417  ;;  %7182 = vmatprep.mubr.bf16.mxu1 %v12004_v45  ;;  %13566 = vrcp.f32 %v1443_v20 }
 0x226   :  { %v13549_v62 = vpop.eup %13548  ;;  %8156 = vmatpush1.bf16.msra.mxu0 %v4157_v13  ;;  %3627 = vperm.xlu0 %11828, %v13545_v60   ;;  %13568 = vpow2.f32 %v10627_v19  ;;  %v303_v19 = vld [vmem:[%s19097_s0 + $0x8d0] sm:$0xff] }
 0x227   :  { %v13551_v14 = vpop.eup %13550  ;;  %8157 = vmatprep.subr.bf16.mxu0 %v19166_v18  ;;  %v16028_v12 = vpop.permute.xlu1 %3432  ;;  %7986 = vmatprep.mubr.bf16.mxu0 %v12006_v2  ;;  %13570 = vpow2.f32 %v10630_v4  ;;  %v1446_v20 = vadd.f32 1.0, %v13549_v62  ;;  %v3979_v2 = vmul.f32 %v15960_v53, %v2251_v5  ;;  %v10637_v53 = vmul.f32 -1.442695, %v303_v19  ;;  %v2256_v62 = vld [vmem:[%s19099_s1 + $0x6d8] sm:$0xff] }
 0x228   :  { %v13553_v51 = vpop.eup %13552  ;;  %3642 = vperm.xlu1 %11829, %v13547_v3   ;;  %13572 = vpow2.f32 %v10629_v15  ;;  %v2254_v15 = vld [vmem:[%s19099_s1 + $0x6c8] sm:$0xff] }
 0x229   :  { %v13555_v56 = vpop.eup %13554  ;;  %v16044_v39 = vpop.permute.xlu0 %3427  ;;  %13574 = vpow2.f32 %v10632_v42  ;;  %v3982_v34 = vmul.f32 %v15964_v40, %v2254_v15  ;;  %v4160_v42 = vpack.c.bf16 %v3980_v27, %v3979_v2  ;;  %v12014_v40 = vld [vmem:[%s19098_s2 + $0xa28] ss:$72 sps:$4 sm:$0xff]  }
 0x22a   :  { %v13557_v21 = vpop.eup %13556  ;;  %8158 = vmatpush1.bf16.msra.mxu0 %v4158_v43  ;;  %3637 = vperm.xlu0 %11828, %v13551_v14   ;;  %13576 = vpow2.f32 %v10631_v23 }
 0x22b   :  { %v13559_v6 = vpop.eup %13558  ;;  %8159 = vmatprep.subr.bf16.mxu0 %v19166_v18  ;;  %v16056_v45 = vpop.permute.xlu1 %3442  ;;  %13578 = vpow2.f32 %v10634_v58  ;;  %v12015_v58 = vld [vmem:[%s19098_s2 + $0x388] ss:$72 sps:$4 sm:$0xff]   ;;  %v4161_v17 = vpack.c.bf16 %v3982_v34, %v3981_v0 }
 0x22c   :  { %v13561_v4 = vpop.eup %13560  ;;  %7183 = vmatmul.mubr.bf16.gmra.mrb[68].mxu1 %v12008_v61  ;;  %3652 = vperm.xlu1 %11829, %v13553_v51   ;;  %13580 = vpow2.f32 %v10633_v33  ;;  %v12016_v33 = vld [vmem:[%s19098_s2 + $0xabc] ss:$72 sps:$4 sm:$0xff]  }
 0x22d   :  { %v13563_v60 = vpop.eup %13562  ;;  %7987 = vmatmul.mubr.bf16.gmra.mrb[20].mxu0 %v12009_v22  ;;  %v16072_v13 = vpop.permute.xlu0 %3437  ;;  %7190 = vmatprep.mubr.bf16.mxu1 %v12010_v10  ;;  %13582 = vpow2.f32 %v10636_v26  ;;  %v12018_v61 = vld [vmem:[%s19098_s2 + $0x41c] ss:$72 sps:$4 sm:$0xff]   ;;  %v10639_v22 = vmul.f32 -1.442695, %v305_v46  ;;  %v3984_v26 = vmul.f32 %v16000_v55, %v2256_v62  ;;  %v12024_v46 = vld [vmem:[%s19098_s2 + $0x4ac] ss:$72 sps:$4 sm:$0xff]  }
 0x22e   :  { %v16074_v28 = vpop.eup %13564  ;;  %8160 = vmatpush1.bf16.msra.mxu0 %v4159_v48  ;;  %3647 = vperm.xlu0 %11828, %v13555_v56   ;;  %13584 = vpow2.f32 %v10635_v30 }
 0x22f   :  { %v16076_v11 = vpop.eup %13566  ;;  %8161 = vmatprep.subr.bf16.mxu0 %v19166_v18  ;;  %v16081_v3 = vpop.permute.xlu1 %2862  ;;  %7994 = vmatprep.mubr.bf16.mxu0 %v12012_v36  ;;  %13586 = vrcp.f32 %v1446_v20  ;;  %v2257_v36 = vld [vmem:[%s19099_s1 + $0x6e0] sm:$0xff] }
 0x230   :  { %v13569_v49 = vpop.eup %13568  ;;  %3662 = vperm.xlu1 %11829, %v13557_v21   ;;  %13588 = vpow2.f32 %v10638_v41  ;;  %v3983_v21 = vmul.f32 %v16022_v7, %v2255_v16  ;;  %v3985_v54 = vmul.f32 %v16044_v39, %v2257_v36  ;;  %v2260_v41 = vld [vmem:[%s19099_s1 + $0x6f8] sm:$0xff]  ;;  %v12022_v39 = vld [vmem:[%s19098_s2 + $0xb4c] ss:$72 sps:$4 sm:$0xff]  }
 0x231   :  { %v13571_v23 = vpop.eup %13570  ;;  %v16098_v14 = vpop.permute.xlu0 %2857  ;;  %v1445_v47 = vadd.f32 1.0, %v13569_v49  ;;  %13590 = vpow2.f32 %v10637_v53  ;;  %v12020_v53 = vld [vmem:[%s19098_s2 + $0xab8] ss:$72 sps:$4 sm:$0xff]   ;;  %v12030_v36 = vld [vmem:[%s19098_s2 + $0x53c] ss:$72 sps:$4 sm:$0xff]  }
 0x232   :  { %v13573_v51 = vpop.eup %13572  ;;  %8162 = vmatpush1.bf16.msra.mxu0 %v4160_v42  ;;  %3657 = vperm.xlu0 %11828, %v13559_v6   ;;  %v1448_v43 = vadd.f32 1.0, %v13571_v23  ;;  %v2258_v6 = vld [vmem:[%s19099_s1 + $0x6e8] sm:$0xff]  ;;  %v4162_v2 = vpack.c.bf16 %v3984_v26, %v3983_v21  ;;  %v307_v42 = vld [vmem:[%s19097_s0 + $0x8f0] sm:$0xff] }
 0x233   :  { %v13575_v29 = vpop.eup %13574  ;;  %8163 = vmatprep.subr.bf16.mxu0 %v19166_v18  ;;  %v16107_v5 = vpop.permute.xlu1 %2872  ;;  %13592 = vrcp.f32 %v1445_v47  ;;  %v1447_v56 = vadd.f32 1.0, %v13573_v51  ;;  %v3986_v15 = vmul.f32 %v16028_v12, %v2258_v6  ;;  %v12021_v12 = vld [vmem:[%s19098_s2 + $0x418] ss:$72 sps:$4 sm:$0xff]   ;;  %v12027_v21 = vld [vmem:[%s19098_s2 + $0x4a8] ss:$72 sps:$4 sm:$0xff]  }
 0x234   :  { %v13577_v10 = vpop.eup %13576  ;;  %7191 = vmatmul.mubr.bf16.gmra.mrb[72].mxu1 %v12014_v40  ;;  %3672 = vperm.xlu1 %11829, %v13561_v4   ;;  %13594 = vrcp.f32 %v1448_v43  ;;  %v1450_v30 = vadd.f32 1.0, %v13575_v29 }
 0x235   :  { %v13579_v8 = vpop.eup %13578  ;;  %7995 = vmatmul.mubr.bf16.gmra.mrb[24].mxu0 %v12015_v58  ;;  %v16120_v20 = vpop.permute.xlu0 %2867  ;;  %7198 = vmatprep.mubr.bf16.mxu1 %v12016_v33  ;;  %13596 = vrcp.f32 %v1447_v56  ;;  %v1449_v55 = vadd.f32 1.0, %v13577_v10  ;;  %v4163_v58 = vpack.c.bf16 %v3986_v15, %v3985_v54 }
 0x236   :  { %v13581_v7 = vpop.eup %13580  ;;  %8164 = vmatpush1.bf16.msra.mxu0 %v4161_v17  ;;  %3667 = vperm.xlu0 %11828, %v13563_v60   ;;  %13598 = vpow2.f32 %v10640_v57  ;;  %v1452_v48 = vadd.f32 1.0, %v13579_v8  ;;  %v2259_v60 = vld [vmem:[%s19099_s1 + $0x6f0] sm:$0xff]  ;;  %v10641_v57 = vmul.f32 -1.442695, %v307_v42 }
 0x237   :  { %v13583_v19 = vpop.eup %13582  ;;  %8165 = vmatprep.subr.bf16.mxu0 %v19166_v18  ;;  %v16123_v4 = vpop.permute.xlu1 %2882  ;;  %8002 = vmatprep.mubr.bf16.mxu0 %v12018_v61  ;;  %13600 = vrcp.f32 %v1450_v30  ;;  %v1451_v50 = vadd.f32 1.0, %v13581_v7  ;;  %v3987_v33 = vmul.f32 %v16072_v13, %v2259_v60  ;;  %v12028_v30 = vld [vmem:[%s19098_s2 + $0xbdc] ss:$72 sps:$4 sm:$0xff]   ;;  %v12032_v60 = vld [vmem:[%s19098_s2 + $0xbd8] ss:$72 sps:$4 sm:$0xff]  }
 0x238   :  { %v13585_v27 = vpop.eup %13584  ;;  %3682 = vperm.xlu1 %11829, %v16074_v28   ;;  %13602 = vpow2.f32 %v10639_v22  ;;  %v308_v28 = vld [vmem:[%s19097_s0 + $0x8f8] sm:$0xff]  ;;  %v1454_v49 = vadd.f32 1.0, %v13583_v19  ;;  %v12026_v22 = vld [vmem:[%s19098_s2 + $0xb48] ss:$72 sps:$4 sm:$0xff]  }
 0x239   :  { %v13587_v34 = vpop.eup %13586  ;;  %v16137_v0 = vpop.permute.xlu0 %2877  ;;  %13604 = vrcp.f32 %v1449_v55  ;;  %v1453_v23 = vadd.f32 1.0, %v13585_v27  ;;  %v10642_v47 = vmul.f32 -1.442695, %v308_v28  ;;  %v12036_v28 = vld [vmem:[%s19098_s2 + $0x5cc] ss:$72 sps:$4 sm:$0xff]  }
 0x23a   :  { %8166 = vmatpush1.bf16.msra.mxu0 %v4162_v2  ;;  %3677 = vperm.xlu0 %11828, %v16076_v11   ;;  %v13589_v62 = vpop.eup %13588  ;;  %13606 = vrcp.f32 %v1452_v48  ;;  %v3988_v11 = vmul.f32 %v16056_v45, %v2260_v41 }
 0x23b   :  { %8167 = vmatprep.subr.bf16.mxu0 %v19166_v18  ;;  %v16153_v40 = vpop.permute.xlu1 %2892  ;;  %v13591_v16 = vpop.eup %13590  ;;  %13608 = vrcp.f32 %v1451_v50  ;;  %v1456_v13 = vadd.f32 1.0, %v13589_v62 }
 0x23c   :  { %7199 = vmatmul.mubr.bf16.gmra.mrb[76].mxu1 %v12020_v53  ;;  %3692 = vperm.xlu1 %11829, %v13587_v34   ;;  %13610 = vrcp.f32 %v1454_v49  ;;  %v4164_v56 = vpack.c.bf16 %v3988_v11, %v3987_v33  ;;  %v1455_v8 = vadd.f32 1.0, %v13591_v16  ;;  %v12038_v33 = vld [vmem:[%s19098_s2 + $0xc68] ss:$72 sps:$4 sm:$0xff]  }
 0x23d   :  { %v13593_v51 = vpop.eup %13592  ;;  %8003 = vmatmul.mubr.bf16.gmra.mrb[28].mxu0 %v12021_v12  ;;  %v16160_v43 = vpop.permute.xlu0 %2887  ;;  %7206 = vmatprep.mubr.bf16.mxu1 %v12022_v39  ;;  %13612 = vrcp.f32 %v1453_v23  ;;  %v12033_v12 = vld [vmem:[%s19098_s2 + $0x538] ss:$72 sps:$4 sm:$0xff]   ;;  %v12034_v39 = vld [vmem:[%s19098_s2 + $0xc6c] ss:$72 sps:$4 sm:$0xff]  }
 0x23e   :  { %v13595_v29 = vpop.eup %13594  ;;  %8168 = vmatpush1.bf16.msra.mxu0 %v4163_v58  ;;  %3687 = vperm.xlu0 %11828, %v13593_v51   ;;  %13614 = vpow2.f32 %v10642_v47 }
 0x23f   :  { %v13597_v17 = vpop.eup %13596  ;;  %8169 = vmatprep.subr.bf16.mxu0 %v19166_v18  ;;  %v16163_v45 = vpop.permute.xlu1 %2902  ;;  %8010 = vmatprep.mubr.bf16.mxu0 %v12024_v46  ;;  %13616 = vpow2.f32 %v10641_v57  ;;  %v12039_v57 = vld [vmem:[%s19098_s2 + $0x5c8] ss:$72 sps:$4 sm:$0xff]  }
 0x240   :  { %v13599_v61 = vpop.eup %13598  ;;  %3702 = vperm.xlu1 %11829, %v13595_v29   ;;  %13618 = vrcp.f32 %v1456_v13  ;;  %v12040_v29 = vld [vmem:[%s19098_s2 + $0xcfc] ss:$72 sps:$4 sm:$0xff]  }
 0x241   :  { %v13601_v10 = vpop.eup %13600  ;;  %v16168_v26 = vpop.permute.xlu0 %2897  ;;  %v1458_v19 = vadd.f32 1.0, %v13599_v61  ;;  %13620 = vrcp.f32 %v1455_v8 }
 0x242   :  { %v13603_v6 = vpop.eup %13602  ;;  %8170 = vmatpush1.bf16.msra.mxu0 %v4164_v56  ;;  %3697 = vperm.xlu0 %11828, %v13597_v17   ;;  %v12042_v17 = vld [vmem:[%s19098_s2 + $0x65c] ss:$72 sps:$4 sm:$0xff]  }
 0x243   :  { %v13605_v55 = vpop.eup %13604  ;;  %v16179_v7 = vpop.permute.xlu1 %2912  ;;  %8364 = vmatprep.subr.bf16.mxu0 %v19166_v18  ;;  %v1457_v2 = vadd.f32 1.0, %v13603_v6  ;;  %13622 = vrcp.f32 %v1458_v19  ;;  %v12045_v6 = vld [vmem:[%s19098_s2 + $0x658] ss:$72 sps:$4 sm:$0xff]  }
 0x244   :  { %7207 = vmatmul.mubr.bf16.gmra.mrb[80].mxu1 %v12026_v22  ;;  %3712 = vperm.xlu1 %11829, %v13601_v10   ;;  %v13607_v48 = vpop.eup %13606 }
 0x245   :  { %8011 = vmatmul.mubr.bf16.gmra.mrb[32].mxu0 %v12027_v21  ;;  %v16182_v27 = vpop.permute.xlu0 %2907  ;;  %7214 = vmatprep.mubr.bf16.mxu1 %v12028_v30  ;;  %v13609_v15 = vpop.eup %13608  ;;  %13624 = vrcp.f32 %v1457_v2  ;;  %v12044_v30 = vld [vmem:[%s19098_s2 + $0xcf8] ss:$72 sps:$4 sm:$0xff]  }
 0x246   :  { %3707 = vperm.xlu0 %11828, %v13605_v55   ;;  %8018 = vmatprep.mubr.bf16.mxu0 %v12030_v36  ;;  %v13611_v41 = vpop.eup %13610  ;;  %v12048_v36 = vld [vmem:[%s19098_s2 + $0x14] ss:$72 sps:$4 sm:$0xff]   ;;  %v2133_v2 = vld [vmem:[%s19099_s1 + $0x300] sm:$0xff] }
 0x247   :  { %v16184_v54 = vpop.permute.xlu1 %2922  ;;  %v13613_v53 = vpop.eup %13612  ;;  %v12049_v55 = vld [vmem:[%s19098_s2 + $0x6ec] ss:$72 sps:$4 sm:$0xff]  }
 0x248   :  { %3722 = vperm.xlu1 %11829, %v13607_v48   ;;  %v13615_v50 = vpop.eup %13614  ;;  %v2134_v48 = vld [vmem:[%s19099_s1 + $0x308] sm:$0xff] }
 0x249   :  { %v16189_v34 = vpop.permute.xlu0 %2917  ;;  %v13617_v49 = vpop.eup %13616  ;;  %v1460_v62 = vadd.f32 1.0, %v13615_v50  ;;  %v12046_v50 = vld [vmem:[%s19098_s2 + $0x10] ss:$72 sps:$4 sm:$0xff]  }
 0x24a   :  { %3717 = vperm.xlu0 %11828, %v13609_v15   ;;  %v1459_v46 = vadd.f32 1.0, %v13617_v49  ;;  %v13619_v23 = vpop.eup %13618 }
 0x24b   :  { %v16200_v42 = vpop.permute.xlu1 %2932  ;;  %13626 = vrcp.f32 %v1460_v62  ;;  %v13621_v58 = vpop.eup %13620 }
 0x24c   :  { %7215 = vmatmul.mubr.bf16.gmra.mrb[84].mxu1 %v12032_v60  ;;  %3732 = vperm.xlu1 %11829, %v13611_v41   ;;  %13628 = vrcp.f32 %v1459_v46  ;;  %v3862_v41 = vmul.f32 %v14742_v24, %v2134_v48  ;;  %v3861_v60 = vmul.f32 %v14749_v37, %v2133_v2  ;;  %v12051_v24 = vld [vmem:[%s19098_s2 + $0x6e8] ss:$72 sps:$4 sm:$0xff]   ;;  %v12052_v37 = vld [vmem:[%s19098_s2 + $0xa4] ss:$72 sps:$4 sm:$0xff]  }
 0x24d   :  { %8019 = vmatmul.mubr.bf16.gmra.mrb[36].mxu0 %v12033_v12  ;;  %v16202_v16 = vpop.permute.xlu0 %2927  ;;  %7222 = vmatprep.mubr.bf16.mxu1 %v12034_v39  ;;  %v13623_v47 = vpop.eup %13622  ;;  %v2136_v12 = vld [vmem:[%s19099_s1 + $0x318] sm:$0xff]  ;;  %v2135_v39 = vld [vmem:[%s19099_s1 + $0x310] sm:$0xff] }
 0x24e   :  { %3727 = vperm.xlu0 %11828, %v13613_v53   ;;  %8026 = vmatprep.mubr.bf16.mxu0 %v12036_v28  ;;  %v4101_v49 = vpack.c.bf16 %v3862_v41, %v3861_v60  ;;  %v3864_v62 = vmul.f32 %v15620_v38, %v2136_v12  ;;  %v3863_v46 = vmul.f32 %v15630_v32, %v2135_v39  ;;  %v12060_v2 = vld [vmem:[%s19098_s2 + $0x80c] ss:$72 sps:$4 sm:$0xff]   ;;  %v2141_v60 = vld [vmem:[%s19099_s1 + $0x340] sm:$0xff] }
 0x24f   :  { %v16204_v11 = vpop.permute.xlu1 %3452  ;;  %v13625_v13 = vpop.eup %13624  ;;  %v2142_v41 = vld [vmem:[%s19099_s1 + $0x348] sm:$0xff]  ;;  %v3869_v39 = vmul.f32 %v15673_v59, %v2141_v60 }
 0x250   :  { %3742 = vperm.xlu1 %11829, %v13619_v23   ;;  %v4102_v32 = vpack.c.bf16 %v3864_v62, %v3863_v46  ;;  %v3870_v12 = vmul.f32 %v15664_v52, %v2142_v41  ;;  %v12063_v52 = vld [vmem:[%s19098_s2 + $0x808] ss:$72 sps:$4 sm:$0xff]   ;;  %v12064_v59 = vld [vmem:[%s19098_s2 + $0x1c4] ss:$72 sps:$4 sm:$0xff]  }
 0x251   :  { %v16209_v51 = vpop.permute.xlu0 %3447 }
 0x252   :  { %3737 = vperm.xlu0 %11828, %v13621_v58   ;;  %v12054_v58 = vld [vmem:[%s19098_s2 + $0x77c] ss:$72 sps:$4 sm:$0xff]   ;;  %v4105_v46 = vpack.c.bf16 %v3870_v12, %v3869_v39  ;;  %v2150_v12 = vld [vmem:[%s19099_s1 + $0x388] sm:$0xff] }
 0x253   :  { %v16220_v61 = vpop.permute.xlu1 %3462  ;;  %v2149_v39 = vld [vmem:[%s19099_s1 + $0x380] sm:$0xff] }
 0x254   :  { %7223 = vmatmul.mubr.bf16.gmra.mrb[88].mxu1 %v12038_v33  ;;  %3752 = vperm.xlu1 %11829, %v13623_v47   ;;  %v2138_v33 = vld [vmem:[%s19099_s1 + $0x328] sm:$0xff]  ;;  %v2137_v47 = vld [vmem:[%s19099_s1 + $0x320] sm:$0xff] }
 0x255   :  { %8027 = vmatmul.mubr.bf16.gmra.mrb[40].mxu0 %v12039_v57  ;;  %v16222_v56 = vpop.permute.xlu0 %3457  ;;  %7230 = vmatprep.mubr.bf16.mxu1 %v12040_v29  ;;  %v13627_v22 = vpop.eup %13626  ;;  %v3866_v57 = vmul.f32 %v15641_v44, %v2138_v33  ;;  %v3865_v29 = vmul.f32 %v15645_v9, %v2137_v47  ;;  %v12057_v44 = vld [vmem:[%s19098_s2 + $0x778] ss:$72 sps:$4 sm:$0xff]   ;;  %v12058_v9 = vld [vmem:[%s19098_s2 + $0x134] ss:$72 sps:$4 sm:$0xff]  }
 0x256   :  { %3747 = vperm.xlu0 %11828, %v13625_v13   ;;  %8034 = vmatprep.mubr.bf16.mxu0 %v12042_v17  ;;  %v13629_v21 = vpop.eup %13628  ;;  %v2140_v13 = vld [vmem:[%s19099_s1 + $0x338] sm:$0xff] }
 0x257   :  { %v16224_v10 = vpop.permute.xlu1 %3472 }
 0x258   :  { %3762 = vperm.xlu1 %11829, %v13627_v22   ;;  %v2139_v22 = vld [vmem:[%s19099_s1 + $0x330] sm:$0xff] }
 0x259   :  { %v16229_v8 = vpop.permute.xlu0 %3467 }
 0x25a   :  { %3757 = vperm.xlu0 %11828, %v13629_v21   ;;  %v12056_v21 = vld [vmem:[%s19098_s2 + $0xa0] ss:$72 sps:$4 sm:$0xff]  }
 0x25b   :  { %v16240_v19 = vpop.permute.xlu1 %3482 }
 0x25c   :  { %7231 = vmatmul.mubr.bf16.gmra.mrb[92].mxu1 %v12044_v30 }
 0x25d   :  { %8035 = vmatmul.mubr.bf16.gmra.mrb[44].mxu0 %v12045_v6  ;;  %v16248_v15 = vpop.permute.xlu0 %3477  ;;  %7271 = vmatprep.mubr.bf16.mxu1 %v12048_v36  ;;  %v4103_v6 = vpack.c.bf16 %v3866_v57, %v3865_v29  ;;  %v3868_v36 = vmul.f32 %v15647_v25, %v2140_v13  ;;  %v2146_v57 = vld [vmem:[%s19099_s1 + $0x368] sm:$0xff]  ;;  %v2145_v29 = vld [vmem:[%s19099_s1 + $0x360] sm:$0xff] }
 0x25e   :  { %8042 = vmatprep.mubr.bf16.mxu0 %v12049_v55  ;;  %v3867_v55 = vmul.f32 %v15652_v31, %v2139_v22  ;;  %v3874_v13 = vmul.f32 %v16107_v5, %v2146_v57  ;;  %v3873_v22 = vmul.f32 %v16120_v20, %v2145_v29  ;;  %v12069_v5 = vld [vmem:[%s19098_s2 + $0x898] ss:$72 sps:$4 sm:$0xff]   ;;  %v12070_v20 = vld [vmem:[%s19098_s2 + $0x254] ss:$72 sps:$4 sm:$0xff]  }
 0x25f   :  { %v16252_v53 = vpop.permute.xlu1 %3492 }
 0x260   :  { %v4104_v31 = vpack.c.bf16 %v3868_v36, %v3867_v55  ;;  %v4107_v55 = vpack.c.bf16 %v3874_v13, %v3873_v22  ;;  %v2154_v13 = vld [vmem:[%s19099_s1 + $0x3a8] sm:$0xff]  ;;  %v2153_v22 = vld [vmem:[%s19099_s1 + $0x3a0] sm:$0xff] }
 0x261   :  { %v16263_v28 = vpop.permute.xlu0 %3487 }
 0x263   :  { %v16273_v23 = vpop.permute.xlu1 %3502 }
 0x264   :  { %7272 = vmatmul.mubr.bf16.vlgmr.msra.gmra.mrb[0].mxu1 %v12046_v50 }
 0x265   :  { %7465 = vmatpush1.bf16.msra.mxu1 %v4101_v49  ;;  %8043 = vmatmul.mubr.bf16.gmra.mrb[48].mxu0 %v12051_v24  ;;  %v16284_v38 = vpop.permute.xlu0 %3497  ;;  %v2144_v24 = vld [vmem:[%s19099_s1 + $0x358] sm:$0xff] }
 0x266   :  { %7466 = vmatprep.subr.bf16.mxu1 %v19166_v18  ;;  %7279 = vmatprep.mubr.bf16.mxu1 %v12052_v37  ;;  %v2143_v37 = vld [vmem:[%s19099_s1 + $0x350] sm:$0xff] }
 0x267   :  { %v16289_v17 = vpop.permute.xlu1 %3512  ;;  %8050 = vmatprep.mubr.bf16.mxu0 %v12054_v58  ;;  %v12062_v49 = vld [vmem:[%s19098_s2 + $0x130] ss:$72 sps:$4 sm:$0xff]   ;;  %v3872_v58 = vmul.f32 %v16081_v3, %v2144_v24  ;;  %v3871_v33 = vmul.f32 %v16098_v14, %v2143_v37  ;;  %v3878_v24 = vmul.f32 %v16153_v40, %v2150_v12  ;;  %v3877_v37 = vmul.f32 %v16160_v43, %v2149_v39  ;;  %v12076_v43 = vld [vmem:[%s19098_s2 + $0x2e4] ss:$72 sps:$4 sm:$0xff]  }
 0x268   :  { %v12075_v40 = vld [vmem:[%s19098_s2 + $0x928] ss:$72 sps:$4 sm:$0xff]  }
 0x269   :  { %7467 = vmatpush1.bf16.msra.mxu1 %v4102_v32  ;;  %v16300_v30 = vpop.permute.xlu0 %3507  ;;  %v12066_v32 = vld [vmem:[%s19098_s2 + $0x89c] ss:$72 sps:$4 sm:$0xff]   ;;  %v4106_v14 = vpack.c.bf16 %v3872_v58, %v3871_v33  ;;  %v4109_v33 = vpack.c.bf16 %v3878_v24, %v3877_v37  ;;  %v2158_v24 = vld [vmem:[%s19099_s1 + $0x3c8] sm:$0xff] }
 0x26a   :  { %7468 = vmatprep.subr.bf16.mxu1 %v19166_v18  ;;  %v2157_v37 = vld [vmem:[%s19099_s1 + $0x3c0] sm:$0xff] }
 0x26b   :  { %v16311_v48 = vpop.permute.xlu1 %3522 }
 0x26c   :  { %7280 = vmatmul.mubr.bf16.gmra.mrb[4].mxu1 %v12056_v21 }
 0x26d   :  { %7469 = vmatpush1.bf16.msra.mxu1 %v4103_v6  ;;  %8051 = vmatmul.mubr.bf16.gmra.mrb[52].mxu0 %v12057_v44  ;;  %v16322_v25 = vpop.permute.xlu0 %3517  ;;  %v2148_v44 = vld [vmem:[%s19099_s1 + $0x378] sm:$0xff]  ;;  %v12068_v6 = vld [vmem:[%s19098_s2 + $0x1c0] ss:$72 sps:$4 sm:$0xff]  }
 0x26e   :  { %7470 = vmatprep.subr.bf16.mxu1 %v19166_v18  ;;  %7287 = vmatprep.mubr.bf16.mxu1 %v12058_v9  ;;  %v2147_v9 = vld [vmem:[%s19099_s1 + $0x370] sm:$0xff] }
 0x26f   :  { %v16327_v50 = vpop.permute.xlu1 %3532  ;;  %8058 = vmatprep.mubr.bf16.mxu0 %v12060_v2  ;;  %v3876_v2 = vmul.f32 %v16123_v4, %v2148_v44  ;;  %v3875_v41 = vmul.f32 %v16137_v0, %v2147_v9  ;;  %v3882_v44 = vmul.f32 %v16179_v7, %v2154_v13  ;;  %v3881_v9 = vmul.f32 %v16182_v27, %v2153_v22  ;;  %v12081_v7 = vld [vmem:[%s19098_s2 + $0x9b8] ss:$72 sps:$4 sm:$0xff]   ;;  %v12082_v27 = vld [vmem:[%s19098_s2 + $0x374] ss:$72 sps:$4 sm:$0xff]  }
 0x271   :  { %7471 = vmatpush1.bf16.msra.mxu1 %v4104_v31  ;;  %v16338_v62 = vpop.permute.xlu0 %3527  ;;  %v12072_v31 = vld [vmem:[%s19098_s2 + $0x92c] ss:$72 sps:$4 sm:$0xff]   ;;  %v4108_v0 = vpack.c.bf16 %v3876_v2, %v3875_v41  ;;  %v4111_v41 = vpack.c.bf16 %v3882_v44, %v3881_v9  ;;  %v2161_v9 = vld [vmem:[%s19099_s1 + $0x3e0] sm:$0xff] }
 0x272   :  { %7472 = vmatprep.subr.bf16.mxu1 %v19166_v18  ;;  %v2162_v44 = vld [vmem:[%s19099_s1 + $0x3e8] sm:$0xff] }
 0x273   :  { %v16349_v47 = vpop.permute.xlu1 %3542 }
 0x274   :  { %7288 = vmatmul.mubr.bf16.gmra.mrb[8].mxu1 %v12062_v49 }
 0x275   :  { %7473 = vmatpush1.bf16.msra.mxu1 %v4105_v46  ;;  %8059 = vmatmul.mubr.bf16.gmra.mrb[56].mxu0 %v12063_v52  ;;  %v16360_v3 = vpop.permute.xlu0 %3537  ;;  %v2152_v52 = vld [vmem:[%s19099_s1 + $0x398] sm:$0xff] }
 0x276   :  { %7474 = vmatprep.subr.bf16.mxu1 %v19166_v18  ;;  %7295 = vmatprep.mubr.bf16.mxu1 %v12064_v59  ;;  %v2151_v59 = vld [vmem:[%s19099_s1 + $0x390] sm:$0xff] }
 0x277   :  { %v16365_v21 = vpop.permute.xlu1 %3552  ;;  %8066 = vmatprep.mubr.bf16.mxu0 %v12066_v32  ;;  %v12074_v46 = vld [vmem:[%s19098_s2 + $0x250] ss:$72 sps:$4 sm:$0xff]   ;;  %v3880_v32 = vmul.f32 %v16163_v45, %v2152_v52  ;;  %v3879_v57 = vmul.f32 %v16168_v26, %v2151_v59  ;;  %v3886_v52 = vmul.f32 %v16200_v42, %v2158_v24  ;;  %v3885_v59 = vmul.f32 %v16202_v16, %v2157_v37  ;;  %v12088_v16 = vld [vmem:[%s19098_s2 + $0x404] ss:$72 sps:$4 sm:$0xff]   ;;  %v12094_v37 = vld [vmem:[%s19098_s2 + $0x494] ss:$72 sps:$4 sm:$0xff]  }
 0x278   :  { %v12087_v42 = vld [vmem:[%s19098_s2 + $0xa48] ss:$72 sps:$4 sm:$0xff]   ;;  %v12093_v24 = vld [vmem:[%s19098_s2 + $0xad8] ss:$72 sps:$4 sm:$0xff]  }
 0x279   :  { %7475 = vmatpush1.bf16.msra.mxu1 %v4106_v14  ;;  %v16376_v36 = vpop.permute.xlu0 %3547  ;;  %v12078_v14 = vld [vmem:[%s19098_s2 + $0x9bc] ss:$72 sps:$4 sm:$0xff]   ;;  %v4110_v26 = vpack.c.bf16 %v3880_v32, %v3879_v57  ;;  %v4113_v57 = vpack.c.bf16 %v3886_v52, %v3885_v59 }
 0x27a   :  { %7476 = vmatprep.subr.bf16.mxu1 %v19166_v18 }
 0x27b   :  { %v16387_v60 = vpop.permute.xlu1 %3562 }
 0x27c   :  { %7296 = vmatmul.mubr.bf16.gmra.mrb[12].mxu1 %v12068_v6 }
 0x27d   :  { %7477 = vmatpush1.bf16.msra.mxu1 %v4107_v55  ;;  %8067 = vmatmul.mubr.bf16.gmra.mrb[60].mxu0 %v12069_v5  ;;  %v16398_v4 = vpop.permute.xlu0 %3557  ;;  %v2156_v5 = vld [vmem:[%s19099_s1 + $0x3b8] sm:$0xff]  ;;  %v12080_v55 = vld [vmem:[%s19098_s2 + $0x2e0] ss:$72 sps:$4 sm:$0xff]  }
 0x27e   :  { %7478 = vmatprep.subr.bf16.mxu1 %v19166_v18  ;;  %7303 = vmatprep.mubr.bf16.mxu1 %v12070_v20  ;;  %v2155_v20 = vld [vmem:[%s19099_s1 + $0x3b0] sm:$0xff] }
 0x27f   :  { %v16403_v49 = vpop.permute.xlu1 %3572  ;;  %8074 = vmatprep.mubr.bf16.mxu0 %v12072_v31  ;;  %v3884_v31 = vmul.f32 %v16184_v54, %v2156_v5  ;;  %v3883_v12 = vmul.f32 %v16189_v34, %v2155_v20 }
 0x281   :  { %7479 = vmatpush1.bf16.msra.mxu1 %v4108_v0  ;;  %v16414_v58 = vpop.permute.xlu0 %3567  ;;  %v12084_v0 = vld [vmem:[%s19098_s2 + $0xa4c] ss:$72 sps:$4 sm:$0xff]   ;;  %v4112_v34 = vpack.c.bf16 %v3884_v31, %v3883_v12  ;;  %v12092_v12 = vld [vmem:[%s19098_s2 + $0x400] ss:$72 sps:$4 sm:$0xff]  }
 0x282   :  { %7480 = vmatprep.subr.bf16.mxu1 %v19166_v18  ;;  %v2163_v31 = vld [vmem:[%s19099_s1 + $0x3f0] sm:$0xff] }
 0x283   :  { %v16425_v29 = vpop.permute.xlu1 %3582 }
 0x284   :  { %7304 = vmatmul.mubr.bf16.gmra.mrb[16].mxu1 %v12074_v46 }
 0x285   :  { %7481 = vmatpush1.bf16.msra.mxu1 %v4109_v33  ;;  %8075 = vmatmul.mubr.bf16.gmra.mrb[64].mxu0 %v12075_v40  ;;  %v16436_v45 = vpop.permute.xlu0 %3577  ;;  %v2160_v40 = vld [vmem:[%s19099_s1 + $0x3d8] sm:$0xff] }
 0x286   :  { %7482 = vmatprep.subr.bf16.mxu1 %v19166_v18  ;;  %7311 = vmatprep.mubr.bf16.mxu1 %v12076_v43  ;;  %v2159_v43 = vld [vmem:[%s19099_s1 + $0x3d0] sm:$0xff] }
 0x287   :  { %v16441_v6 = vpop.permute.xlu1 %3592  ;;  %8082 = vmatprep.mubr.bf16.mxu0 %v12078_v14  ;;  %v12086_v33 = vld [vmem:[%s19098_s2 + $0x370] ss:$72 sps:$4 sm:$0xff]  }
 0x289   :  { %7483 = vmatpush1.bf16.msra.mxu1 %v4110_v26  ;;  %v16452_v2 = vpop.permute.xlu0 %3587  ;;  %v12090_v26 = vld [vmem:[%s19098_s2 + $0xadc] ss:$72 sps:$4 sm:$0xff]  }
 0x28a   :  { %7484 = vmatprep.subr.bf16.mxu1 %v19166_v18 }
 0x28b   :  { %v16463_v39 = vpop.permute.xlu1 %3602 }
 0x28c   :  { %7312 = vmatmul.mubr.bf16.gmra.mrb[20].mxu1 %v12080_v55 }
 0x28d   :  { %7485 = vmatpush1.bf16.msra.mxu1 %v4111_v41  ;;  %8083 = vmatmul.mubr.bf16.gmra.mrb[68].mxu0 %v12081_v7  ;;  %v16474_v54 = vpop.permute.xlu0 %3597 }
 0x28e   :  { %7486 = vmatprep.subr.bf16.mxu1 %v19166_v18  ;;  %7319 = vmatprep.mubr.bf16.mxu1 %v12082_v27  ;;  %v2164_v27 = vld [vmem:[%s19099_s1 + $0x3f8] sm:$0xff] }
 0x28f   :  { %v2943_v46 = vpop.permute.xlu1 %2942  ;;  %8090 = vmatprep.mubr.bf16.mxu0 %v12084_v0 }
 0x290   :  { %v3888_v14 = vmul.f32 %v2943_v46, %v2160_v40  ;;  %v12096_v46 = vld [vmem:[%s19098_s2 + $0xb6c] ss:$72 sps:$4 sm:$0xff]  }
 0x291   :  { %7487 = vmatpush1.bf16.msra.mxu1 %v4112_v34  ;;  %v2938_v32 = vpop.permute.xlu0 %2937 }
 0x292   :  { %7488 = vmatprep.subr.bf16.mxu1 %v19166_v18  ;;  %v3887_v13 = vmul.f32 %v2938_v32, %v2159_v43  ;;  %v12098_v43 = vld [vmem:[%s19098_s2 + $0x490] ss:$72 sps:$4 sm:$0xff]   ;;  %v12100_v32 = vld [vmem:[%s19098_s2 + $0x524] ss:$72 sps:$4 sm:$0xff]  }
 0x293   :  { %v2953_v22 = vpop.permute.xlu1 %2952 }
 0x294   :  { %7320 = vmatmul.mubr.bf16.gmra.mrb[24].mxu1 %v12086_v33  ;;  %v4114_v20 = vpack.c.bf16 %v3888_v14, %v3887_v13  ;;  %v3890_v55 = vmul.f32 %v2953_v22, %v2162_v44  ;;  %v12099_v33 = vld [vmem:[%s19098_s2 + $0xb68] ss:$72 sps:$4 sm:$0xff]   ;;  %v12106_v14 = vld [vmem:[%s19098_s2 + $0x5b4] ss:$72 sps:$4 sm:$0xff]   ;;  %v12112_v44 = vld [vmem:[%s19098_s2 + $0x644] ss:$72 sps:$4 sm:$0xff]  }
 0x295   :  { %7489 = vmatpush1.bf16.msra.mxu1 %v4113_v57  ;;  %8091 = vmatmul.mubr.bf16.gmra.mrb[72].mxu0 %v12087_v42  ;;  %v2948_v5 = vpop.permute.xlu0 %2947  ;;  %v12102_v42 = vld [vmem:[%s19098_s2 + $0xbfc] ss:$72 sps:$4 sm:$0xff]   ;;  %v12105_v57 = vld [vmem:[%s19098_s2 + $0xbf8] ss:$72 sps:$4 sm:$0xff]   ;;  %v12108_v13 = vld [vmem:[%s19098_s2 + $0xc8c] ss:$72 sps:$4 sm:$0xff]  }
 0x296   :  { %7490 = vmatprep.subr.bf16.mxu1 %v19166_v18  ;;  %7327 = vmatprep.mubr.bf16.mxu1 %v12088_v16  ;;  %v3889_v7 = vmul.f32 %v2948_v5, %v2161_v9  ;;  %v12104_v16 = vld [vmem:[%s19098_s2 + $0x520] ss:$72 sps:$4 sm:$0xff]   ;;  %v12110_v22 = vld [vmem:[%s19098_s2 + $0x5b0] ss:$72 sps:$4 sm:$0xff]   ;;  %v12114_v9 = vld [vmem:[%s19098_s2 + $0xd1c] ss:$72 sps:$4 sm:$0xff]  }
 0x297   :  { %8098 = vmatprep.mubr.bf16.mxu0 %v12090_v26  ;;  %v2963_v41 = vpop.permute.xlu1 %2962  ;;  %v12111_v26 = vld [vmem:[%s19098_s2 + $0xc88] ss:$72 sps:$4 sm:$0xff]  }
 0x298   :  { %v4115_v34 = vpack.c.bf16 %v3890_v55, %v3889_v7  ;;  %v3892_v52 = vmul.f32 %v2963_v41, %v2164_v27  ;;  %v12116_v5 = vld [vmem:[%s19098_s2 + $0x640] ss:$72 sps:$4 sm:$0xff]   ;;  %v12118_v55 = vld [vmem:[%s19098_s2 + $0x6d4] ss:$72 sps:$4 sm:$0xff]  }
 0x299   :  { %7491 = vmatpush1.bf16.msra.mxu1 %v4114_v20  ;;  %v2958_v0 = vpop.permute.xlu0 %2957  ;;  %v12117_v20 = vld [vmem:[%s19098_s2 + $0xd18] ss:$72 sps:$4 sm:$0xff]   ;;  %v12122_v7 = vld [vmem:[%s19098_s2 + $0x34] ss:$72 sps:$4 sm:$0xff]   ;;  %v2262_v27 = vld [vmem:[%s19099_s1 + $0x708] sm:$0xff] }
 0x29a   :  { %7492 = vmatprep.subr.bf16.mxu1 %v19166_v18  ;;  %v3891_v59 = vmul.f32 %v2958_v0, %v2163_v31  ;;  %v2261_v41 = vld [vmem:[%s19099_s1 + $0x700] sm:$0xff]  ;;  %v3990_v31 = vmul.f32 %v16204_v11, %v2262_v27  ;;  %v2264_v0 = vld [vmem:[%s19099_s1 + $0x718] sm:$0xff] }
 0x29b   :  { %v12124_v11 = vld [vmem:[%s19098_s2 + $0x764] ss:$72 sps:$4 sm:$0xff]  }
 0x29c   :  { %7328 = vmatmul.mubr.bf16.gmra.mrb[28].mxu1 %v12092_v12  ;;  %v4116_v40 = vpack.c.bf16 %v3892_v52, %v3891_v59  ;;  %v3989_v12 = vmul.f32 %v16209_v51, %v2261_v41  ;;  %v12126_v51 = vld [vmem:[%s19098_s2 + $0xc4] ss:$72 sps:$4 sm:$0xff]   ;;  %v3992_v59 = vmul.f32 %v16220_v61, %v2264_v0 }
 0x29d   :  { %7493 = vmatpush1.bf16.msra.mxu1 %v4115_v34  ;;  %8099 = vmatmul.mubr.bf16.gmra.mrb[76].mxu0 %v12093_v24  ;;  %v12123_v24 = vld [vmem:[%s19098_s2 + $0x6d0] ss:$72 sps:$4 sm:$0xff]   ;;  %v2273_v0 = vld [vmem:[%s19099_s1 + $0x760] sm:$0xff] }
 0x29e   :  { %7494 = vmatprep.subr.bf16.mxu1 %v19166_v18  ;;  %7335 = vmatprep.mubr.bf16.mxu1 %v12094_v37  ;;  %v2263_v37 = vld [vmem:[%s19099_s1 + $0x710] sm:$0xff]  ;;  %v4165_v52 = vpack.c.bf16 %v3990_v31, %v3989_v12  ;;  %v2274_v12 = vld [vmem:[%s19099_s1 + $0x768] sm:$0xff] }
 0x29f   :  { %8106 = vmatprep.mubr.bf16.mxu0 %v12096_v46  ;;  %v12120_v34 = vld [vmem:[%s19098_s2 + $0x30] ss:$72 sps:$4 sm:$0xff]   ;;  %v3991_v46 = vmul.f32 %v16222_v56, %v2263_v37 }
 0x2a0   :  { %v2276_v37 = vld [vmem:[%s19099_s1 + $0x778] sm:$0xff] }
 0x2a1   :  { %7495 = vmatpush1.bf16.msra.mxu1 %v4116_v40  ;;  %v2266_v40 = vld [vmem:[%s19099_s1 + $0x728] sm:$0xff] }
 0x2a2   :  { %11075 = vmatprep.subr.bf16.mxu1 %v19166_v18  ;;  %v3994_v61 = vmul.f32 %v16224_v10, %v2266_v40  ;;  %v12130_v10 = vld [vmem:[%s19098_s2 + $0x7f4] ss:$72 sps:$4 sm:$0xff]   ;;  %v2278_v40 = vld [vmem:[%s19099_s1 + $0x788] sm:$0xff] }
 0x2a4   :  { %7336 = vmatmul.mubr.bf16.gmra.mrb[32].mxu1 %v12098_v43  ;;  %v2265_v43 = vld [vmem:[%s19099_s1 + $0x720] sm:$0xff] }
 0x2a5   :  { %8107 = vmatmul.mubr.bf16.gmra.mrb[80].mxu0 %v12099_v33  ;;  %7343 = vmatprep.mubr.bf16.mxu1 %v12100_v32  ;;  %v4166_v33 = vpack.c.bf16 %v3992_v59, %v3991_v46  ;;  %v3993_v56 = vmul.f32 %v16229_v8, %v2265_v43  ;;  %v2268_v32 = vld [vmem:[%s19099_s1 + $0x738] sm:$0xff]  ;;  %v4004_v59 = vmul.f32 %v16311_v48, %v2276_v37  ;;  %v2277_v43 = vld [vmem:[%s19099_s1 + $0x780] sm:$0xff] }
 0x2a6   :  { %8114 = vmatprep.mubr.bf16.mxu0 %v12102_v42  ;;  %v12128_v42 = vld [vmem:[%s19098_s2 + $0x760] ss:$72 sps:$4 sm:$0xff]   ;;  %v12132_v8 = vld [vmem:[%s19098_s2 + $0x154] ss:$72 sps:$4 sm:$0xff]   ;;  %v4006_v48 = vmul.f32 %v16327_v50, %v2278_v40  ;;  %v12148_v50 = vld [vmem:[%s19098_s2 + $0x9a4] ss:$72 sps:$4 sm:$0xff]  }
 0x2a7   :  { %v2292_v37 = vld [vmem:[%s19099_s1 + $0x7f8] sm:$0xff] }
 0x2a8   :  { %v12171_v40 = vld [vmem:[%s19098_s2 + $0x4b0] ss:$72 sps:$4 sm:$0xff]  }
 0x2ac   :  { %7344 = vmatmul.mubr.bf16.gmra.mrb[36].mxu1 %v12104_v16  ;;  %v2267_v16 = vld [vmem:[%s19099_s1 + $0x730] sm:$0xff] }
 0x2ad   :  { %8115 = vmatmul.mubr.bf16.gmra.mrb[84].mxu0 %v12105_v57  ;;  %7351 = vmatprep.mubr.bf16.mxu1 %v12106_v14  ;;  %v12129_v57 = vld [vmem:[%s19098_s2 + $0xc0] ss:$72 sps:$4 sm:$0xff]   ;;  %v4167_v14 = vpack.c.bf16 %v3994_v61, %v3993_v56  ;;  %v2280_v61 = vld [vmem:[%s19099_s1 + $0x798] sm:$0xff] }
 0x2ae   :  { %8122 = vmatprep.mubr.bf16.mxu0 %v12108_v13  ;;  %v3996_v13 = vmul.f32 %v16240_v19, %v2268_v32  ;;  %v12146_v56 = vld [vmem:[%s19098_s2 + $0x910] ss:$72 sps:$4 sm:$0xff]  }
 0x2af   :  { %v2279_v32 = vld [vmem:[%s19099_s1 + $0x790] sm:$0xff] }
 0x2b4   :  { %7352 = vmatmul.mubr.bf16.gmra.mrb[40].mxu1 %v12110_v22  ;;  %v3995_v22 = vmul.f32 %v16248_v15, %v2267_v16 }
 0x2b5   :  { %8123 = vmatmul.mubr.bf16.gmra.mrb[88].mxu0 %v12111_v26  ;;  %7359 = vmatprep.mubr.bf16.mxu1 %v12112_v44  ;;  %v2270_v26 = vld [vmem:[%s19099_s1 + $0x748] sm:$0xff]  ;;  %v2269_v44 = vld [vmem:[%s19099_s1 + $0x740] sm:$0xff] }
 0x2b6   :  { %8130 = vmatprep.mubr.bf16.mxu0 %v12114_v9  ;;  %v4168_v9 = vpack.c.bf16 %v3996_v13, %v3995_v22  ;;  %v3998_v19 = vmul.f32 %v16252_v53, %v2270_v26  ;;  %v3997_v15 = vmul.f32 %v16263_v28, %v2269_v44  ;;  %v12136_v53 = vld [vmem:[%s19098_s2 + $0x884] ss:$72 sps:$4 sm:$0xff]   ;;  %v2284_v22 = vld [vmem:[%s19099_s1 + $0x7b8] sm:$0xff]  ;;  %v12152_v26 = vld [vmem:[%s19098_s2 + $0x9a0] ss:$72 sps:$4 sm:$0xff]  }
 0x2b7   :  { %v12138_v28 = vld [vmem:[%s19098_s2 + $0x1e4] ss:$72 sps:$4 sm:$0xff]   ;;  %v2283_v44 = vld [vmem:[%s19099_s1 + $0x7b0] sm:$0xff] }
 0x2b8   :  { %v4169_v27 = vpack.c.bf16 %v3998_v19, %v3997_v15  ;;  %v4012_v15 = vmul.f32 %v16387_v60, %v2284_v22  ;;  %v12204_v22 = vld [vmem:[%s19098_s2 + $0x814] ss:$72 sps:$4 sm:$0xff]  }
 0x2bc   :  { %7360 = vmatmul.mubr.bf16.gmra.mrb[44].mxu1 %v12116_v5  ;;  %v2272_v5 = vld [vmem:[%s19099_s1 + $0x758] sm:$0xff] }
 0x2bd   :  { %8131 = vmatmul.mubr.bf16.gmra.mrb[92].mxu0 %v12117_v20  ;;  %7367 = vmatprep.mubr.bf16.mxu1 %v12118_v55  ;;  %v12134_v20 = vld [vmem:[%s19098_s2 + $0x7f0] ss:$72 sps:$4 sm:$0xff]   ;;  %v4000_v41 = vmul.f32 %v16273_v23, %v2272_v5  ;;  %v4002_v23 = vmul.f32 %v16289_v17, %v2274_v12  ;;  %v12142_v17 = vld [vmem:[%s19098_s2 + $0x914] ss:$72 sps:$4 sm:$0xff]   ;;  %v4011_v5 = vmul.f32 %v16398_v4, %v2283_v44  ;;  %v19178_v44 = vld [vmem:[#allocation3_spill] sm:$0xff] }
 0x2be   :  { %8171 = vmatprep.mubr.bf16.mxu0 %v12122_v7  ;;  %v2271_v55 = vld [vmem:[%s19099_s1 + $0x750] sm:$0xff] }
 0x2bf   :  { %v12135_v7 = vld [vmem:[%s19098_s2 + $0x150] ss:$72 sps:$4 sm:$0xff]   ;;  %v3999_v31 = vmul.f32 %v16284_v38, %v2271_v55  ;;  %v4001_v38 = vmul.f32 %v16300_v30, %v2273_v0  ;;  %v12144_v30 = vld [vmem:[%s19098_s2 + $0x274] ss:$72 sps:$4 sm:$0xff]   ;;  %v2285_v55 = vld [vmem:[%s19099_s1 + $0x7c0] sm:$0xff] }
 0x2c0   :  { %v4013_v4 = vmul.f32 %v16414_v58, %v2285_v55  ;;  %v12162_v58 = vld [vmem:[%s19098_s2 + $0x424] ss:$72 sps:$4 sm:$0xff]  }
 0x2c1   :  { %v12214_v55 = vld [vmem:[%s19098_s2 + $0x25c] ss:$72 sps:$4 sm:$0xff]  }
 0x2c4   :  { %7368 = vmatmul.mubr.bf16.gmra.mrb[48].mxu1 %v12123_v24  ;;  %v4170_v24 = vpack.c.bf16 %v4000_v41, %v3999_v31  ;;  %v12159_v41 = vld [vmem:[%s19098_s2 + $0x390] ss:$72 sps:$4 sm:$0xff]  }
 0x2c5   :  { %8172 = vmatmul.mubr.bf16.vlgmr.msra.gmra.mrb[0].mxu0 %v12120_v34  ;;  %7375 = vmatprep.mubr.bf16.mxu1 %v12124_v11  ;;  %v12140_v34 = vld [vmem:[%s19098_s2 + $0x880] ss:$72 sps:$4 sm:$0xff]   ;;  %v2275_v11 = vld [vmem:[%s19099_s1 + $0x770] sm:$0xff] }
 0x2c6   :  { %8365 = vmatpush1.bf16.msra.mxu0 %v4165_v52  ;;  %8179 = vmatprep.mubr.bf16.mxu0 %v12126_v51  ;;  %v12141_v51 = vld [vmem:[%s19098_s2 + $0x1e0] ss:$72 sps:$4 sm:$0xff]   ;;  %v4171_v52 = vpack.c.bf16 %v4002_v23, %v4001_v38  ;;  %v4003_v46 = vmul.f32 %v16322_v25, %v2275_v11  ;;  %v4005_v25 = vmul.f32 %v16338_v62, %v2277_v43  ;;  %v12150_v62 = vld [vmem:[%s19098_s2 + $0x304] ss:$72 sps:$4 sm:$0xff]   ;;  %v2291_v11 = vld [vmem:[%s19099_s1 + $0x7f0] sm:$0xff] }
 0x2c7   :  { %8366 = vmatprep.subr.bf16.mxu0 %v19166_v18  ;;  %v2289_v23 = vld [vmem:[%s19099_s1 + $0x7e0] sm:$0xff] }
 0x2c8   :  { %v4173_v16 = vpack.c.bf16 %v4006_v48, %v4005_v25  ;;  %v12176_v43 = vld [vmem:[%s19098_s2 + $0xbe0] ss:$72 sps:$4 sm:$0xff]   ;;  %v12178_v48 = vld [vmem:[%s19098_s2 + $0xc74] ss:$72 sps:$4 sm:$0xff]  }
 0x2c9   :  { %v12180_v25 = vld [vmem:[%s19098_s2 + $0x5d4] ss:$72 sps:$4 sm:$0xff]  }
 0x2ca   :  { %8367 = vmatpush1.bf16.msra.mxu0 %v4166_v33  ;;  %v4172_v33 = vpack.c.bf16 %v4004_v59, %v4003_v46  ;;  %v12170_v46 = vld [vmem:[%s19098_s2 + $0xb50] ss:$72 sps:$4 sm:$0xff]  }
 0x2cb   :  { %8368 = vmatprep.subr.bf16.mxu0 %v19166_v18 }
 0x2cc   :  { %7376 = vmatmul.mubr.bf16.gmra.mrb[52].mxu1 %v12128_v42  ;;  %v12147_v42 = vld [vmem:[%s19098_s2 + $0x270] ss:$72 sps:$4 sm:$0xff]  }
 0x2cd   :  { %8180 = vmatmul.mubr.bf16.gmra.mrb[4].mxu0 %v12129_v57  ;;  %7383 = vmatprep.mubr.bf16.mxu1 %v12130_v10  ;;  %v4008_v57 = vmul.f32 %v16349_v47, %v2280_v61  ;;  %v4007_v10 = vmul.f32 %v16360_v3, %v2279_v32  ;;  %v12182_v61 = vld [vmem:[%s19098_s2 + $0xc70] ss:$72 sps:$4 sm:$0xff]   ;;  %v12184_v32 = vld [vmem:[%s19098_s2 + $0xd04] ss:$72 sps:$4 sm:$0xff]  }
 0x2ce   :  { %8369 = vmatpush1.bf16.msra.mxu0 %v4167_v14  ;;  %8187 = vmatprep.mubr.bf16.mxu0 %v12132_v8  ;;  %v2282_v8 = vld [vmem:[%s19099_s1 + $0x7a8] sm:$0xff]  ;;  %v2281_v14 = vld [vmem:[%s19099_s1 + $0x7a0] sm:$0xff] }
 0x2cf   :  { %8370 = vmatprep.subr.bf16.mxu0 %v19166_v18  ;;  %v4174_v13 = vpack.c.bf16 %v4008_v57, %v4007_v10  ;;  %v4010_v47 = vmul.f32 %v16365_v21, %v2282_v8  ;;  %v4009_v3 = vmul.f32 %v16376_v36, %v2281_v14  ;;  %v12154_v21 = vld [vmem:[%s19098_s2 + $0xa34] ss:$72 sps:$4 sm:$0xff]   ;;  %v12190_v10 = vld [vmem:[%s19098_s2 + $0x18] ss:$72 sps:$4 sm:$0xff]  }
 0x2d0   :  { %v12156_v36 = vld [vmem:[%s19098_s2 + $0x394] ss:$72 sps:$4 sm:$0xff]   ;;  %v12195_v8 = vld [vmem:[%s19098_s2 + $0x6f0] ss:$72 sps:$4 sm:$0xff]  }
 0x2d1   :  { %v4175_v19 = vpack.c.bf16 %v4010_v47, %v4009_v3  ;;  %v12193_v57 = vld [vmem:[%s19098_s2 + $0x6f4] ss:$72 sps:$4 sm:$0xff]   ;;  %v12200_v47 = vld [vmem:[%s19098_s2 + $0xa8] ss:$72 sps:$4 sm:$0xff]  }
 0x2d2   :  { %8371 = vmatpush1.bf16.msra.mxu0 %v4168_v9  ;;  %v12153_v9 = vld [vmem:[%s19098_s2 + $0x300] ss:$72 sps:$4 sm:$0xff]   ;;  %v12196_v14 = vld [vmem:[%s19098_s2 + $0xac] ss:$72 sps:$4 sm:$0xff]  }
 0x2d3   :  { %8372 = vmatprep.subr.bf16.mxu0 %v19166_v18  ;;  %v12201_v3 = vld [vmem:[%s19098_s2 + $0x780] ss:$72 sps:$4 sm:$0xff]  }
 0x2d4   :  { %7384 = vmatmul.mubr.bf16.gmra.mrb[56].mxu1 %v12134_v20  ;;  %v2286_v20 = vld [vmem:[%s19099_s1 + $0x7c8] sm:$0xff] }
 0x2d5   :  { %8188 = vmatmul.mubr.bf16.gmra.mrb[8].mxu0 %v12135_v7  ;;  %7391 = vmatprep.mubr.bf16.mxu1 %v12136_v53  ;;  %v4176_v7 = vpack.c.bf16 %v4012_v15, %v4011_v5  ;;  %v4014_v60 = vmul.f32 %v16403_v49, %v2286_v20  ;;  %v2288_v53 = vld [vmem:[%s19099_s1 + $0x7d8] sm:$0xff]  ;;  %v12160_v49 = vld [vmem:[%s19098_s2 + $0xac4] ss:$72 sps:$4 sm:$0xff]   ;;  %v12212_v15 = vld [vmem:[%s19098_s2 + $0x1c8] ss:$72 sps:$4 sm:$0xff]  }
 0x2d6   :  { %8373 = vmatpush1.bf16.msra.mxu0 %v4169_v27  ;;  %8195 = vmatprep.mubr.bf16.mxu0 %v12138_v28  ;;  %v12158_v28 = vld [vmem:[%s19098_s2 + $0xa30] ss:$72 sps:$4 sm:$0xff]   ;;  %v4016_v12 = vmul.f32 %v16425_v29, %v2288_v53  ;;  %v12213_v20 = vld [vmem:[%s19098_s2 + $0x8a0] ss:$72 sps:$4 sm:$0xff]  }
 0x2d7   :  { %8374 = vmatprep.subr.bf16.mxu0 %v19166_v18  ;;  %v2287_v27 = vld [vmem:[%s19099_s1 + $0x7d0] sm:$0xff]  ;;  %v4177_v31 = vpack.c.bf16 %v4014_v60, %v4013_v4  ;;  %v19180_v5 = vld [vmem:[#allocation5_spill] sm:$0xff]  ;;  %v19181_v60 = vld [vmem:[#allocation6_spill] sm:$0xff] }
 0x2d8   :  { %v4015_v0 = vmul.f32 %v16436_v45, %v2287_v27  ;;  %v4017_v45 = vmul.f32 %v16452_v2, %v2289_v23  ;;  %v12168_v2 = vld [vmem:[%s19098_s2 + $0x4b4] ss:$72 sps:$4 sm:$0xff]   ;;  %v12218_v4 = vld [vmem:[%s19098_s2 + $0x258] ss:$72 sps:$4 sm:$0xff]   ;;  %v19182_v53 = vld [vmem:[#allocation7_spill] sm:$0xff] }
 0x2d9   :  { %v12220_v27 = vld [vmem:[%s19098_s2 + $0x2ec] ss:$72 sps:$4 sm:$0xff]   ;;  %v19185_v23 = vld [vmem:[#allocation10_spill] sm:$0xff] }
 0x2da   :  { %8375 = vmatpush1.bf16.msra.mxu0 %v4170_v24  ;;  %v2290_v24 = vld [vmem:[%s19099_s1 + $0x7e8] sm:$0xff]  ;;  %v4178_v38 = vpack.c.bf16 %v4016_v12, %v4015_v0  ;;  %v12226_v0 = vld [vmem:[%s19098_s2 + $0x37c] ss:$72 sps:$4 sm:$0xff]  }
 0x2db   :  { %8376 = vmatprep.subr.bf16.mxu0 %v19166_v18  ;;  %v4018_v29 = vmul.f32 %v16441_v6, %v2290_v24  ;;  %v12166_v6 = vld [vmem:[%s19098_s2 + $0xb54] ss:$72 sps:$4 sm:$0xff]   ;;  %v12225_v12 = vld [vmem:[%s19098_s2 + $0x9c0] ss:$72 sps:$4 sm:$0xff]  }
 0x2dc   :  { %7392 = vmatmul.mubr.bf16.gmra.mrb[60].mxu1 %v12140_v34  ;;  %v12164_v34 = vld [vmem:[%s19098_s2 + $0xac0] ss:$72 sps:$4 sm:$0xff]   ;;  %v12228_v24 = vld [vmem:[%s19098_s2 + $0xa54] ss:$72 sps:$4 sm:$0xff]  }
 0x2dd   :  { %8196 = vmatmul.mubr.bf16.gmra.mrb[12].mxu0 %v12141_v51  ;;  %7399 = vmatprep.mubr.bf16.mxu1 %v12142_v17  ;;  %v12165_v51 = vld [vmem:[%s19098_s2 + $0x420] ss:$72 sps:$4 sm:$0xff]   ;;  %v4179_v17 = vpack.c.bf16 %v4018_v29, %v4017_v45  ;;  %v12231_v45 = vld [vmem:[%s19098_s2 + $0xa50] ss:$72 sps:$4 sm:$0xff]  }
 0x2de   :  { %8377 = vmatpush1.bf16.msra.mxu0 %v4171_v52  ;;  %8203 = vmatprep.mubr.bf16.mxu0 %v12144_v30  ;;  %v4020_v30 = vmul.f32 %v16463_v39, %v2292_v37  ;;  %v4019_v52 = vmul.f32 %v16474_v54, %v2291_v11  ;;  %v12172_v39 = vld [vmem:[%s19098_s2 + $0xbe4] ss:$72 sps:$4 sm:$0xff]   ;;  %v12236_v11 = vld [vmem:[%s19098_s2 + $0x408] ss:$72 sps:$4 sm:$0xff]  }
 0x2df   :  { %8378 = vmatprep.subr.bf16.mxu0 %v19166_v18  ;;  %v12174_v54 = vld [vmem:[%s19098_s2 + $0x544] ss:$72 sps:$4 sm:$0xff]  }
 0x2e0   :  { %v4180_v59 = vpack.c.bf16 %v4020_v30, %v4019_v52  ;;  %v19186_v29 = vld [vmem:[#allocation11_spill] sm:$0xff]  ;;  %v3613_v30 = vpop.permute.xlu1 %3612  ;;  %v3608_v52 = vpop.permute.xlu0 %3607 }
 0x2e1   :  { %v12232_v37 = vld [vmem:[%s19098_s2 + $0x40c] ss:$72 sps:$4 sm:$0xff]  }
 0x2e2   :  { %8379 = vmatpush1.bf16.msra.mxu0 %v4172_v33  ;;  %v12177_v33 = vld [vmem:[%s19098_s2 + $0x540] ss:$72 sps:$4 sm:$0xff]  }
 0x2e3   :  { %8380 = vmatprep.subr.bf16.mxu0 %v19166_v18 }
 0x2e4   :  { %7400 = vmatmul.mubr.bf16.gmra.mrb[64].mxu1 %v12146_v56  ;;  %v12183_v56 = vld [vmem:[%s19098_s2 + $0x5d0] ss:$72 sps:$4 sm:$0xff]  }
 0x2e5   :  { %8204 = vmatmul.mubr.bf16.gmra.mrb[16].mxu0 %v12147_v42  ;;  %7407 = vmatprep.mubr.bf16.mxu1 %v12148_v50  ;;  %v12186_v42 = vld [vmem:[%s19098_s2 + $0x664] ss:$72 sps:$4 sm:$0xff]   ;;  %v12188_v50 = vld [vmem:[%s19098_s2 + $0xd00] ss:$72 sps:$4 sm:$0xff]  }
 0x2e6   :  { %8381 = vmatpush1.bf16.msra.mxu0 %v4173_v16  ;;  %8211 = vmatprep.mubr.bf16.mxu0 %v12150_v62  ;;  %v12189_v62 = vld [vmem:[%s19098_s2 + $0x660] ss:$72 sps:$4 sm:$0xff]   ;;  %v12192_v16 = vld [vmem:[%s19098_s2 + $0x1c] ss:$72 sps:$4 sm:$0xff]  }
 0x2e7   :  { %8382 = vmatprep.subr.bf16.mxu0 %v19166_v18 }
 0x2ea   :  { %8383 = vmatpush1.bf16.msra.mxu0 %v4174_v13  ;;  %v12198_v13 = vld [vmem:[%s19098_s2 + $0x784] ss:$72 sps:$4 sm:$0xff]  }
 0x2eb   :  { %8384 = vmatprep.subr.bf16.mxu0 %v19166_v18 }
 0x2ec   :  { %7408 = vmatmul.mubr.bf16.gmra.mrb[68].mxu1 %v12152_v26  ;;  %v19177_v26 = vld [vmem:[#allocation2_spill] sm:$0xff] }
 0x2ed   :  { %8212 = vmatmul.mubr.bf16.gmra.mrb[20].mxu0 %v12153_v9  ;;  %7415 = vmatprep.mubr.bf16.mxu1 %v12154_v21  ;;  %v12207_v9 = vld [vmem:[%s19098_s2 + $0x810] ss:$72 sps:$4 sm:$0xff]   ;;  %v12208_v21 = vld [vmem:[%s19098_s2 + $0x1cc] ss:$72 sps:$4 sm:$0xff]  }
 0x2ee   :  { %8385 = vmatpush1.bf16.msra.mxu0 %v4175_v19  ;;  %8219 = vmatprep.mubr.bf16.mxu0 %v12156_v36  ;;  %v12210_v36 = vld [vmem:[%s19098_s2 + $0x8a4] ss:$72 sps:$4 sm:$0xff]   ;;  %v19179_v19 = vld [vmem:[#allocation4_spill] sm:$0xff] }
 0x2ef   :  { %8386 = vmatprep.subr.bf16.mxu0 %v19166_v18 }
 0x2f2   :  { %8387 = vmatpush1.bf16.msra.mxu0 %v4176_v7  ;;  %v12216_v7 = vld [vmem:[%s19098_s2 + $0x934] ss:$72 sps:$4 sm:$0xff]  }
 0x2f3   :  { %8388 = vmatprep.subr.bf16.mxu0 %v19166_v18 }
 0x2f4   :  { %7416 = vmatmul.mubr.bf16.gmra.mrb[72].mxu1 %v12158_v28  ;;  %v12219_v28 = vld [vmem:[%s19098_s2 + $0x930] ss:$72 sps:$4 sm:$0xff]  }
 0x2f5   :  { %8220 = vmatmul.mubr.bf16.gmra.mrb[24].mxu0 %v12159_v41  ;;  %7423 = vmatprep.mubr.bf16.mxu1 %v12160_v49  ;;  %v12222_v41 = vld [vmem:[%s19098_s2 + $0x9c4] ss:$72 sps:$4 sm:$0xff]   ;;  %v19183_v49 = vld [vmem:[#allocation8_spill] sm:$0xff] }
 0x2f6   :  { %8389 = vmatpush1.bf16.msra.mxu0 %v4177_v31  ;;  %8227 = vmatprep.mubr.bf16.mxu0 %v12162_v58  ;;  %v12224_v58 = vld [vmem:[%s19098_s2 + $0x2e8] ss:$72 sps:$4 sm:$0xff]   ;;  %v19184_v31 = vld [vmem:[#allocation9_spill] sm:$0xff] }
 0x2f7   :  { %8390 = vmatprep.subr.bf16.mxu0 %v19166_v18 }
 0x2fa   :  { %8391 = vmatpush1.bf16.msra.mxu0 %v4178_v38  ;;  %v12230_v38 = vld [vmem:[%s19098_s2 + $0x378] ss:$72 sps:$4 sm:$0xff]  }
 0x2fb   :  { %8392 = vmatprep.subr.bf16.mxu0 %v19166_v18 }
 0x2fc   :  { %7424 = vmatmul.mubr.bf16.gmra.mrb[76].mxu1 %v12164_v34  ;;  %v12234_v34 = vld [vmem:[%s19098_s2 + $0xae4] ss:$72 sps:$4 sm:$0xff]  }
 0x2fd   :  { %8228 = vmatmul.mubr.bf16.gmra.mrb[28].mxu0 %v12165_v51  ;;  %7431 = vmatprep.mubr.bf16.mxu1 %v12166_v6  ;;  %v19187_v51 = vld [vmem:[#allocation12_spill] sm:$0xff]  ;;  %v12237_v6 = vld [vmem:[%s19098_s2 + $0xae0] ss:$72 sps:$4 sm:$0xff]  }
 0x2fe   :  { %8393 = vmatpush1.bf16.msra.mxu0 %v4179_v17  ;;  %8235 = vmatprep.mubr.bf16.mxu0 %v12168_v2  ;;  %v12240_v2 = vld [vmem:[%s19098_s2 + $0xb74] ss:$72 sps:$4 sm:$0xff]  }
 0x2ff   :  { %8394 = vmatprep.subr.bf16.mxu0 %v19166_v18  ;;  %v19188_v17 = vld [vmem:[#allocation13_spill] sm:$0xff] }
 0x302   :  { %8395 = vmatpush1.bf16.msra.mxu0 %v4180_v59  ;;  %v12242_v59 = vld [vmem:[%s19098_s2 + $0x498] ss:$72 sps:$4 sm:$0xff]  }
 0x303   :  { %8589 = vmatprep.subr.bf16.mxu0 %v19166_v18 }
 0x304   :  { %7432 = vmatmul.mubr.bf16.gmra.mrb[80].mxu1 %v12170_v46  ;;  %v19189_v46 = vld [vmem:[#allocation14_spill] sm:$0xff] }
 0x305   :  { %8236 = vmatmul.mubr.bf16.gmra.mrb[32].mxu0 %v12171_v40  ;;  %7439 = vmatprep.mubr.bf16.mxu1 %v12172_v39  ;;  %v12243_v40 = vld [vmem:[%s19098_s2 + $0xb70] ss:$72 sps:$4 sm:$0xff]   ;;  %v12244_v39 = vld [vmem:[%s19098_s2 + $0x52c] ss:$72 sps:$4 sm:$0xff]  }
 0x306   :  { %8243 = vmatprep.mubr.bf16.mxu0 %v12174_v54  ;;  %v12246_v54 = vld [vmem:[%s19098_s2 + $0xc04] ss:$72 sps:$4 sm:$0xff]  }
 0x30c   :  { %7440 = vmatmul.mubr.bf16.gmra.mrb[84].mxu1 %v12176_v43  ;;  %v3623_v43 = vpop.permute.xlu1 %3622 }
 0x30d   :  { %8244 = vmatmul.mubr.bf16.gmra.mrb[36].mxu0 %v12177_v33  ;;  %7447 = vmatprep.mubr.bf16.mxu1 %v12178_v48  ;;  %v3618_v33 = vpop.permute.xlu0 %3617  ;;  %v12248_v48 = vld [vmem:[%s19098_s2 + $0x528] ss:$72 sps:$4 sm:$0xff]  }
 0x30e   :  { %8251 = vmatprep.mubr.bf16.mxu0 %v12180_v25  ;;  %v12249_v25 = vld [vmem:[%s19098_s2 + $0xc00] ss:$72 sps:$4 sm:$0xff]  }
 0x314   :  { %7448 = vmatmul.mubr.bf16.gmra.mrb[88].mxu1 %v12182_v61  ;;  %v12250_v61 = vld [vmem:[%s19098_s2 + $0x5bc] ss:$72 sps:$4 sm:$0xff]  }
 0x315   :  { %8252 = vmatmul.mubr.bf16.gmra.mrb[40].mxu0 %v12183_v56  ;;  %7455 = vmatprep.mubr.bf16.mxu1 %v12184_v32  ;;  %v12252_v56 = vld [vmem:[%s19098_s2 + $0xc94] ss:$72 sps:$4 sm:$0xff]   ;;  %v3633_v32 = vpop.permute.xlu1 %3632 }
 0x316   :  { %8259 = vmatprep.mubr.bf16.mxu0 %v12186_v42  ;;  %v3628_v42 = vpop.permute.xlu0 %3627 }
 0x31c   :  { %7456 = vmatmul.mubr.bf16.gmra.mrb[92].mxu1 %v12188_v50  ;;  %v12254_v50 = vld [vmem:[%s19098_s2 + $0x5b8] ss:$72 sps:$4 sm:$0xff]  }
 0x31d   :  { %8260 = vmatmul.mubr.bf16.gmra.mrb[44].mxu0 %v12189_v62  ;;  %7496 = vmatprep.mubr.bf16.mxu1 %v12192_v16  ;;  %v3643_v62 = vpop.permute.xlu1 %3642  ;;  %v3638_v16 = vpop.permute.xlu0 %3637 }
 0x31e   :  { %8267 = vmatprep.mubr.bf16.mxu0 %v12193_v57  ;;  %v12255_v57 = vld [vmem:[%s19098_s2 + $0xc90] ss:$72 sps:$4 sm:$0xff]  }
 0x324   :  { %7497 = vmatmul.mubr.bf16.vlgmr.msra.gmra.mrb[0].mxu1 %v12190_v10  ;;  %v12256_v10 = vld [vmem:[%s19098_s2 + $0x64c] ss:$72 sps:$4 sm:$0xff]  }
 0x325   :  { %11091 = vmatpush1.bf16.msra.mxu1 %v14773_v35  ;;  %8268 = vmatmul.mubr.bf16.gmra.mrb[48].mxu0 %v12195_v8  ;;  %v12202_v35 = vld [vmem:[%s19098_s2 + $0x13c] ss:$72 sps:$4 sm:$0xff]  }
 0x326   :  { %11076 = vmatprep.subr.bf16.mxu1 %v19166_v18  ;;  %7504 = vmatprep.mubr.bf16.mxu1 %v12196_v14  ;;  %v12258_v8 = vld [vmem:[%s19098_s2 + $0xd24] ss:$72 sps:$4 sm:$0xff]   ;;  %v3653_v14 = vpop.permute.xlu1 %3652 }
 0x327   :  { %8275 = vmatprep.mubr.bf16.mxu0 %v12198_v13  ;;  %v3648_v13 = vpop.permute.xlu0 %3647 }
 0x329   :  { %11092 = vmatpush1.bf16.msra.mxu1 %v14783_v63  ;;  %v12206_v63 = vld [vmem:[%s19098_s2 + $0x138] ss:$72 sps:$4 sm:$0xff]  }
 0x32a   :  { %11077 = vmatprep.subr.bf16.mxu1 %v19166_v18 }
 0x32c   :  { %7505 = vmatmul.mubr.bf16.gmra.mrb[4].mxu1 %v12200_v47  ;;  %v12260_v47 = vld [vmem:[%s19098_s2 + $0x648] ss:$72 sps:$4 sm:$0xff]  }
 0x32d   :  { %11093 = vmatpush1.bf16.msra.mxu1 %v19177_v26  ;;  %8276 = vmatmul.mubr.bf16.gmra.mrb[52].mxu0 %v12201_v3  ;;  %v12261_v3 = vld [vmem:[%s19098_s2 + $0xd20] ss:$72 sps:$4 sm:$0xff]  }
 0x32e   :  { %11078 = vmatprep.subr.bf16.mxu1 %v19166_v18  ;;  %7512 = vmatprep.mubr.bf16.mxu1 %v12202_v35  ;;  %v12262_v35 = vld [vmem:[%s19098_s2 + $0x6dc] ss:$72 sps:$4 sm:$0xff]   ;;  %v2294_v26 = vld [vmem:[%s19099_s1 + $0x808] sm:$0xff] }
 0x32f   :  { %8283 = vmatprep.mubr.bf16.mxu0 %v12204_v22  ;;  %v12266_v22 = vld [vmem:[%s19098_s2 + $0x3c] ss:$72 sps:$4 sm:$0xff]  }
 0x331   :  { %11094 = vmatpush1.bf16.msra.mxu1 %v19178_v44  ;;  %v17043_v44 = vpop.permute.xlu1 %3662 }
 0x332   :  { %11079 = vmatprep.subr.bf16.mxu1 %v19166_v18 }
 0x334   :  { %7513 = vmatmul.mubr.bf16.gmra.mrb[8].mxu1 %v12206_v63  ;;  %v2293_v63 = vld [vmem:[%s19099_s1 + $0x800] sm:$0xff] }
 0x335   :  { %11095 = vmatpush1.bf16.msra.mxu1 %v19179_v19  ;;  %8284 = vmatmul.mubr.bf16.gmra.mrb[56].mxu0 %v12207_v9  ;;  %v17045_v9 = vpop.permute.xlu0 %3657  ;;  %v2296_v19 = vld [vmem:[%s19099_s1 + $0x818] sm:$0xff] }
 0x336   :  { %11080 = vmatprep.subr.bf16.mxu1 %v19166_v18  ;;  %7520 = vmatprep.mubr.bf16.mxu1 %v12208_v21  ;;  %v4022_v21 = vmul.f32 %v3613_v30, %v2294_v26 }
 0x337   :  { %8291 = vmatprep.mubr.bf16.mxu0 %v12210_v36  ;;  %v4021_v36 = vmul.f32 %v3608_v52, %v2293_v63 }
 0x339   :  { %11096 = vmatpush1.bf16.msra.mxu1 %v19180_v5  ;;  %v2295_v5 = vld [vmem:[%s19099_s1 + $0x810] sm:$0xff] }
 0x33a   :  { %11081 = vmatprep.subr.bf16.mxu1 %v19166_v18 }
 0x33c   :  { %7521 = vmatmul.mubr.bf16.gmra.mrb[12].mxu1 %v12212_v15  ;;  %v12267_v15 = vld [vmem:[%s19098_s2 + $0x6d8] ss:$72 sps:$4 sm:$0xff]  }
 0x33d   :  { %11097 = vmatpush1.bf16.msra.mxu1 %v19181_v60  ;;  %8292 = vmatmul.mubr.bf16.gmra.mrb[60].mxu0 %v12213_v20  ;;  %v12264_v20 = vld [vmem:[%s19098_s2 + $0x38] ss:$72 sps:$4 sm:$0xff]   ;;  %v17065_v60 = vpop.permute.xlu1 %3672 }
 0x33e   :  { %11082 = vmatprep.subr.bf16.mxu1 %v19166_v18  ;;  %7528 = vmatprep.mubr.bf16.mxu1 %v12214_v55  ;;  %v12268_v55 = vld [vmem:[%s19098_s2 + $0x76c] ss:$72 sps:$4 sm:$0xff]  }
 0x33f   :  { %8299 = vmatprep.mubr.bf16.mxu0 %v12216_v7  ;;  %v12270_v7 = vld [vmem:[%s19098_s2 + $0xcc] ss:$72 sps:$4 sm:$0xff]  }
 0x341   :  { %11098 = vmatpush1.bf16.msra.mxu1 %v19182_v53  ;;  %v4181_v53 = vpack.c.bf16 %v4022_v21, %v4021_v36  ;;  %v2310_v21 = vld [vmem:[%s19099_s1 + $0x888] sm:$0xff]  ;;  %v2309_v36 = vld [vmem:[%s19099_s1 + $0x880] sm:$0xff] }
 0x342   :  { %11083 = vmatprep.subr.bf16.mxu1 %v19166_v18 }
 0x344   :  { %7529 = vmatmul.mubr.bf16.gmra.mrb[16].mxu1 %v12218_v4  ;;  %v17067_v4 = vpop.permute.xlu0 %3667 }
 0x345   :  { %11099 = vmatpush1.bf16.msra.mxu1 %v19183_v49  ;;  %8300 = vmatmul.mubr.bf16.gmra.mrb[64].mxu0 %v12219_v28  ;;  %v4024_v28 = vmul.f32 %v3623_v43, %v2296_v19  ;;  %v2297_v49 = vld [vmem:[%s19099_s1 + $0x820] sm:$0xff] }
 0x346   :  { %11084 = vmatprep.subr.bf16.mxu1 %v19166_v18  ;;  %7536 = vmatprep.mubr.bf16.mxu1 %v12220_v27  ;;  %v4023_v27 = vmul.f32 %v3618_v33, %v2295_v5  ;;  %v12279_v43 = vld [vmem:[%s19098_s2 + $0x158] ss:$72 sps:$4 sm:$0xff]   ;;  %v12280_v33 = vld [vmem:[%s19098_s2 + $0x88c] ss:$72 sps:$4 sm:$0xff]  }
 0x347   :  { %8307 = vmatprep.mubr.bf16.mxu0 %v12222_v41  ;;  %v2298_v41 = vld [vmem:[%s19099_s1 + $0x828] sm:$0xff] }
 0x349   :  { %11100 = vmatpush1.bf16.msra.mxu1 %v19184_v31  ;;  %v4026_v31 = vmul.f32 %v3633_v32, %v2298_v41  ;;  %v2306_v32 = vld [vmem:[%s19099_s1 + $0x868] sm:$0xff] }
 0x34a   :  { %11085 = vmatprep.subr.bf16.mxu1 %v19166_v18 }
 0x34c   :  { %7537 = vmatmul.mubr.bf16.gmra.mrb[20].mxu1 %v12224_v58  ;;  %v4182_v58 = vpack.c.bf16 %v4024_v28, %v4023_v27  ;;  %v12292_v28 = vld [vmem:[%s19098_s2 + $0x9ac] ss:$72 sps:$4 sm:$0xff]  }
 0x34d   :  { %11101 = vmatpush1.bf16.msra.mxu1 %v19185_v23  ;;  %8308 = vmatmul.mubr.bf16.gmra.mrb[68].mxu0 %v12225_v12  ;;  %v4025_v12 = vmul.f32 %v3628_v42, %v2297_v49  ;;  %v2299_v23 = vld [vmem:[%s19099_s1 + $0x830] sm:$0xff]  ;;  %v2305_v42 = vld [vmem:[%s19099_s1 + $0x860] sm:$0xff] }
 0x34e   :  { %11086 = vmatprep.subr.bf16.mxu1 %v19166_v18  ;;  %7544 = vmatprep.mubr.bf16.mxu1 %v12226_v0  ;;  %v2300_v0 = vld [vmem:[%s19099_s1 + $0x838] sm:$0xff]  ;;  %v12294_v27 = vld [vmem:[%s19098_s2 + $0x30c] ss:$72 sps:$4 sm:$0xff]  }
 0x34f   :  { %8315 = vmatprep.mubr.bf16.mxu0 %v12228_v24  ;;  %v12272_v24 = vld [vmem:[%s19098_s2 + $0x768] ss:$72 sps:$4 sm:$0xff]  }
 0x351   :  { %11102 = vmatpush1.bf16.msra.mxu1 %v19186_v29  ;;  %v3678_v29 = vpop.permute.xlu0 %3677 }
 0x352   :  { %11087 = vmatprep.subr.bf16.mxu1 %v19166_v18 }
 0x354   :  { %7545 = vmatmul.mubr.bf16.gmra.mrb[24].mxu1 %v12230_v38  ;;  %v3683_v38 = vpop.permute.xlu1 %3682 }
 0x355   :  { %11103 = vmatpush1.bf16.msra.mxu1 %v15027_v1  ;;  %8316 = vmatmul.mubr.bf16.gmra.mrb[72].mxu0 %v12231_v45  ;;  %v12238_v1 = vld [vmem:[%s19098_s2 + $0x49c] ss:$72 sps:$4 sm:$0xff]   ;;  %v12273_v45 = vld [vmem:[%s19098_s2 + $0xc8] ss:$72 sps:$4 sm:$0xff]   ;;  %v3688_v30 = vpop.permute.xlu0 %3687 }
 0x356   :  { %11088 = vmatprep.subr.bf16.mxu1 %v19166_v18  ;;  %7552 = vmatprep.mubr.bf16.mxu1 %v12232_v37  ;;  %v12274_v37 = vld [vmem:[%s19098_s2 + $0x7fc] ss:$72 sps:$4 sm:$0xff]   ;;  %v4037_v5 = vmul.f32 %v3688_v30, %v2309_v36  ;;  %v2318_v30 = vld [vmem:[%s19099_s1 + $0x8c8] sm:$0xff] }
 0x357   :  { %8323 = vmatprep.mubr.bf16.mxu0 %v12234_v34  ;;  %v12276_v34 = vld [vmem:[%s19098_s2 + $0x15c] ss:$72 sps:$4 sm:$0xff]  }
 0x359   :  { %11104 = vmatpush1.bf16.msra.mxu1 %v19187_v51  ;;  %v4028_v51 = vmul.f32 %v3643_v62, %v2300_v0  ;;  %v3698_v62 = vpop.permute.xlu0 %3697 }
 0x35a   :  { %11089 = vmatprep.subr.bf16.mxu1 %v19166_v18 }
 0x35c   :  { %7553 = vmatmul.mubr.bf16.gmra.mrb[28].mxu1 %v12236_v11  ;;  %v4183_v11 = vpack.c.bf16 %v4026_v31, %v4025_v12  ;;  %v2314_v31 = vld [vmem:[%s19099_s1 + $0x8a8] sm:$0xff]  ;;  %v2313_v12 = vld [vmem:[%s19099_s1 + $0x8a0] sm:$0xff] }
 0x35d   :  { %11105 = vmatpush1.bf16.msra.mxu1 %v19188_v17  ;;  %8324 = vmatmul.mubr.bf16.gmra.mrb[76].mxu0 %v12237_v6  ;;  %v4027_v6 = vmul.f32 %v3638_v16, %v2299_v23  ;;  %v3693_v17 = vpop.permute.xlu1 %3692  ;;  %v3708_v26 = vpop.permute.xlu0 %3707 }
 0x35e   :  { %11090 = vmatprep.subr.bf16.mxu1 %v19166_v18  ;;  %7560 = vmatprep.mubr.bf16.mxu1 %v12238_v1  ;;  %v2302_v1 = vld [vmem:[%s19099_s1 + $0x848] sm:$0xff] }
 0x35f   :  { %8331 = vmatprep.mubr.bf16.mxu0 %v12240_v2  ;;  %v2301_v2 = vld [vmem:[%s19099_s1 + $0x840] sm:$0xff]  ;;  %v4184_v52 = vpack.c.bf16 %v4028_v51, %v4027_v6 }
 0x360   :  { %v12298_v51 = vld [vmem:[%s19098_s2 + $0xa3c] ss:$72 sps:$4 sm:$0xff]  }
 0x361   :  { %11106 = vmatpush1.bf16.msra.mxu1 %v19189_v46  ;;  %v4029_v46 = vmul.f32 %v3648_v13, %v2301_v2  ;;  %v2307_v13 = vld [vmem:[%s19099_s1 + $0x870] sm:$0xff]  ;;  %v12300_v6 = vld [vmem:[%s19098_s2 + $0x39c] ss:$72 sps:$4 sm:$0xff]  }
 0x364   :  { %7561 = vmatmul.mubr.bf16.gmra.mrb[32].mxu1 %v12242_v59  ;;  %v4030_v59 = vmul.f32 %v3653_v14, %v2302_v1  ;;  %v12284_v14 = vld [vmem:[%s19098_s2 + $0x888] ss:$72 sps:$4 sm:$0xff]  }
 0x365   :  { %8332 = vmatmul.mubr.bf16.gmra.mrb[80].mxu0 %v12243_v40  ;;  %7568 = vmatprep.mubr.bf16.mxu1 %v12244_v39  ;;  %v2304_v40 = vld [vmem:[%s19099_s1 + $0x858] sm:$0xff] }
 0x366   :  { %8339 = vmatprep.mubr.bf16.mxu0 %v12246_v54  ;;  %v12278_v39 = vld [vmem:[%s19098_s2 + $0x7f8] ss:$72 sps:$4 sm:$0xff]   ;;  %v2303_v54 = vld [vmem:[%s19099_s1 + $0x850] sm:$0xff] }
 0x36c   :  { %7569 = vmatmul.mubr.bf16.gmra.mrb[36].mxu1 %v12248_v48  ;;  %v12282_v48 = vld [vmem:[%s19098_s2 + $0x1ec] ss:$72 sps:$4 sm:$0xff]  }
 0x36d   :  { %8340 = vmatmul.mubr.bf16.gmra.mrb[84].mxu0 %v12249_v25  ;;  %7576 = vmatprep.mubr.bf16.mxu1 %v12250_v61  ;;  %v4185_v25 = vpack.c.bf16 %v4030_v59, %v4029_v46  ;;  %v4032_v61 = vmul.f32 %v17043_v44, %v2304_v40 }
 0x36e   :  { %8347 = vmatprep.mubr.bf16.mxu0 %v12252_v56  ;;  %v4031_v56 = vmul.f32 %v17045_v9, %v2303_v54  ;;  %v4035_v9 = vmul.f32 %v3678_v29, %v2307_v13  ;;  %v4041_v29 = vmul.f32 %v3708_v26, %v2313_v12  ;;  %v12336_v12 = vld [vmem:[%s19098_s2 + $0x6e4] ss:$72 sps:$4 sm:$0xff]  }
 0x370   :  { %v4186_v16 = vpack.c.bf16 %v4032_v61, %v4031_v56  ;;  %v12304_v61 = vld [vmem:[%s19098_s2 + $0xacc] ss:$72 sps:$4 sm:$0xff]  }
 0x371   :  { %v12306_v56 = vld [vmem:[%s19098_s2 + $0x42c] ss:$72 sps:$4 sm:$0xff]  }
 0x374   :  { %7577 = vmatmul.mubr.bf16.gmra.mrb[40].mxu1 %v12254_v50  ;;  %v3703_v50 = vpop.permute.xlu1 %3702 }
 0x375   :  { %8348 = vmatmul.mubr.bf16.gmra.mrb[88].mxu0 %v12255_v57  ;;  %7584 = vmatprep.mubr.bf16.mxu1 %v12256_v10  ;;  %v4034_v57 = vmul.f32 %v17065_v60, %v2306_v32  ;;  %v4033_v10 = vmul.f32 %v17067_v4, %v2305_v42  ;;  %v3718_v4 = vpop.permute.xlu0 %3717 }
 0x376   :  { %8355 = vmatprep.mubr.bf16.mxu0 %v12258_v8  ;;  %v2308_v8 = vld [vmem:[%s19099_s1 + $0x878] sm:$0xff] }
 0x377   :  { %v4187_v63 = vpack.c.bf16 %v4034_v57, %v4033_v10  ;;  %v4036_v44 = vmul.f32 %v3683_v38, %v2308_v8  ;;  %v2322_v57 = vld [vmem:[%s19099_s1 + $0x8e8] sm:$0xff]  ;;  %v2321_v10 = vld [vmem:[%s19099_s1 + $0x8e0] sm:$0xff] }
 0x379   :  { %v4188_v19 = vpack.c.bf16 %v4036_v44, %v4035_v9  ;;  %v12310_v44 = vld [vmem:[%s19098_s2 + $0xb5c] ss:$72 sps:$4 sm:$0xff]  }
 0x37a   :  { %v12312_v9 = vld [vmem:[%s19098_s2 + $0x4bc] ss:$72 sps:$4 sm:$0xff]  }
 0x37c   :  { %7585 = vmatmul.mubr.bf16.gmra.mrb[44].mxu1 %v12260_v47  ;;  %v12285_v47 = vld [vmem:[%s19098_s2 + $0x1e8] ss:$72 sps:$4 sm:$0xff]  }
 0x37d   :  { %8356 = vmatmul.mubr.bf16.gmra.mrb[92].mxu0 %v12261_v3  ;;  %7592 = vmatprep.mubr.bf16.mxu1 %v12262_v35  ;;  %v12286_v3 = vld [vmem:[%s19098_s2 + $0x91c] ss:$72 sps:$4 sm:$0xff]  }
 0x37e   :  { %8396 = vmatprep.mubr.bf16.mxu0 %v12266_v22  ;;  %v12288_v35 = vld [vmem:[%s19098_s2 + $0x27c] ss:$72 sps:$4 sm:$0xff]   ;;  %v3713_v22 = vpop.permute.xlu1 %3712 }
 0x37f   :  { %v4042_v38 = vmul.f32 %v3713_v22, %v2314_v31  ;;  %v2323_v22 = vld [vmem:[%s19099_s1 + $0x8f0] sm:$0xff] }
 0x380   :  { %v12333_v31 = vld [vmem:[%s19098_s2 + $0x668] ss:$72 sps:$4 sm:$0xff]  }
 0x381   :  { %v4191_v1 = vpack.c.bf16 %v4042_v38, %v4041_v29  ;;  %v12340_v38 = vld [vmem:[%s19098_s2 + $0x774] ss:$72 sps:$4 sm:$0xff]  }
 0x382   :  { %v3723_v60 = vpop.permute.xlu1 %3722  ;;  %v12342_v29 = vld [vmem:[%s19098_s2 + $0x78c] ss:$72 sps:$4 sm:$0xff]  }
 0x384   :  { %7593 = vmatmul.mubr.bf16.gmra.mrb[48].mxu1 %v12267_v15  ;;  %v4038_v15 = vmul.f32 %v3693_v17, %v2310_v21 }
 0x385   :  { %8397 = vmatmul.mubr.bf16.vlgmr.msra.gmra.mrb[0].mxu0 %v12264_v20  ;;  %7600 = vmatprep.mubr.bf16.mxu1 %v12268_v55  ;;  %v2312_v20 = vld [vmem:[%s19099_s1 + $0x898] sm:$0xff] }
 0x386   :  { %8590 = vmatpush1.bf16.msra.mxu0 %v4181_v53  ;;  %8404 = vmatprep.mubr.bf16.mxu0 %v12270_v7  ;;  %v12290_v55 = vld [vmem:[%s19098_s2 + $0x918] ss:$72 sps:$4 sm:$0xff]   ;;  %v2311_v7 = vld [vmem:[%s19099_s1 + $0x890] sm:$0xff]  ;;  %v4189_v41 = vpack.c.bf16 %v4038_v15, %v4037_v5  ;;  %v4040_v49 = vmul.f32 %v3703_v50, %v2312_v20  ;;  %v3733_v0 = vpop.permute.xlu1 %3732 }
 0x387   :  { %8591 = vmatprep.subr.bf16.mxu0 %v19166_v18  ;;  %v12291_v53 = vld [vmem:[%s19098_s2 + $0x278] ss:$72 sps:$4 sm:$0xff]  }
 0x388   :  { %v12314_v5 = vld [vmem:[%s19098_s2 + $0xb58] ss:$72 sps:$4 sm:$0xff]  }
 0x389   :  { %v12315_v20 = vld [vmem:[%s19098_s2 + $0x4b8] ss:$72 sps:$4 sm:$0xff]  }
 0x38a   :  { %8592 = vmatpush1.bf16.msra.mxu0 %v4182_v58  ;;  %v4039_v58 = vmul.f32 %v3698_v62, %v2311_v7  ;;  %v3743_v59 = vpop.permute.xlu1 %3742  ;;  %v12318_v7 = vld [vmem:[%s19098_s2 + $0x54c] ss:$72 sps:$4 sm:$0xff]  }
 0x38b   :  { %8593 = vmatprep.subr.bf16.mxu0 %v19166_v18 }
 0x38c   :  { %7601 = vmatmul.mubr.bf16.gmra.mrb[52].mxu1 %v12272_v24  ;;  %v3728_v24 = vpop.permute.xlu0 %3727  ;;  %v4190_v23 = vpack.c.bf16 %v4040_v49, %v4039_v58  ;;  %v12330_v49 = vld [vmem:[%s19098_s2 + $0x66c] ss:$72 sps:$4 sm:$0xff]   ;;  %v12332_v58 = vld [vmem:[%s19098_s2 + $0xd08] ss:$72 sps:$4 sm:$0xff]  }
 0x38d   :  { %8405 = vmatmul.mubr.bf16.gmra.mrb[4].mxu0 %v12273_v45  ;;  %7608 = vmatprep.mubr.bf16.mxu1 %v12274_v37  ;;  %v2316_v45 = vld [vmem:[%s19099_s1 + $0x8b8] sm:$0xff]  ;;  %v12296_v37 = vld [vmem:[%s19098_s2 + $0x9a8] ss:$72 sps:$4 sm:$0xff]  }
 0x38e   :  { %8594 = vmatpush1.bf16.msra.mxu0 %v4183_v11  ;;  %8412 = vmatprep.mubr.bf16.mxu0 %v12276_v34  ;;  %v2315_v34 = vld [vmem:[%s19099_s1 + $0x8b0] sm:$0xff]  ;;  %v4044_v2 = vmul.f32 %v3723_v60, %v2316_v45  ;;  %v3753_v32 = vpop.permute.xlu1 %3752 }
 0x38f   :  { %8595 = vmatprep.subr.bf16.mxu0 %v19166_v18  ;;  %v12297_v11 = vld [vmem:[%s19098_s2 + $0x308] ss:$72 sps:$4 sm:$0xff]   ;;  %v4043_v17 = vmul.f32 %v3718_v4, %v2315_v34  ;;  %v12322_v4 = vld [vmem:[%s19098_s2 + $0xc7c] ss:$72 sps:$4 sm:$0xff]  }
 0x390   :  { %v3738_v46 = vpop.permute.xlu0 %3737  ;;  %v12321_v60 = vld [vmem:[%s19098_s2 + $0x548] ss:$72 sps:$4 sm:$0xff]   ;;  %v12346_v34 = vld [vmem:[%s19098_s2 + $0x804] ss:$72 sps:$4 sm:$0xff]  }
 0x391   :  { %v4192_v40 = vpack.c.bf16 %v4044_v2, %v4043_v17  ;;  %v12344_v45 = vld [vmem:[%s19098_s2 + $0x770] ss:$72 sps:$4 sm:$0xff]   ;;  %v12354_v2 = vld [vmem:[%s19098_s2 + $0x8ac] ss:$72 sps:$4 sm:$0xff]  }
 0x392   :  { %8596 = vmatpush1.bf16.msra.mxu0 %v4184_v52  ;;  %v2317_v52 = vld [vmem:[%s19099_s1 + $0x8c0] sm:$0xff] }
 0x393   :  { %8597 = vmatprep.subr.bf16.mxu0 %v19166_v18  ;;  %v4045_v54 = vmul.f32 %v3728_v24, %v2317_v52  ;;  %v12334_v24 = vld [vmem:[%s19098_s2 + $0x6e0] ss:$72 sps:$4 sm:$0xff]   ;;  %v12356_v52 = vld [vmem:[%s19098_s2 + $0x890] ss:$72 sps:$4 sm:$0xff]  }
 0x394   :  { %7609 = vmatmul.mubr.bf16.gmra.mrb[56].mxu1 %v12278_v39  ;;  %v4046_v39 = vmul.f32 %v3733_v0, %v2318_v30  ;;  %v3748_v42 = vpop.permute.xlu0 %3747  ;;  %v12337_v0 = vld [vmem:[%s19098_s2 + $0x6fc] ss:$72 sps:$4 sm:$0xff]  }
 0x395   :  { %8413 = vmatmul.mubr.bf16.gmra.mrb[8].mxu0 %v12279_v43  ;;  %7616 = vmatprep.mubr.bf16.mxu1 %v12280_v33  ;;  %v2320_v43 = vld [vmem:[%s19099_s1 + $0x8d8] sm:$0xff]  ;;  %v4049_v13 = vmul.f32 %v3748_v42, %v2321_v10  ;;  %v12366_v42 = vld [vmem:[%s19098_s2 + $0x9cc] ss:$72 sps:$4 sm:$0xff]   ;;  %v12369_v10 = vld [vmem:[%s19098_s2 + $0x9c8] ss:$72 sps:$4 sm:$0xff]  }
 0x396   :  { %8598 = vmatpush1.bf16.msra.mxu0 %v4185_v25  ;;  %8420 = vmatprep.mubr.bf16.mxu0 %v12282_v48  ;;  %v12302_v33 = vld [vmem:[%s19098_s2 + $0xa38] ss:$72 sps:$4 sm:$0xff]   ;;  %v2319_v48 = vld [vmem:[%s19099_s1 + $0x8d0] sm:$0xff]  ;;  %v4193_v50 = vpack.c.bf16 %v4046_v39, %v4045_v54  ;;  %v4048_v62 = vmul.f32 %v3743_v59, %v2320_v43  ;;  %v12360_v54 = vld [vmem:[%s19098_s2 + $0x93c] ss:$72 sps:$4 sm:$0xff]  }
 0x397   :  { %8599 = vmatprep.subr.bf16.mxu0 %v19166_v18  ;;  %v12303_v25 = vld [vmem:[%s19098_s2 + $0x398] ss:$72 sps:$4 sm:$0xff]  }
 0x398   :  { %v3758_v26 = vpop.permute.xlu0 %3757 }
 0x39a   :  { %8600 = vmatpush1.bf16.msra.mxu0 %v4186_v16  ;;  %v4047_v16 = vmul.f32 %v3738_v46, %v2319_v48  ;;  %v12357_v46 = vld [vmem:[%s19098_s2 + $0x8a8] ss:$72 sps:$4 sm:$0xff]  }
 0x39b   :  { %8601 = vmatprep.subr.bf16.mxu0 %v19166_v18  ;;  %v12362_v48 = vld [vmem:[%s19098_s2 + $0x920] ss:$72 sps:$4 sm:$0xff]  }
 0x39c   :  { %7617 = vmatmul.mubr.bf16.gmra.mrb[60].mxu1 %v12284_v14  ;;  %v4194_v8 = vpack.c.bf16 %v4048_v62, %v4047_v16  ;;  %v4050_v14 = vmul.f32 %v3753_v32, %v2322_v57  ;;  %v12368_v16 = vld [vmem:[%s19098_s2 + $0x9b0] ss:$72 sps:$4 sm:$0xff]  }
 0x39d   :  { %8421 = vmatmul.mubr.bf16.gmra.mrb[12].mxu0 %v12285_v47  ;;  %7624 = vmatprep.mubr.bf16.mxu1 %v12286_v3  ;;  %v2324_v47 = vld [vmem:[%s19099_s1 + $0x8f8] sm:$0xff]  ;;  %v12308_v3 = vld [vmem:[%s19098_s2 + $0xac8] ss:$72 sps:$4 sm:$0xff]  }
 0x39e   :  { %8602 = vmatpush1.bf16.msra.mxu0 %v4187_v63  ;;  %8428 = vmatprep.mubr.bf16.mxu0 %v12288_v35  ;;  %v3763_v35 = vpop.permute.xlu1 %3762  ;;  %v12309_v63 = vld [vmem:[%s19098_s2 + $0x428] ss:$72 sps:$4 sm:$0xff]   ;;  %v4195_v21 = vpack.c.bf16 %v4050_v14, %v4049_v13  ;;  %v12372_v13 = vld [vmem:[%s19098_s2 + $0xa5c] ss:$72 sps:$4 sm:$0xff]  }
 0x39f   :  { %8603 = vmatprep.subr.bf16.mxu0 %v19166_v18  ;;  %v4052_v36 = vmul.f32 %v3763_v35, %v2324_v47  ;;  %v12374_v35 = vld [vmem:[%s19098_s2 + $0xa40] ss:$72 sps:$4 sm:$0xff]  }
 0x3a2   :  { %8604 = vmatpush1.bf16.msra.mxu0 %v4188_v19  ;;  %v4051_v19 = vmul.f32 %v3758_v26, %v2323_v22  ;;  %v12375_v26 = vld [vmem:[%s19098_s2 + $0xa58] ss:$72 sps:$4 sm:$0xff]  }
 0x3a3   :  { %8605 = vmatprep.subr.bf16.mxu0 %v19166_v18 }
 0x3a4   :  { %7625 = vmatmul.mubr.bf16.gmra.mrb[64].mxu1 %v12290_v55  ;;  %v4196_v15 = vpack.c.bf16 %v4052_v36, %v4051_v19  ;;  %v12316_v55 = vld [vmem:[%s19098_s2 + $0xbec] ss:$72 sps:$4 sm:$0xff]   ;;  %v12380_v19 = vld [vmem:[%s19098_s2 + $0xad0] ss:$72 sps:$4 sm:$0xff]  }
 0x3a5   :  { %8429 = vmatmul.mubr.bf16.gmra.mrb[16].mxu0 %v12291_v53  ;;  %7632 = vmatprep.mubr.bf16.mxu1 %v12292_v28  ;;  %v12324_v53 = vld [vmem:[%s19098_s2 + $0x5dc] ss:$72 sps:$4 sm:$0xff]   ;;  %v12326_v28 = vld [vmem:[%s19098_s2 + $0xc78] ss:$72 sps:$4 sm:$0xff]  }
 0x3a6   :  { %8606 = vmatpush1.bf16.msra.mxu0 %v4189_v41  ;;  %8436 = vmatprep.mubr.bf16.mxu0 %v12294_v27  ;;  %v12327_v27 = vld [vmem:[%s19098_s2 + $0x5d8] ss:$72 sps:$4 sm:$0xff]   ;;  %v12328_v41 = vld [vmem:[%s19098_s2 + $0xd0c] ss:$72 sps:$4 sm:$0xff]  }
 0x3a7   :  { %8607 = vmatprep.subr.bf16.mxu0 %v19166_v18 }
 0x3aa   :  { %8608 = vmatpush1.bf16.msra.mxu0 %v4190_v23  ;;  %v12339_v23 = vld [vmem:[%s19098_s2 + $0x6f8] ss:$72 sps:$4 sm:$0xff]  }
 0x3ab   :  { %8609 = vmatprep.subr.bf16.mxu0 %v19166_v18 }
 0x3ac   :  { %7633 = vmatmul.mubr.bf16.gmra.mrb[68].mxu1 %v12296_v37  ;;  %v12345_v37 = vld [vmem:[%s19098_s2 + $0x788] ss:$72 sps:$4 sm:$0xff]  }
 0x3ad   :  { %8437 = vmatmul.mubr.bf16.gmra.mrb[20].mxu0 %v12297_v11  ;;  %7640 = vmatprep.mubr.bf16.mxu1 %v12298_v51  ;;  %v12348_v11 = vld [vmem:[%s19098_s2 + $0x81c] ss:$72 sps:$4 sm:$0xff]   ;;  %v12350_v51 = vld [vmem:[%s19098_s2 + $0x800] ss:$72 sps:$4 sm:$0xff]  }
 0x3ae   :  { %8610 = vmatpush1.bf16.msra.mxu0 %v4191_v1  ;;  %8444 = vmatprep.mubr.bf16.mxu0 %v12300_v6  ;;  %v12351_v6 = vld [vmem:[%s19098_s2 + $0x818] ss:$72 sps:$4 sm:$0xff]   ;;  %v12352_v1 = vld [vmem:[%s19098_s2 + $0x894] ss:$72 sps:$4 sm:$0xff]  }
 0x3af   :  { %8611 = vmatprep.subr.bf16.mxu0 %v19166_v18 }
 0x3b2   :  { %8612 = vmatpush1.bf16.msra.mxu0 %v4192_v40  ;;  %v12358_v40 = vld [vmem:[%s19098_s2 + $0x924] ss:$72 sps:$4 sm:$0xff]  }
 0x3b3   :  { %8613 = vmatprep.subr.bf16.mxu0 %v19166_v18 }
 0x3b4   :  { %7641 = vmatmul.mubr.bf16.gmra.mrb[72].mxu1 %v12302_v33 }
 0x3b5   :  { %8445 = vmatmul.mubr.bf16.gmra.mrb[24].mxu0 %v12303_v25  ;;  %7648 = vmatprep.mubr.bf16.mxu1 %v12304_v61  ;;  %v12363_v61 = vld [vmem:[%s19098_s2 + $0x938] ss:$72 sps:$4 sm:$0xff]  }
 0x3b6   :  { %8614 = vmatpush1.bf16.msra.mxu0 %v4193_v50  ;;  %8452 = vmatprep.mubr.bf16.mxu0 %v12306_v56  ;;  %v12364_v56 = vld [vmem:[%s19098_s2 + $0x9b4] ss:$72 sps:$4 sm:$0xff]  }
 0x3b7   :  { %8615 = vmatprep.subr.bf16.mxu0 %v19166_v18 }
 0x3ba   :  { %8616 = vmatpush1.bf16.msra.mxu0 %v4194_v8  ;;  %v12370_v8 = vld [vmem:[%s19098_s2 + $0xa44] ss:$72 sps:$4 sm:$0xff]  }
 0x3bb   :  { %8617 = vmatprep.subr.bf16.mxu0 %v19166_v18 }
 0x3bc   :  { %7649 = vmatmul.mubr.bf16.gmra.mrb[76].mxu1 %v12308_v3 }
 0x3bd   :  { %8453 = vmatmul.mubr.bf16.gmra.mrb[28].mxu0 %v12309_v63  ;;  %7656 = vmatprep.mubr.bf16.mxu1 %v12310_v44  ;;  %v12376_v63 = vld [vmem:[%s19098_s2 + $0xad4] ss:$72 sps:$4 sm:$0xff]  }
 0x3be   :  { %8618 = vmatpush1.bf16.msra.mxu0 %v4195_v21  ;;  %8460 = vmatprep.mubr.bf16.mxu0 %v12312_v9  ;;  %v12378_v9 = vld [vmem:[%s19098_s2 + $0xaec] ss:$72 sps:$4 sm:$0xff]  }
 0x3bf   :  { %8619 = vmatprep.subr.bf16.mxu0 %v19166_v18  ;;  %v12320_v18 = vld [vmem:[%s19098_s2 + $0xbe8] ss:$72 sps:$4 sm:$0xff]  }
 0x3c2   :  { %8620 = vmatpush1.bf16.msra.mxu0 %v4196_v15 }
 0x3c4   :  { %7657 = vmatmul.mubr.bf16.gmra.mrb[80].mxu1 %v12314_v5  ;;  %v12381_v5 = vld [vmem:[%s19098_s2 + $0xae8] ss:$72 sps:$4 sm:$0xff]  }
 0x3c5   :  { %8461 = vmatmul.mubr.bf16.gmra.mrb[32].mxu0 %v12315_v20  ;;  %7664 = vmatprep.mubr.bf16.mxu1 %v12316_v55  ;;  %v12382_v20 = vld [vmem:[%s19098_s2 + $0xb64] ss:$72 sps:$4 sm:$0xff]  }
 0x3c6   :  { %8468 = vmatprep.mubr.bf16.mxu0 %v12318_v7  ;;  %v12384_v7 = vld [vmem:[%s19098_s2 + $0xb7c] ss:$72 sps:$4 sm:$0xff]  }
 0x3cc   :  { %7665 = vmatmul.mubr.bf16.gmra.mrb[84].mxu1 %v12320_v18 }
 0x3cd   :  { %8469 = vmatmul.mubr.bf16.gmra.mrb[36].mxu0 %v12321_v60  ;;  %7672 = vmatprep.mubr.bf16.mxu1 %v12322_v4  ;;  %v12386_v4 = vld [vmem:[%s19098_s2 + $0xb60] ss:$72 sps:$4 sm:$0xff]  }
 0x3ce   :  { %8476 = vmatprep.mubr.bf16.mxu0 %v12324_v53 }
 0x3d4   :  { %7673 = vmatmul.mubr.bf16.gmra.mrb[88].mxu1 %v12326_v28  ;;  %v12387_v28 = vld [vmem:[%s19098_s2 + $0xb78] ss:$72 sps:$4 sm:$0xff]  }
 0x3d5   :  { %8477 = vmatmul.mubr.bf16.gmra.mrb[40].mxu0 %v12327_v27  ;;  %7680 = vmatprep.mubr.bf16.mxu1 %v12328_v41  ;;  %v12388_v27 = vld [vmem:[%s19098_s2 + $0xbf4] ss:$72 sps:$4 sm:$0xff]  }
 0x3d6   :  { %8484 = vmatprep.mubr.bf16.mxu0 %v12330_v49  ;;  %v12390_v49 = vld [vmem:[%s19098_s2 + $0xc0c] ss:$72 sps:$4 sm:$0xff]  }
 0x3dc   :  { %7681 = vmatmul.mubr.bf16.gmra.mrb[92].mxu1 %v12332_v58 }
 0x3dd   :  { %8485 = vmatmul.mubr.bf16.gmra.mrb[44].mxu0 %v12333_v31  ;;  %7817 = vmatprep.mubr.bf16.mxu1 %v12336_v12  ;;  %v12392_v12 = vld [vmem:[%s19098_s2 + $0xbf0] ss:$72 sps:$4 sm:$0xff]  }
 0x3de   :  { %8492 = vmatprep.mubr.bf16.mxu0 %v12337_v0 }
 0x3e4   :  { %7818 = vmatmul.mubr.bf16.vlgmr.msra.gmra.mrb[48].mxu1 %v12334_v24  ;;  %v12393_v24 = vld [vmem:[%s19098_s2 + $0xc08] ss:$72 sps:$4 sm:$0xff]  }
 0x3e5   :  { %8493 = vmatmul.mubr.bf16.gmra.mrb[48].mxu0 %v12339_v23  ;;  %7825 = vmatprep.mubr.bf16.mxu1 %v12340_v38  ;;  %v12394_v23 = vld [vmem:[%s19098_s2 + $0xc84] ss:$72 sps:$4 sm:$0xff]  }
 0x3e6   :  { %8500 = vmatprep.mubr.bf16.mxu0 %v12342_v29  ;;  %v12396_v29 = vld [vmem:[%s19098_s2 + $0xc9c] ss:$72 sps:$4 sm:$0xff]  }
 0x3ec   :  { %7826 = vmatmul.mubr.bf16.gmra.mrb[52].mxu1 %v12344_v45 }
 0x3ed   :  { %8501 = vmatmul.mubr.bf16.gmra.mrb[52].mxu0 %v12345_v37  ;;  %7833 = vmatprep.mubr.bf16.mxu1 %v12346_v34  ;;  %v12398_v34 = vld [vmem:[%s19098_s2 + $0xc80] ss:$72 sps:$4 sm:$0xff]  }
 0x3ee   :  { %8508 = vmatprep.mubr.bf16.mxu0 %v12348_v11 }
 0x3f4   :  { %7834 = vmatmul.mubr.bf16.gmra.mrb[56].mxu1 %v12350_v51  ;;  %v12399_v51 = vld [vmem:[%s19098_s2 + $0xc98] ss:$72 sps:$4 sm:$0xff]  }
 0x3f5   :  { %8509 = vmatmul.mubr.bf16.gmra.mrb[56].mxu0 %v12351_v6  ;;  %7841 = vmatprep.mubr.bf16.mxu1 %v12352_v1  ;;  %v12400_v6 = vld [vmem:[%s19098_s2 + $0xd14] ss:$72 sps:$4 sm:$0xff]  }
 0x3f6   :  { %8516 = vmatprep.mubr.bf16.mxu0 %v12354_v2  ;;  %v12402_v2 = vld [vmem:[%s19098_s2 + $0xd2c] ss:$72 sps:$4 sm:$0xff]  }
 0x3f7   :  { %v17340_v17 = vpop.f32.mrb[0].mxu1 }
 0x3f8   :  { %v7500_v30 = vpop.f32.mrb[1].mxu1 }
 0x3f9   :  { %v17345_v59 = vpop.f32.mrb[2].mxu1 }
 0x3fa   :  { %v7503_v39 = vpop.f32.mrb[3].mxu1 }
 0x3fb   :  { %v12405_v39 = vld [vmem:[%s19098_s2 + $0xd28] ss:$72 sps:$4 sm:$0xff]  }
 0x3fc   :  { %7842 = vmatmul.mubr.bf16.gmra.mrb[60].mxu1 %v12356_v52 }
 0x3fd   :  { %8517 = vmatmul.mubr.bf16.gmra.mrb[60].mxu0 %v12357_v46  ;;  %7849 = vmatprep.mubr.bf16.mxu1 %v12358_v40  ;;  %v12404_v46 = vld [vmem:[%s19098_s2 + $0xd10] ss:$72 sps:$4 sm:$0xff]  }
 0x3fe   :  { %8524 = vmatprep.mubr.bf16.mxu0 %v12360_v54 }
 0x3ff   :  { %v17356_v43 = vpop.f32.mrb[4].mxu1 }
 0x400   :  { %v7508_v33 = vpop.f32.mrb[5].mxu1 }
 0x401   :  { %v17361_v25 = vpop.f32.mrb[6].mxu1  ;;  %v12408_v33 = vld [vmem:[%s19098_s2 + $0x44] ss:$72 sps:$4 sm:$0xff]  }
 0x402   :  { %v7511_v32 = vpop.f32.mrb[7].mxu1 }
 0x403   :  { %v12406_v32 = vld [vmem:[%s19098_s2 + $0x40] ss:$72 sps:$4 sm:$0xff]  }
 0x404   :  { %7850 = vmatmul.mubr.bf16.gmra.mrb[64].mxu1 %v12362_v48 }
 0x405   :  { %8525 = vmatmul.mubr.bf16.gmra.mrb[64].mxu0 %v12363_v61  ;;  %7857 = vmatprep.mubr.bf16.mxu1 %v12364_v56 }
 0x406   :  { %8532 = vmatprep.mubr.bf16.mxu0 %v12366_v42 }
 0x407   :  { %v17372_v50 = vpop.f32.mrb[8].mxu1 }
 0x408   :  { %v7516_v62 = vpop.f32.mrb[9].mxu1 }
 0x409   :  { %v17377_v57 = vpop.f32.mrb[10].mxu1  ;;  %v12409_v62 = vld [vmem:[%s19098_s2 + $0xd4] ss:$72 sps:$4 sm:$0xff]  }
 0x40a   :  { %v7519_v14 = vpop.f32.mrb[11].mxu1 }
 0x40b   :  { %v12411_v14 = vld [vmem:[%s19098_s2 + $0xd0] ss:$72 sps:$4 sm:$0xff]  }
 0x40c   :  { %7858 = vmatmul.mubr.bf16.gmra.mrb[68].mxu1 %v12368_v16 }
 0x40d   :  { %8533 = vmatmul.mubr.bf16.gmra.mrb[68].mxu0 %v12369_v10  ;;  %7865 = vmatprep.mubr.bf16.mxu1 %v12370_v8 }
 0x40e   :  { %8540 = vmatprep.mubr.bf16.mxu0 %v12372_v13 }
 0x40f   :  { %v17388_v47 = vpop.f32.mrb[12].mxu1 }
 0x410   :  { %v7524_v3 = vpop.f32.mrb[13].mxu1 }
 0x411   :  { %v17393_v22 = vpop.f32.mrb[14].mxu1  ;;  %v12412_v3 = vld [vmem:[%s19098_s2 + $0x164] ss:$72 sps:$4 sm:$0xff]  }
 0x412   :  { %v7527_v44 = vpop.f32.mrb[15].mxu1 }
 0x413   :  { %v12414_v44 = vld [vmem:[%s19098_s2 + $0x160] ss:$72 sps:$4 sm:$0xff]  }
 0x414   :  { %7866 = vmatmul.mubr.bf16.gmra.mrb[72].mxu1 %v12374_v35 }
 0x415   :  { %8541 = vmatmul.mubr.bf16.gmra.mrb[72].mxu0 %v12375_v26  ;;  %7873 = vmatprep.mubr.bf16.mxu1 %v12376_v63 }
 0x416   :  { %8548 = vmatprep.mubr.bf16.mxu0 %v12378_v9 }
 0x417   :  { %v17404_v21 = vpop.f32.mrb[16].mxu1 }
 0x418   :  { %v7532_v36 = vpop.f32.mrb[17].mxu1 }
 0x419   :  { %v17409_v15 = vpop.f32.mrb[18].mxu1  ;;  %v12415_v36 = vld [vmem:[%s19098_s2 + $0x1f4] ss:$72 sps:$4 sm:$0xff]  }
 0x41a   :  { %v7535_v55 = vpop.f32.mrb[19].mxu1 }
 0x41b   :  { %v12421_v55 = vld [vmem:[%s19098_s2 + $0x314] ss:$72 sps:$4 sm:$0xff]  }
 0x41c   :  { %7874 = vmatmul.mubr.bf16.gmra.mrb[76].mxu1 %v12380_v19  ;;  %v12417_v19 = vld [vmem:[%s19098_s2 + $0x1f0] ss:$72 sps:$4 sm:$0xff]  }
 0x41d   :  { %8549 = vmatmul.mubr.bf16.gmra.mrb[76].mxu0 %v12381_v5  ;;  %7881 = vmatprep.mubr.bf16.mxu1 %v12382_v20  ;;  %v12418_v5 = vld [vmem:[%s19098_s2 + $0x284] ss:$72 sps:$4 sm:$0xff]   ;;  %v12420_v20 = vld [vmem:[%s19098_s2 + $0x280] ss:$72 sps:$4 sm:$0xff]  }
 0x41e   :  { %8556 = vmatprep.mubr.bf16.mxu0 %v12384_v7  ;;  %v12423_v7 = vld [vmem:[%s19098_s2 + $0x310] ss:$72 sps:$4 sm:$0xff]  }
 0x41f   :  { %v17420_v18 = vpop.f32.mrb[20].mxu1 }
 0x420   :  { %v7540_v60 = vpop.f32.mrb[21].mxu1 }
 0x421   :  { %v17425_v53 = vpop.f32.mrb[22].mxu1  ;;  %v12424_v60 = vld [vmem:[%s19098_s2 + $0x3a4] ss:$72 sps:$4 sm:$0xff]  }
 0x422   :  { %v7543_v41 = vpop.f32.mrb[23].mxu1 }
 0x423   :  { %v12430_v41 = vld [vmem:[%s19098_s2 + $0x4c4] ss:$72 sps:$4 sm:$0xff]  }
 0x424   :  { %7882 = vmatmul.mubr.bf16.gmra.mrb[80].mxu1 %v12386_v4  ;;  %v12426_v4 = vld [vmem:[%s19098_s2 + $0x3a0] ss:$72 sps:$4 sm:$0xff]  }
 0x425   :  { %8557 = vmatmul.mubr.bf16.gmra.mrb[80].mxu0 %v12387_v28  ;;  %7889 = vmatprep.mubr.bf16.mxu1 %v12388_v27  ;;  %v12427_v28 = vld [vmem:[%s19098_s2 + $0x434] ss:$72 sps:$4 sm:$0xff]   ;;  %v12429_v27 = vld [vmem:[%s19098_s2 + $0x430] ss:$72 sps:$4 sm:$0xff]  }
 0x426   :  { %8564 = vmatprep.mubr.bf16.mxu0 %v12390_v49  ;;  %v12432_v49 = vld [vmem:[%s19098_s2 + $0x4c0] ss:$72 sps:$4 sm:$0xff]  }
 0x427   :  { %v17436_v58 = vpop.f32.mrb[24].mxu1 }
 0x428   :  { %v7548_v31 = vpop.f32.mrb[25].mxu1 }
 0x429   :  { %v17441_v0 = vpop.f32.mrb[26].mxu1  ;;  %v12433_v31 = vld [vmem:[%s19098_s2 + $0x554] ss:$72 sps:$4 sm:$0xff]  }
 0x42a   :  { %v7551_v38 = vpop.f32.mrb[27].mxu1 }
 0x42b   :  { %v12439_v38 = vld [vmem:[%s19098_s2 + $0x674] ss:$72 sps:$4 sm:$0xff]  }
 0x42c   :  { %7890 = vmatmul.mubr.bf16.gmra.mrb[84].mxu1 %v12392_v12  ;;  %v12435_v12 = vld [vmem:[%s19098_s2 + $0x550] ss:$72 sps:$4 sm:$0xff]  }
 0x42d   :  { %8565 = vmatmul.mubr.bf16.gmra.mrb[84].mxu0 %v12393_v24  ;;  %7897 = vmatprep.mubr.bf16.mxu1 %v12394_v23  ;;  %v12436_v24 = vld [vmem:[%s19098_s2 + $0x5e4] ss:$72 sps:$4 sm:$0xff]   ;;  %v12438_v23 = vld [vmem:[%s19098_s2 + $0x5e0] ss:$72 sps:$4 sm:$0xff]  }
 0x42e   :  { %8572 = vmatprep.mubr.bf16.mxu0 %v12396_v29  ;;  %v12441_v29 = vld [vmem:[%s19098_s2 + $0x670] ss:$72 sps:$4 sm:$0xff]  }
 0x42f   :  { %v17452_v45 = vpop.f32.mrb[28].mxu1 }
 0x430   :  { %v7556_v37 = vpop.f32.mrb[29].mxu1 }
 0x431   :  { %v17457_v11 = vpop.f32.mrb[30].mxu1  ;;  %v12442_v37 = vld [vmem:[%s19098_s2 + $0x704] ss:$72 sps:$4 sm:$0xff]  }
 0x432   :  { %v7559_v1 = vpop.f32.mrb[31].mxu1 }
 0x433   :  { %v12448_v1 = vld [vmem:[%s19098_s2 + $0x824] ss:$72 sps:$4 sm:$0xff]  }
 0x434   :  { %7898 = vmatmul.mubr.bf16.gmra.mrb[88].mxu1 %v12398_v34  ;;  %v12444_v34 = vld [vmem:[%s19098_s2 + $0x700] ss:$72 sps:$4 sm:$0xff]  }
 0x435   :  { %8573 = vmatmul.mubr.bf16.gmra.mrb[88].mxu0 %v12399_v51  ;;  %7905 = vmatprep.mubr.bf16.mxu1 %v12400_v6  ;;  %v12445_v51 = vld [vmem:[%s19098_s2 + $0x794] ss:$72 sps:$4 sm:$0xff]   ;;  %v12447_v6 = vld [vmem:[%s19098_s2 + $0x790] ss:$72 sps:$4 sm:$0xff]  }
 0x436   :  { %8580 = vmatprep.mubr.bf16.mxu0 %v12402_v2  ;;  %v12450_v2 = vld [vmem:[%s19098_s2 + $0x820] ss:$72 sps:$4 sm:$0xff]  }
 0x437   :  { %v17468_v30 = vpop.f32.mrb[32].mxu1 }
 0x438   :  { %v7564_v52 = vpop.f32.mrb[33].mxu1 }
 0x439   :  { %v17473_v40 = vpop.f32.mrb[34].mxu1  ;;  %v12451_v52 = vld [vmem:[%s19098_s2 + $0x8b4] ss:$72 sps:$4 sm:$0xff]  }
 0x43a   :  { %v7567_v54 = vpop.f32.mrb[35].mxu1 }
 0x43c   :  { %7906 = vmatmul.mubr.bf16.gmra.mrb[92].mxu1 %v12404_v46 }
 0x43d   :  { %8581 = vmatmul.mubr.bf16.gmra.mrb[92].mxu0 %v12405_v39 }
 0x43e   :  { %8621 = vmatprep.mubr.bf16.mxu0 %v12408_v33  ;;  %v12453_v33 = vld [vmem:[%s19098_s2 + $0x8b0] ss:$72 sps:$4 sm:$0xff]  }
 0x43f   :  { %v17481_v48 = vpop.f32.mrb[36].mxu1 }
 0x440   :  { %v7572_v61 = vpop.f32.mrb[37].mxu1 }
 0x441   :  { %v17483_v56 = vpop.f32.mrb[38].mxu1 }
 0x442   :  { %v7575_v42 = vpop.f32.mrb[39].mxu1 }
 0x445   :  { %8622 = vmatmul.mubr.bf16.vlgmr.msra.gmra.mrb[0].mxu0 %v12406_v32  ;;  %v12454_v32 = vld [vmem:[%s19098_s2 + $0x944] ss:$72 sps:$4 sm:$0xff]  }
 0x446   :  { %8629 = vmatprep.mubr.bf16.mxu0 %v12409_v62 }
 0x447   :  { %v17491_v16 = vpop.f32.mrb[40].mxu1 }
 0x448   :  { %v7580_v10 = vpop.f32.mrb[41].mxu1 }
 0x449   :  { %v17493_v8 = vpop.f32.mrb[42].mxu1 }
 0x44a   :  { %v7583_v13 = vpop.f32.mrb[43].mxu1 }
 0x44d   :  { %8630 = vmatmul.mubr.bf16.gmra.mrb[4].mxu0 %v12411_v14  ;;  %v12456_v14 = vld [vmem:[%s19098_s2 + $0x940] ss:$72 sps:$4 sm:$0xff]  }
 0x44e   :  { %8637 = vmatprep.mubr.bf16.mxu0 %v12412_v3  ;;  %v12457_v3 = vld [vmem:[%s19098_s2 + $0x9d4] ss:$72 sps:$4 sm:$0xff]  }
 0x44f   :  { %v17501_v35 = vpop.f32.mrb[44].mxu1 }
 0x450   :  { %v7588_v26 = vpop.f32.mrb[45].mxu1 }
 0x451   :  { %v17503_v63 = vpop.f32.mrb[46].mxu1 }
 0x452   :  { %v7591_v9 = vpop.f32.mrb[47].mxu1 }
 0x455   :  { %8638 = vmatmul.mubr.bf16.gmra.mrb[8].mxu0 %v12414_v44 }
 0x456   :  { %8645 = vmatprep.mubr.bf16.mxu0 %v12415_v36  ;;  %v12459_v36 = vld [vmem:[%s19098_s2 + $0x9d0] ss:$72 sps:$4 sm:$0xff]  }
 0x45d   :  { %8646 = vmatmul.mubr.bf16.gmra.mrb[12].mxu0 %v12417_v19 }
 0x45e   :  { %8653 = vmatprep.mubr.bf16.mxu0 %v12418_v5  ;;  %v12460_v5 = vld [vmem:[%s19098_s2 + $0xa64] ss:$72 sps:$4 sm:$0xff]  }
 0x465   :  { %8654 = vmatmul.mubr.bf16.gmra.mrb[16].mxu0 %v12420_v20 }
 0x466   :  { %8661 = vmatprep.mubr.bf16.mxu0 %v12421_v55 }
 0x46d   :  { %8662 = vmatmul.mubr.bf16.gmra.mrb[20].mxu0 %v12423_v7 }
 0x46e   :  { %8669 = vmatprep.mubr.bf16.mxu0 %v12424_v60  ;;  %v12462_v60 = vld [vmem:[%s19098_s2 + $0xa60] ss:$72 sps:$4 sm:$0xff]  }
 0x475   :  { %8670 = vmatmul.mubr.bf16.gmra.mrb[24].mxu0 %v12426_v4 }
 0x476   :  { %8677 = vmatprep.mubr.bf16.mxu0 %v12427_v28  ;;  %v12463_v28 = vld [vmem:[%s19098_s2 + $0xaf4] ss:$72 sps:$4 sm:$0xff]  }
 0x47d   :  { %8678 = vmatmul.mubr.bf16.gmra.mrb[28].mxu0 %v12429_v27 }
 0x47e   :  { %8685 = vmatprep.mubr.bf16.mxu0 %v12430_v41 }
 0x485   :  { %8686 = vmatmul.mubr.bf16.gmra.mrb[32].mxu0 %v12432_v49 }
 0x486   :  { %8693 = vmatprep.mubr.bf16.mxu0 %v12433_v31  ;;  %v12465_v31 = vld [vmem:[%s19098_s2 + $0xaf0] ss:$72 sps:$4 sm:$0xff]  }
 0x48d   :  { %8694 = vmatmul.mubr.bf16.gmra.mrb[36].mxu0 %v12435_v12 }
 0x48e   :  { %8701 = vmatprep.mubr.bf16.mxu0 %v12436_v24  ;;  %v12466_v24 = vld [vmem:[%s19098_s2 + $0xb84] ss:$72 sps:$4 sm:$0xff]  }
 0x495   :  { %8702 = vmatmul.mubr.bf16.gmra.mrb[40].mxu0 %v12438_v23 }
 0x496   :  { %8709 = vmatprep.mubr.bf16.mxu0 %v12439_v38 }
 0x49d   :  { %8710 = vmatmul.mubr.bf16.gmra.mrb[44].mxu0 %v12441_v29 }
 0x49e   :  { %8717 = vmatprep.mubr.bf16.mxu0 %v12442_v37  ;;  %v12468_v37 = vld [vmem:[%s19098_s2 + $0xb80] ss:$72 sps:$4 sm:$0xff]  }
 0x4a5   :  { %8718 = vmatmul.mubr.bf16.gmra.mrb[48].mxu0 %v12444_v34 }
 0x4a6   :  { %8725 = vmatprep.mubr.bf16.mxu0 %v12445_v51  ;;  %v12469_v51 = vld [vmem:[%s19098_s2 + $0xc14] ss:$72 sps:$4 sm:$0xff]  }
 0x4ad   :  { %8726 = vmatmul.mubr.bf16.gmra.mrb[52].mxu0 %v12447_v6 }
 0x4ae   :  { %8733 = vmatprep.mubr.bf16.mxu0 %v12448_v1 }
 0x4b5   :  { %8734 = vmatmul.mubr.bf16.gmra.mrb[56].mxu0 %v12450_v2 }
 0x4b6   :  { %8741 = vmatprep.mubr.bf16.mxu0 %v12451_v52  ;;  %v12471_v52 = vld [vmem:[%s19098_s2 + $0xc10] ss:$72 sps:$4 sm:$0xff]  }
 0x4b7   :  { %v17583_v46 = vpop.f32.mrb[48].mxu1 }
 0x4b8   :  { %v7821_v39 = vpop.f32.mrb[49].mxu1 }
 0x4b9   :  { %v17585_v54 = vpop.f32.mrb[50].mxu1 }
 0x4ba   :  { %v7824_v61 = vpop.f32.mrb[51].mxu1 }
 0x4bd   :  { %8742 = vmatmul.mubr.bf16.gmra.mrb[60].mxu0 %v12453_v33  ;;  %v12472_v33 = vld [vmem:[%s19098_s2 + $0xca4] ss:$72 sps:$4 sm:$0xff]  }
 0x4be   :  { %8749 = vmatprep.mubr.bf16.mxu0 %v12454_v32 }
 0x4bf   :  { %v17593_v42 = vpop.f32.mrb[52].mxu1 }
 0x4c0   :  { %v7829_v62 = vpop.f32.mrb[53].mxu1 }
 0x4c1   :  { %v17595_v10 = vpop.f32.mrb[54].mxu1 }
 0x4c2   :  { %v7832_v13 = vpop.f32.mrb[55].mxu1 }
 0x4c5   :  { %8750 = vmatmul.mubr.bf16.gmra.mrb[64].mxu0 %v12456_v14  ;;  %v12474_v14 = vld [vmem:[%s19098_s2 + $0xca0] ss:$72 sps:$4 sm:$0xff]  }
 0x4c6   :  { %8757 = vmatprep.mubr.bf16.mxu0 %v12457_v3  ;;  %v12475_v3 = vld [vmem:[%s19098_s2 + $0xd34] ss:$72 sps:$4 sm:$0xff]  }
 0x4c7   :  { %v17603_v26 = vpop.f32.mrb[56].mxu1 }
 0x4c8   :  { %v7837_v44 = vpop.f32.mrb[57].mxu1 }
 0x4c9   :  { %v17605_v9 = vpop.f32.mrb[58].mxu1 }
 0x4ca   :  { %v7840_v19 = vpop.f32.mrb[59].mxu1 }
 0x4cd   :  { %8758 = vmatmul.mubr.bf16.gmra.mrb[68].mxu0 %v12459_v36 }
 0x4ce   :  { %8765 = vmatprep.mubr.bf16.mxu0 %v12460_v5  ;;  %v12477_v5 = vld [vmem:[%s19098_s2 + $0xd30] ss:$72 sps:$4 sm:$0xff]  }
 0x4cf   :  { %v17613_v20 = vpop.f32.mrb[60].mxu1 }
 0x4d0   :  { %v7845_v55 = vpop.f32.mrb[61].mxu1 }
 0x4d1   :  { %v17615_v7 = vpop.f32.mrb[62].mxu1 }
 0x4d2   :  { %v7848_v4 = vpop.f32.mrb[63].mxu1 }
 0x4d5   :  { %8766 = vmatmul.mubr.bf16.gmra.mrb[72].mxu0 %v12462_v60 }
 0x4d6   :  { %8773 = vmatprep.mubr.bf16.mxu0 %v12463_v28 }
 0x4d7   :  { %v17623_v27 = vpop.f32.mrb[64].mxu1 }
 0x4d8   :  { %v7853_v41 = vpop.f32.mrb[65].mxu1 }
 0x4d9   :  { %v17625_v49 = vpop.f32.mrb[66].mxu1 }
 0x4da   :  { %v7856_v12 = vpop.f32.mrb[67].mxu1 }
 0x4dd   :  { %8774 = vmatmul.mubr.bf16.gmra.mrb[76].mxu0 %v12465_v31 }
 0x4de   :  { %8781 = vmatprep.mubr.bf16.mxu0 %v12466_v24 }
 0x4df   :  { %v17633_v23 = vpop.f32.mrb[68].mxu1 }
 0x4e0   :  { %v7861_v38 = vpop.f32.mrb[69].mxu1 }
 0x4e1   :  { %v17635_v29 = vpop.f32.mrb[70].mxu1 }
 0x4e2   :  { %v7864_v34 = vpop.f32.mrb[71].mxu1 }
 0x4e5   :  { %8782 = vmatmul.mubr.bf16.gmra.mrb[80].mxu0 %v12468_v37 }
 0x4e6   :  { %8789 = vmatprep.mubr.bf16.mxu0 %v12469_v51 }
 0x4e7   :  { %v17643_v6 = vpop.f32.mrb[72].mxu1 }
 0x4e8   :  { %v7869_v1 = vpop.f32.mrb[73].mxu1 }
 0x4e9   :  { %v17645_v2 = vpop.f32.mrb[74].mxu1 }
 0x4ea   :  { %v7872_v39 = vpop.f32.mrb[75].mxu1 }
 0x4ed   :  { %8790 = vmatmul.mubr.bf16.gmra.mrb[84].mxu0 %v12471_v52 }
 0x4ee   :  { %8797 = vmatprep.mubr.bf16.mxu0 %v12472_v33 }
 0x4ef   :  { %v17653_v61 = vpop.f32.mrb[76].mxu1 }
 0x4f0   :  { %v7877_v32 = vpop.f32.mrb[77].mxu1 }
 0x4f1   :  { %v17655_v62 = vpop.f32.mrb[78].mxu1 }
 0x4f2   :  { %v7880_v13 = vpop.f32.mrb[79].mxu1 }
 0x4f5   :  { %8798 = vmatmul.mubr.bf16.gmra.mrb[88].mxu0 %v12474_v14 }
 0x4f6   :  { %8805 = vmatprep.mubr.bf16.mxu0 %v12475_v3 }
 0x4f7   :  { %v17663_v44 = vpop.f32.mrb[80].mxu1 }
 0x4f8   :  { %v7885_v36 = vpop.f32.mrb[81].mxu1 }
 0x4f9   :  { %v17665_v19 = vpop.f32.mrb[82].mxu1 }
 0x4fa   :  { %v7888_v55 = vpop.f32.mrb[83].mxu1 }
 0x4fd   :  { %8806 = vmatmul.mubr.bf16.gmra.mrb[92].mxu0 %v12477_v5 }
 0x4ff   :  { %v17670_v60 = vpop.f32.mrb[84].mxu1 }
 0x500   :  { %v7893_v4 = vpop.f32.mrb[85].mxu1 }
 0x501   :  { %v17672_v28 = vpop.f32.mrb[86].mxu1 }
 0x502   :  { %v7896_v41 = vpop.f32.mrb[87].mxu1 }
 0x507   :  { %v17674_v31 = vpop.f32.mrb[88].mxu1 }
 0x508   :  { %v7901_v12 = vpop.f32.mrb[89].mxu1 }
 0x509   :  { %v17676_v24 = vpop.f32.mrb[90].mxu1 }
 0x50a   :  { %v7904_v38 = vpop.f32.mrb[91].mxu1 }
 0x50f   :  { %v17678_v37 = vpop.f32.mrb[92].mxu1 }
 0x510   :  { %v7909_v34 = vpop.f32.mrb[93].mxu1 }
 0x511   :  { %v17680_v51 = vpop.f32.mrb[94].mxu1 }
 0x512   :  { %v7912_v1 = vpop.f32.mrb[95].mxu1 }
 0x518   :  { %v8623_v52 = vpop.f32.mrb[0].mxu0 }
 0x519   :  { %v17683_v39 = vadd.f32 %v8623_v52, %v17340_v17  ;;  %v8625_v33 = vpop.f32.mrb[1].mxu0 }
 0x51a   :  { %v8626_v32 = vpop.f32.mrb[2].mxu0 }
 0x51b   :  { %v17686_v14 = vadd.f32 %v8626_v32, %v17345_v59  ;;  %v8628_v13 = vpop.f32.mrb[3].mxu0  ;;  %v8815_v3 = vsel %vm8814_vm0, %v17683_v39, 0.0  ;;  %v9007_v17 = vmul.f32 %v17683_v39, %v17683_v39 }
 0x51c   :  { %8816 = vadd.xlane.f32.xlu0 %v8815_v3 }
 0x51d   :  { %v8818_v36 = vsel %vm8814_vm0, %v17686_v14, 0.0  ;;  %v9008_v5 = vmul.f32 %v17686_v14, %v17686_v14  ;;  %v9055_v12 = vsel %vm8814_vm0, %v9007_v17, 0.0 }
 0x51e   :  { %8819 = vadd.xlane.f32.xlu1 %v8818_v36 }
 0x51f   :  { %v9058_v55 = vsel %vm8814_vm0, %v9008_v5, 0.0 }
 0x520   :  { %v8631_v4 = vpop.f32.mrb[4].mxu0  ;;  %9059 = vadd.xlane.f32.xlu0 %v9058_v55 }
 0x521   :  { %v17698_v59 = vadd.f32 %v8631_v4, %v17356_v43  ;;  %v8633_v41 = vpop.f32.mrb[5].mxu0 }
 0x522   :  { %v8634_v38 = vpop.f32.mrb[6].mxu0  ;;  %9056 = vadd.xlane.f32.xlu1 %v9055_v12 }
 0x523   :  { %v17702_v34 = vadd.f32 %v8634_v38, %v17361_v25  ;;  %v8636_v1 = vpop.f32.mrb[7].mxu0  ;;  %v8821_v52 = vsel %vm8814_vm0, %v17698_v59, 0.0  ;;  %v9009_v33 = vmul.f32 %v17698_v59, %v17698_v59 }
 0x524   :  { %8822 = vadd.xlane.f32.xlu0 %v8821_v52 }
 0x525   :  { %19190 = vst [vmem:[#allocation2_spill] sm:$0xff] %v17702_v34  ;;  %v9061_v32 = vsel %vm8814_vm0, %v9009_v33, 0.0  ;;  %v8824_v43 = vsel %vm8814_vm0, %v17702_v34, 0.0  ;;  %v9010_v13 = vmul.f32 %v17702_v34, %v17702_v34 }
 0x526   :  { %9062 = vadd.xlane.f32.xlu1 %v9061_v32 }
 0x527   :  { %v9064_v41 = vsel %vm8814_vm0, %v9010_v13, 0.0 }
 0x528   :  { %v8639_v3 = vpop.f32.mrb[8].mxu0  ;;  %8825 = vadd.xlane.f32.xlu0 %v8824_v43 }
 0x529   :  { %v17714_v25 = vadd.f32 %v8639_v3, %v17372_v50  ;;  %v8641_v36 = vpop.f32.mrb[9].mxu0 }
 0x52a   :  { %v8642_v5 = vpop.f32.mrb[10].mxu0 }
 0x52b   :  { %19191 = vst [vmem:[#allocation3_spill] sm:$0xff] %v17714_v25  ;;  %v17717_v17 = vadd.f32 %v8642_v5, %v17377_v57  ;;  %v8644_v55 = vpop.f32.mrb[11].mxu0  ;;  %v8827_v4 = vsel %vm8814_vm0, %v17714_v25, 0.0  ;;  %v9011_v12 = vmul.f32 %v17714_v25, %v17714_v25 }
 0x52c   :  { %8828 = vadd.xlane.f32.xlu1 %v8827_v4  ;;  %9065 = vadd.xlane.f32.xlu0 %v9064_v41 }
 0x52d   :  { %19192 = vst [vmem:[#allocation4_spill] sm:$0xff] %v17717_v17  ;;  %v9067_v38 = vsel %vm8814_vm0, %v9011_v12, 0.0  ;;  %v8830_v50 = vsel %vm8814_vm0, %v17717_v17, 0.0  ;;  %v9012_v57 = vmul.f32 %v17717_v17, %v17717_v17 }
 0x52f   :  { %v9070_v36 = vsel %vm8814_vm0, %v9012_v57, 0.0 }
 0x530   :  { %v8647_v1 = vpop.f32.mrb[12].mxu0  ;;  %9068 = vadd.xlane.f32.xlu1 %v9067_v38  ;;  %8831 = vadd.xlane.f32.xlu0 %v8830_v50 }
 0x531   :  { %v17730_v52 = vadd.f32 %v8647_v1, %v17388_v47  ;;  %v8649_v33 = vpop.f32.mrb[13].mxu0 }
 0x532   :  { %v8650_v32 = vpop.f32.mrb[14].mxu0 }
 0x533   :  { %19193 = vst [vmem:[#allocation5_spill] sm:$0xff] %v17730_v52  ;;  %v17733_v43 = vadd.f32 %v8650_v32, %v17393_v22  ;;  %v8652_v13 = vpop.f32.mrb[15].mxu0  ;;  %v8833_v3 = vsel %vm8814_vm0, %v17730_v52, 0.0  ;;  %v9013_v5 = vmul.f32 %v17730_v52, %v17730_v52 }
 0x534   :  { %8834 = vadd.xlane.f32.xlu1 %v8833_v3  ;;  %9071 = vadd.xlane.f32.xlu0 %v9070_v36 }
 0x535   :  { %19194 = vst [vmem:[#allocation6_spill] sm:$0xff] %v17733_v43  ;;  %v9073_v55 = vsel %vm8814_vm0, %v9013_v5, 0.0  ;;  %v8836_v47 = vsel %vm8814_vm0, %v17733_v43, 0.0  ;;  %v9014_v22 = vmul.f32 %v17733_v43, %v17733_v43 }
 0x537   :  { %v9076_v33 = vsel %vm8814_vm0, %v9014_v22, 0.0 }
 0x538   :  { %v8655_v4 = vpop.f32.mrb[16].mxu0  ;;  %9074 = vadd.xlane.f32.xlu1 %v9073_v55  ;;  %8837 = vadd.xlane.f32.xlu0 %v8836_v47 }
 0x539   :  { %v17746_v41 = vadd.f32 %v8655_v4, %v17404_v21  ;;  %v8657_v12 = vpop.f32.mrb[17].mxu0 }
 0x53a   :  { %v8658_v38 = vpop.f32.mrb[18].mxu0 }
 0x53b   :  { %19195 = vst [vmem:[#allocation7_spill] sm:$0xff] %v17746_v41  ;;  %v17749_v50 = vadd.f32 %v8658_v38, %v17409_v15  ;;  %v8660_v57 = vpop.f32.mrb[19].mxu0  ;;  %v8839_v1 = vsel %vm8814_vm0, %v17746_v41, 0.0  ;;  %v9015_v32 = vmul.f32 %v17746_v41, %v17746_v41 }
 0x53c   :  { %8840 = vadd.xlane.f32.xlu1 %v8839_v1  ;;  %9077 = vadd.xlane.f32.xlu0 %v9076_v33 }
 0x53d   :  { %19196 = vst [vmem:[#allocation8_spill] sm:$0xff] %v17749_v50  ;;  %v9079_v13 = vsel %vm8814_vm0, %v9015_v32, 0.0  ;;  %v8842_v21 = vsel %vm8814_vm0, %v17749_v50, 0.0  ;;  %v9016_v15 = vmul.f32 %v17749_v50, %v17749_v50  ;;  %v9490_v50 = vld [vmem:[%s19100_s3 + $0x18] sm:$0xff] }
 0x53f   :  { %v9082_v12 = vsel %vm8814_vm0, %v9016_v15, 0.0 }
 0x540   :  { %v8663_v3 = vpop.f32.mrb[20].mxu0  ;;  %9080 = vadd.xlane.f32.xlu1 %v9079_v13  ;;  %8843 = vadd.xlane.f32.xlu0 %v8842_v21 }
 0x541   :  { %v17762_v36 = vadd.f32 %v8663_v3, %v17420_v18  ;;  %v8665_v5 = vpop.f32.mrb[21].mxu0 }
 0x542   :  { %v8666_v55 = vpop.f32.mrb[22].mxu0 }
 0x543   :  { %19197 = vst [vmem:[#allocation9_spill] sm:$0xff] %v17762_v36  ;;  %v17765_v47 = vadd.f32 %v8666_v55, %v17425_v53  ;;  %v8668_v22 = vpop.f32.mrb[23].mxu0  ;;  %v8845_v4 = vsel %vm8814_vm0, %v17762_v36, 0.0  ;;  %v9017_v38 = vmul.f32 %v17762_v36, %v17762_v36 }
 0x544   :  { %8846 = vadd.xlane.f32.xlu1 %v8845_v4  ;;  %9083 = vadd.xlane.f32.xlu0 %v9082_v12 }
 0x545   :  { %19198 = vst [vmem:[#allocation10_spill] sm:$0xff] %v17765_v47  ;;  %v9085_v57 = vsel %vm8814_vm0, %v9017_v38, 0.0  ;;  %v8848_v18 = vsel %vm8814_vm0, %v17765_v47, 0.0  ;;  %v9018_v53 = vmul.f32 %v17765_v47, %v17765_v47 }
 0x547   :  { %v9088_v5 = vsel %vm8814_vm0, %v9018_v53, 0.0 }
 0x548   :  { %v8671_v1 = vpop.f32.mrb[24].mxu0  ;;  %9086 = vadd.xlane.f32.xlu1 %v9085_v57  ;;  %8849 = vadd.xlane.f32.xlu0 %v8848_v18 }
 0x549   :  { %v17778_v33 = vadd.f32 %v8671_v1, %v17436_v58  ;;  %v8673_v32 = vpop.f32.mrb[25].mxu0 }
 0x54a   :  { %v8674_v13 = vpop.f32.mrb[26].mxu0 }
 0x54b   :  { %19199 = vst [vmem:[#allocation11_spill] sm:$0xff] %v17778_v33  ;;  %v17781_v21 = vadd.f32 %v8674_v13, %v17441_v0  ;;  %v8676_v15 = vpop.f32.mrb[27].mxu0  ;;  %v8851_v3 = vsel %vm8814_vm0, %v17778_v33, 0.0  ;;  %v9019_v55 = vmul.f32 %v17778_v33, %v17778_v33 }
 0x54c   :  { %8852 = vadd.xlane.f32.xlu1 %v8851_v3  ;;  %9089 = vadd.xlane.f32.xlu0 %v9088_v5 }
 0x54d   :  { %19200 = vst [vmem:[#allocation12_spill] sm:$0xff] %v17781_v21  ;;  %v9091_v22 = vsel %vm8814_vm0, %v9019_v55, 0.0  ;;  %v8854_v58 = vsel %vm8814_vm0, %v17781_v21, 0.0  ;;  %v9020_v0 = vmul.f32 %v17781_v21, %v17781_v21 }
 0x54f   :  { %v9094_v32 = vsel %vm8814_vm0, %v9020_v0, 0.0 }
 0x550   :  { %v8679_v4 = vpop.f32.mrb[28].mxu0  ;;  %9092 = vadd.xlane.f32.xlu1 %v9091_v22  ;;  %8855 = vadd.xlane.f32.xlu0 %v8854_v58 }
 0x551   :  { %v17794_v12 = vadd.f32 %v8679_v4, %v17452_v45  ;;  %v8681_v38 = vpop.f32.mrb[29].mxu0 }
 0x552   :  { %v8682_v57 = vpop.f32.mrb[30].mxu0 }
 0x553   :  { %19201 = vst [vmem:[#allocation13_spill] sm:$0xff] %v17794_v12  ;;  %v17797_v18 = vadd.f32 %v8682_v57, %v17457_v11  ;;  %v8684_v53 = vpop.f32.mrb[31].mxu0  ;;  %v8857_v1 = vsel %vm8814_vm0, %v17794_v12, 0.0  ;;  %v9021_v13 = vmul.f32 %v17794_v12, %v17794_v12 }
 0x554   :  { %8858 = vadd.xlane.f32.xlu1 %v8857_v1  ;;  %9095 = vadd.xlane.f32.xlu0 %v9094_v32 }
 0x555   :  { %19202 = vst [vmem:[#allocation14_spill] sm:$0xff] %v17797_v18  ;;  %v9097_v15 = vsel %vm8814_vm0, %v9021_v13, 0.0  ;;  %v8860_v45 = vsel %vm8814_vm0, %v17797_v18, 0.0  ;;  %v9022_v11 = vmul.f32 %v17797_v18, %v17797_v18 }
 0x557   :  { %v9100_v38 = vsel %vm8814_vm0, %v9022_v11, 0.0 }
 0x558   :  { %v8687_v3 = vpop.f32.mrb[32].mxu0  ;;  %9098 = vadd.xlane.f32.xlu1 %v9097_v15  ;;  %8861 = vadd.xlane.f32.xlu0 %v8860_v45 }
 0x559   :  { %v17810_v5 = vadd.f32 %v8687_v3, %v17468_v30  ;;  %v8689_v55 = vpop.f32.mrb[33].mxu0 }
 0x55a   :  { %v8690_v22 = vpop.f32.mrb[34].mxu0 }
 0x55b   :  { %19203 = vst [vmem:[#allocation15_spill] sm:$0xff] %v17810_v5  ;;  %v17813_v58 = vadd.f32 %v8690_v22, %v17473_v40  ;;  %v8692_v0 = vpop.f32.mrb[35].mxu0  ;;  %v8863_v4 = vsel %vm8814_vm0, %v17810_v5, 0.0  ;;  %v9023_v57 = vmul.f32 %v17810_v5, %v17810_v5 }
 0x55c   :  { %8864 = vadd.xlane.f32.xlu1 %v8863_v4  ;;  %9101 = vadd.xlane.f32.xlu0 %v9100_v38 }
 0x55d   :  { %19204 = vst [vmem:[#allocation16_spill] sm:$0xff] %v17813_v58  ;;  %v9103_v53 = vsel %vm8814_vm0, %v9023_v57, 0.0  ;;  %v8866_v30 = vsel %vm8814_vm0, %v17813_v58, 0.0  ;;  %v9024_v40 = vmul.f32 %v17813_v58, %v17813_v58 }
 0x55f   :  { %v9106_v55 = vsel %vm8814_vm0, %v9024_v40, 0.0 }
 0x560   :  { %v8695_v1 = vpop.f32.mrb[36].mxu0  ;;  %9104 = vadd.xlane.f32.xlu1 %v9103_v53  ;;  %8867 = vadd.xlane.f32.xlu0 %v8866_v30 }
 0x561   :  { %v17826_v32 = vadd.f32 %v8695_v1, %v17481_v48  ;;  %v8697_v13 = vpop.f32.mrb[37].mxu0 }
 0x562   :  { %v8698_v15 = vpop.f32.mrb[38].mxu0 }
 0x563   :  { %19205 = vst [vmem:[#allocation17_spill] sm:$0xff] %v17826_v32  ;;  %v17829_v45 = vadd.f32 %v8698_v15, %v17483_v56  ;;  %v8700_v11 = vpop.f32.mrb[39].mxu0  ;;  %v8869_v3 = vsel %vm8814_vm0, %v17826_v32, 0.0  ;;  %v9025_v22 = vmul.f32 %v17826_v32, %v17826_v32 }
 0x564   :  { %8870 = vadd.xlane.f32.xlu1 %v8869_v3  ;;  %9107 = vadd.xlane.f32.xlu0 %v9106_v55 }
 0x565   :  { %19206 = vst [vmem:[#allocation18_spill] sm:$0xff] %v17829_v45  ;;  %v9109_v0 = vsel %vm8814_vm0, %v9025_v22, 0.0  ;;  %v8872_v48 = vsel %vm8814_vm0, %v17829_v45, 0.0  ;;  %v9026_v56 = vmul.f32 %v17829_v45, %v17829_v45 }
 0x567   :  { %v9112_v13 = vsel %vm8814_vm0, %v9026_v56, 0.0 }
 0x568   :  { %v8703_v4 = vpop.f32.mrb[40].mxu0  ;;  %9110 = vadd.xlane.f32.xlu1 %v9109_v0  ;;  %8873 = vadd.xlane.f32.xlu0 %v8872_v48 }
 0x569   :  { %v17842_v38 = vadd.f32 %v8703_v4, %v17491_v16  ;;  %v8705_v57 = vpop.f32.mrb[41].mxu0 }
 0x56a   :  { %v8706_v53 = vpop.f32.mrb[42].mxu0 }
 0x56b   :  { %19207 = vst [vmem:[#allocation19_spill] sm:$0xff] %v17842_v38  ;;  %v17845_v30 = vadd.f32 %v8706_v53, %v17493_v8  ;;  %v8708_v40 = vpop.f32.mrb[43].mxu0  ;;  %v8875_v1 = vsel %vm8814_vm0, %v17842_v38, 0.0  ;;  %v9027_v15 = vmul.f32 %v17842_v38, %v17842_v38 }
 0x56c   :  { %8876 = vadd.xlane.f32.xlu1 %v8875_v1  ;;  %9113 = vadd.xlane.f32.xlu0 %v9112_v13 }
 0x56d   :  { %19208 = vst [vmem:[#allocation20_spill] sm:$0xff] %v17845_v30  ;;  %v9115_v11 = vsel %vm8814_vm0, %v9027_v15, 0.0  ;;  %v8878_v16 = vsel %vm8814_vm0, %v17845_v30, 0.0  ;;  %v9028_v8 = vmul.f32 %v17845_v30, %v17845_v30 }
 0x56f   :  { %v9118_v57 = vsel %vm8814_vm0, %v9028_v8, 0.0 }
 0x570   :  { %v8711_v3 = vpop.f32.mrb[44].mxu0  ;;  %9116 = vadd.xlane.f32.xlu1 %v9115_v11  ;;  %8879 = vadd.xlane.f32.xlu0 %v8878_v16 }
 0x571   :  { %v17858_v55 = vadd.f32 %v8711_v3, %v17501_v35  ;;  %v8713_v22 = vpop.f32.mrb[45].mxu0 }
 0x572   :  { %v8714_v0 = vpop.f32.mrb[46].mxu0 }
 0x573   :  { %19209 = vst [vmem:[#allocation21_spill] sm:$0xff] %v17858_v55  ;;  %v17861_v48 = vadd.f32 %v8714_v0, %v17503_v63  ;;  %v8716_v56 = vpop.f32.mrb[47].mxu0  ;;  %v8881_v4 = vsel %vm8814_vm0, %v17858_v55, 0.0  ;;  %v9029_v53 = vmul.f32 %v17858_v55, %v17858_v55 }
 0x574   :  { %8882 = vadd.xlane.f32.xlu1 %v8881_v4  ;;  %9119 = vadd.xlane.f32.xlu0 %v9118_v57 }
 0x575   :  { %19210 = vst [vmem:[#allocation22_spill] sm:$0xff] %v17861_v48  ;;  %v9121_v40 = vsel %vm8814_vm0, %v9029_v53, 0.0  ;;  %v8884_v35 = vsel %vm8814_vm0, %v17861_v48, 0.0  ;;  %v9030_v63 = vmul.f32 %v17861_v48, %v17861_v48 }
 0x577   :  { %v9124_v22 = vsel %vm8814_vm0, %v9030_v63, 0.0 }
 0x578   :  { %v8719_v1 = vpop.f32.mrb[48].mxu0  ;;  %9122 = vadd.xlane.f32.xlu1 %v9121_v40  ;;  %8885 = vadd.xlane.f32.xlu0 %v8884_v35 }
 0x579   :  { %v17874_v13 = vadd.f32 %v8719_v1, %v17583_v46  ;;  %v8721_v15 = vpop.f32.mrb[49].mxu0 }
 0x57a   :  { %v8722_v11 = vpop.f32.mrb[50].mxu0 }
 0x57b   :  { %19211 = vst [vmem:[#allocation23_spill] sm:$0xff] %v17874_v13  ;;  %v17877_v16 = vadd.f32 %v8722_v11, %v17585_v54  ;;  %v8724_v8 = vpop.f32.mrb[51].mxu0  ;;  %v8887_v3 = vsel %vm8814_vm0, %v17874_v13, 0.0  ;;  %v9031_v0 = vmul.f32 %v17874_v13, %v17874_v13 }
 0x57c   :  { %8888 = vadd.xlane.f32.xlu1 %v8887_v3  ;;  %9125 = vadd.xlane.f32.xlu0 %v9124_v22 }
 0x57d   :  { %19212 = vst [vmem:[#allocation24_spill] sm:$0xff] %v17877_v16  ;;  %v9127_v56 = vsel %vm8814_vm0, %v9031_v0, 0.0  ;;  %v8890_v46 = vsel %vm8814_vm0, %v17877_v16, 0.0  ;;  %v9032_v54 = vmul.f32 %v17877_v16, %v17877_v16 }
 0x57f   :  { %v9130_v15 = vsel %vm8814_vm0, %v9032_v54, 0.0 }
 0x580   :  { %v8727_v4 = vpop.f32.mrb[52].mxu0  ;;  %9128 = vadd.xlane.f32.xlu1 %v9127_v56  ;;  %8891 = vadd.xlane.f32.xlu0 %v8890_v46 }
 0x581   :  { %v17890_v57 = vadd.f32 %v8727_v4, %v17593_v42  ;;  %v8729_v53 = vpop.f32.mrb[53].mxu0 }
 0x582   :  { %v8730_v40 = vpop.f32.mrb[54].mxu0 }
 0x583   :  { %19213 = vst [vmem:[#allocation25_spill] sm:$0xff] %v17890_v57  ;;  %v17893_v35 = vadd.f32 %v8730_v40, %v17595_v10  ;;  %v8732_v63 = vpop.f32.mrb[55].mxu0  ;;  %v8893_v1 = vsel %vm8814_vm0, %v17890_v57, 0.0  ;;  %v9033_v11 = vmul.f32 %v17890_v57, %v17890_v57 }
 0x584   :  { %8894 = vadd.xlane.f32.xlu1 %v8893_v1  ;;  %9131 = vadd.xlane.f32.xlu0 %v9130_v15 }
 0x585   :  { %19214 = vst [vmem:[#allocation26_spill] sm:$0xff] %v17893_v35  ;;  %v9133_v8 = vsel %vm8814_vm0, %v9033_v11, 0.0  ;;  %v8896_v42 = vsel %vm8814_vm0, %v17893_v35, 0.0  ;;  %v9034_v10 = vmul.f32 %v17893_v35, %v17893_v35 }
 0x587   :  { %v9136_v53 = vsel %vm8814_vm0, %v9034_v10, 0.0 }
 0x588   :  { %v8735_v3 = vpop.f32.mrb[56].mxu0  ;;  %9134 = vadd.xlane.f32.xlu1 %v9133_v8  ;;  %8897 = vadd.xlane.f32.xlu0 %v8896_v42 }
 0x589   :  { %v17906_v22 = vadd.f32 %v8735_v3, %v17603_v26  ;;  %v8737_v0 = vpop.f32.mrb[57].mxu0 }
 0x58a   :  { %v8738_v56 = vpop.f32.mrb[58].mxu0 }
 0x58b   :  { %19215 = vst [vmem:[#allocation27_spill] sm:$0xff] %v17906_v22  ;;  %v17909_v46 = vadd.f32 %v8738_v56, %v17605_v9  ;;  %v8740_v54 = vpop.f32.mrb[59].mxu0  ;;  %v8899_v4 = vsel %vm8814_vm0, %v17906_v22, 0.0  ;;  %v9035_v40 = vmul.f32 %v17906_v22, %v17906_v22 }
 0x58c   :  { %8900 = vadd.xlane.f32.xlu1 %v8899_v4  ;;  %9137 = vadd.xlane.f32.xlu0 %v9136_v53 }
 0x58d   :  { %19216 = vst [vmem:[#allocation28_spill] sm:$0xff] %v17909_v46  ;;  %v9139_v63 = vsel %vm8814_vm0, %v9035_v40, 0.0  ;;  %v8902_v26 = vsel %vm8814_vm0, %v17909_v46, 0.0  ;;  %v9036_v9 = vmul.f32 %v17909_v46, %v17909_v46 }
 0x58f   :  { %v9142_v0 = vsel %vm8814_vm0, %v9036_v9, 0.0 }
 0x590   :  { %v8743_v1 = vpop.f32.mrb[60].mxu0  ;;  %9140 = vadd.xlane.f32.xlu1 %v9139_v63  ;;  %8903 = vadd.xlane.f32.xlu0 %v8902_v26 }
 0x591   :  { %v17922_v15 = vadd.f32 %v8743_v1, %v17613_v20  ;;  %v8745_v11 = vpop.f32.mrb[61].mxu0 }
 0x592   :  { %v8746_v8 = vpop.f32.mrb[62].mxu0 }
 0x593   :  { %19217 = vst [vmem:[#allocation29_spill] sm:$0xff] %v17922_v15  ;;  %v17925_v42 = vadd.f32 %v8746_v8, %v17615_v7  ;;  %v8748_v10 = vpop.f32.mrb[63].mxu0  ;;  %v8905_v3 = vsel %vm8814_vm0, %v17922_v15, 0.0  ;;  %v9037_v56 = vmul.f32 %v17922_v15, %v17922_v15 }
 0x594   :  { %8906 = vadd.xlane.f32.xlu1 %v8905_v3  ;;  %9143 = vadd.xlane.f32.xlu0 %v9142_v0 }
 0x595   :  { %19218 = vst [vmem:[#allocation30_spill] sm:$0xff] %v17925_v42  ;;  %v9145_v54 = vsel %vm8814_vm0, %v9037_v56, 0.0  ;;  %v8908_v20 = vsel %vm8814_vm0, %v17925_v42, 0.0  ;;  %v9038_v7 = vmul.f32 %v17925_v42, %v17925_v42 }
 0x597   :  { %v9148_v11 = vsel %vm8814_vm0, %v9038_v7, 0.0 }
 0x598   :  { %v8751_v4 = vpop.f32.mrb[64].mxu0  ;;  %9146 = vadd.xlane.f32.xlu1 %v9145_v54  ;;  %8909 = vadd.xlane.f32.xlu0 %v8908_v20 }
 0x599   :  { %v17938_v53 = vadd.f32 %v8751_v4, %v17623_v27  ;;  %v8753_v40 = vpop.f32.mrb[65].mxu0 }
 0x59a   :  { %v8754_v63 = vpop.f32.mrb[66].mxu0 }
 0x59b   :  { %19219 = vst [vmem:[#allocation31_spill] sm:$0xff] %v17938_v53  ;;  %v17941_v26 = vadd.f32 %v8754_v63, %v17625_v49  ;;  %v8756_v9 = vpop.f32.mrb[67].mxu0  ;;  %v8911_v1 = vsel %vm8814_vm0, %v17938_v53, 0.0  ;;  %v9039_v8 = vmul.f32 %v17938_v53, %v17938_v53 }
 0x59c   :  { %8912 = vadd.xlane.f32.xlu1 %v8911_v1  ;;  %9149 = vadd.xlane.f32.xlu0 %v9148_v11 }
 0x59d   :  { %19220 = vst [vmem:[#allocation32_spill] sm:$0xff] %v17941_v26  ;;  %v9151_v10 = vsel %vm8814_vm0, %v9039_v8, 0.0  ;;  %v8914_v27 = vsel %vm8814_vm0, %v17941_v26, 0.0  ;;  %v9040_v49 = vmul.f32 %v17941_v26, %v17941_v26 }
 0x59f   :  { %v9154_v40 = vsel %vm8814_vm0, %v9040_v49, 0.0 }
 0x5a0   :  { %v8759_v3 = vpop.f32.mrb[68].mxu0  ;;  %9152 = vadd.xlane.f32.xlu1 %v9151_v10  ;;  %8915 = vadd.xlane.f32.xlu0 %v8914_v27 }
 0x5a1   :  { %v17954_v0 = vadd.f32 %v8759_v3, %v17633_v23  ;;  %v8761_v56 = vpop.f32.mrb[69].mxu0 }
 0x5a2   :  { %v8762_v54 = vpop.f32.mrb[70].mxu0 }
 0x5a3   :  { %19221 = vst [vmem:[#allocation33_spill] sm:$0xff] %v17954_v0  ;;  %v17957_v20 = vadd.f32 %v8762_v54, %v17635_v29  ;;  %v8764_v7 = vpop.f32.mrb[71].mxu0  ;;  %v8917_v4 = vsel %vm8814_vm0, %v17954_v0, 0.0  ;;  %v9041_v63 = vmul.f32 %v17954_v0, %v17954_v0 }
 0x5a4   :  { %8918 = vadd.xlane.f32.xlu1 %v8917_v4  ;;  %9155 = vadd.xlane.f32.xlu0 %v9154_v40 }
 0x5a5   :  { %19222 = vst [vmem:[#allocation34_spill] sm:$0xff] %v17957_v20  ;;  %v9157_v9 = vsel %vm8814_vm0, %v9041_v63, 0.0  ;;  %v8920_v23 = vsel %vm8814_vm0, %v17957_v20, 0.0  ;;  %v9042_v29 = vmul.f32 %v17957_v20, %v17957_v20 }
 0x5a7   :  { %v9160_v7 = vsel %vm8814_vm0, %v9042_v29, 0.0 }
 0x5a8   :  { %v8767_v1 = vpop.f32.mrb[72].mxu0  ;;  %9158 = vadd.xlane.f32.xlu1 %v9157_v9  ;;  %8921 = vadd.xlane.f32.xlu0 %v8920_v23 }
 0x5a9   :  { %v17970_v11 = vadd.f32 %v8767_v1, %v17643_v6  ;;  %v8769_v8 = vpop.f32.mrb[73].mxu0  ;;  %v8817_v10 = vpop.xlane.xlu0 %8816 }
 0x5aa   :  { %v8770_v27 = vpop.f32.mrb[74].mxu0  ;;  %v17985_v23 = vmul.f32 0.020408163, %v8817_v10 }
 0x5ab   :  { %19223 = vst [vmem:[#allocation35_spill] sm:$0xff] %v17970_v11  ;;  %v17973_v49 = vadd.f32 %v8770_v27, %v17645_v2  ;;  %v8772_v3 = vpop.f32.mrb[75].mxu0  ;;  %v8820_v56 = vpop.xlane.xlu1 %8819  ;;  %v8923_v54 = vsel %vm8814_vm0, %v17970_v11, 0.0  ;;  %v9043_v4 = vmul.f32 %v17970_v11, %v17970_v11 }
 0x5ac   :  { %8924 = vadd.xlane.f32.xlu1 %v8923_v54  ;;  %9161 = vadd.xlane.f32.xlu0 %v9160_v7 }
 0x5ad   :  { %19224 = vst [vmem:[#allocation36_spill] sm:$0xff] %v17973_v49  ;;  %v9060_v6 = vpop.xlane.xlu0 %9059  ;;  %v9163_v63 = vsel %vm8814_vm0, %v9043_v4, 0.0  ;;  %v8926_v2 = vsel %vm8814_vm0, %v17973_v49, 0.0  ;;  %v9044_v9 = vmul.f32 %v17973_v49, %v17973_v49 }
 0x5af   :  { %v9057_v40 = vpop.xlane.xlu1 %9056  ;;  %v9166_v10 = vsel %vm8814_vm0, %v9044_v9, 0.0 }
 0x5b0   :  { %v8775_v1 = vpop.f32.mrb[76].mxu0  ;;  %9164 = vadd.xlane.f32.xlu1 %v9163_v63  ;;  %8927 = vadd.xlane.f32.xlu0 %v8926_v2  ;;  %v9199_v3 = vmul.f32 0.020408163, %v9057_v40 }
 0x5b1   :  { %v17988_v29 = vadd.f32 %v8775_v1, %v17653_v61  ;;  %v8777_v8 = vpop.f32.mrb[77].mxu0  ;;  %v17990_v27 = vpop.xlane.xlu0 %8822  ;;  %v9247_v61 = vmul.f32 %v17985_v23, %v17985_v23 }
 0x5b2   :  { %v8778_v54 = vpop.f32.mrb[78].mxu0  ;;  %v8961_v55 = vmul.f32 0.020408163, %v17990_v27 }
 0x5b3   :  { %19225 = vst [vmem:[#allocation37_spill] sm:$0xff] %v17988_v29  ;;  %v17993_v7 = vadd.f32 %v8778_v54, %v17655_v62  ;;  %v8780_v4 = vpop.f32.mrb[79].mxu0  ;;  %v8929_v11 = vsel %vm8814_vm0, %v17988_v29, 0.0  ;;  %v9045_v63 = vmul.f32 %v17988_v29, %v17988_v29  ;;  %v18002_v2 = vpop.xlane.xlu1 %9062  ;;  %v18006_v62 = vmul.f32 0.020408163, %v8820_v56 }
 0x5b4   :  { %8930 = vadd.xlane.f32.xlu1 %v8929_v11  ;;  %9167 = vadd.xlane.f32.xlu0 %v9166_v10  ;;  %v9295_v1 = vsub.f32 %v9199_v3, %v9247_v61  ;;  %v9200_v3 = vmul.f32 0.020408163, %v9060_v6  ;;  %v9249_v48 = vmul.f32 %v8961_v55, %v8961_v55 }
 0x5b5   :  { %19226 = vst [vmem:[#allocation38_spill] sm:$0xff] %v17993_v7  ;;  %v18004_v40 = vpop.xlane.xlu0 %8825  ;;  %v9169_v8 = vsel %vm8814_vm0, %v9045_v63, 0.0  ;;  %v8932_v9 = vsel %vm8814_vm0, %v17993_v7, 0.0  ;;  %v9046_v54 = vmul.f32 %v17993_v7, %v17993_v7  ;;  %v9248_v56 = vmul.f32 %v18006_v62, %v18006_v62 }
 0x5b6   :  { %v9343_v63 = vmax.f32 %v9295_v1, 0.0  ;;  %v18119_v38 = vmul.f32 0.020408163, %v18004_v40 }
 0x5b8   :  { %v8783_v4 = vpop.f32.mrb[80].mxu0  ;;  %9170 = vadd.xlane.f32.xlu1 %v9169_v8  ;;  %8933 = vadd.xlane.f32.xlu0 %v8932_v9  ;;  %v9391_v6 = vadd.f32 1e-05, %v9343_v63  ;;  %v9250_v12 = vmul.f32 %v18119_v38, %v18119_v38 }
 0x5b9   :  { %v18014_v11 = vadd.f32 %v8783_v4, %v17663_v44  ;;  %v8785_v10 = vpop.f32.mrb[81].mxu0  ;;  %v18016_v29 = vpop.xlane.xlu1 %8828  ;;  %v9172_v44 = vsel %vm8814_vm0, %v9046_v54, 0.0 }
 0x5ba   :  { %v18020_v61 = vpop.xlane.xlu0 %9065  ;;  %v8786_v49 = vpop.f32.mrb[82].mxu0  ;;  %v9296_v10 = vsub.f32 %v9200_v3, %v9248_v56  ;;  %13630 = vrsqrt.f32 %v9391_v6 }
 0x5bb   :  { %19227 = vst [vmem:[#allocation39_spill] sm:$0xff] %v18014_v11  ;;  %v18023_v0 = vadd.f32 %v8786_v49, %v17665_v19  ;;  %v8788_v7 = vpop.f32.mrb[83].mxu0  ;;  %v8935_v8 = vsel %vm8814_vm0, %v18014_v11, 0.0  ;;  %v9047_v9 = vmul.f32 %v18014_v11, %v18014_v11  ;;  %v9202_v5 = vmul.f32 0.020408163, %v18020_v61 }
 0x5bc   :  { %8936 = vadd.xlane.f32.xlu1 %v8935_v8  ;;  %9173 = vadd.xlane.f32.xlu0 %v9172_v44  ;;  %v9344_v3 = vmax.f32 %v9296_v10, 0.0 }
 0x5bd   :  { %19228 = vst [vmem:[#allocation40_spill] sm:$0xff] %v18023_v0  ;;  %v18030_v4 = vpop.xlane.xlu1 %9068  ;;  %v9175_v19 = vsel %vm8814_vm0, %v9047_v9, 0.0  ;;  %v8938_v49 = vsel %vm8814_vm0, %v18023_v0, 0.0  ;;  %v9048_v7 = vmul.f32 %v18023_v0, %v18023_v0  ;;  %v9298_v33 = vsub.f32 %v9202_v5, %v9250_v12 }
 0x5be   :  { %v18032_v1 = vpop.xlane.xlu0 %8831 }
 0x5bf   :  { %v9178_v0 = vsel %vm8814_vm0, %v9048_v7, 0.0  ;;  %v9346_v36 = vmax.f32 %v9298_v33, 0.0 }
 0x5c0   :  { %v8791_v54 = vpop.f32.mrb[84].mxu0  ;;  %9176 = vadd.xlane.f32.xlu1 %v9175_v19  ;;  %8939 = vadd.xlane.f32.xlu0 %v8938_v49 }
 0x5c1   :  { %v18040_v8 = vadd.f32 %v8791_v54, %v17670_v60  ;;  %v8793_v44 = vpop.f32.mrb[85].mxu0  ;;  %v18042_v11 = vpop.xlane.xlu1 %8834  ;;  %v9392_v60 = vadd.f32 1e-05, %v9344_v3  ;;  %v9394_v12 = vadd.f32 1e-05, %v9346_v36 }
 0x5c2   :  { %v18044_v63 = vpop.xlane.xlu0 %9071  ;;  %v8794_v56 = vpop.f32.mrb[86].mxu0 }
 0x5c3   :  { %19229 = vst [vmem:[#allocation41_spill] sm:$0xff] %v18040_v8  ;;  %v18047_v9 = vadd.f32 %v8794_v56, %v17672_v28  ;;  %v8796_v20 = vpop.f32.mrb[87].mxu0  ;;  %13632 = vrsqrt.f32 %v9392_v60  ;;  %v9487_v56 = vld [vmem:[%s19100_s3] sm:$0xff]  ;;  %v8941_v27 = vsel %vm8814_vm0, %v18040_v8, 0.0  ;;  %v9049_v58 = vmul.f32 %v18040_v8, %v18040_v8 }
 0x5c4   :  { %9179 = vadd.xlane.f32.xlu0 %v9178_v0  ;;  %v13631_v7 = vpop.eup %13630 }
 0x5c5   :  { %19230 = vst [vmem:[#allocation42_spill] sm:$0xff] %v18047_v9  ;;  %v18050_v19 = vpop.xlane.xlu1 %9074  ;;  %v8944_v8 = vsel %vm8814_vm0, %v18047_v9, 0.0  ;;  %v9050_v47 = vmul.f32 %v18047_v9, %v18047_v9 }
 0x5c6   :  { %v18052_v49 = vpop.xlane.xlu0 %8837 }
 0x5c7   :  { %v9184_v5 = vsel %vm8814_vm0, %v9050_v47, 0.0  ;;  %v9489_v47 = vld [vmem:[%s19100_s3 + $0x10] sm:$0xff] }
 0x5c8   :  { %v8799_v54 = vpop.f32.mrb[88].mxu0 }
 0x5c9   :  { %v18055_v44 = vadd.f32 %v8799_v54, %v17674_v31  ;;  %v8801_v6 = vpop.f32.mrb[89].mxu0  ;;  %v18057_v53 = vpop.xlane.xlu1 %8840  ;;  %v9535_v54 = vmul.f32 %v13631_v7, %v9487_v56  ;;  %v9488_v7 = vld [vmem:[%s19100_s3 + $0x8] sm:$0xff] }
 0x5ca   :  { %v18059_v10 = vpop.xlane.xlu0 %9077  ;;  %v8802_v28 = vpop.f32.mrb[90].mxu0 }
 0x5cb   :  { %19231 = vst [vmem:[#allocation43_spill] sm:$0xff] %v18055_v44  ;;  %v18062_v20 = vadd.f32 %v8802_v28, %v17676_v24  ;;  %v8804_v0 = vpop.f32.mrb[91].mxu0  ;;  %v9631_v56 = vmul.f32 %v9535_v54, %v17985_v23 }
 0x5cd   :  { %19232 = vst [vmem:[#allocation44_spill] sm:$0xff] %v18062_v20  ;;  %v18067_v3 = vpop.xlane.xlu1 %9080  ;;  %v13633_v22 = vpop.eup %13632 }
 0x5ce   :  { %v18069_v31 = vpop.xlane.xlu0 %8843 }
 0x5d0   :  { %v8807_v6 = vpop.f32.mrb[92].mxu0 }
 0x5d1   :  { %v18072_v26 = vadd.f32 %v8807_v6, %v17678_v37  ;;  %v8809_v15 = vpop.f32.mrb[93].mxu0  ;;  %v18074_v60 = vpop.xlane.xlu1 %8846  ;;  %9729 = vperm.xlu1 %11829, %v9535_v54  }
 0x5d2   :  { %v18076_v24 = vpop.xlane.xlu0 %9083  ;;  %v8810_v28 = vpop.f32.mrb[94].mxu0  ;;  %v9536_v15 = vmul.f32 %v13633_v22, %v9488_v7 }
 0x5d3   :  { %19233 = vst [vmem:[#allocation45_spill] sm:$0xff] %v18072_v26  ;;  %v18079_v0 = vadd.f32 %v8810_v28, %v17680_v51  ;;  %v8812_v42 = vpop.f32.mrb[95].mxu0  ;;  %v9583_v51 = vld [vmem:[%s19101_s4] sm:$0xff] }
 0x5d4   :  { %v9679_v42 = vsub.f32 %v9583_v51, %v9631_v56  ;;  %v9632_v33 = vmul.f32 %v9536_v15, %v18006_v62 }
 0x5d5   :  { %19234 = vst [vmem:[#allocation46_spill] sm:$0xff] %v18079_v0  ;;  %v18081_v46 = vpop.xlane.xlu1 %9086 }
 0x5d6   :  { %v18086_v37 = vpop.xlane.xlu0 %8849 }
 0x5d9   :  { %v18089_v6 = vpop.xlane.xlu1 %8852 }
 0x5da   :  { %v18094_v28 = vpop.xlane.xlu0 %9089  ;;  %9734 = vperm.xlu0 %11828, %v9536_v15  }
 0x5dd   :  { %v18096_v57 = vpop.xlane.xlu1 %9092 }
 0x5de   :  { %v18098_v35 = vpop.xlane.xlu0 %8855  ;;  %10017 = vperm.xlu0 %11828, %v9679_v42   ;;  %v9201_v42 = vmul.f32 0.020408163, %v18002_v2 }
 0x5e0   :  { %v9297_v45 = vsub.f32 %v9201_v42, %v9249_v48  ;;  %v9181_v48 = vsel %vm8814_vm0, %v9049_v58, 0.0 }
 0x5e1   :  { %v18100_v13 = vpop.xlane.xlu1 %8858 }
 0x5e2   :  { %v18102_v22 = vpop.xlane.xlu0 %9095  ;;  %v9345_v18 = vmax.f32 %v9297_v45, 0.0 }
 0x5e4   :  { %v9393_v21 = vadd.f32 1e-05, %v9345_v18 }
 0x5e5   :  { %v18104_v23 = vpop.xlane.xlu1 %9098 }
 0x5e6   :  { %v18106_v54 = vpop.xlane.xlu0 %8861  ;;  %13634 = vrsqrt.f32 %v9393_v21 }
 0x5e7   :  { %13636 = vrsqrt.f32 %v9394_v12 }
 0x5e9   :  { %v18108_v7 = vpop.xlane.xlu1 %8864 }
 0x5ea   :  { %v18110_v16 = vpop.xlane.xlu0 %9101 }
 0x5ed   :  { %v18113_v56 = vpop.xlane.xlu1 %9104 }
 0x5ee   :  { %v18115_v51 = vpop.xlane.xlu0 %8867 }
 0x5f0   :  { %v13635_v36 = vpop.eup %13634 }
 0x5f1   :  { %v18121_v30 = vpop.xlane.xlu1 %8870  ;;  %v9537_v62 = vmul.f32 %v13635_v36, %v9489_v47  ;;  %v13637_v15 = vpop.eup %13636 }
 0x5f2   :  { %v18123_v32 = vpop.xlane.xlu0 %9107 }
 0x5f3   :  { %v9633_v43 = vmul.f32 %v9537_v62, %v8961_v55 }
 0x5f5   :  { %v18132_v2 = vpop.xlane.xlu1 %9110  ;;  %8942 = vadd.xlane.f32.xlu1 %v8941_v27 }
 0x5f6   :  { %v18134_v40 = vpop.xlane.xlu0 %8873 }
 0x5f9   :  { %v18137_v42 = vpop.xlane.xlu1 %8876  ;;  %9182 = vadd.xlane.f32.xlu1 %v9181_v48 }
 0x5fa   :  { %v18139_v61 = vpop.xlane.xlu0 %9113 }
 0x5fd   :  { %v18145_v27 = vpop.xlane.xlu1 %9116  ;;  %8945 = vadd.xlane.f32.xlu0 %v8944_v8  ;;  %v9584_v8 = vld [vmem:[%s19101_s4 + $0x8] sm:$0xff] }
 0x5fe   :  { %v18147_v45 = vpop.xlane.xlu0 %8879  ;;  %v9680_v21 = vsub.f32 %v9584_v8, %v9632_v33  ;;  %v9538_v33 = vmul.f32 %v13637_v15, %v9490_v50 }
 0x601   :  { %v18150_v58 = vpop.xlane.xlu1 %8882  ;;  %9185 = vadd.xlane.f32.xlu0 %v9184_v5 }
 0x602   :  { %v18152_v18 = vpop.xlane.xlu0 %9119 }
 0x605   :  { %v18155_v48 = vpop.xlane.xlu1 %9122 }
 0x606   :  { %v18160_v9 = vpop.xlane.xlu0 %8885 }
 0x609   :  { %v18162_v41 = vpop.xlane.xlu1 %8888 }
 0x60a   :  { %v18167_v5 = vpop.xlane.xlu0 %9125  ;;  %10022 = vperm.xlu1 %11829, %v9680_v21   ;;  %v9585_v21 = vld [vmem:[%s19101_s4 + $0x10] sm:$0xff] }
 0x60b   :  { %v9681_v47 = vsub.f32 %v9585_v21, %v9633_v43  ;;  %v8963_v21 = vmul.f32 0.020408163, %v18016_v29 }
 0x60d   :  { %v18169_v12 = vpop.xlane.xlu1 %9128 }
 0x60e   :  { %19235 = vst [vmem:[#allocation47_spill] sm:$0xff] %v18169_v12  ;;  %v18174_v52 = vpop.xlane.xlu0 %8891  ;;  %9739 = vperm.xlu1 %11829, %v9537_v62  }
 0x611   :  { %v18176_v8 = vpop.xlane.xlu1 %8894 }
 0x612   :  { %19236 = vst [vmem:[#allocation48_spill] sm:$0xff] %v18176_v8  ;;  %v18178_v17 = vpop.xlane.xlu0 %9131  ;;  %9744 = vperm.xlu1 %11829, %v9538_v33  }
 0x613   :  { %19237 = vst [vmem:[#allocation49_spill] sm:$0xff] %v18178_v17 }
 0x615   :  { %v18183_v36 = vpop.xlane.xlu1 %9134 }
 0x616   :  { %19238 = vst [vmem:[#allocation50_spill] sm:$0xff] %v18183_v36  ;;  %v18185_v25 = vpop.xlane.xlu0 %8897 }
 0x617   :  { %10027 = vperm.xlu0 %11828, %v9681_v47  }
 0x619   :  { %v18187_v34 = vpop.xlane.xlu1 %8900 }
 0x61a   :  { %19239 = vst [vmem:[#allocation51_spill] sm:$0xff] %v18187_v34  ;;  %v18189_v12 = vpop.xlane.xlu0 %9137  ;;  %v9203_v34 = vmul.f32 0.020408163, %v18030_v4 }
 0x61b   :  { %19240 = vst [vmem:[#allocation52_spill] sm:$0xff] %v18189_v12 }
 0x61d   :  { %v18191_v50 = vpop.xlane.xlu1 %9140 }
 0x61e   :  { %19241 = vst [vmem:[#allocation53_spill] sm:$0xff] %v18191_v50  ;;  %v18193_v55 = vpop.xlane.xlu0 %8903  ;;  %v9251_v50 = vmul.f32 %v8963_v21, %v8963_v21 }
 0x61f   :  { %19242 = vst [vmem:[#allocation54_spill] sm:$0xff] %v18193_v55  ;;  %v18212_v55 = vmul.f32 0.020408163, %v18032_v1  ;;  %v8950_v1 = vsel %vm8814_vm0, %v18062_v20, 0.0 }
 0x621   :  { %v18195_v62 = vpop.xlane.xlu1 %8906  ;;  %v9252_v29 = vmul.f32 %v18212_v55, %v18212_v55 }
 0x622   :  { %19243 = vst [vmem:[#allocation55_spill] sm:$0xff] %v18195_v62  ;;  %v18197_v15 = vpop.xlane.xlu0 %9143 }
 0x623   :  { %19244 = vst [vmem:[#allocation56_spill] sm:$0xff] %v18197_v15  ;;  %v9299_v15 = vsub.f32 %v9203_v34, %v9251_v50  ;;  %v9052_v34 = vmul.f32 %v18062_v20, %v18062_v20 }
 0x625   :  { %v18199_v8 = vpop.xlane.xlu1 %9146 }
 0x626   :  { %19245 = vst [vmem:[#allocation57_spill] sm:$0xff] %v18199_v8  ;;  %v18201_v17 = vpop.xlane.xlu0 %8909  ;;  %v9204_v8 = vmul.f32 0.020408163, %v18044_v63  ;;  %v9051_v63 = vmul.f32 %v18055_v44, %v18055_v44 }
 0x627   :  { %19246 = vst [vmem:[#allocation58_spill] sm:$0xff] %v18201_v17 }
 0x628   :  { %v9300_v4 = vsub.f32 %v9204_v8, %v9252_v29 }
 0x629   :  { %v18203_v43 = vpop.xlane.xlu1 %8912 }
 0x62a   :  { %19247 = vst [vmem:[#allocation59_spill] sm:$0xff] %v18203_v43  ;;  %v18206_v47 = vpop.xlane.xlu0 %9149 }
 0x62b   :  { %19248 = vst [vmem:[#allocation60_spill] sm:$0xff] %v18206_v47  ;;  %v9347_v47 = vmax.f32 %v9299_v15, 0.0  ;;  %v9348_v15 = vmax.f32 %v9300_v4, 0.0  ;;  %v9634_v4 = vmul.f32 %v9538_v33, %v18119_v38  ;;  %v9492_v38 = vld [vmem:[%s19100_s3 + $0x28] sm:$0xff] }
 0x62d   :  { %v18209_v36 = vpop.xlane.xlu1 %9152  ;;  %v9395_v8 = vadd.f32 1e-05, %v9347_v47  ;;  %v9396_v20 = vadd.f32 1e-05, %v9348_v15 }
 0x62e   :  { %19249 = vst [vmem:[#allocation61_spill] sm:$0xff] %v18209_v36  ;;  %v18214_v62 = vpop.xlane.xlu0 %8915  ;;  %v8947_v36 = vsel %vm8814_vm0, %v18055_v44, 0.0 }
 0x62f   :  { %19250 = vst [vmem:[#allocation62_spill] sm:$0xff] %v18214_v62  ;;  %13638 = vrsqrt.f32 %v9395_v8 }
 0x630   :  { %13640 = vrsqrt.f32 %v9396_v20 }
 0x631   :  { %v18217_v17 = vpop.xlane.xlu1 %8918 }
 0x632   :  { %19251 = vst [vmem:[#allocation63_spill] sm:$0xff] %v18217_v17  ;;  %v18221_v43 = vpop.xlane.xlu0 %9155  ;;  %v9187_v17 = vsel %vm8814_vm0, %v9051_v63, 0.0  ;;  %v9491_v63 = vld [vmem:[%s19100_s3 + $0x20] sm:$0xff] }
 0x633   :  { %19252 = vst [vmem:[#allocation64_spill] sm:$0xff] %v18221_v43 }
 0x635   :  { %v18223_v12 = vpop.xlane.xlu1 %9158 }
 0x636   :  { %19253 = vst [vmem:[#allocation65_spill] sm:$0xff] %v18223_v12  ;;  %v18233_v50 = vpop.xlane.xlu0 %8921  ;;  %8951 = vadd.xlane.f32.xlu0 %v8950_v1  ;;  %8948 = vadd.xlane.f32.xlu1 %v8947_v36  ;;  %v9190_v12 = vsel %vm8814_vm0, %v9052_v34, 0.0 }
 0x639   :  { %v18235_v29 = vpop.xlane.xlu1 %8924 }
 0x63a   :  { %v18239_v43 = vpop.xlane.xlu0 %9161  ;;  %9191 = vadd.xlane.f32.xlu0 %v9190_v12  ;;  %9188 = vadd.xlane.f32.xlu1 %v9187_v17  ;;  %v9586_v12 = vld [vmem:[%s19101_s4 + $0x18] sm:$0xff]  ;;  %v13639_v17 = vpop.eup %13638 }
 0x63b   :  { %v9682_v20 = vsub.f32 %v9586_v12, %v9634_v4  ;;  %v13641_v15 = vpop.eup %13640  ;;  %v9539_v33 = vmul.f32 %v13639_v17, %v9491_v63  ;;  %v9587_v4 = vld [vmem:[%s19101_s4 + $0x20] sm:$0xff] }
 0x63d   :  { %v18241_v62 = vpop.xlane.xlu1 %9164 }
 0x63e   :  { %19254 = vst [vmem:[#allocation66_spill] sm:$0xff] %v18241_v62  ;;  %v18243_v44 = vpop.xlane.xlu0 %8927  ;;  %v9635_v62 = vmul.f32 %v9539_v33, %v8963_v21 }
 0x640   :  { %v9683_v12 = vsub.f32 %v9587_v4, %v9635_v62  ;;  %v18290_v62 = vmul.f32 0.020408163, %v18052_v49  ;;  %v9205_v4 = vmul.f32 0.020408163, %v18050_v19  ;;  %v9207_v19 = vmul.f32 0.020408163, %v18067_v3 }
 0x641   :  { %v18245_v36 = vpop.xlane.xlu1 %8930 }
 0x642   :  { %19255 = vst [vmem:[#allocation67_spill] sm:$0xff] %v18245_v36  ;;  %v18247_v47 = vpop.xlane.xlu0 %9167 }
 0x645   :  { %v18255_v34 = vpop.xlane.xlu1 %9170 }
 0x646   :  { %v18250_v1 = vpop.xlane.xlu0 %8933  ;;  %19257 = vst [vmem:[#allocation69_spill] sm:$0xff] %v18255_v34 }
 0x647   :  { %19256 = vst [vmem:[#allocation68_spill] sm:$0xff] %v18250_v1  ;;  %v18267_v1 = vmul.f32 %v13641_v15, %v9492_v38 }
 0x649   :  { %v18265_v36 = vpop.xlane.xlu1 %8936 }
 0x64a   :  { %v18260_v8 = vpop.xlane.xlu0 %9173  ;;  %19259 = vst [vmem:[#allocation71_spill] sm:$0xff] %v18265_v36  ;;  %v8953_v36 = vsel %vm8814_vm0, %v18072_v26, 0.0 }
 0x64b   :  { %19258 = vst [vmem:[#allocation70_spill] sm:$0xff] %v18260_v8  ;;  %10032 = vperm.xlu1 %11829, %v9682_v20  }
 0x64d   :  { %v18275_v8 = vpop.xlane.xlu1 %9176 }
 0x64e   :  { %v18269_v34 = vpop.xlane.xlu0 %8939  ;;  %19260 = vst [vmem:[#allocation72_spill] sm:$0xff] %v18275_v8 }
 0x64f   :  { %9754 = vperm.xlu1 %11829, %v18267_v1  }
 0x650   :  { %9749 = vperm.xlu0 %11828, %v9539_v33   ;;  %v18287_v33 = vmul.f32 0.020408163, %v18042_v11  ;;  %v18302_v11 = vmul.f32 0.020408163, %v18057_v53 }
 0x651   :  { %v9730_v63 = vpop.permute.xlu1 %9729 }
 0x652   :  { %v18277_v17 = vpop.xlane.xlu0 %9179  ;;  %v9967_v21 = vmul.f32 %v17683_v39, %v9730_v63  ;;  %v9253_v39 = vmul.f32 %v18287_v33, %v18287_v33  ;;  %v9254_v63 = vmul.f32 %v18290_v62, %v18290_v62  ;;  %v9255_v3 = vmul.f32 %v18302_v11, %v18302_v11 }
 0x653   :  { %19261 = vst [vmem:[#allocation73_spill] sm:$0xff] %v18277_v17  ;;  %v8956_v17 = vsel %vm8814_vm0, %v18079_v0, 0.0 }
 0x654   :  { %10037 = vperm.xlu0 %11828, %v9683_v12   ;;  %v9206_v12 = vmul.f32 0.020408163, %v18059_v10  ;;  %v9208_v10 = vmul.f32 0.020408163, %v18076_v24 }
 0x659   :  { %v18279_v20 = vpop.permute.xlu0 %9734 }
 0x65d   :  { %v10018_v15 = vpop.permute.xlu0 %10017 }
 0x65e   :  { %v10255_v38 = vadd.f32 %v10018_v15, %v9967_v21  ;;  %v9301_v21 = vsub.f32 %v9205_v4, %v9253_v39  ;;  %v9302_v15 = vsub.f32 %v9206_v12, %v9254_v63  ;;  %v9054_v4 = vmul.f32 %v18079_v0, %v18079_v0 }
 0x65f   :  { %v9303_v63 = vsub.f32 %v9207_v19, %v9255_v3 }
 0x660   :  { %10303 = vst.msk [vmem:[%s19102_s5] sm:$0xff] %vm8814_vm0, %v10255_v38  ;;  %v18299_v38 = vmul.f32 0.020408163, %v18069_v31  ;;  %v9349_v49 = vmax.f32 %v9301_v21, 0.0  ;;  %v9350_v8 = vmax.f32 %v9302_v15, 0.0  ;;  %v9053_v31 = vmul.f32 %v18072_v26, %v18072_v26 }
 0x661   :  { %v18319_v21 = vmul.f32 0.020408163, %v18086_v37  ;;  %v9196_v15 = vsel %vm8814_vm0, %v9054_v4, 0.0  ;;  %v18324_v26 = vmul.f32 0.020408163, %v18074_v60 }
 0x662   :  { %v9256_v53 = vmul.f32 %v18299_v38, %v18299_v38  ;;  %v9397_v24 = vadd.f32 1e-05, %v9349_v49  ;;  %v9398_v12 = vadd.f32 1e-05, %v9350_v8  ;;  %v9193_v0 = vsel %vm8814_vm0, %v9053_v31, 0.0 }
 0x663   :  { %v9351_v8 = vmax.f32 %v9303_v63, 0.0  ;;  %v9209_v49 = vmul.f32 0.020408163, %v18081_v46  ;;  %v9258_v37 = vmul.f32 %v18319_v21, %v18319_v21  ;;  %v9257_v19 = vmul.f32 %v18324_v26, %v18324_v26 }
 0x664   :  { %v9304_v39 = vsub.f32 %v9208_v10, %v9256_v53  ;;  %13642 = vrsqrt.f32 %v9398_v12  ;;  %v18333_v60 = vmul.f32 0.020408163, %v18098_v35  ;;  %v9212_v46 = vmul.f32 0.020408163, %v18102_v22  ;;  %v9494_v22 = vld [vmem:[%s19100_s3 + $0x38] sm:$0xff] }
 0x665   :  { %13644 = vrsqrt.f32 %v9397_v24  ;;  %v9305_v31 = vsub.f32 %v9209_v49, %v9257_v19  ;;  %v9211_v24 = vmul.f32 0.020408163, %v18096_v57 }
 0x666   :  { %v9260_v35 = vmul.f32 %v18333_v60, %v18333_v60 }
 0x667   :  { %v9353_v3 = vmax.f32 %v9305_v31, 0.0 }
 0x66e   :  { %v13643_v63 = vpop.eup %13642 }
 0x66f   :  { %v9542_v19 = vmul.f32 %v13643_v63, %v9494_v22  ;;  %v9589_v22 = vld [vmem:[%s19101_s4 + $0x30] sm:$0xff] }
 0x673   :  { %8957 = vadd.xlane.f32.xlu0 %v8956_v17  ;;  %8954 = vadd.xlane.f32.xlu1 %v8953_v36  ;;  %v9210_v36 = vmul.f32 0.020408163, %v18094_v28  ;;  %v9352_v17 = vmax.f32 %v9304_v39, 0.0  ;;  %v18336_v28 = vmul.f32 0.020408163, %v18089_v6  ;;  %v9636_v39 = vmul.f32 %v18267_v1, %v18212_v55  ;;  %v9588_v6 = vld [vmem:[%s19101_s4 + $0x28] sm:$0xff] }
 0x674   :  { %v9493_v55 = vld [vmem:[%s19100_s3 + $0x30] sm:$0xff]  ;;  %v9308_v1 = vsub.f32 %v9212_v46, %v9260_v35  ;;  %v9968_v46 = vmul.f32 %v17686_v14, %v18279_v20  ;;  %v9496_v14 = vld [vmem:[%s19100_s3 + $0x48] sm:$0xff] }
 0x675   :  { %v9306_v10 = vsub.f32 %v9210_v36, %v9258_v37  ;;  %v9400_v4 = vadd.f32 1e-05, %v9352_v17  ;;  %v9259_v57 = vmul.f32 %v18336_v28, %v18336_v28  ;;  %v9401_v17 = vadd.f32 1e-05, %v9353_v3 }
 0x676   :  { %v9684_v37 = vsub.f32 %v9588_v6, %v9636_v39  ;;  %v9356_v31 = vmax.f32 %v9308_v1, 0.0  ;;  %v9590_v6 = vld [vmem:[%s19101_s4 + $0x38] sm:$0xff] }
 0x677   :  { %9197 = vadd.xlane.f32.xlu0 %v9196_v15  ;;  %9194 = vadd.xlane.f32.xlu1 %v9193_v0  ;;  %v9399_v0 = vadd.f32 1e-05, %v9351_v8  ;;  %v9354_v53 = vmax.f32 %v9306_v10, 0.0  ;;  %13646 = vrsqrt.f32 %v9400_v4  ;;  %v13645_v15 = vpop.eup %13644  ;;  %v9307_v8 = vsub.f32 %v9211_v24, %v9259_v57 }
 0x678   :  { %v18360_v10 = vmul.f32 0.020408163, %v18106_v54  ;;  %v9541_v4 = vmul.f32 %v13645_v15, %v9493_v55  ;;  %v9213_v24 = vmul.f32 0.020408163, %v18104_v23  ;;  %v9638_v54 = vmul.f32 %v9542_v19, %v18290_v62  ;;  %v9495_v15 = vld [vmem:[%s19100_s3 + $0x40] sm:$0xff] }
 0x679   :  { %13648 = vrsqrt.f32 %v9399_v0  ;;  %v9402_v36 = vadd.f32 1e-05, %v9354_v53  ;;  %v18363_v0 = vmul.f32 0.020408163, %v18100_v13  ;;  %v9214_v53 = vmul.f32 0.020408163, %v18110_v16 }
 0x67a   :  { %v9355_v3 = vmax.f32 %v9307_v8, 0.0  ;;  %v9262_v35 = vmul.f32 %v18360_v10, %v18360_v10  ;;  %v9637_v16 = vmul.f32 %v9541_v4, %v18287_v33  ;;  %v9404_v33 = vadd.f32 1e-05, %v9356_v31 }
 0x67b   :  { %13650 = vrsqrt.f32 %v9402_v36  ;;  %v9261_v23 = vmul.f32 %v18363_v0, %v18363_v0  ;;  %v9686_v1 = vsub.f32 %v9590_v6, %v9638_v54  ;;  %v18394_v8 = vmul.f32 0.020408163, %v18115_v51  ;;  %v9497_v6 = vld [vmem:[%s19100_s3 + $0x50] sm:$0xff] }
 0x67c   :  { %13652 = vrsqrt.f32 %v9401_v17  ;;  %v9310_v57 = vsub.f32 %v9214_v53, %v9262_v35  ;;  %v9403_v36 = vadd.f32 1e-05, %v9355_v3  ;;  %v9216_v53 = vmul.f32 0.020408163, %v18123_v32  ;;  %v9592_v32 = vld [vmem:[%s19101_s4 + $0x48] sm:$0xff] }
 0x67d   :  { %v9309_v55 = vsub.f32 %v9213_v24, %v9261_v23  ;;  %13654 = vrsqrt.f32 %v9404_v33  ;;  %v9215_v3 = vmul.f32 0.020408163, %v18113_v56 }
 0x67e   :  { %v9358_v31 = vmax.f32 %v9310_v57, 0.0  ;;  %13656 = vrsqrt.f32 %v9403_v36  ;;  %v18423_v57 = vmul.f32 0.020408163, %v18134_v40 }
 0x681   :  { %v13647_v63 = vpop.eup %13646 }
 0x682   :  { %v18340_v12 = vpop.xlane.xlu1 %8942  ;;  %v9544_v17 = vmul.f32 %v13647_v63, %v9496_v14  ;;  %v9264_v63 = vmul.f32 %v18394_v8, %v18394_v8 }
 0x683   :  { %v13649_v20 = vpop.eup %13648 }
 0x684   :  { %v9640_v51 = vmul.f32 %v9544_v17, %v18299_v38  ;;  %v9591_v38 = vld [vmem:[%s19101_s4 + $0x40] sm:$0xff]  ;;  %v9312_v14 = vsub.f32 %v9216_v53, %v9264_v63 }
 0x686   :  { %v18357_v49 = vpop.xlane.xlu1 %9182  ;;  %v9688_v33 = vsub.f32 %v9592_v32, %v9640_v51 }
 0x688   :  { %10042 = vperm.xlu1 %11829, %v9684_v37   ;;  %v9685_v37 = vsub.f32 %v9589_v22, %v9637_v16  ;;  %v9406_v16 = vadd.f32 1e-05, %v9358_v31  ;;  %v9217_v31 = vmul.f32 0.020408163, %v18132_v2  ;;  %v9593_v2 = vld [vmem:[%s19101_s4 + $0x50] sm:$0xff] }
 0x68a   :  { %v10023_v39 = vpop.permute.xlu1 %10022  ;;  %v18381_v62 = vpop.xlane.xlu0 %8945  ;;  %13658 = vrsqrt.f32 %v9406_v16  ;;  %v9219_v16 = vmul.f32 0.020408163, %v18145_v27  ;;  %v9596_v27 = vld [vmem:[%s19101_s4 + $0x68] sm:$0xff] }
 0x68b   :  { %v10256_v13 = vadd.f32 %v10023_v39, %v9968_v46  ;;  %v18397_v46 = vmul.f32 0.020408163, %v18108_v7  ;;  %v13651_v39 = vpop.eup %13650  ;;  %v9498_v7 = vld [vmem:[%s19100_s3 + $0x58] sm:$0xff] }
 0x68c   :  { %9764 = vperm.xlu1 %11829, %v9542_v19   ;;  %v9543_v19 = vmul.f32 %v13649_v20, %v9495_v15  ;;  %v9546_v23 = vmul.f32 %v13651_v39, %v9498_v7 }
 0x68d   :  { %10304 = vst.msk [vmem:[%s19102_s5 + $0x8] sm:$0xff] %vm8814_vm0, %v10256_v13  ;;  %9759 = vperm.xlu0 %11828, %v9541_v4   ;;  %v9357_v4 = vmax.f32 %v9309_v55, 0.0  ;;  %v13653_v13 = vpop.eup %13652  ;;  %v9263_v56 = vmul.f32 %v18397_v46, %v18397_v46 }
 0x68e   :  { %v9740_v24 = vpop.permute.xlu1 %9739  ;;  %v18401_v54 = vpop.xlane.xlu0 %9185  ;;  %v9639_v35 = vmul.f32 %v9543_v19, %v18302_v11  ;;  %v9642_v40 = vmul.f32 %v9546_v23, %v18319_v21 }
 0x68f   :  { %v9969_v20 = vmul.f32 %v17698_v59, %v9740_v24  ;;  %v9405_v11 = vadd.f32 1e-05, %v9357_v4  ;;  %v9311_v22 = vsub.f32 %v9215_v3, %v9263_v56  ;;  %v9218_v59 = vmul.f32 0.020408163, %v18139_v61  ;;  %v13655_v53 = vpop.eup %13654  ;;  %v9500_v4 = vld [vmem:[%s19100_s3 + $0x68] sm:$0xff]  ;;  %v9499_v24 = vld [vmem:[%s19100_s3 + $0x60] sm:$0xff] }
 0x690   :  { %10052 = vperm.xlu1 %11829, %v9686_v1   ;;  %v9687_v55 = vsub.f32 %v9591_v38, %v9639_v35  ;;  %v9545_v1 = vmul.f32 %v13653_v13, %v9497_v6  ;;  %v9266_v61 = vmul.f32 %v18423_v57, %v18423_v57  ;;  %v13657_v3 = vpop.eup %13656  ;;  %v18453_v35 = vmul.f32 0.020408163, %v18137_v42 }
 0x691   :  { %10047 = vperm.xlu0 %11828, %v9685_v37   ;;  %v9360_v37 = vmax.f32 %v9312_v14, 0.0  ;;  %13660 = vrsqrt.f32 %v9405_v11  ;;  %v9548_v13 = vmul.f32 %v13655_v53, %v9500_v4  ;;  %v18456_v56 = vmul.f32 0.020408163, %v18147_v45 }
 0x692   :  { %v9641_v39 = vmul.f32 %v9545_v1, %v18324_v26  ;;  %v9314_v7 = vsub.f32 %v9218_v59, %v9266_v61  ;;  %v9547_v6 = vmul.f32 %v13657_v3, %v9499_v24  ;;  %v9267_v42 = vmul.f32 %v18453_v35, %v18453_v35 }
 0x693   :  { %v9408_v51 = vadd.f32 1e-05, %v9360_v37  ;;  %v9644_v11 = vmul.f32 %v9548_v13, %v18333_v60  ;;  %v9268_v45 = vmul.f32 %v18456_v56, %v18456_v56  ;;  %v9595_v60 = vld [vmem:[%s19101_s4 + $0x60] sm:$0xff]  ;;  %v9221_v3 = vmul.f32 0.020408163, %v18155_v48  ;;  %v9504_v48 = vld [vmem:[%s19100_s3 + $0x88] sm:$0xff] }
 0x694   :  { %9774 = vperm.xlu1 %11829, %v9544_v17   ;;  %v18426_v17 = vmul.f32 0.020408163, %v18121_v30  ;;  %v9594_v30 = vld [vmem:[%s19101_s4 + $0x58] sm:$0xff]  ;;  %v9689_v38 = vsub.f32 %v9593_v2, %v9641_v39  ;;  %v9362_v14 = vmax.f32 %v9314_v7, 0.0  ;;  %v9222_v39 = vmul.f32 0.020408163, %v18167_v5 }
 0x695   :  { %9769 = vperm.xlu0 %11828, %v9543_v19   ;;  %v9359_v19 = vmax.f32 %v9311_v22, 0.0  ;;  %v9690_v26 = vsub.f32 %v9594_v30, %v9642_v40  ;;  %13662 = vrsqrt.f32 %v9408_v51  ;;  %v13659_v22 = vpop.eup %13658  ;;  %v9692_v40 = vsub.f32 %v9596_v27, %v9644_v11  ;;  %v9598_v5 = vld [vmem:[%s19101_s4 + $0x78] sm:$0xff] }
 0x696   :  { %v10028_v15 = vpop.permute.xlu0 %10027  ;;  %v9265_v21 = vmul.f32 %v18426_v17, %v18426_v17  ;;  %v19262_v11 = vld [vmem:[#allocation49_spill] sm:$0xff] }
 0x697   :  { %v10257_v36 = vadd.f32 %v10028_v15, %v9969_v20  ;;  %v9407_v63 = vadd.f32 1e-05, %v9359_v19  ;;  %v9220_v20 = vmul.f32 0.020408163, %v18152_v18  ;;  %v9643_v15 = vmul.f32 %v9547_v6, %v18336_v28  ;;  %v9502_v18 = vld [vmem:[%s19100_s3 + $0x78] sm:$0xff] }
 0x698   :  { %10062 = vperm.xlu1 %11829, %v9688_v33   ;;  %v9313_v32 = vsub.f32 %v9217_v31, %v9265_v21  ;;  %v18479_v28 = vmul.f32 0.020408163, %v18160_v9  ;;  %v9550_v19 = vmul.f32 %v13659_v22, %v9502_v18  ;;  %v18482_v31 = vmul.f32 0.020408163, %v18150_v58 }
 0x699   :  { %10305 = vst.msk [vmem:[%s19102_s5 + $0x10] sm:$0xff] %vm8814_vm0, %v10257_v36  ;;  %10057 = vperm.xlu0 %11828, %v9687_v55   ;;  %13664 = vrsqrt.f32 %v9407_v63  ;;  %v9315_v36 = vsub.f32 %v9219_v16, %v9267_v42  ;;  %v9501_v55 = vld [vmem:[%s19100_s3 + $0x70] sm:$0xff]  ;;  %v9316_v37 = vsub.f32 %v9220_v20, %v9268_v45  ;;  %v9691_v30 = vsub.f32 %v9595_v60, %v9643_v15  ;;  %v9503_v63 = vld [vmem:[%s19100_s3 + $0x80] sm:$0xff]  ;;  %v19263_v45 = vld [vmem:[#allocation47_spill] sm:$0xff] }
 0x69a   :  { %v9270_v9 = vmul.f32 %v18479_v28, %v18479_v28  ;;  %v9646_v21 = vmul.f32 %v9550_v19, %v18360_v10  ;;  %v9269_v58 = vmul.f32 %v18482_v31, %v18482_v31  ;;  %v9597_v10 = vld [vmem:[%s19101_s4 + $0x70] sm:$0xff]  ;;  %v18508_v20 = vmul.f32 0.020408163, %v18162_v41  ;;  %v9600_v41 = vld [vmem:[%s19101_s4 + $0x88] sm:$0xff] }
 0x69b   :  { %v13661_v33 = vpop.eup %13660  ;;  %v9363_v61 = vmax.f32 %v9315_v36, 0.0  ;;  %v9364_v4 = vmax.f32 %v9316_v37, 0.0  ;;  %v9224_v22 = vmul.f32 0.020408163, %v19262_v11  ;;  %v9223_v27 = vmul.f32 0.020408163, %v19263_v45 }
 0x69c   :  { %9784 = vperm.xlu1 %11829, %v9546_v23   ;;  %v9361_v23 = vmax.f32 %v9313_v32, 0.0  ;;  %v9549_v53 = vmul.f32 %v13661_v33, %v9501_v55  ;;  %v9506_v36 = vld [vmem:[%s19100_s3 + $0x98] sm:$0xff]  ;;  %v9271_v55 = vmul.f32 %v18508_v20, %v18508_v20  ;;  %v9505_v37 = vld [vmem:[%s19100_s3 + $0x90] sm:$0xff] }
 0x69d   :  { %9779 = vperm.xlu0 %11828, %v9545_v1   ;;  %v9410_v1 = vadd.f32 1e-05, %v9362_v14  ;;  %v9411_v7 = vadd.f32 1e-05, %v9363_v61  ;;  %v9412_v32 = vadd.f32 1e-05, %v9364_v4 }
 0x69e   :  { %v9409_v59 = vadd.f32 1e-05, %v9361_v23  ;;  %v9645_v24 = vmul.f32 %v9549_v53, %v18363_v0  ;;  %v9694_v0 = vsub.f32 %v9598_v5, %v9646_v21  ;;  %v19264_v61 = vld [vmem:[#allocation48_spill] sm:$0xff] }
 0x69f   :  { %13666 = vrsqrt.f32 %v9410_v1  ;;  %v13663_v2 = vpop.eup %13662  ;;  %v19265_v4 = vld [vmem:[#allocation52_spill] sm:$0xff] }
 0x6a0   :  { %10072 = vperm.xlu1 %11829, %v9690_v26   ;;  %13668 = vrsqrt.f32 %v9409_v59  ;;  %v9318_v26 = vsub.f32 %v9222_v39, %v9270_v9  ;;  %v9693_v16 = vsub.f32 %v9597_v10, %v9645_v24  ;;  %v18534_v39 = vmul.f32 0.020408163, %v19264_v61  ;;  %v19267_v10 = vld [vmem:[#allocation51_spill] sm:$0xff] }
 0x6a1   :  { %10067 = vperm.xlu0 %11828, %v9689_v38   ;;  %v9552_v38 = vmul.f32 %v13663_v2, %v9504_v48  ;;  %13670 = vrsqrt.f32 %v9411_v7 }
 0x6a2   :  { %v9366_v23 = vmax.f32 %v9318_v26, 0.0  ;;  %13672 = vrsqrt.f32 %v9412_v32  ;;  %v9273_v26 = vmul.f32 %v18534_v39, %v18534_v39 }
 0x6a3   :  { %v13665_v51 = vpop.eup %13664  ;;  %v9648_v15 = vmul.f32 %v9552_v38, %v18394_v8  ;;  %v9599_v8 = vld [vmem:[%s19101_s4 + $0x80] sm:$0xff] }
 0x6a4   :  { %9794 = vperm.xlu1 %11829, %v9548_v13   ;;  %v9317_v13 = vsub.f32 %v9221_v3, %v9269_v58  ;;  %v9551_v14 = vmul.f32 %v13665_v51, %v9503_v63  ;;  %v9414_v1 = vadd.f32 1e-05, %v9366_v23  ;;  %v9226_v3 = vmul.f32 0.020408163, %v19265_v4  ;;  %v19266_v58 = vld [vmem:[#allocation50_spill] sm:$0xff] }
 0x6a5   :  { %9789 = vperm.xlu0 %11828, %v9547_v6   ;;  %v18505_v6 = vmul.f32 0.020408163, %v18174_v52  ;;  %v9225_v5 = vmul.f32 0.020408163, %v19266_v58  ;;  %v18544_v63 = vmul.f32 0.020408163, %v19267_v10 }
 0x6a6   :  { %v9365_v42 = vmax.f32 %v9317_v13, 0.0  ;;  %v9647_v33 = vmul.f32 %v9551_v14, %v18397_v46  ;;  %13674 = vrsqrt.f32 %v9414_v1  ;;  %v9602_v13 = vld [vmem:[%s19101_s4 + $0x98] sm:$0xff] }
 0x6a7   :  { %v9272_v52 = vmul.f32 %v18505_v6, %v18505_v6  ;;  %v9321_v23 = vsub.f32 %v9225_v5, %v9273_v26  ;;  %v19271_v26 = vld [vmem:[#allocation55_spill] sm:$0xff] }
 0x6a8   :  { %10082 = vperm.xlu1 %11829, %v9692_v40   ;;  %v9413_v59 = vadd.f32 1e-05, %v9365_v42  ;;  %v18531_v40 = vmul.f32 0.020408163, %v18185_v25  ;;  %v9695_v9 = vsub.f32 %v9599_v8, %v9647_v33  ;;  %v19268_v42 = vld [vmem:[#allocation53_spill] sm:$0xff]  ;;  %v19270_v33 = vld [vmem:[#allocation56_spill] sm:$0xff] }
 0x6a9   :  { %10077 = vperm.xlu0 %11828, %v9691_v30   ;;  %v13667_v18 = vpop.eup %13666  ;;  %v9320_v46 = vsub.f32 %v9224_v22, %v9272_v52  ;;  %v9696_v30 = vsub.f32 %v9600_v41, %v9648_v15  ;;  %v9227_v11 = vmul.f32 0.020408163, %v19268_v42  ;;  %v19269_v22 = vld [vmem:[#allocation54_spill] sm:$0xff]  ;;  %v9275_v52 = vmul.f32 %v18544_v63, %v18544_v63 }
 0x6aa   :  { %v13669_v60 = vpop.eup %13668  ;;  %13676 = vrsqrt.f32 %v9413_v59  ;;  %v9274_v25 = vmul.f32 %v18531_v40, %v18531_v40  ;;  %v18561_v45 = vmul.f32 0.020408163, %v19269_v22  ;;  %v9369_v1 = vmax.f32 %v9321_v23, 0.0  ;;  %v19273_v22 = vld [vmem:[#allocation60_spill] sm:$0xff] }
 0x6ab   :  { %v9553_v21 = vmul.f32 %v13669_v60, %v9505_v37  ;;  %v9368_v2 = vmax.f32 %v9320_v46, 0.0  ;;  %v13671_v24 = vpop.eup %13670  ;;  %v9745_v60 = vpop.permute.xlu1 %9744  ;;  %v9323_v8 = vsub.f32 %v9227_v11, %v9275_v52  ;;  %v18587_v10 = vmul.f32 0.020408163, %v19271_v26  ;;  %v19275_v52 = vld [vmem:[#allocation2_spill] sm:$0xff] }
 0x6ac   :  { %9804 = vperm.xlu1 %11829, %v9550_v19   ;;  %v9319_v19 = vsub.f32 %v9223_v27, %v9271_v55  ;;  %v13673_v7 = vpop.eup %13672  ;;  %v9322_v32 = vsub.f32 %v9226_v3, %v9274_v25  ;;  %v9276_v37 = vmul.f32 %v18561_v45, %v18561_v45  ;;  %v9417_v5 = vadd.f32 1e-05, %v9369_v1 }
 0x6ad   :  { %9799 = vperm.xlu0 %11828, %v9549_v53   ;;  %v9554_v53 = vmul.f32 %v13667_v18, %v9506_v36  ;;  %v9228_v36 = vmul.f32 0.020408163, %v19270_v33  ;;  %v9371_v25 = vmax.f32 %v9323_v8, 0.0 }
 0x6ae   :  { %v9367_v48 = vmax.f32 %v9319_v19, 0.0  ;;  %v9370_v41 = vmax.f32 %v9322_v32, 0.0 }
 0x6af   :  { %v9650_v51 = vmul.f32 %v9554_v53, %v18423_v57  ;;  %v9507_v57 = vld [vmem:[%s19100_s3 + $0xa0] sm:$0xff]  ;;  %v9324_v4 = vsub.f32 %v9228_v36, %v9276_v37  ;;  %v9419_v11 = vadd.f32 1e-05, %v9371_v25 }
 0x6b0   :  { %10092 = vperm.xlu1 %11829, %v9694_v0   ;;  %v9649_v0 = vmul.f32 %v9553_v21, %v18426_v17  ;;  %v9415_v17 = vadd.f32 1e-05, %v9367_v48  ;;  %v9555_v18 = vmul.f32 %v13671_v24, %v9507_v57  ;;  %v13675_v59 = vpop.eup %13674  ;;  %v9418_v61 = vadd.f32 1e-05, %v9370_v41  ;;  %v19276_v25 = vld [vmem:[#allocation62_spill] sm:$0xff] }
 0x6b1   :  { %10087 = vperm.xlu0 %11828, %v9693_v16   ;;  %v9601_v16 = vld [vmem:[%s19101_s4 + $0x90] sm:$0xff]  ;;  %v9698_v27 = vsub.f32 %v9602_v13, %v9650_v51  ;;  %v9372_v32 = vmax.f32 %v9324_v4, 0.0  ;;  %v19272_v13 = vld [vmem:[#allocation58_spill] sm:$0xff]  ;;  %v9970_v41 = vmul.f32 %v19275_v52, %v9745_v60  ;;  %v9277_v60 = vmul.f32 %v18587_v10, %v18587_v10 }
 0x6b2   :  { %v9697_v55 = vsub.f32 %v9601_v16, %v9649_v0  ;;  %v9651_v19 = vmul.f32 %v9555_v18, %v18453_v35  ;;  %v9509_v35 = vld [vmem:[%s19100_s3 + $0xb0] sm:$0xff]  ;;  %v18590_v0 = vmul.f32 0.020408163, %v19272_v13 }
 0x6b3   :  { %v9420_v8 = vadd.f32 1e-05, %v9372_v32  ;;  %v9605_v4 = vld [vmem:[%s19101_s4 + $0xb0] sm:$0xff]  ;;  %v19277_v32 = vld [vmem:[#allocation59_spill] sm:$0xff] }
 0x6b4   :  { %9814 = vperm.xlu1 %11829, %v9552_v38   ;;  %v9508_v38 = vld [vmem:[%s19100_s3 + $0xa8] sm:$0xff]  ;;  %v9278_v37 = vmul.f32 %v18590_v0, %v18590_v0  ;;  %v18625_v13 = vmul.f32 0.020408163, %v19277_v32 }
 0x6b5   :  { %9809 = vperm.xlu0 %11828, %v9551_v14   ;;  %v9416_v14 = vadd.f32 1e-05, %v9368_v2  ;;  %v9556_v15 = vmul.f32 %v13673_v7, %v9508_v38  ;;  %v9603_v2 = vld [vmem:[%s19101_s4 + $0xa0] sm:$0xff] }
 0x6b6   :  { %v9699_v51 = vsub.f32 %v9603_v2, %v9651_v19 }
 0x6b7   :  { %13678 = vrsqrt.f32 %v9416_v14  ;;  %v9652_v46 = vmul.f32 %v9556_v15, %v18456_v56 }
 0x6b8   :  { %10102 = vperm.xlu1 %11829, %v9696_v30   ;;  %13680 = vrsqrt.f32 %v9415_v17  ;;  %v9510_v30 = vld [vmem:[%s19100_s3 + $0xb8] sm:$0xff]  ;;  %v9230_v17 = vmul.f32 0.020408163, %v19273_v22 }
 0x6b9   :  { %10097 = vperm.xlu0 %11828, %v9695_v9   ;;  %v9558_v24 = vmul.f32 %v13675_v59, %v9510_v30  ;;  %13682 = vrsqrt.f32 %v9418_v61 }
 0x6ba   :  { %13684 = vrsqrt.f32 %v9417_v5 }
 0x6bb   :  { %13686 = vrsqrt.f32 %v9419_v11  ;;  %v19280_v11 = vld [vmem:[#allocation3_spill] sm:$0xff] }
 0x6bc   :  { %9824 = vperm.xlu1 %11829, %v9554_v53   ;;  %v13677_v53 = vpop.eup %13676  ;;  %13688 = vrsqrt.f32 %v9420_v8 }
 0x6bd   :  { %9819 = vperm.xlu0 %11828, %v9553_v21   ;;  %v9604_v21 = vld [vmem:[%s19101_s4 + $0xa8] sm:$0xff]  ;;  %v9557_v7 = vmul.f32 %v13677_v53, %v9509_v35 }
 0x6be   :  { %v9700_v48 = vsub.f32 %v9604_v21, %v9652_v46 }
 0x6bf   :  { %v9653_v46 = vmul.f32 %v9557_v7, %v18482_v31  ;;  %v9511_v31 = vld [vmem:[%s19100_s3 + $0xc0] sm:$0xff] }
 0x6c0   :  { %10112 = vperm.xlu1 %11829, %v9698_v27   ;;  %v9654_v27 = vmul.f32 %v9558_v24, %v18479_v28  ;;  %v9512_v28 = vld [vmem:[%s19100_s3 + $0xc8] sm:$0xff] }
 0x6c1   :  { %10107 = vperm.xlu0 %11828, %v9697_v55   ;;  %v9606_v55 = vld [vmem:[%s19101_s4 + $0xb8] sm:$0xff]  ;;  %v13679_v1 = vpop.eup %13678 }
 0x6c2   :  { %v13681_v19 = vpop.eup %13680  ;;  %v9560_v5 = vmul.f32 %v13679_v1, %v9512_v28  ;;  %v9513_v1 = vld [vmem:[%s19100_s3 + $0xd0] sm:$0xff] }
 0x6c3   :  { %v8949_v3 = vpop.xlane.xlu1 %8948  ;;  %v8952_v9 = vpop.xlane.xlu0 %8951  ;;  %v9559_v26 = vmul.f32 %v13681_v19, %v9511_v31  ;;  %v9531_v31 = vld [vmem:[%s19100_s3 + $0x160] sm:$0xff] }
 0x6c4   :  { %v18582_v56 = vmul.f32 0.020408163, %v8949_v3  ;;  %v18584_v58 = vmul.f32 0.020408163, %v8952_v9  ;;  %9834 = vperm.xlu1 %11829, %v9556_v15   ;;  %v19274_v15 = vld [vmem:[#allocation57_spill] sm:$0xff]  ;;  %v9326_v3 = vsub.f32 %v9230_v17, %v9278_v37  ;;  %v9702_v9 = vsub.f32 %v9606_v55, %v9654_v27 }
 0x6c5   :  { %9829 = vperm.xlu0 %11828, %v9555_v18   ;;  %v9229_v18 = vmul.f32 0.020408163, %v19274_v15  ;;  %v9656_v17 = vmul.f32 %v9560_v5, %v18505_v6  ;;  %v9514_v27 = vld [vmem:[%s19100_s3 + $0xd8] sm:$0xff]  ;;  %v9607_v6 = vld [vmem:[%s19101_s4 + $0xc0] sm:$0xff] }
 0x6c6   :  { %v9291_v16 = vmul.f32 %v18582_v56, %v18582_v56  ;;  %v9292_v14 = vmul.f32 %v18584_v58, %v18584_v58 }
 0x6c7   :  { %v9189_v38 = vpop.xlane.xlu1 %9188  ;;  %v9192_v57 = vpop.xlane.xlu0 %9191  ;;  %v9325_v21 = vsub.f32 %v9229_v18, %v9277_v60  ;;  %v18653_v60 = vmul.f32 0.020408163, %v18233_v50  ;;  %v9532_v50 = vld [vmem:[%s19100_s3 + $0x168] sm:$0xff] }
 0x6c8   :  { %v9243_v23 = vmul.f32 0.020408163, %v9189_v38  ;;  %v9244_v42 = vmul.f32 0.020408163, %v9192_v57  ;;  %10122 = vperm.xlu1 %11829, %v9700_v48   ;;  %v9374_v38 = vmax.f32 %v9326_v3, 0.0  ;;  %v19278_v57 = vld [vmem:[#allocation64_spill] sm:$0xff] }
 0x6c9   :  { %10117 = vperm.xlu0 %11828, %v9699_v51   ;;  %v9701_v51 = vsub.f32 %v9605_v4, %v9653_v46 }
 0x6ca   :  { %v9339_v33 = vsub.f32 %v9243_v23, %v9291_v16  ;;  %v9340_v36 = vsub.f32 %v9244_v42, %v9292_v14  ;;  %v9232_v16 = vmul.f32 0.020408163, %v19278_v57  ;;  %v9373_v14 = vmax.f32 %v9325_v21, 0.0  ;;  %v19279_v23 = vld [vmem:[#allocation61_spill] sm:$0xff]  ;;  %v9609_v57 = vld [vmem:[%s19101_s4 + $0xd0] sm:$0xff] }
 0x6cb   :  { %v10033_v59 = vpop.permute.xlu1 %10032  ;;  %v9231_v42 = vmul.f32 0.020408163, %v19279_v23  ;;  %v9422_v8 = vadd.f32 1e-05, %v9374_v38  ;;  %v9234_v21 = vmul.f32 0.020408163, %v18239_v43  ;;  %v9282_v43 = vmul.f32 %v18653_v60, %v18653_v60 }
 0x6cc   :  { %v9387_v30 = vmax.f32 %v9339_v33, 0.0  ;;  %v9388_v53 = vmax.f32 %v9340_v36, 0.0  ;;  %v10258_v61 = vadd.f32 %v10033_v59, %v9970_v41  ;;  %9844 = vperm.xlu1 %11829, %v9558_v24   ;;  %v18622_v24 = vmul.f32 0.020408163, %v19276_v25  ;;  %v9608_v41 = vld [vmem:[%s19101_s4 + $0xc8] sm:$0xff]  ;;  %v19282_v25 = vld [vmem:[#allocation65_spill] sm:$0xff] }
 0x6cd   :  { %9839 = vperm.xlu0 %11828, %v9557_v7   ;;  %v13683_v7 = vpop.eup %13682  ;;  %v9655_v33 = vmul.f32 %v9559_v26, %v18508_v20  ;;  %v9279_v36 = vmul.f32 %v18625_v13, %v18625_v13  ;;  %v9421_v46 = vadd.f32 1e-05, %v9373_v14  ;;  %v9704_v20 = vsub.f32 %v9608_v41, %v9656_v17 }
 0x6ce   :  { %v9435_v2 = vadd.f32 1e-05, %v9387_v30  ;;  %v9436_v35 = vadd.f32 1e-05, %v9388_v53  ;;  %10306 = vst.msk [vmem:[%s19102_s5 + $0x18] sm:$0xff] %vm8814_vm0, %v10258_v61  ;;  %v13685_v15 = vpop.eup %13684  ;;  %v9280_v18 = vmul.f32 %v18622_v24, %v18622_v24  ;;  %v9562_v59 = vmul.f32 %v13683_v7, %v9514_v27  ;;  %v19281_v61 = vld [vmem:[#allocation63_spill] sm:$0xff] }
 0x6cf   :  { %v9750_v48 = vpop.permute.xlu0 %9749  ;;  %v9327_v28 = vsub.f32 %v9231_v42, %v9279_v36  ;;  %v13687_v19 = vpop.eup %13686  ;;  %v9703_v30 = vsub.f32 %v9607_v6, %v9655_v33  ;;  %v9561_v53 = vmul.f32 %v13685_v15, %v9513_v1  ;;  %v18656_v4 = vmul.f32 0.020408163, %v19281_v61  ;;  %v19283_v6 = vld [vmem:[#allocation66_spill] sm:$0xff] }
 0x6d0   :  { %13690 = vrsqrt.f32 %v9435_v2  ;;  %10132 = vperm.xlu1 %11829, %v9702_v9   ;;  %v9971_v22 = vmul.f32 %v19280_v11, %v9750_v48  ;;  %v9328_v37 = vsub.f32 %v9232_v16, %v9280_v18  ;;  %v13689_v3 = vpop.eup %13688  ;;  %v9658_v2 = vmul.f32 %v9562_v59, %v18531_v40  ;;  %v9516_v40 = vld [vmem:[%s19100_s3 + $0xe8] sm:$0xff]  ;;  %v9515_v16 = vld [vmem:[%s19100_s3 + $0xe0] sm:$0xff] }
 0x6d1   :  { %13692 = vrsqrt.f32 %v9436_v35  ;;  %10127 = vperm.xlu0 %11828, %v9701_v51   ;;  %v9233_v48 = vmul.f32 0.020408163, %v19282_v25  ;;  %v9610_v51 = vld [vmem:[%s19101_s4 + $0xd8] sm:$0xff]  ;;  %v9657_v32 = vmul.f32 %v9561_v53, %v18534_v39  ;;  %v9281_v38 = vmul.f32 %v18656_v4, %v18656_v4 }
 0x6d2   :  { %13694 = vrsqrt.f32 %v9422_v8  ;;  %v9376_v9 = vmax.f32 %v9328_v37, 0.0  ;;  %v9330_v23 = vsub.f32 %v9234_v21, %v9282_v43  ;;  %v9706_v42 = vsub.f32 %v9610_v51, %v9658_v2  ;;  %v19285_v2 = vld [vmem:[#allocation67_spill] sm:$0xff]  ;;  %v19287_v51 = vld [vmem:[#allocation69_spill] sm:$0xff] }
 0x6d3   :  { %v10038_v52 = vpop.permute.xlu0 %10037  ;;  %13696 = vrsqrt.f32 %v9421_v46  ;;  %v9329_v17 = vsub.f32 %v9233_v48, %v9281_v38  ;;  %v9564_v27 = vmul.f32 %v13689_v3, %v9516_v40  ;;  %v18697_v18 = vmul.f32 0.020408163, %v18243_v44  ;;  %v9614_v38 = vld [vmem:[%s19101_s4 + $0xf8] sm:$0xff] }
 0x6d4   :  { %v10259_v55 = vadd.f32 %v10038_v52, %v9971_v22  ;;  %9854 = vperm.xlu1 %11829, %v9560_v5   ;;  %v9375_v5 = vmax.f32 %v9327_v28, 0.0  ;;  %v9424_v39 = vadd.f32 1e-05, %v9376_v9  ;;  %v9705_v52 = vsub.f32 %v9609_v57, %v9657_v32  ;;  %v9517_v28 = vld [vmem:[%s19100_s3 + $0xf0] sm:$0xff] }
 0x6d5   :  { %9849 = vperm.xlu0 %11828, %v9559_v26   ;;  %v9563_v41 = vmul.f32 %v13687_v19, %v9515_v16  ;;  %v18700_v33 = vmul.f32 0.020408163, %v18235_v29  ;;  %v9378_v36 = vmax.f32 %v9330_v23, 0.0  ;;  %v9235_v1 = vmul.f32 0.020408163, %v19283_v6  ;;  %v9612_v29 = vld [vmem:[%s19101_s4 + $0xe8] sm:$0xff] }
 0x6d6   :  { %10307 = vst.msk [vmem:[%s19102_s5 + $0x20] sm:$0xff] %vm8814_vm0, %v10259_v55  ;;  %v9423_v22 = vadd.f32 1e-05, %v9375_v5  ;;  %13698 = vrsqrt.f32 %v9424_v39  ;;  %v9377_v55 = vmax.f32 %v9329_v17, 0.0  ;;  %v9284_v44 = vmul.f32 %v18697_v18, %v18697_v18  ;;  %v19286_v5 = vld [vmem:[#allocation70_spill] sm:$0xff]  ;;  %v9520_v16 = vld [vmem:[%s19100_s3 + $0x108] sm:$0xff] }
 0x6d7   :  { %v9659_v37 = vmul.f32 %v9563_v41, %v18544_v63  ;;  %v9283_v46 = vmul.f32 %v18700_v33, %v18700_v33  ;;  %v9238_v25 = vmul.f32 0.020408163, %v19286_v5  ;;  %v19288_v6 = vld [vmem:[#allocation71_spill] sm:$0xff] }
 0x6d8   :  { %10142 = vperm.xlu1 %11829, %v9704_v20   ;;  %13700 = vrsqrt.f32 %v9423_v22  ;;  %v9426_v20 = vadd.f32 1e-05, %v9378_v36  ;;  %v9425_v63 = vadd.f32 1e-05, %v9377_v55  ;;  %v18749_v36 = vmul.f32 0.020408163, %v18269_v34 }
 0x6d9   :  { %10137 = vperm.xlu0 %11828, %v9703_v30   ;;  %v9331_v30 = vsub.f32 %v9235_v1, %v9283_v46  ;;  %v18752_v1 = vmul.f32 0.020408163, %v19288_v6 }
 0x6da   :  { %v13691_v35 = vpop.eup %13690  ;;  %13702 = vrsqrt.f32 %v9426_v20  ;;  %v9288_v34 = vmul.f32 %v18749_v36, %v18749_v36  ;;  %v9522_v20 = vld [vmem:[%s19100_s3 + $0x118] sm:$0xff] }
 0x6db   :  { %v13693_v26 = vpop.eup %13692  ;;  %v18676_v7 = vmul.f32 %v13691_v35, %v9531_v31  ;;  %v19284_v31 = vld [vmem:[#allocation68_spill] sm:$0xff]  ;;  %13704 = vrsqrt.f32 %v9425_v63  ;;  %v9379_v48 = vmax.f32 %v9331_v30, 0.0  ;;  %v9287_v63 = vmul.f32 %v18752_v1, %v18752_v1 }
 0x6dc   :  { %9864 = vperm.xlu1 %11829, %v9562_v59   ;;  %v18686_v14 = vmul.f32 %v13693_v26, %v9532_v50  ;;  %v13695_v8 = vpop.eup %13694  ;;  %v18723_v3 = vmul.f32 0.020408163, %v19284_v31  ;;  %v18726_v50 = vmul.f32 0.020408163, %v19285_v2  ;;  %v9237_v26 = vmul.f32 0.020408163, %v19287_v51 }
 0x6dd   :  { %9859 = vperm.xlu0 %11828, %v9561_v53   ;;  %v18690_v11 = vmul.f32 %v18676_v7, %v18582_v56  ;;  %v9236_v56 = vmul.f32 0.020408163, %v18247_v47  ;;  %v9518_v47 = vld [vmem:[%s19100_s3 + $0xf8] sm:$0xff]  ;;  %v13697_v59 = vpop.eup %13696  ;;  %v9521_v30 = vld [vmem:[%s19100_s3 + $0x110] sm:$0xff]  ;;  %v18775_v2 = vmul.f32 0.020408163, %v18381_v62 }
 0x6de   :  { %v18694_v15 = vmul.f32 %v18686_v14, %v18584_v58  ;;  %v9660_v58 = vmul.f32 %v9564_v27, %v18561_v45  ;;  %v9611_v45 = vld [vmem:[%s19101_s4 + $0xe0] sm:$0xff]  ;;  %v9566_v61 = vmul.f32 %v13695_v8, %v9518_v47  ;;  %v9565_v21 = vmul.f32 %v13697_v59, %v9517_v28  ;;  %v19289_v8 = vld [vmem:[#allocation73_spill] sm:$0xff] }
 0x6df   :  { %v9332_v19 = vsub.f32 %v9236_v56, %v9284_v44  ;;  %v9707_v9 = vsub.f32 %v9611_v45, %v9659_v37  ;;  %v9286_v40 = vmul.f32 %v18723_v3, %v18723_v3  ;;  %v9285_v23 = vmul.f32 %v18726_v50, %v18726_v50  ;;  %v19290_v37 = vld [vmem:[#allocation72_spill] sm:$0xff]  ;;  %v9616_v45 = vld [vmem:[%s19101_s4 + $0x108] sm:$0xff] }
 0x6e0   :  { %10152 = vperm.xlu1 %11829, %v9706_v42   ;;  %v9708_v53 = vsub.f32 %v9612_v29, %v9660_v58  ;;  %v9662_v43 = vmul.f32 %v9566_v61, %v18590_v0  ;;  %v13699_v32 = vpop.eup %13698  ;;  %v9661_v57 = vmul.f32 %v9565_v21, %v18587_v10  ;;  %v9613_v0 = vld [vmem:[%s19101_s4 + $0xf0] sm:$0xff]  ;;  %v9519_v42 = vld [vmem:[%s19100_s3 + $0x100] sm:$0xff]  ;;  %v9427_v10 = vadd.f32 1e-05, %v9379_v48 }
 0x6e1   :  { %10147 = vperm.xlu0 %11828, %v9705_v52   ;;  %v9380_v35 = vmax.f32 %v9332_v19, 0.0  ;;  %v9334_v17 = vsub.f32 %v9238_v25, %v9286_v40  ;;  %v9240_v44 = vmul.f32 0.020408163, %v19289_v8  ;;  %v9239_v47 = vmul.f32 0.020408163, %v19290_v37  ;;  %v9620_v8 = vld [vmem:[%s19101_s4 + $0x128] sm:$0xff] }
 0x6e2   :  { %v13701_v39 = vpop.eup %13700  ;;  %v9710_v52 = vsub.f32 %v9614_v38, %v9662_v43  ;;  %v9709_v56 = vsub.f32 %v9613_v0, %v9661_v57  ;;  %v18778_v25 = vmul.f32 0.020408163, %v18340_v12  ;;  %v9242_v51 = vmul.f32 0.020408163, %v18401_v54  ;;  %v9618_v12 = vld [vmem:[%s19101_s4 + $0x118] sm:$0xff]  ;;  %v9524_v54 = vld [vmem:[%s19100_s3 + $0x128] sm:$0xff] }
 0x6e3   :  { %v9428_v22 = vadd.f32 1e-05, %v9380_v35  ;;  %v9567_v55 = vmul.f32 %v13701_v39, %v9519_v42  ;;  %v9382_v58 = vmax.f32 %v9334_v17, 0.0  ;;  %v9335_v31 = vsub.f32 %v9239_v47, %v9287_v63  ;;  %v9523_v39 = vld [vmem:[%s19100_s3 + $0x120] sm:$0xff] }
 0x6e4   :  { %9874 = vperm.xlu1 %11829, %v9564_v27   ;;  %v9333_v27 = vsub.f32 %v9237_v26, %v9285_v23  ;;  %v13703_v46 = vpop.eup %13702  ;;  %v9241_v43 = vmul.f32 0.020408163, %v18357_v49  ;;  %v9290_v62 = vmul.f32 %v18775_v2, %v18775_v2  ;;  %v9289_v49 = vmul.f32 %v18778_v25, %v18778_v25 }
 0x6e5   :  { %9869 = vperm.xlu0 %11828, %v9563_v41   ;;  %v9568_v41 = vmul.f32 %v13699_v32, %v9520_v16  ;;  %13706 = vrsqrt.f32 %v9428_v22  ;;  %v9663_v28 = vmul.f32 %v9567_v55, %v18625_v13  ;;  %v13705_v19 = vpop.eup %13704  ;;  %v9383_v26 = vmax.f32 %v9335_v31, 0.0  ;;  %v9755_v16 = vpop.permute.xlu1 %9754 }
 0x6e6   :  { %13708 = vrsqrt.f32 %v9427_v10  ;;  %v9381_v29 = vmax.f32 %v9333_v27, 0.0  ;;  %v9569_v5 = vmul.f32 %v13705_v19, %v9521_v30  ;;  %v9337_v42 = vsub.f32 %v9241_v43, %v9289_v49  ;;  %v19292_v49 = vld [vmem:[#allocation6_spill] sm:$0xff] }
 0x6e7   :  { %v9664_v59 = vmul.f32 %v9568_v41, %v18622_v24  ;;  %v9615_v24 = vld [vmem:[%s19101_s4 + $0x100] sm:$0xff]  ;;  %v9431_v0 = vadd.f32 1e-05, %v9383_v26  ;;  %v9528_v26 = vld [vmem:[%s19100_s3 + $0x148] sm:$0xff] }
 0x6e8   :  { %10162 = vperm.xlu1 %11829, %v9708_v53   ;;  %v9430_v53 = vadd.f32 1e-05, %v9382_v58  ;;  %v9429_v13 = vadd.f32 1e-05, %v9381_v29  ;;  %v9711_v35 = vsub.f32 %v9615_v24, %v9663_v28  ;;  %v9665_v38 = vmul.f32 %v9569_v5, %v18656_v4  ;;  %v9526_v29 = vld [vmem:[%s19100_s3 + $0x138] sm:$0xff] }
 0x6e9   :  { %10157 = vperm.xlu0 %11828, %v9707_v9   ;;  %v9712_v9 = vsub.f32 %v9616_v45, %v9664_v59  ;;  %v9338_v4 = vsub.f32 %v9242_v51, %v9290_v62  ;;  %v9619_v59 = vld [vmem:[%s19101_s4 + $0x120] sm:$0xff]  ;;  %v9621_v62 = vld [vmem:[%s19101_s4 + $0x130] sm:$0xff] }
 0x6ea   :  { %13710 = vrsqrt.f32 %v9430_v53 }
 0x6eb   :  { %13712 = vrsqrt.f32 %v9429_v13 }
 0x6ec   :  { %9884 = vperm.xlu1 %11829, %v9566_v61   ;;  %v9336_v61 = vsub.f32 %v9240_v44, %v9288_v34 }
 0x6ed   :  { %9879 = vperm.xlu0 %11828, %v9565_v21   ;;  %v9570_v21 = vmul.f32 %v13703_v46, %v9522_v20  ;;  %v19291_v20 = vld [vmem:[#allocation4_spill] sm:$0xff] }
 0x6ee   :  { %v9384_v48 = vmax.f32 %v9336_v61, 0.0  ;;  %v9972_v19 = vmul.f32 %v19291_v20, %v9755_v16 }
 0x6ef   :  { %v9666_v32 = vmul.f32 %v9570_v21, %v18653_v60  ;;  %v13707_v40 = vpop.eup %13706  ;;  %v9617_v60 = vld [vmem:[%s19101_s4 + $0x110] sm:$0xff] }
 0x6f0   :  { %10172 = vperm.xlu1 %11829, %v9710_v52   ;;  %v13709_v57 = vpop.eup %13708  ;;  %v9432_v23 = vadd.f32 1e-05, %v9384_v48  ;;  %v9572_v17 = vmul.f32 %v13707_v40, %v9524_v54  ;;  %v9713_v10 = vsub.f32 %v9617_v60, %v9665_v38  ;;  %v9622_v48 = vld [vmem:[%s19101_s4 + $0x138] sm:$0xff] }
 0x6f1   :  { %10167 = vperm.xlu0 %11828, %v9709_v56   ;;  %v9714_v22 = vsub.f32 %v9618_v12, %v9666_v32  ;;  %v9571_v27 = vmul.f32 %v13709_v57, %v9523_v39  ;;  %v9386_v56 = vmax.f32 %v9338_v4, 0.0  ;;  %v9527_v12 = vld [vmem:[%s19100_s3 + $0x140] sm:$0xff]  ;;  %v19293_v60 = vld [vmem:[#allocation5_spill] sm:$0xff] }
 0x6f2   :  { %13714 = vrsqrt.f32 %v9432_v23  ;;  %v9668_v6 = vmul.f32 %v9572_v17, %v18697_v18  ;;  %v9525_v18 = vld [vmem:[%s19100_s3 + $0x130] sm:$0xff] }
 0x6f3   :  { %13716 = vrsqrt.f32 %v9431_v0  ;;  %v9667_v44 = vmul.f32 %v9571_v27, %v18700_v33  ;;  %v9434_v46 = vadd.f32 1e-05, %v9386_v56  ;;  %v9624_v56 = vld [vmem:[%s19101_s4 + $0x148] sm:$0xff] }
 0x6f4   :  { %9894 = vperm.xlu1 %11829, %v9568_v41   ;;  %v13711_v58 = vpop.eup %13710  ;;  %v9716_v33 = vsub.f32 %v9620_v8, %v9668_v6 }
 0x6f5   :  { %9889 = vperm.xlu0 %11828, %v9567_v55   ;;  %v9385_v55 = vmax.f32 %v9337_v42, 0.0  ;;  %v13713_v37 = vpop.eup %13712  ;;  %v9574_v28 = vmul.f32 %v13711_v58, %v9526_v29  ;;  %v9715_v24 = vsub.f32 %v9619_v59, %v9667_v44  ;;  %13718 = vrsqrt.f32 %v9434_v46  ;;  %v9623_v44 = vld [vmem:[%s19101_s4 + $0x140] sm:$0xff]  ;;  %v9529_v29 = vld [vmem:[%s19100_s3 + $0x150] sm:$0xff] }
 0x6f6   :  { %v9573_v30 = vmul.f32 %v13713_v37, %v9525_v18  ;;  %v19294_v18 = vld [vmem:[#allocation8_spill] sm:$0xff] }
 0x6f7   :  { %v9433_v34 = vadd.f32 1e-05, %v9385_v55 }
 0x6f8   :  { %10182 = vperm.xlu1 %11829, %v9712_v9   ;;  %v9669_v51 = vmul.f32 %v9573_v30, %v18726_v50 }
 0x6f9   :  { %10177 = vperm.xlu0 %11828, %v9711_v35   ;;  %13720 = vrsqrt.f32 %v9433_v34  ;;  %v19295_v34 = vld [vmem:[#allocation7_spill] sm:$0xff] }
 0x6fa   :  { %v9717_v23 = vsub.f32 %v9621_v62, %v9669_v51  ;;  %v19297_v51 = vld [vmem:[#allocation9_spill] sm:$0xff] }
 0x6fc   :  { %9904 = vperm.xlu1 %11829, %v9570_v21   ;;  %v9670_v21 = vmul.f32 %v9574_v28, %v18723_v3  ;;  %v13715_v35 = vpop.eup %13714 }
 0x6fd   :  { %9899 = vperm.xlu0 %11828, %v9569_v5   ;;  %v13717_v3 = vpop.eup %13716  ;;  %v9576_v57 = vmul.f32 %v13715_v35, %v9528_v26 }
 0x6fe   :  { %v9718_v54 = vsub.f32 %v9622_v48, %v9670_v21  ;;  %v9575_v4 = vmul.f32 %v13717_v3, %v9527_v12  ;;  %v9628_v12 = vld [vmem:[%s19101_s4 + $0x168] sm:$0xff] }
 0x700   :  { %v8955_v52 = vpop.xlane.xlu1 %8954  ;;  %10192 = vperm.xlu1 %11829, %v9714_v22   ;;  %v8958_v41 = vpop.xlane.xlu0 %8957  ;;  %v9671_v55 = vmul.f32 %v9575_v4, %v18752_v1 }
 0x701   :  { %10187 = vperm.xlu0 %11828, %v9713_v10   ;;  %v18815_v63 = vmul.f32 0.020408163, %v8958_v41  ;;  %v18817_v53 = vmul.f32 0.020408163, %v8955_v52  ;;  %v9672_v52 = vmul.f32 %v9576_v57, %v18749_v36  ;;  %v13719_v41 = vpop.eup %13718  ;;  %v9530_v36 = vld [vmem:[%s19100_s3 + $0x158] sm:$0xff] }
 0x702   :  { %v9578_v59 = vmul.f32 %v13719_v41, %v9530_v36  ;;  %v19300_v36 = vld [vmem:[#allocation14_spill] sm:$0xff] }
 0x703   :  { %v9294_v5 = vmul.f32 %v18815_v63, %v18815_v63  ;;  %v9293_v43 = vmul.f32 %v18817_v53, %v18817_v53  ;;  %v13721_v6 = vpop.eup %13720  ;;  %v9720_v1 = vsub.f32 %v9624_v56, %v9672_v52 }
 0x704   :  { %v9195_v47 = vpop.xlane.xlu1 %9194  ;;  %9914 = vperm.xlu1 %11829, %v9572_v17   ;;  %v9198_v45 = vpop.xlane.xlu0 %9197 }
 0x705   :  { %9909 = vperm.xlu0 %11828, %v9571_v27   ;;  %v9246_v13 = vmul.f32 0.020408163, %v9198_v45  ;;  %v9245_v9 = vmul.f32 0.020408163, %v9195_v47 }
 0x707   :  { %v9342_v50 = vsub.f32 %v9246_v13, %v9294_v5  ;;  %v9341_v38 = vsub.f32 %v9245_v9, %v9293_v43  ;;  %v9626_v13 = vld [vmem:[%s19101_s4 + $0x158] sm:$0xff]  ;;  %v19296_v5 = vld [vmem:[#allocation10_spill] sm:$0xff] }
 0x708   :  { %v10043_v61 = vpop.permute.xlu1 %10042  ;;  %10202 = vperm.xlu1 %11829, %v9716_v33   ;;  %v9719_v33 = vsub.f32 %v9623_v44, %v9671_v55 }
 0x709   :  { %v10260_v31 = vadd.f32 %v10043_v61, %v9972_v19  ;;  %10197 = vperm.xlu0 %11828, %v9715_v24   ;;  %v9390_v22 = vmax.f32 %v9342_v50, 0.0  ;;  %v9389_v27 = vmax.f32 %v9341_v38, 0.0  ;;  %v9674_v61 = vmul.f32 %v9578_v59, %v18775_v2  ;;  %v9625_v2 = vld [vmem:[%s19101_s4 + $0x150] sm:$0xff]  ;;  %v9534_v50 = vld [vmem:[%s19100_s3 + $0x178] sm:$0xff] }
 0x70b   :  { %10308 = vst.msk [vmem:[%s19102_s5 + $0x28] sm:$0xff] %vm8814_vm0, %v10260_v31  ;;  %v9438_v37 = vadd.f32 1e-05, %v9390_v22  ;;  %v9437_v47 = vadd.f32 1e-05, %v9389_v27  ;;  %v9722_v35 = vsub.f32 %v9626_v13, %v9674_v61  ;;  %v19304_v61 = vld [vmem:[#allocation18_spill] sm:$0xff] }
 0x70c   :  { %v9765_v32 = vpop.permute.xlu1 %9764  ;;  %9924 = vperm.xlu1 %11829, %v9574_v28   ;;  %v9760_v40 = vpop.permute.xlu0 %9759  ;;  %v9577_v28 = vmul.f32 %v13721_v6, %v9529_v29 }
 0x70d   :  { %9919 = vperm.xlu0 %11828, %v9573_v30   ;;  %v9974_v16 = vmul.f32 %v19292_v49, %v9765_v32  ;;  %v9973_v39 = vmul.f32 %v19293_v60, %v9760_v40  ;;  %13722 = vrsqrt.f32 %v9438_v37  ;;  %v9627_v49 = vld [vmem:[%s19101_s4 + $0x160] sm:$0xff]  ;;  %v9724_v60 = vsub.f32 %v9628_v12, %v18694_v15 }
 0x70e   :  { %13724 = vrsqrt.f32 %v9437_v47  ;;  %v9673_v31 = vmul.f32 %v9577_v28, %v18778_v25 }
 0x710   :  { %v10053_v0 = vpop.permute.xlu1 %10052  ;;  %10212 = vperm.xlu1 %11829, %v9718_v54   ;;  %v10048_v42 = vpop.permute.xlu0 %10047  ;;  %v9721_v3 = vsub.f32 %v9625_v2, %v9673_v31  ;;  %v19305_v31 = vld [vmem:[#allocation17_spill] sm:$0xff] }
 0x711   :  { %v10262_v17 = vadd.f32 %v10053_v0, %v9974_v16  ;;  %v10261_v10 = vadd.f32 %v10048_v42, %v9973_v39  ;;  %10207 = vperm.xlu0 %11828, %v9717_v23   ;;  %v9533_v16 = vld [vmem:[%s19100_s3 + $0x170] sm:$0xff]  ;;  %v19299_v0 = vld [vmem:[#allocation11_spill] sm:$0xff] }
 0x712   :  { %v19298_v23 = vld [vmem:[#allocation12_spill] sm:$0xff] }
 0x713   :  { %10310 = vst.msk [vmem:[%s19102_s5 + $0x38] sm:$0xff] %vm8814_vm0, %v10262_v17  ;;  %10309 = vst.msk [vmem:[%s19102_s5 + $0x30] sm:$0xff] %vm8814_vm0, %v10261_v10 }
 0x714   :  { %v9775_v58 = vpop.permute.xlu1 %9774  ;;  %9934 = vperm.xlu1 %11829, %v9576_v57   ;;  %v9770_v8 = vpop.permute.xlu0 %9769 }
 0x715   :  { %9929 = vperm.xlu0 %11828, %v9575_v4   ;;  %v9976_v46 = vmul.f32 %v19294_v18, %v9775_v58  ;;  %v9975_v45 = vmul.f32 %v19295_v34, %v9770_v8  ;;  %v19301_v58 = vld [vmem:[#allocation13_spill] sm:$0xff]  ;;  %v19302_v18 = vld [vmem:[#allocation16_spill] sm:$0xff]  ;;  %v19303_v34 = vld [vmem:[#allocation15_spill] sm:$0xff] }
 0x717   :  { %v13723_v25 = vpop.eup %13722 }
 0x718   :  { %v10063_v20 = vpop.permute.xlu1 %10062  ;;  %10222 = vperm.xlu1 %11829, %v9720_v1   ;;  %v10058_v19 = vpop.permute.xlu0 %10057  ;;  %v9582_v39 = vmul.f32 %v13723_v25, %v9534_v50 }
 0x719   :  { %v10264_v24 = vadd.f32 %v10063_v20, %v9976_v46  ;;  %v10263_v30 = vadd.f32 %v10058_v19, %v9975_v45  ;;  %10217 = vperm.xlu0 %11828, %v9719_v33   ;;  %v13725_v38 = vpop.eup %13724 }
 0x71a   :  { %v9581_v22 = vmul.f32 %v13725_v38, %v9533_v16  ;;  %v9678_v41 = vmul.f32 %v9582_v39, %v18815_v63  ;;  %v9629_v63 = vld [vmem:[%s19101_s4 + $0x170] sm:$0xff] }
 0x71b   :  { %10312 = vst.msk [vmem:[%s19102_s5 + $0x48] sm:$0xff] %vm8814_vm0, %v10264_v24  ;;  %10311 = vst.msk [vmem:[%s19102_s5 + $0x40] sm:$0xff] %vm8814_vm0, %v10263_v30 }
 0x71c   :  { %v9785_v9 = vpop.permute.xlu1 %9784  ;;  %9944 = vperm.xlu1 %11829, %v9578_v59   ;;  %v9780_v21 = vpop.permute.xlu0 %9779 }
 0x71d   :  { %9939 = vperm.xlu0 %11828, %v9577_v28   ;;  %v9978_v48 = vmul.f32 %v19296_v5, %v9785_v9  ;;  %v9977_v26 = vmul.f32 %v19297_v51, %v9780_v21 }
 0x720   :  { %v10073_v43 = vpop.permute.xlu1 %10072  ;;  %10232 = vperm.xlu1 %11829, %v9722_v35   ;;  %v10068_v32 = vpop.permute.xlu0 %10067 }
 0x721   :  { %v10266_v40 = vadd.f32 %v10073_v43, %v9978_v48  ;;  %v10265_v62 = vadd.f32 %v10068_v32, %v9977_v26  ;;  %10227 = vperm.xlu0 %11828, %v9721_v3   ;;  %v19306_v26 = vld [vmem:[#allocation20_spill] sm:$0xff]  ;;  %v19307_v43 = vld [vmem:[#allocation19_spill] sm:$0xff] }
 0x723   :  { %10314 = vst.msk [vmem:[%s19102_s5 + $0x58] sm:$0xff] %vm8814_vm0, %v10266_v40  ;;  %10313 = vst.msk [vmem:[%s19102_s5 + $0x50] sm:$0xff] %vm8814_vm0, %v10265_v62 }
 0x724   :  { %v9795_v54 = vpop.permute.xlu1 %9794  ;;  %9954 = vperm.xlu1 %11829, %v18686_v14   ;;  %v9790_v57 = vpop.permute.xlu0 %9789  ;;  %v9723_v14 = vsub.f32 %v9627_v49, %v18690_v11  ;;  %v9677_v11 = vmul.f32 %v9581_v22, %v18817_v53  ;;  %v19309_v49 = vld [vmem:[#allocation21_spill] sm:$0xff] }
 0x725   :  { %9949 = vperm.xlu0 %11828, %v18676_v7   ;;  %v9980_v4 = vmul.f32 %v19298_v23, %v9795_v54  ;;  %v9979_v42 = vmul.f32 %v19299_v0, %v9790_v57  ;;  %v9630_v7 = vld [vmem:[%s19101_s4 + $0x178] sm:$0xff]  ;;  %v19308_v54 = vld [vmem:[#allocation22_spill] sm:$0xff] }
 0x726   :  { %v9726_v55 = vsub.f32 %v9630_v7, %v9678_v41  ;;  %v9725_v44 = vsub.f32 %v9629_v63, %v9677_v11 }
 0x728   :  { %v10083_v17 = vpop.permute.xlu1 %10082  ;;  %10242 = vperm.xlu1 %11829, %v9724_v60   ;;  %v10078_v10 = vpop.permute.xlu0 %10077 }
 0x729   :  { %v10268_v27 = vadd.f32 %v10083_v17, %v9980_v4  ;;  %v10267_v52 = vadd.f32 %v10078_v10, %v9979_v42  ;;  %10237 = vperm.xlu0 %11828, %v9723_v14   ;;  %v19310_v14 = vld [vmem:[#allocation24_spill] sm:$0xff]  ;;  %v19311_v17 = vld [vmem:[#allocation23_spill] sm:$0xff] }
 0x72b   :  { %10316 = vst.msk [vmem:[%s19102_s5 + $0x68] sm:$0xff] %vm8814_vm0, %v10268_v27  ;;  %10315 = vst.msk [vmem:[%s19102_s5 + $0x60] sm:$0xff] %vm8814_vm0, %v10267_v52 }
 0x72c   :  { %v9805_v15 = vpop.permute.xlu1 %9804  ;;  %9964 = vperm.xlu1 %11829, %v9582_v39   ;;  %v9800_v56 = vpop.permute.xlu0 %9799 }
 0x72d   :  { %9959 = vperm.xlu0 %11828, %v9581_v22   ;;  %v9982_v6 = vmul.f32 %v19300_v36, %v9805_v15  ;;  %v9981_v8 = vmul.f32 %v19301_v58, %v9800_v56  ;;  %v19312_v56 = vld [vmem:[#allocation26_spill] sm:$0xff] }
 0x730   :  { %v10093_v29 = vpop.permute.xlu1 %10092  ;;  %10252 = vperm.xlu1 %11829, %v9726_v55   ;;  %v10088_v37 = vpop.permute.xlu0 %10087  ;;  %v19313_v55 = vld [vmem:[#allocation25_spill] sm:$0xff] }
 0x731   :  { %v10270_v47 = vadd.f32 %v10093_v29, %v9982_v6  ;;  %v10269_v1 = vadd.f32 %v10088_v37, %v9981_v8  ;;  %10247 = vperm.xlu0 %11828, %v9725_v44  }
 0x733   :  { %10318 = vst.msk [vmem:[%s19102_s5 + $0x78] sm:$0xff] %vm8814_vm0, %v10270_v47  ;;  %10317 = vst.msk [vmem:[%s19102_s5 + $0x70] sm:$0xff] %vm8814_vm0, %v10269_v1  ;;  %v19314_v47 = vld [vmem:[#allocation28_spill] sm:$0xff] }
 0x734   :  { %v9815_v53 = vpop.permute.xlu1 %9814  ;;  %v9810_v59 = vpop.permute.xlu0 %9809 }
 0x735   :  { %v9984_v46 = vmul.f32 %v19302_v18, %v9815_v53  ;;  %v9983_v45 = vmul.f32 %v19303_v34, %v9810_v59  ;;  %v19315_v53 = vld [vmem:[#allocation27_spill] sm:$0xff] }
 0x738   :  { %v10103_v33 = vpop.permute.xlu1 %10102  ;;  %v10098_v28 = vpop.permute.xlu0 %10097 }
 0x739   :  { %v10272_v20 = vadd.f32 %v10103_v33, %v9984_v46  ;;  %v10271_v19 = vadd.f32 %v10098_v28, %v9983_v45 }
 0x73b   :  { %10320 = vst.msk [vmem:[%s19102_s5 + $0x88] sm:$0xff] %vm8814_vm0, %v10272_v20  ;;  %10319 = vst.msk [vmem:[%s19102_s5 + $0x80] sm:$0xff] %vm8814_vm0, %v10271_v19  ;;  %v19316_v20 = vld [vmem:[#allocation30_spill] sm:$0xff] }
 0x73c   :  { %v9825_v24 = vpop.permute.xlu1 %9824  ;;  %v9820_v30 = vpop.permute.xlu0 %9819 }
 0x73d   :  { %v9986_v13 = vmul.f32 %v19304_v61, %v9825_v24  ;;  %v9985_v9 = vmul.f32 %v19305_v31, %v9820_v30  ;;  %v19317_v24 = vld [vmem:[#allocation29_spill] sm:$0xff] }
 0x740   :  { %v10113_v21 = vpop.permute.xlu1 %10112  ;;  %v10108_v2 = vpop.permute.xlu0 %10107 }
 0x741   :  { %v10274_v35 = vadd.f32 %v10113_v21, %v9986_v13  ;;  %v10273_v5 = vadd.f32 %v10108_v2, %v9985_v9 }
 0x743   :  { %10322 = vst.msk [vmem:[%s19102_s5 + $0x98] sm:$0xff] %vm8814_vm0, %v10274_v35  ;;  %10321 = vst.msk [vmem:[%s19102_s5 + $0x90] sm:$0xff] %vm8814_vm0, %v10273_v5  ;;  %v19318_v35 = vld [vmem:[#allocation32_spill] sm:$0xff] }
 0x744   :  { %v9835_v48 = vpop.permute.xlu1 %9834  ;;  %v9830_v51 = vpop.permute.xlu0 %9829 }
 0x745   :  { %v9988_v3 = vmul.f32 %v19306_v26, %v9835_v48  ;;  %v9987_v32 = vmul.f32 %v19307_v43, %v9830_v51  ;;  %v19319_v48 = vld [vmem:[#allocation31_spill] sm:$0xff] }
 0x748   :  { %v10123_v40 = vpop.permute.xlu1 %10122  ;;  %v10118_v62 = vpop.permute.xlu0 %10117 }
 0x749   :  { %v10276_v25 = vadd.f32 %v10123_v40, %v9988_v3  ;;  %v10275_v12 = vadd.f32 %v10118_v62, %v9987_v32 }
 0x74b   :  { %10324 = vst.msk [vmem:[%s19102_s5 + $0xa8] sm:$0xff] %vm8814_vm0, %v10276_v25  ;;  %10323 = vst.msk [vmem:[%s19102_s5 + $0xa0] sm:$0xff] %vm8814_vm0, %v10275_v12  ;;  %v19320_v25 = vld [vmem:[#allocation34_spill] sm:$0xff] }
 0x74c   :  { %v9845_v50 = vpop.permute.xlu1 %9844  ;;  %v9840_v38 = vpop.permute.xlu0 %9839 }
 0x74d   :  { %v9990_v57 = vmul.f32 %v19308_v54, %v9845_v50  ;;  %v9989_v16 = vmul.f32 %v19309_v49, %v9840_v38  ;;  %v19321_v50 = vld [vmem:[#allocation33_spill] sm:$0xff] }
 0x750   :  { %v10133_v60 = vpop.permute.xlu1 %10132  ;;  %v10128_v39 = vpop.permute.xlu0 %10127 }
 0x751   :  { %v10278_v23 = vadd.f32 %v10133_v60, %v9990_v57  ;;  %v10277_v4 = vadd.f32 %v10128_v39, %v9989_v16 }
 0x753   :  { %10326 = vst.msk [vmem:[%s19102_s5 + $0xb8] sm:$0xff] %vm8814_vm0, %v10278_v23  ;;  %10325 = vst.msk [vmem:[%s19102_s5 + $0xb0] sm:$0xff] %vm8814_vm0, %v10277_v4  ;;  %v19322_v23 = vld [vmem:[#allocation36_spill] sm:$0xff] }
 0x754   :  { %v9855_v0 = vpop.permute.xlu1 %9854  ;;  %v9850_v42 = vpop.permute.xlu0 %9849 }
 0x755   :  { %v9992_v22 = vmul.f32 %v19310_v14, %v9855_v0  ;;  %v9991_v10 = vmul.f32 %v19311_v17, %v9850_v42  ;;  %v19323_v0 = vld [vmem:[#allocation35_spill] sm:$0xff] }
 0x758   :  { %v10143_v27 = vpop.permute.xlu1 %10142  ;;  %v10138_v52 = vpop.permute.xlu0 %10137 }
 0x759   :  { %v10280_v41 = vadd.f32 %v10143_v27, %v9992_v22  ;;  %v10279_v7 = vadd.f32 %v10138_v52, %v9991_v10 }
 0x75b   :  { %10328 = vst.msk [vmem:[%s19102_s5 + $0xc8] sm:$0xff] %vm8814_vm0, %v10280_v41  ;;  %10327 = vst.msk [vmem:[%s19102_s5 + $0xc0] sm:$0xff] %vm8814_vm0, %v10279_v7  ;;  %v19324_v41 = vld [vmem:[#allocation38_spill] sm:$0xff] }
 0x75c   :  { %v9865_v11 = vpop.permute.xlu1 %9864  ;;  %v9860_v15 = vpop.permute.xlu0 %9859 }
 0x75d   :  { %v9994_v63 = vmul.f32 %v19312_v56, %v9865_v11  ;;  %v9993_v36 = vmul.f32 %v19313_v55, %v9860_v15  ;;  %v19325_v11 = vld [vmem:[#allocation37_spill] sm:$0xff] }
 0x760   :  { %v10153_v6 = vpop.permute.xlu1 %10152  ;;  %v10148_v58 = vpop.permute.xlu0 %10147 }
 0x761   :  { %v10282_v8 = vadd.f32 %v10153_v6, %v9994_v63  ;;  %v10281_v44 = vadd.f32 %v10148_v58, %v9993_v36 }
 0x763   :  { %10330 = vst.msk [vmem:[%s19102_s5 + $0xd8] sm:$0xff] %vm8814_vm0, %v10282_v8  ;;  %10329 = vst.msk [vmem:[%s19102_s5 + $0xd0] sm:$0xff] %vm8814_vm0, %v10281_v44  ;;  %v19326_v8 = vld [vmem:[#allocation40_spill] sm:$0xff] }
 0x764   :  { %v9875_v29 = vpop.permute.xlu1 %9874  ;;  %v9870_v37 = vpop.permute.xlu0 %9869 }
 0x765   :  { %v9996_v1 = vmul.f32 %v19314_v47, %v9875_v29  ;;  %v9995_v59 = vmul.f32 %v19315_v53, %v9870_v37  ;;  %v19327_v29 = vld [vmem:[#allocation39_spill] sm:$0xff] }
 0x768   :  { %v10163_v18 = vpop.permute.xlu1 %10162  ;;  %v10158_v46 = vpop.permute.xlu0 %10157 }
 0x769   :  { %v10284_v34 = vadd.f32 %v10163_v18, %v9996_v1  ;;  %v10283_v45 = vadd.f32 %v10158_v46, %v9995_v59 }
 0x76b   :  { %10332 = vst.msk [vmem:[%s19102_s5 + $0xe8] sm:$0xff] %vm8814_vm0, %v10284_v34  ;;  %10331 = vst.msk [vmem:[%s19102_s5 + $0xe0] sm:$0xff] %vm8814_vm0, %v10283_v45  ;;  %v19328_v34 = vld [vmem:[#allocation42_spill] sm:$0xff] }
 0x76c   :  { %v9885_v33 = vpop.permute.xlu1 %9884  ;;  %v9880_v28 = vpop.permute.xlu0 %9879 }
 0x76d   :  { %v9998_v19 = vmul.f32 %v19316_v20, %v9885_v33  ;;  %v9997_v30 = vmul.f32 %v19317_v24, %v9880_v28  ;;  %v19329_v33 = vld [vmem:[#allocation41_spill] sm:$0xff] }
 0x770   :  { %v10173_v61 = vpop.permute.xlu1 %10172  ;;  %v10168_v13 = vpop.permute.xlu0 %10167 }
 0x771   :  { %v10286_v31 = vadd.f32 %v10173_v61, %v9998_v19  ;;  %v10285_v9 = vadd.f32 %v10168_v13, %v9997_v30 }
 0x773   :  { %10334 = vst.msk [vmem:[%s19102_s5 + $0xf8] sm:$0xff] %vm8814_vm0, %v10286_v31  ;;  %10333 = vst.msk [vmem:[%s19102_s5 + $0xf0] sm:$0xff] %vm8814_vm0, %v10285_v9  ;;  %v19330_v31 = vld [vmem:[#allocation44_spill] sm:$0xff] }
 0x774   :  { %v9895_v21 = vpop.permute.xlu1 %9894  ;;  %v9890_v2 = vpop.permute.xlu0 %9889 }
 0x775   :  { %v10000_v5 = vmul.f32 %v19318_v35, %v9895_v21  ;;  %v9999_v51 = vmul.f32 %v19319_v48, %v9890_v2  ;;  %v19331_v21 = vld [vmem:[#allocation43_spill] sm:$0xff] }
 0x778   :  { %v10183_v26 = vpop.permute.xlu1 %10182  ;;  %v10178_v3 = vpop.permute.xlu0 %10177 }
 0x779   :  { %v10288_v43 = vadd.f32 %v10183_v26, %v10000_v5  ;;  %v10287_v32 = vadd.f32 %v10178_v3, %v9999_v51 }
 0x77b   :  { %10336 = vst.msk [vmem:[%s19102_s5 + $0x108] sm:$0xff] %vm8814_vm0, %v10288_v43  ;;  %10335 = vst.msk [vmem:[%s19102_s5 + $0x100] sm:$0xff] %vm8814_vm0, %v10287_v32  ;;  %v19332_v43 = vld [vmem:[#allocation46_spill] sm:$0xff] }
 0x77c   :  { %v9905_v40 = vpop.permute.xlu1 %9904  ;;  %v9900_v62 = vpop.permute.xlu0 %9899 }
 0x77d   :  { %v10002_v12 = vmul.f32 %v19320_v25, %v9905_v40  ;;  %v10001_v38 = vmul.f32 %v19321_v50, %v9900_v62  ;;  %v19333_v40 = vld [vmem:[#allocation45_spill] sm:$0xff] }
 0x780   :  { %v10193_v54 = vpop.permute.xlu1 %10192  ;;  %v10188_v57 = vpop.permute.xlu0 %10187 }
 0x781   :  { %v10290_v49 = vadd.f32 %v10193_v54, %v10002_v12  ;;  %v10289_v16 = vadd.f32 %v10188_v57, %v10001_v38 }
 0x783   :  { %10338 = vst.msk [vmem:[%s19102_s5 + $0x118] sm:$0xff] %vm8814_vm0, %v10290_v49  ;;  %10337 = vst.msk [vmem:[%s19102_s5 + $0x110] sm:$0xff] %vm8814_vm0, %v10289_v16 }
 0x784   :  { %v9915_v60 = vpop.permute.xlu1 %9914  ;;  %v9910_v39 = vpop.permute.xlu0 %9909 }
 0x785   :  { %v10004_v4 = vmul.f32 %v19322_v23, %v9915_v60  ;;  %v10003_v42 = vmul.f32 %v19323_v0, %v9910_v39 }
 0x788   :  { %v10203_v14 = vpop.permute.xlu1 %10202  ;;  %v10198_v22 = vpop.permute.xlu0 %10197 }
 0x789   :  { %v10292_v17 = vadd.f32 %v10203_v14, %v10004_v4  ;;  %v10291_v10 = vadd.f32 %v10198_v22, %v10003_v42 }
 0x78b   :  { %10340 = vst.msk [vmem:[%s19102_s5 + $0x128] sm:$0xff] %vm8814_vm0, %v10292_v17  ;;  %10339 = vst.msk [vmem:[%s19102_s5 + $0x120] sm:$0xff] %vm8814_vm0, %v10291_v10 }
 0x78c   :  { %v9925_v27 = vpop.permute.xlu1 %9924  ;;  %v9920_v52 = vpop.permute.xlu0 %9919 }
 0x78d   :  { %v10006_v7 = vmul.f32 %v19324_v41, %v9925_v27  ;;  %v10005_v15 = vmul.f32 %v19325_v11, %v9920_v52 }
 0x790   :  { %v10213_v56 = vpop.permute.xlu1 %10212  ;;  %v10208_v63 = vpop.permute.xlu0 %10207 }
 0x791   :  { %v10294_v55 = vadd.f32 %v10213_v56, %v10006_v7  ;;  %v10293_v36 = vadd.f32 %v10208_v63, %v10005_v15 }
 0x793   :  { %10342 = vst.msk [vmem:[%s19102_s5 + $0x138] sm:$0xff] %vm8814_vm0, %v10294_v55  ;;  %10341 = vst.msk [vmem:[%s19102_s5 + $0x130] sm:$0xff] %vm8814_vm0, %v10293_v36 }
 0x794   :  { %v9935_v6 = vpop.permute.xlu1 %9934  ;;  %v9930_v58 = vpop.permute.xlu0 %9929 }
 0x795   :  { %v10008_v44 = vmul.f32 %v19326_v8, %v9935_v6  ;;  %v10007_v37 = vmul.f32 %v19327_v29, %v9930_v58 }
 0x798   :  { %v10223_v47 = vpop.permute.xlu1 %10222  ;;  %v10218_v1 = vpop.permute.xlu0 %10217 }
 0x799   :  { %v10296_v53 = vadd.f32 %v10223_v47, %v10008_v44  ;;  %v10295_v59 = vadd.f32 %v10218_v1, %v10007_v37 }
 0x79b   :  { %10344 = vst.msk [vmem:[%s19102_s5 + $0x148] sm:$0xff] %vm8814_vm0, %v10296_v53  ;;  %10343 = vst.msk [vmem:[%s19102_s5 + $0x140] sm:$0xff] %vm8814_vm0, %v10295_v59 }
 0x79c   :  { %v9945_v18 = vpop.permute.xlu1 %9944  ;;  %v9940_v46 = vpop.permute.xlu0 %9939 }
 0x79d   :  { %v10010_v45 = vmul.f32 %v19328_v34, %v9945_v18  ;;  %v10009_v28 = vmul.f32 %v19329_v33, %v9940_v46 }
 0x7a0   :  { %v10233_v20 = vpop.permute.xlu1 %10232  ;;  %v10228_v19 = vpop.permute.xlu0 %10227 }
 0x7a1   :  { %v10298_v24 = vadd.f32 %v10233_v20, %v10010_v45  ;;  %v10297_v30 = vadd.f32 %v10228_v19, %v10009_v28 }
 0x7a3   :  { %10346 = vst.msk [vmem:[%s19102_s5 + $0x158] sm:$0xff] %vm8814_vm0, %v10298_v24  ;;  %10345 = vst.msk [vmem:[%s19102_s5 + $0x150] sm:$0xff] %vm8814_vm0, %v10297_v30 }
 0x7a4   :  { %v9955_v61 = vpop.permute.xlu1 %9954  ;;  %v9950_v13 = vpop.permute.xlu0 %9949 }
 0x7a5   :  { %v10012_v9 = vmul.f32 %v19330_v31, %v9955_v61  ;;  %v10011_v2 = vmul.f32 %v19331_v21, %v9950_v13 }
 0x7a8   :  { %v10243_v35 = vpop.permute.xlu1 %10242  ;;  %v10238_v5 = vpop.permute.xlu0 %10237 }
 0x7a9   :  { %v10300_v48 = vadd.f32 %v10243_v35, %v10012_v9  ;;  %v10299_v51 = vadd.f32 %v10238_v5, %v10011_v2 }
 0x7ab   :  { %10348 = vst.msk [vmem:[%s19102_s5 + $0x168] sm:$0xff] %vm8814_vm0, %v10300_v48  ;;  %10347 = vst.msk [vmem:[%s19102_s5 + $0x160] sm:$0xff] %vm8814_vm0, %v10299_v51 }
 0x7ac   :  { %v9965_v26 = vpop.permute.xlu1 %9964  ;;  %v9960_v3 = vpop.permute.xlu0 %9959 }
 0x7ad   :  { %v10014_v32 = vmul.f32 %v19332_v43, %v9965_v26  ;;  %v10013_v62 = vmul.f32 %v19333_v40, %v9960_v3 }
 0x7b0   :  { %v10253_v25 = vpop.permute.xlu1 %10252  ;;  %v10248_v12 = vpop.permute.xlu0 %10247 }
 0x7b1   :  { %v10302_v50 = vadd.f32 %v10253_v25, %v10014_v32  ;;  %v10301_v38 = vadd.f32 %v10248_v12, %v10013_v62 }
 0x7b3   :  { %10350 = vst.msk [vmem:[%s19102_s5 + $0x178] sm:$0xff] %vm8814_vm0, %v10302_v50  ;;  %10349 = vst.msk [vmem:[%s19102_s5 + $0x170] sm:$0xff] %vm8814_vm0, %v10301_v38 }

</bundles_post_ra>
